<compile_context>
chip_gen: v7x
topology: tpu7x:2x2x1
jax: 0.10.0
libtpu: 0.0.40
codegen_flags: <defaults>
</compile_context>

<pallas_src>
import functools

import jax
import jax.numpy as jnp
from jax import lax
from jax.experimental import pallas as pl
from jax.experimental.pallas import tpu as pltpu

EPS = 1e-5


def _bn_relu(h, bgb_ref, eps):
    """h: (B, tn) f32 pre-activation; bgb_ref rows = [bias, gamma, beta]."""
    h = h + bgb_ref[0:1, :]
    mu = jnp.mean(h, axis=0, keepdims=True)
    bvar = jnp.mean((h - mu) ** 2, axis=0, keepdims=True)
    hn = (h - mu) * lax.rsqrt(bvar + eps)
    hn = hn * bgb_ref[1:2, :] + bgb_ref[2:3, :]
    return jnp.maximum(hn, 0.0)


# ----------------------------------------------------------------------------
# Kernel A: Linear + BN + ReLU, single reduction step (layer 1, K=256).
# grid = (N // tn,)  -- purely parallel, no scratch.
# ----------------------------------------------------------------------------
def linear_bn_relu_1k_kernel(x_ref, w_ref, bgb_ref, o_ref, *, eps):
    xb = x_ref[...].astype(jnp.bfloat16)
    h = jnp.dot(xb, w_ref[...], preferred_element_type=jnp.float32)
    o_ref[...] = _bn_relu(h, bgb_ref, eps).astype(o_ref.dtype)


def fused_linear_bn_relu_1k(x, w_bf16, bgb, *, tn, eps=EPS):
    B, K = x.shape
    K2, N = w_bf16.shape
    assert K == K2 and N % tn == 0
    ce = pl.CostEstimate(
        flops=2 * B * K * N,
        transcendentals=0,
        bytes_accessed=w_bf16.size * 2 + x.size * 4 + bgb.size * 4 + B * N * 4)
    kernel = functools.partial(linear_bn_relu_1k_kernel, eps=eps)
    return pl.pallas_call(
        kernel,
        out_shape=jax.ShapeDtypeStruct((B, N), jnp.float32),
        grid_spec=pltpu.PrefetchScalarGridSpec(
            num_scalar_prefetch=0,
            grid=(N // tn,),
            in_specs=[
                pl.BlockSpec((B, K), lambda j: (0, 0)),    # x (full K)
                pl.BlockSpec((K, tn), lambda j: (0, j)),   # W (bf16)
                pl.BlockSpec((3, tn), lambda j: (0, j)),   # [bias; gamma; beta]
            ],
            out_specs=pl.BlockSpec((B, tn), lambda j: (0, j)),
        ),
        compiler_params=pltpu.CompilerParams(
            dimension_semantics=("parallel",)),
        cost_estimate=ce,
    )(x, w_bf16, bgb)


# ----------------------------------------------------------------------------
# Kernel B: Linear + BN + ReLU with K-tiled reduction (layer 2).
# grid = (N // tn, K // tk); reduction axis last.
# ----------------------------------------------------------------------------
def linear_bn_relu_kernel(x_ref, w_ref, bgb_ref, o_ref, acc_ref, *, eps):
    k = pl.program_id(1)

    @pl.when(k == 0)
    def _():
        acc_ref[...] = jnp.zeros_like(acc_ref)

    xb = x_ref[...].astype(jnp.bfloat16)
    acc_ref[...] += jnp.dot(xb, w_ref[...], preferred_element_type=jnp.float32)

    @pl.when(k == pl.num_programs(1) - 1)
    def _():
        o_ref[...] = _bn_relu(acc_ref[...], bgb_ref, eps).astype(o_ref.dtype)


def fused_linear_bn_relu(x, w_bf16, bgb, *, tn, tk, eps=EPS):
    B, K = x.shape
    K2, N = w_bf16.shape
    assert K == K2 and N % tn == 0 and K % tk == 0
    ce = pl.CostEstimate(
        flops=2 * B * K * N,
        transcendentals=0,
        bytes_accessed=w_bf16.size * 2 + x.size * 4 + bgb.size * 4 + B * N * 4)
    kernel = functools.partial(linear_bn_relu_kernel, eps=eps)
    return pl.pallas_call(
        kernel,
        out_shape=jax.ShapeDtypeStruct((B, N), jnp.float32),
        grid_spec=pltpu.PrefetchScalarGridSpec(
            num_scalar_prefetch=0,
            grid=(N // tn, K // tk),
            in_specs=[
                pl.BlockSpec((B, tk), lambda j, k: (0, k)),   # x
                pl.BlockSpec((tk, tn), lambda j, k: (k, j)),  # W (bf16)
                pl.BlockSpec((3, tn), lambda j, k: (0, j)),   # [bias; gamma; beta]
            ],
            out_specs=pl.BlockSpec((B, tn), lambda j, k: (0, j)),
            scratch_shapes=[pltpu.VMEM((B, tn), jnp.float32)],
        ),
        compiler_params=pltpu.CompilerParams(
            dimension_semantics=("parallel", "arbitrary")),
        cost_estimate=ce,
    )(x, w_bf16, bgb)


# ----------------------------------------------------------------------------
# Kernel C: Layer 3 (Linear + BN + ReLU, padded 516->640) fused with the
# mean / softplus(var) heads.  grid = (K // tk,), full padded N resident.
# ----------------------------------------------------------------------------
def l3_heads_kernel(x_ref, w_ref, bgb_ref, wm_ref, bm_ref, wv_ref, bv_ref,
                    mean_ref, var_ref, acc_ref, *, eps):
    k = pl.program_id(0)

    @pl.when(k == 0)
    def _():
        acc_ref[...] = jnp.zeros_like(acc_ref)

    xb = x_ref[...].astype(jnp.bfloat16)
    acc_ref[...] += jnp.dot(xb, w_ref[...], preferred_element_type=jnp.float32)

    @pl.when(k == pl.num_programs(0) - 1)
    def _():
        h3 = _bn_relu(acc_ref[...], bgb_ref, eps)          # (B, 640), padded cols are 0
        m = jnp.dot(h3, wm_ref[...], preferred_element_type=jnp.float32) + bm_ref[...]
        mean_ref[...] = m.astype(mean_ref.dtype)
        v = jnp.dot(h3, wv_ref[...], preferred_element_type=jnp.float32) + bv_ref[...]
        # F.softplus with default beta=1, threshold=20
        sp = jnp.where(v > 20.0, v, jnp.log1p(jnp.exp(jnp.minimum(v, 20.0))))
        var_ref[...] = sp.astype(var_ref.dtype)


def fused_l3_heads(x, w3_bf16, bgb3, wm, bm, wv, bv, *, tk, eps=EPS):
    B, K = x.shape
    K2, NP = w3_bf16.shape                 # NP = padded 640
    _, D = wm.shape
    assert K == K2 and K % tk == 0
    ce = pl.CostEstimate(
        flops=2 * B * K * NP + 4 * B * NP * D,
        transcendentals=B * D,
        bytes_accessed=(w3_bf16.size * 2 + x.size * 4 + bgb3.size * 4
                        + (wm.size + wv.size) * 4 + 2 * B * D * 4))
    kernel = functools.partial(l3_heads_kernel, eps=eps)
    return pl.pallas_call(
        kernel,
        out_shape=(jax.ShapeDtypeStruct((B, D), jnp.float32),
                   jax.ShapeDtypeStruct((B, D), jnp.float32)),
        grid_spec=pltpu.PrefetchScalarGridSpec(
            num_scalar_prefetch=0,
            grid=(K // tk,),
            in_specs=[
                pl.BlockSpec((B, tk), lambda k: (0, k)),    # h2
                pl.BlockSpec((tk, NP), lambda k: (k, 0)),   # W3 (bf16, padded)
                pl.BlockSpec((3, NP), lambda k: (0, 0)),    # [bias; gamma; beta]
                pl.BlockSpec((NP, D), lambda k: (0, 0)),    # Wm (padded rows 0)
                pl.BlockSpec((1, D), lambda k: (0, 0)),     # bm
                pl.BlockSpec((NP, D), lambda k: (0, 0)),    # Wv (padded rows 0)
                pl.BlockSpec((1, D), lambda k: (0, 0)),     # bv
            ],
            out_specs=(pl.BlockSpec((B, D), lambda k: (0, 0)),
                       pl.BlockSpec((B, D), lambda k: (0, 0))),
            scratch_shapes=[pltpu.VMEM((B, NP), jnp.float32)],
        ),
        compiler_params=pltpu.CompilerParams(
            dimension_semantics=("arbitrary",)),
        cost_estimate=ce,
    )(x, w3_bf16, bgb3, wm, bm, wv, bv)


# ----------------------------------------------------------------------------
# Parameter prep + full forward pass
# ----------------------------------------------------------------------------
N3, N3P = 516, 640   # real / lane-aligned padded layer-3 width


def prepare_params(p, d_rep):
    """f32 module params -> kernel-ready params (bf16 weights, packed BN, padding)."""
    pack = lambda b, g, be: jnp.stack([b, g, be], axis=0)        # (3, N)
    w3p = jnp.zeros((2048, N3P), jnp.float32).at[:, :N3].set(p["w3"])
    b3p = jnp.zeros((N3P,), jnp.float32).at[:N3].set(p["b3"])
    g3p = jnp.ones((N3P,), jnp.float32).at[:N3].set(p["g3"])
    be3p = jnp.zeros((N3P,), jnp.float32).at[:N3].set(p["be3"])
    wmp = jnp.zeros((N3P, d_rep), jnp.float32).at[:N3, :].set(p["wm"])
    wvp = jnp.zeros((N3P, d_rep), jnp.float32).at[:N3, :].set(p["wv"])
    return dict(
        w1=p["w1"].astype(jnp.bfloat16), bgb1=pack(p["b1"], p["g1"], p["be1"]),
        w2=p["w2"].astype(jnp.bfloat16), bgb2=pack(p["b2"], p["g2"], p["be2"]),
        w3=w3p.astype(jnp.bfloat16), bgb3=pack(b3p, g3p, be3p),
        wm=wmp, bm=p["bm"].reshape(1, d_rep),
        wv=wvp, bv=p["bv"].reshape(1, d_rep),
    )


def mlp_encoder_forward(x, kp, input_dim):
    B = x.shape[0]
    h = x.reshape(B, input_dim)                                   # view(s[0], input_dim)
    h = fused_linear_bn_relu_1k(h, kp["w1"], kp["bgb1"], tn=2048)          # 256 -> 4096
    h = fused_linear_bn_relu(h, kp["w2"], kp["bgb2"], tn=1024, tk=2048)    # 4096 -> 2048
    mean, var = fused_l3_heads(h, kp["w3"], kp["bgb3"],                    # 2048 -> 516 -> heads
                               kp["wm"], kp["bm"], kp["wv"], kp["bv"], tk=1024)
    return mean, var


def make_params(key, input_dim, d_rep):
    def lin(k, fan_in, fan_out, scale):
        kw, kb = jax.random.split(k)
        w = jax.random.normal(kw, (fan_in, fan_out), jnp.float32) * scale
        b = jax.random.normal(kb, (fan_out,), jnp.float32) * 0.01
        return w, b

    ks = jax.random.split(key, 5)
    w1, b1 = lin(ks[0], input_dim, 4096, 0.05)
    w2, b2 = lin(ks[1], 4096, 2048, 0.02)
    w3, b3 = lin(ks[2], 2048, 516, 0.02)
    wm, bm = lin(ks[3], 516, d_rep, 0.05)
    wv, bv = lin(ks[4], 516, d_rep, 0.05)
    return dict(
        w1=w1, b1=b1, g1=jnp.ones((4096,), jnp.float32), be1=jnp.zeros((4096,), jnp.float32),
        w2=w2, b2=b2, g2=jnp.ones((2048,), jnp.float32), be2=jnp.zeros((2048,), jnp.float32),
        w3=w3, b3=b3, g3=jnp.ones((516,), jnp.float32), be3=jnp.zeros((516,), jnp.float32),
        wm=wm, bm=bm, wv=wv, bv=bv,
    )


# pure-JAX reference with the same bf16 matmul-operand rounding as the kernel
def reference_forward(x, p, input_dim):
    bf = lambda a: a.astype(jnp.bfloat16).astype(jnp.float32)

    def bn(h, g, be, eps=EPS):
        mu = jnp.mean(h, axis=0, keepdims=True)
        v = jnp.mean((h - mu) ** 2, axis=0, keepdims=True)
        return (h - mu) * lax.rsqrt(v + eps) * g + be

    h = x.reshape(x.shape[0], input_dim)
    h = jnp.maximum(bn(bf(h) @ bf(p["w1"]) + p["b1"], p["g1"], p["be1"]), 0.0)
    h = jnp.maximum(bn(bf(h) @ bf(p["w2"]) + p["b2"], p["g2"], p["be2"]), 0.0)
    h = jnp.maximum(bn(bf(h) @ bf(p["w3"]) + p["b3"], p["g3"], p["be3"]), 0.0)
    mean = h @ p["wm"] + p["bm"]
    v = h @ p["wv"] + p["bv"]
    var = jnp.where(v > 20.0, v, jnp.log1p(jnp.exp(jnp.minimum(v, 20.0))))
    return mean, var


if __name__ == "__main__":
    B, C, H, W = 8, 4, 8, 8          # NCHW example input
    input_dim = C * H * W            # 256
    d_rep = 32

    key = jax.random.PRNGKey(0)
    kx, kp = jax.random.split(key)
    x = jax.random.normal(kx, (B, C, H, W), jnp.float32)
    params = make_params(kp, input_dim, d_rep)
    kparams = prepare_params(params, d_rep)

    fwd = jax.jit(lambda x, p: mlp_encoder_forward(x, p, input_dim))
    mean, var = fwd(x, kparams)
    jax.block_until_ready((mean, var))

    mean_ref, var_ref = reference_forward(x, params, input_dim)
    assert mean.shape == (B, d_rep) and var.shape == (B, d_rep)
    assert jnp.allclose(mean, mean_ref, rtol=2e-2, atol=2e-2)
    assert jnp.allclose(var, var_ref, rtol=2e-2, atol=2e-2)
    assert bool(jnp.all(var >= 0.0))

    print("KERNEL_OK")
</pallas_src>

<mosaic_0001>
module attributes {stable_mosaic.version = 11 : i64} {
  func.func @linear_bn_relu_kernel(%arg0: i32, %arg1: i32, %arg2: memref<8x2048xf32, #tpu.memory_space<vmem>>, %arg3: memref<2048x1024xbf16, #tpu.memory_space<vmem>>, %arg4: memref<3x1024xf32, #tpu.memory_space<vmem>>, %arg5: memref<8x1024xf32, #tpu.memory_space<vmem>>, %arg6: memref<8x1024xf32, #tpu.memory_space<vmem>>) attributes {dimension_semantics = [#tpu.dimension_semantics<parallel>, #tpu.dimension_semantics<arbitrary>], iteration_bounds = array<i64: 2, 2>, scalar_prefetch = 0 : i64, scratch_operands = 1 : i64, tpu.core_type = #tpu.core_type<tc>, window_params = [{transform_indices = @transform_0, window_bounds = array<i64: 8, 2048>}, {transform_indices = @transform_1, window_bounds = array<i64: 2048, 1024>}, {transform_indices = @transform_2, window_bounds = array<i64: 3, 1024>}, {transform_indices = @transform_3, window_bounds = array<i64: 8, 1024>}]} {
    %c0_i32 = arith.constant 0 : i32
    %0 = arith.cmpi eq, %arg1, %c0_i32 : i32
    %1 = arith.extui %0 : i1 to i32
    %c0_i32_0 = arith.constant 0 : i32
    %2 = arith.cmpi ne, %1, %c0_i32_0 : i32
    scf.if %2 {
      %cst_9 = arith.constant 0.000000e+00 : f32
      %13 = vector.broadcast %cst_9 : f32 to vector<8x1024xf32>
      %c0_10 = arith.constant 0 : index
      %c0_11 = arith.constant 0 : index
      %14 = vector.load %arg6[%c0_10, %c0_11] : memref<8x1024xf32, #tpu.memory_space<vmem>>, vector<8x1024xf32>
      tpu.vector_store %arg6[%c0_10, %c0_11], %13 {strides = array<i32>} : memref<8x1024xf32, #tpu.memory_space<vmem>>, vector<8x1024xf32>,
    } else {
    }
    %c0 = arith.constant 0 : index
    %c0_1 = arith.constant 0 : index
    %3 = vector.load %arg2[%c0, %c0_1] : memref<8x2048xf32, #tpu.memory_space<vmem>>, vector<8x2048xf32>
    %4 = arith.truncf %3 : vector<8x2048xf32> to vector<8x2048xbf16>
    %c0_2 = arith.constant 0 : index
    %c0_3 = arith.constant 0 : index
    %5 = vector.load %arg6[%c0_2, %c0_3] : memref<8x1024xf32, #tpu.memory_space<vmem>>, vector<8x1024xf32>
    %c0_4 = arith.constant 0 : index
    %c0_5 = arith.constant 0 : index
    %6 = vector.load %arg3[%c0_4, %c0_5] : memref<2048x1024xbf16, #tpu.memory_space<vmem>>, vector<2048x1024xbf16>
    %cst = arith.constant dense<0.000000e+00> : vector<8x1024xf32>
    %7 = tpu.matmul %4, %6, %cst {dimension_numbers = #tpu.dot_dimension_numbers<[1], [0], [0], [1], [0, 0, 1, 1], [], []>} : vector<8x2048xbf16>, vector<2048x1024xbf16>, vector<8x1024xf32> -> vector<8x1024xf32>
    %8 = arith.addf %5, %7 : vector<8x1024xf32>
    %c0_6 = arith.constant 0 : index
    %c0_7 = arith.constant 0 : index
    %9 = vector.load %arg6[%c0_6, %c0_7] : memref<8x1024xf32, #tpu.memory_space<vmem>>, vector<8x1024xf32>
    tpu.vector_store %arg6[%c0_6, %c0_7], %8 {strides = array<i32>} : memref<8x1024xf32, #tpu.memory_space<vmem>>, vector<8x1024xf32>,
    %c1_i32 = arith.constant 1 : i32
    %10 = arith.cmpi eq, %arg1, %c1_i32 : i32
    %11 = arith.extui %10 : i1 to i32
    %c0_i32_8 = arith.constant 0 : i32
    %12 = arith.cmpi ne, %11, %c0_i32_8 : i32
    scf.if %12 {
      %c0_9 = arith.constant 0 : index
      %c0_10 = arith.constant 0 : index
      %13 = vector.load %arg6[%c0_9, %c0_10] : memref<8x1024xf32, #tpu.memory_space<vmem>>, vector<8x1024xf32>
      %c0_11 = arith.constant 0 : index
      %c0_12 = arith.constant 0 : index
      %14 = vector.load %arg4[%c0_11, %c0_12] : memref<3x1024xf32, #tpu.memory_space<vmem>>, vector<1x1024xf32>
      %15 = vector.broadcast %14 : vector<1x1024xf32> to vector<8x1024xf32>
      %16 = arith.addf %13, %15 : vector<8x1024xf32>
      %cst_13 = arith.constant dense<0.000000e+00> : vector<1024xf32>
      %17 = vector.multi_reduction <add>, %16, %cst_13 [0] : vector<8x1024xf32> to vector<1024xf32>
      %18 = vector.shape_cast %17 : vector<1024xf32> to vector<1x1024xf32>
      %cst_14 = arith.constant 8.000000e+00 : f32
      %19 = vector.broadcast %cst_14 : f32 to vector<1x1024xf32>
      %20 = arith.divf %18, %19 : vector<1x1024xf32>
      %21 = vector.broadcast %20 : vector<1x1024xf32> to vector<8x1024xf32>
      %22 = arith.subf %16, %21 : vector<8x1024xf32>
      %23 = arith.mulf %22, %22 : vector<8x1024xf32>
      %cst_15 = arith.constant dense<0.000000e+00> : vector<1024xf32>
      %24 = vector.multi_reduction <add>, %23, %cst_15 [0] : vector<8x1024xf32> to vector<1024xf32>
      %25 = vector.shape_cast %24 : vector<1024xf32> to vector<1x1024xf32>
      %cst_16 = arith.constant 8.000000e+00 : f32
      %26 = vector.broadcast %cst_16 : f32 to vector<1x1024xf32>
      %27 = arith.divf %25, %26 : vector<1x1024xf32>
      %28 = vector.broadcast %20 : vector<1x1024xf32> to vector<8x1024xf32>
      %29 = arith.subf %16, %28 : vector<8x1024xf32>
      %cst_17 = arith.constant 9.99999974E-6 : f32
      %30 = vector.broadcast %cst_17 : f32 to vector<1x1024xf32>
      %31 = arith.addf %27, %30 : vector<1x1024xf32>
      %32 = math.rsqrt %31 : vector<1x1024xf32>
      %33 = vector.broadcast %32 : vector<1x1024xf32> to vector<8x1024xf32>
      %34 = arith.mulf %29, %33 : vector<8x1024xf32>
      %c1 = arith.constant 1 : index
      %c0_18 = arith.constant 0 : index
      %35 = vector.load %arg4[%c1, %c0_18] : memref<3x1024xf32, #tpu.memory_space<vmem>>, vector<1x1024xf32>
      %36 = vector.broadcast %35 : vector<1x1024xf32> to vector<8x1024xf32>
      %37 = arith.mulf %34, %36 : vector<8x1024xf32>
      %c2 = arith.constant 2 : index
      %c0_19 = arith.constant 0 : index
      %38 = vector.load %arg4[%c2, %c0_19] : memref<3x1024xf32, #tpu.memory_space<vmem>>, vector<1x1024xf32>
      %39 = vector.broadcast %38 : vector<1x1024xf32> to vector<8x1024xf32>
      %40 = arith.addf %37, %39 : vector<8x1024xf32>
      %cst_20 = arith.constant 0.000000e+00 : f32
      %41 = vector.broadcast %cst_20 : f32 to vector<8x1024xf32>
      %42 = arith.maximumf %40, %41 : vector<8x1024xf32>
      %c0_21 = arith.constant 0 : index
      %c0_22 = arith.constant 0 : index
      %43 = vector.load %arg5[%c0_21, %c0_22] : memref<8x1024xf32, #tpu.memory_space<vmem>>, vector<8x1024xf32>
      tpu.vector_store %arg5[%c0_21, %c0_22], %42 {strides = array<i32>} : memref<8x1024xf32, #tpu.memory_space<vmem>>, vector<8x1024xf32>,
    } else {
    }
    return
  }
  func.func @transform_0(%arg0: i32, %arg1: i32) -> (i32, i32) {
    %c0_i32 = arith.constant 0 : i32
    %c0_i32_0 = arith.constant 0 : i32
    return %c0_i32, %arg1 : i32, i32
  }
  func.func @transform_1(%arg0: i32, %arg1: i32) -> (i32, i32) {
    %c0_i32 = arith.constant 0 : i32
    return %arg1, %arg0 : i32, i32
  }
  func.func @transform_2(%arg0: i32, %arg1: i32) -> (i32, i32) {
    %c0_i32 = arith.constant 0 : i32
    %c0_i32_0 = arith.constant 0 : i32
    return %c0_i32, %arg0 : i32, i32
  }
  func.func @transform_3(%arg0: i32, %arg1: i32) -> (i32, i32) {
    %c0_i32 = arith.constant 0 : i32
    %c0_i32_0 = arith.constant 0 : i32
    return %c0_i32, %arg0 : i32, i32
  }
}

module attributes {stable_mosaic.version = 11 : i64} {
  func.func @linear_bn_relu_1k_kernel(%arg0: i32, %arg1: memref<8x256xf32, #tpu.memory_space<vmem>>, %arg2: memref<256x2048xbf16, #tpu.memory_space<vmem>>, %arg3: memref<3x2048xf32, #tpu.memory_space<vmem>>, %arg4: memref<8x2048xf32, #tpu.memory_space<vmem>>) attributes {dimension_semantics = [#tpu.dimension_semantics<parallel>], iteration_bounds = array<i64: 2>, scalar_prefetch = 0 : i64, scratch_operands = 0 : i64, tpu.core_type = #tpu.core_type<tc>, window_params = [{pipeline_mode = #tpu.pipeline_mode<synchronous>, transform_indices = @transform_0, window_bounds = array<i64: 8, 256>}, {transform_indices = @transform_1, window_bounds = array<i64: 256, 2048>}, {transform_indices = @transform_2, window_bounds = array<i64: 3, 2048>}, {transform_indices = @transform_3, window_bounds = array<i64: 8, 2048>}]} {
    %c0 = arith.constant 0 : index
    %c0_0 = arith.constant 0 : index
    %0 = vector.load %arg1[%c0, %c0_0] : memref<8x256xf32, #tpu.memory_space<vmem>>, vector<8x256xf32>
    %1 = arith.truncf %0 : vector<8x256xf32> to vector<8x256xbf16>
    %c0_1 = arith.constant 0 : index
    %c0_2 = arith.constant 0 : index
    %2 = vector.load %arg2[%c0_1, %c0_2] : memref<256x2048xbf16, #tpu.memory_space<vmem>>, vector<256x2048xbf16>
    %cst = arith.constant dense<0.000000e+00> : vector<8x2048xf32>
    %3 = tpu.matmul %1, %2, %cst {dimension_numbers = #tpu.dot_dimension_numbers<[1], [0], [0], [1], [0, 0, 1, 1], [], []>} : vector<8x256xbf16>, vector<256x2048xbf16>, vector<8x2048xf32> -> vector<8x2048xf32>
    %c0_3 = arith.constant 0 : index
    %c0_4 = arith.constant 0 : index
    %4 = vector.load %arg3[%c0_3, %c0_4] : memref<3x2048xf32, #tpu.memory_space<vmem>>, vector<1x2048xf32>
    %5 = vector.broadcast %4 : vector<1x2048xf32> to vector<8x2048xf32>
    %6 = arith.addf %3, %5 : vector<8x2048xf32>
    %cst_5 = arith.constant dense<0.000000e+00> : vector<2048xf32>
    %7 = vector.multi_reduction <add>, %6, %cst_5 [0] : vector<8x2048xf32> to vector<2048xf32>
    %8 = vector.shape_cast %7 : vector<2048xf32> to vector<1x2048xf32>
    %cst_6 = arith.constant 8.000000e+00 : f32
    %9 = vector.broadcast %cst_6 : f32 to vector<1x2048xf32>
    %10 = arith.divf %8, %9 : vector<1x2048xf32>
    %11 = vector.broadcast %10 : vector<1x2048xf32> to vector<8x2048xf32>
    %12 = arith.subf %6, %11 : vector<8x2048xf32>
    %13 = arith.mulf %12, %12 : vector<8x2048xf32>
    %cst_7 = arith.constant dense<0.000000e+00> : vector<2048xf32>
    %14 = vector.multi_reduction <add>, %13, %cst_7 [0] : vector<8x2048xf32> to vector<2048xf32>
    %15 = vector.shape_cast %14 : vector<2048xf32> to vector<1x2048xf32>
    %cst_8 = arith.constant 8.000000e+00 : f32
    %16 = vector.broadcast %cst_8 : f32 to vector<1x2048xf32>
    %17 = arith.divf %15, %16 : vector<1x2048xf32>
    %18 = vector.broadcast %10 : vector<1x2048xf32> to vector<8x2048xf32>
    %19 = arith.subf %6, %18 : vector<8x2048xf32>
    %cst_9 = arith.constant 9.99999974E-6 : f32
    %20 = vector.broadcast %cst_9 : f32 to vector<1x2048xf32>
    %21 = arith.addf %17, %20 : vector<1x2048xf32>
    %22 = math.rsqrt %21 : vector<1x2048xf32>
    %23 = vector.broadcast %22 : vector<1x2048xf32> to vector<8x2048xf32>
    %24 = arith.mulf %19, %23 : vector<8x2048xf32>
    %c1 = arith.constant 1 : index
    %c0_10 = arith.constant 0 : index
    %25 = vector.load %arg3[%c1, %c0_10] : memref<3x2048xf32, #tpu.memory_space<vmem>>, vector<1x2048xf32>
    %26 = vector.broadcast %25 : vector<1x2048xf32> to vector<8x2048xf32>
    %27 = arith.mulf %24, %26 : vector<8x2048xf32>
    %c2 = arith.constant 2 : index
    %c0_11 = arith.constant 0 : index
    %28 = vector.load %arg3[%c2, %c0_11] : memref<3x2048xf32, #tpu.memory_space<vmem>>, vector<1x2048xf32>
    %29 = vector.broadcast %28 : vector<1x2048xf32> to vector<8x2048xf32>
    %30 = arith.addf %27, %29 : vector<8x2048xf32>
    %cst_12 = arith.constant 0.000000e+00 : f32
    %31 = vector.broadcast %cst_12 : f32 to vector<8x2048xf32>
    %32 = arith.maximumf %30, %31 : vector<8x2048xf32>
    %c0_13 = arith.constant 0 : index
    %c0_14 = arith.constant 0 : index
    %33 = vector.load %arg4[%c0_13, %c0_14] : memref<8x2048xf32, #tpu.memory_space<vmem>>, vector<8x2048xf32>
    tpu.vector_store %arg4[%c0_13, %c0_14], %32 {strides = array<i32>} : memref<8x2048xf32, #tpu.memory_space<vmem>>, vector<8x2048xf32>,
    return
  }
  func.func @transform_0(%arg0: i32) -> (i32, i32) {
    %c0_i32 = arith.constant 0 : i32
    %c0_i32_0 = arith.constant 0 : i32
    %c0_i32_1 = arith.constant 0 : i32
    return %c0_i32, %c0_i32_0 : i32, i32
  }
  func.func @transform_1(%arg0: i32) -> (i32, i32) {
    %c0_i32 = arith.constant 0 : i32
    %c0_i32_0 = arith.constant 0 : i32
    return %c0_i32, %arg0 : i32, i32
  }
  func.func @transform_2(%arg0: i32) -> (i32, i32) {
    %c0_i32 = arith.constant 0 : i32
    %c0_i32_0 = arith.constant 0 : i32
    return %c0_i32, %arg0 : i32, i32
  }
  func.func @transform_3(%arg0: i32) -> (i32, i32) {
    %c0_i32 = arith.constant 0 : i32
    %c0_i32_0 = arith.constant 0 : i32
    return %c0_i32, %arg0 : i32, i32
  }
}

module attributes {stable_mosaic.version = 11 : i64} {
  func.func @l3_heads_kernel(%arg0: i32, %arg1: memref<8x1024xf32, #tpu.memory_space<vmem>>, %arg2: memref<1024x640xbf16, #tpu.memory_space<vmem>>, %arg3: memref<3x640xf32, #tpu.memory_space<vmem>>, %arg4: memref<640x32xf32, #tpu.memory_space<vmem>>, %arg5: memref<1x32xf32, #tpu.memory_space<vmem>>, %arg6: memref<640x32xf32, #tpu.memory_space<vmem>>, %arg7: memref<1x32xf32, #tpu.memory_space<vmem>>, %arg8: memref<8x32xf32, #tpu.memory_space<vmem>>, %arg9: memref<8x32xf32, #tpu.memory_space<vmem>>, %arg10: memref<8x640xf32, #tpu.memory_space<vmem>>) attributes {dimension_semantics = [#tpu.dimension_semantics<arbitrary>], iteration_bounds = array<i64: 2>, scalar_prefetch = 0 : i64, scratch_operands = 1 : i64, tpu.core_type = #tpu.core_type<tc>, window_params = [{transform_indices = @transform_0, window_bounds = array<i64: 8, 1024>}, {transform_indices = @transform_1, window_bounds = array<i64: 1024, 640>}, {pipeline_mode = #tpu.pipeline_mode<synchronous>, transform_indices = @transform_2, window_bounds = array<i64: 3, 640>}, {pipeline_mode = #tpu.pipeline_mode<synchronous>, transform_indices = @transform_3, window_bounds = array<i64: 640, 32>}, {pipeline_mode = #tpu.pipeline_mode<synchronous>, transform_indices = @transform_4, window_bounds = array<i64: 1, 32>}, {pipeline_mode = #tpu.pipeline_mode<synchronous>, transform_indices = @transform_5, window_bounds = array<i64: 640, 32>}, {pipeline_mode = #tpu.pipeline_mode<synchronous>, transform_indices = @transform_6, window_bounds = array<i64: 1, 32>}, {pipeline_mode = #tpu.pipeline_mode<synchronous>, transform_indices = @transform_7, window_bounds = array<i64: 8, 32>}, {pipeline_mode = #tpu.pipeline_mode<synchronous>, transform_indices = @transform_8, window_bounds = array<i64: 8, 32>}]} {
    %c0_i32 = arith.constant 0 : i32
    %0 = arith.cmpi eq, %arg0, %c0_i32 : i32
    %1 = arith.extui %0 : i1 to i32
    %c0_i32_0 = arith.constant 0 : i32
    %2 = arith.cmpi ne, %1, %c0_i32_0 : i32
    scf.if %2 {
      %cst_9 = arith.constant 0.000000e+00 : f32
      %13 = vector.broadcast %cst_9 : f32 to vector<8x640xf32>
      %c0_10 = arith.constant 0 : index
      %c0_11 = arith.constant 0 : index
      %14 = vector.load %arg10[%c0_10, %c0_11] : memref<8x640xf32, #tpu.memory_space<vmem>>, vector<8x640xf32>
      tpu.vector_store %arg10[%c0_10, %c0_11], %13 {strides = array<i32>} : memref<8x640xf32, #tpu.memory_space<vmem>>, vector<8x640xf32>,
    } else {
    }
    %c0 = arith.constant 0 : index
    %c0_1 = arith.constant 0 : index
    %3 = vector.load %arg1[%c0, %c0_1] : memref<8x1024xf32, #tpu.memory_space<vmem>>, vector<8x1024xf32>
    %4 = arith.truncf %3 : vector<8x1024xf32> to vector<8x1024xbf16>
    %c0_2 = arith.constant 0 : index
    %c0_3 = arith.constant 0 : index
    %5 = vector.load %arg10[%c0_2, %c0_3] : memref<8x640xf32, #tpu.memory_space<vmem>>, vector<8x640xf32>
    %c0_4 = arith.constant 0 : index
    %c0_5 = arith.constant 0 : index
    %6 = vector.load %arg2[%c0_4, %c0_5] : memref<1024x640xbf16, #tpu.memory_space<vmem>>, vector<1024x640xbf16>
    %cst = arith.constant dense<0.000000e+00> : vector<8x640xf32>
    %7 = tpu.matmul %4, %6, %cst {dimension_numbers = #tpu.dot_dimension_numbers<[1], [0], [0], [1], [0, 0, 1, 1], [], []>} : vector<8x1024xbf16>, vector<1024x640xbf16>, vector<8x640xf32> -> vector<8x640xf32>
    %8 = arith.addf %5, %7 : vector<8x640xf32>
    %c0_6 = arith.constant 0 : index
    %c0_7 = arith.constant 0 : index
    %9 = vector.load %arg10[%c0_6, %c0_7] : memref<8x640xf32, #tpu.memory_space<vmem>>, vector<8x640xf32>
    tpu.vector_store %arg10[%c0_6, %c0_7], %8 {strides = array<i32>} : memref<8x640xf32, #tpu.memory_space<vmem>>, vector<8x640xf32>,
    %c1_i32 = arith.constant 1 : i32
    %10 = arith.cmpi eq, %arg0, %c1_i32 : i32
    %11 = arith.extui %10 : i1 to i32
    %c0_i32_8 = arith.constant 0 : i32
    %12 = arith.cmpi ne, %11, %c0_i32_8 : i32
    scf.if %12 {
      %c0_9 = arith.constant 0 : index
      %c0_10 = arith.constant 0 : index
      %13 = vector.load %arg10[%c0_9, %c0_10] : memref<8x640xf32, #tpu.memory_space<vmem>>, vector<8x640xf32>
      %c0_11 = arith.constant 0 : index
      %c0_12 = arith.constant 0 : index
      %14 = vector.load %arg3[%c0_11, %c0_12] : memref<3x640xf32, #tpu.memory_space<vmem>>, vector<1x640xf32>
      %15 = vector.broadcast %14 : vector<1x640xf32> to vector<8x640xf32>
      %16 = arith.addf %13, %15 : vector<8x640xf32>
      %cst_13 = arith.constant dense<0.000000e+00> : vector<640xf32>
      %17 = vector.multi_reduction <add>, %16, %cst_13 [0] : vector<8x640xf32> to vector<640xf32>
      %18 = vector.shape_cast %17 : vector<640xf32> to vector<1x640xf32>
      %cst_14 = arith.constant 8.000000e+00 : f32
      %19 = vector.broadcast %cst_14 : f32 to vector<1x640xf32>
      %20 = arith.divf %18, %19 : vector<1x640xf32>
      %21 = vector.broadcast %20 : vector<1x640xf32> to vector<8x640xf32>
      %22 = arith.subf %16, %21 : vector<8x640xf32>
      %23 = arith.mulf %22, %22 : vector<8x640xf32>
      %cst_15 = arith.constant dense<0.000000e+00> : vector<640xf32>
      %24 = vector.multi_reduction <add>, %23, %cst_15 [0] : vector<8x640xf32> to vector<640xf32>
      %25 = vector.shape_cast %24 : vector<640xf32> to vector<1x640xf32>
      %cst_16 = arith.constant 8.000000e+00 : f32
      %26 = vector.broadcast %cst_16 : f32 to vector<1x640xf32>
      %27 = arith.divf %25, %26 : vector<1x640xf32>
      %28 = vector.broadcast %20 : vector<1x640xf32> to vector<8x640xf32>
      %29 = arith.subf %16, %28 : vector<8x640xf32>
      %cst_17 = arith.constant 9.99999974E-6 : f32
      %30 = vector.broadcast %cst_17 : f32 to vector<1x640xf32>
      %31 = arith.addf %27, %30 : vector<1x640xf32>
      %32 = math.rsqrt %31 : vector<1x640xf32>
      %33 = vector.broadcast %32 : vector<1x640xf32> to vector<8x640xf32>
      %34 = arith.mulf %29, %33 : vector<8x640xf32>
      %c1 = arith.constant 1 : index
      %c0_18 = arith.constant 0 : index
      %35 = vector.load %arg3[%c1, %c0_18] : memref<3x640xf32, #tpu.memory_space<vmem>>, vector<1x640xf32>
      %36 = vector.broadcast %35 : vector<1x640xf32> to vector<8x640xf32>
      %37 = arith.mulf %34, %36 : vector<8x640xf32>
      %c2 = arith.constant 2 : index
      %c0_19 = arith.constant 0 : index
      %38 = vector.load %arg3[%c2, %c0_19] : memref<3x640xf32, #tpu.memory_space<vmem>>, vector<1x640xf32>
      %39 = vector.broadcast %38 : vector<1x640xf32> to vector<8x640xf32>
      %40 = arith.addf %37, %39 : vector<8x640xf32>
      %cst_20 = arith.constant 0.000000e+00 : f32
      %41 = vector.broadcast %cst_20 : f32 to vector<8x640xf32>
      %42 = arith.maximumf %40, %41 : vector<8x640xf32>
      %c0_21 = arith.constant 0 : index
      %c0_22 = arith.constant 0 : index
      %43 = vector.load %arg4[%c0_21, %c0_22] : memref<640x32xf32, #tpu.memory_space<vmem>>, vector<640x32xf32>
      %cst_23 = arith.constant dense<0.000000e+00> : vector<8x32xf32>
      %44 = tpu.matmul %42, %43, %cst_23 {dimension_numbers = #tpu.dot_dimension_numbers<[1], [0], [0], [1], [0, 0, 1, 1], [], []>} : vector<8x640xf32>, vector<640x32xf32>, vector<8x32xf32> -> vector<8x32xf32>
      %c0_24 = arith.constant 0 : index
      %c0_25 = arith.constant 0 : index
      %45 = vector.load %arg5[%c0_24, %c0_25] : memref<1x32xf32, #tpu.memory_space<vmem>>, vector<1x32xf32>
      %46 = vector.broadcast %45 : vector<1x32xf32> to vector<8x32xf32>
      %47 = arith.addf %44, %46 : vector<8x32xf32>
      %c0_26 = arith.constant 0 : index
      %c0_27 = arith.constant 0 : index
      %48 = vector.load %arg8[%c0_26, %c0_27] : memref<8x32xf32, #tpu.memory_space<vmem>>, vector<8x32xf32>
      tpu.vector_store %arg8[%c0_26, %c0_27], %47 {strides = array<i32>} : memref<8x32xf32, #tpu.memory_space<vmem>>, vector<8x32xf32>,
      %c0_28 = arith.constant 0 : index
      %c0_29 = arith.constant 0 : index
      %49 = vector.load %arg6[%c0_28, %c0_29] : memref<640x32xf32, #tpu.memory_space<vmem>>, vector<640x32xf32>
      %cst_30 = arith.constant dense<0.000000e+00> : vector<8x32xf32>
      %50 = tpu.matmul %42, %49, %cst_30 {dimension_numbers = #tpu.dot_dimension_numbers<[1], [0], [0], [1], [0, 0, 1, 1], [], []>} : vector<8x640xf32>, vector<640x32xf32>, vector<8x32xf32> -> vector<8x32xf32>
      %c0_31 = arith.constant 0 : index
      %c0_32 = arith.constant 0 : index
      %51 = vector.load %arg7[%c0_31, %c0_32] : memref<1x32xf32, #tpu.memory_space<vmem>>, vector<1x32xf32>
      %52 = vector.broadcast %51 : vector<1x32xf32> to vector<8x32xf32>
      %53 = arith.addf %50, %52 : vector<8x32xf32>
      %cst_33 = arith.constant 2.000000e+01 : f32
      %54 = vector.broadcast %cst_33 : f32 to vector<8x32xf32>
      %55 = arith.cmpf ogt, %53, %54 : vector<8x32xf32>
      %cst_34 = arith.constant 2.000000e+01 : f32
      %56 = vector.broadcast %cst_34 : f32 to vector<8x32xf32>
      %57 = arith.minimumf %53, %56 : vector<8x32xf32>
      %58 = math.exp %57 : vector<8x32xf32>
      %59 = math.log1p %58 : vector<8x32xf32>
      %60 = arith.select %55, %53, %59 : vector<8x32xi1>, vector<8x32xf32>
      %c0_35 = arith.constant 0 : index
      %c0_36 = arith.constant 0 : index
      %61 = vector.load %arg9[%c0_35, %c0_36] : memref<8x32xf32, #tpu.memory_space<vmem>>, vector<8x32xf32>
      tpu.vector_store %arg9[%c0_35, %c0_36], %60 {strides = array<i32>} : memref<8x32xf32, #tpu.memory_space<vmem>>, vector<8x32xf32>,
    } else {
    }
    return
  }
  func.func @transform_0(%arg0: i32) -> (i32, i32) {
    %c0_i32 = arith.constant 0 : i32
    %c0_i32_0 = arith.constant 0 : i32
    return %c0_i32, %arg0 : i32, i32
  }
  func.func @transform_1(%arg0: i32) -> (i32, i32) {
    %c0_i32 = arith.constant 0 : i32
    %c0_i32_0 = arith.constant 0 : i32
    return %arg0, %c0_i32 : i32, i32
  }
  func.func @transform_2(%arg0: i32) -> (i32, i32) {
    %c0_i32 = arith.constant 0 : i32
    %c0_i32_0 = arith.constant 0 : i32
    %c0_i32_1 = arith.constant 0 : i32
    return %c0_i32, %c0_i32_0 : i32, i32
  }
  func.func @transform_3(%arg0: i32) -> (i32, i32) {
    %c0_i32 = arith.constant 0 : i32
    %c0_i32_0 = arith.constant 0 : i32
    %c0_i32_1 = arith.constant 0 : i32
    return %c0_i32, %c0_i32_0 : i32, i32
  }
  func.func @transform_4(%arg0: i32) -> (i32, i32) {
    %c0_i32 = arith.constant 0 : i32
    %c0_i32_0 = arith.constant 0 : i32
    %c0_i32_1 = arith.constant 0 : i32
    return %c0_i32, %c0_i32_0 : i32, i32
  }
  func.func @transform_5(%arg0: i32) -> (i32, i32) {
    %c0_i32 = arith.constant 0 : i32
    %c0_i32_0 = arith.constant 0 : i32
    %c0_i32_1 = arith.constant 0 : i32
    return %c0_i32, %c0_i32_0 : i32, i32
  }
  func.func @transform_6(%arg0: i32) -> (i32, i32) {
    %c0_i32 = arith.constant 0 : i32
    %c0_i32_0 = arith.constant 0 : i32
    %c0_i32_1 = arith.constant 0 : i32
    return %c0_i32, %c0_i32_0 : i32, i32
  }
  func.func @transform_7(%arg0: i32) -> (i32, i32) {
    %c0_i32 = arith.constant 0 : i32
    %c0_i32_0 = arith.constant 0 : i32
    %c0_i32_1 = arith.constant 0 : i32
    return %c0_i32, %c0_i32_0 : i32, i32
  }
  func.func @transform_8(%arg0: i32) -> (i32, i32) {
    %c0_i32 = arith.constant 0 : i32
    %c0_i32_0 = arith.constant 0 : i32
    %c0_i32_1 = arith.constant 0 : i32
    return %c0_i32, %c0_i32_0 : i32, i32
  }
}

</mosaic_0001>

<bundles_post_ra>
// kernel: _lambda_.3
= control target key start
LH: loop header
LB: loop body
LE: loop exit
PB: predicated region body
PF: predicated region fallthrough
CT: control target
= control target key end

     0   :  { %8 = vsyncpa [#allocation3], 0  ;;  %s3892_s0 = inlined_call_operand.vmem [shape: f32[8,256], index: 0, kind: input, shape index: {}]   ;;  %s3893_s1 = inlined_call_operand.hbm [shape: bf16[256,4096], index: 1, kind: input, shape index: {}]   ;;  %s3894_s2 = inlined_call_operand.hbm [shape: f32[3,4096], index: 2, kind: input, shape index: {}]   ;;  %s3895_s3 = inlined_call_operand.vmem [shape: f32[8,4096], index: 3, kind: output, shape index: {}]  }
   0x1   :  { %10 = vsyncpa [#allocation3 + $0x1], 0 }
   0x2   :  { %11 = vsyncpa [#allocation5], 0 }
   0x3   :  { %13 = vsyncpa [#allocation5 + $0x1], 0  ;;  %s3300_s12 = smov 0   ;;  %s3302_s13 = smov 0  }
   0x4   :  { %s3304_s14 = smov 0   ;;  %s3306_s15 = smov 0  }
   0x5 LB: > { %s2816_s16 = sadd.s32 4294967295, %s3273_s15   ;;  %s3320_s17 = sadd.s32 1, %s3273_s15   ;;  %s3273_s15 = sphi %s3306_s15, %s3905_s15   ;;  %s3269_s14 = sphi %s3304_s14, %s3904_s14   ;;  %s3265_s13 = sphi %s3302_s13, %s3903_s13   ;;  %s3261_s12 = sphi %s3300_s12, %s3902_s12  }
   0x6   : > { %s44_s18 = ssub.s32 %s3273_s15, %s3320_s17  ;;  %s47_s19 = sadd.s32 1, %s3269_s14 }
   0x7   : > { %p45_p0 = scmp.eq.s32.totalorder %s44_s18, 0  ;;  %p54_p1 = scmp.ne.s32.totalorder %s3269_s14, %s3265_s13 }
   0x8   : > { %p55_p2 = scmp.eq.s32.totalorder %s3273_s15, 0  ;;  %p60_p3 = scmp.ne.s32.totalorder %s3265_s13, %s3261_s12 }
   0x9   : > { %s3330_s20 = scalar_select %p45_p0, %s3269_s14, %s47_s19  }
   0xa   : > { %p56_p4 = por %p55_p2, %p54_p1  ;;  %p61_p5 = scmp.eq.s32.totalorder %s2816_s16, 0 }
   0xb   : > { %p3107_p6 = scmp.lt.s32.totalorder %s3273_s15, 2  ;;  %s3340_s22 = sand.u32 1, %s3269_s14  }
   0xc   : > { %p3335_p7 = por %p61_p5, %p60_p3  ;;  %s2820_s23 = sshll.u32 %s3340_s22, 11 }
   0xd   : > { %s3094_s24 = sshll.u32 %s3273_s15, 10  ;;  %s143_s28 = scalar_lea.vmem [#allocation2], %s2820_s23 }
   0xe   : > { %s3897_s21 = scalar_select %p3335_p7, 1, 0 }
   0xf   : > { %s3349_s27 = scalar_lea.hbm %s3893_s1, %s3094_s24  ;;  %s150_s29 = sshll.u32 %s143_s28, 4  ;;  %s3351_s29 = int_to_ptr.vmem [resolvable:$true] %s150_s29 }
  0x10   : > { %p3353_p8 = pnand %p3107_p6, %p56_p4  ;;  %s140_s4 = scalar_lea.sflag [#allocation3], %s3340_s22 }
  0x11   : > { %s3175_s5 = scalar_lea.hbm %s3349_s27, 32768  ;;  %s3180_s8 = scalar_lea.hbm %s3893_s1, 65536 }
  0x12   : > { %p3176_p9 = scmp.ne.s32.totalorder %s3349_s27, %s3175_s5  ;;  %p3177_p10 = pneg %p3353_p8 }
  0x13   : > { %p3181_p13 = scmp.lt.u32.totalorder %s3349_s27, %s3893_s1  ;;  %p3182_p0 = scmp.lt.u32.totalorder %s3180_s8, %s3175_s5 }
  0x14   : > { %p3178_p11 = pnand %p3177_p10, %p3176_p9  ;;  %p3184_p2 = scmp.lt.u32.totalorder %s3175_s5, %s3349_s27 }
  0x15   : > { %p3183_p1 = por %p3182_p0, %p3181_p13 }
  0x16   : > { %p3179_p12 = pneg %p3178_p11 }
  0x17   : > { %p3185_p3 = por %p3184_p2, %p3183_p1 }
  0x19   : > { %p3186_p4 = pnand %p3185_p3, %p3179_p12 }
  0x1b   : > { %3189 = shalt.err (!%p3186_p4)
}
  0x1c   : > { %s3190_s11 = scalar_lea.vmem %s3351_s29, 32768  ;;  %s3275_s12 = smov [#allocation2]  }
  0x1d   : > { %p3191_p5 = scmp.ne.s32.totalorder %s3351_s29, %s3190_s11  ;;  %s3195_s18 = sshll.u32 %s3275_s12, 4  ;;  %s3196_s18 = int_to_ptr.vmem [resolvable:$false] %s3195_s18 }
  0x1e   : > { %s3197_s19 = scalar_lea.vmem %s3196_s18, 65536  ;;  %p3198_p11 = scmp.lt.s32.totalorder %s3351_s29, %s3196_s18 }
  0x1f   : > { %p3193_p6 = pnand %p3191_p5, %p3177_p10  ;;  %p3199_p13 = scmp.lt.s32.totalorder %s3197_s19, %s3190_s11 }
  0x21   : > { %p3194_p9 = pneg %p3193_p6  ;;  %p3200_p0 = por %p3199_p13, %p3198_p11 }
  0x23   : > { %p3201_p1 = pnand %p3200_p0, %p3194_p9 }
  0x25   : > { %3204 = shalt.err (!%p3201_p1)
}
  0x26   : > { %s3276_s23 = smov 2048   ;;  %s3277_s25 = smov 1024  }
  0x27   : > { %s3278_s26 = smov 64   ;;  %p2826_p12 = scmp.ge.s32.totalorder %s3273_s15, 1 }
  0x28   : > { %3103 = dma.hbm_to_vmem [thread:$0]  (!%p3353_p8), %s3349_s27, 32768, %s3351_s29, %s140_s4, %s3276_s23, %s3277_s25, %s3278_s26  }
  0x29   : > { %p177_p2 = scmp.lt.s32.totalorder %s3273_s15, 3  ;;  %s2823_s28 = sshll.u32 %s3340_s22, 6 }
  0x2a   : > { %s3397_s8 = scalar_lea.hbm %s3894_s2, %s3094_s24  ;;  %s164_s9 = scalar_lea.vmem [#allocation4], %s2823_s28 }
  0x2b   : > { %p3388_p3 = pnand %p2826_p12, %p177_p2  ;;  %s172_s10 = sshll.u32 %s164_s9, 4  ;;  %s173_s10 = int_to_ptr.vmem [resolvable:$true] %s172_s10 }
  0x2c   : > { %s161_s27 = scalar_lea.sflag [#allocation5], %s3340_s22  ;;  %s3205_s29 = scalar_lea.hbm %s3397_s8, 1024 }
  0x2d   : > { %s3899_s5 = scalar_select %p3388_p3, 1, 0 }
  0x2e   : > { %p3206_p4 = scmp.ne.s32.totalorder %s3397_s8, %s3205_s29  ;;  %s3210_s12 = scalar_lea.hbm %s3894_s2, 2048 }
  0x2f   : > { %p3211_p9 = scmp.lt.u32.totalorder %s3397_s8, %s3894_s2  ;;  %p3212_p11 = scmp.lt.u32.totalorder %s3210_s12, %s3205_s29 }
  0x30   : > { %p3208_p5 = pnand %p3206_p4, %p3177_p10  ;;  %p3214_p0 = scmp.lt.u32.totalorder %s3205_s29, %s3397_s8 }
  0x31   : > { %p3213_p13 = por %p3212_p11, %p3211_p9 }
  0x32   : > { %p3209_p6 = pneg %p3208_p5 }
  0x33   : > { %p3215_p1 = por %p3214_p0, %p3213_p13 }
  0x35   : > { %p3216_p12 = pnand %p3215_p1, %p3209_p6 }
  0x37   : > { %3219 = shalt.err (!%p3216_p12)
}
  0x38   : > { %s3220_s22 = scalar_lea.vmem %s173_s10, 1024  ;;  %s3279_s19 = smov [#allocation4]  }
  0x39   : > { %p3221_p2 = scmp.ne.s32.totalorder %s173_s10, %s3220_s22  ;;  %s3225_s23 = sshll.u32 %s3279_s19, 4  ;;  %s3226_s23 = int_to_ptr.vmem [resolvable:$false] %s3225_s23 }
  0x3a   : > { %s3227_s25 = scalar_lea.vmem %s3226_s23, 2048  ;;  %p3228_p7 = scmp.lt.s32.totalorder %s173_s10, %s3226_s23 }
  0x3b   : > { %p3223_p4 = pnand %p3221_p2, %p3177_p10  ;;  %p3229_p3 = scmp.lt.s32.totalorder %s3227_s25, %s3220_s22 }
  0x3d   : > { %p3224_p5 = pneg %p3223_p4  ;;  %p3230_p9 = por %p3229_p3, %p3228_p7 }
  0x3f   : > { %p3231_p11 = pnand %p3230_p9, %p3224_p5 }
  0x41   : > { %3234 = shalt.err (!%p3231_p11)
}
  0x42   : > { %3106 = dma.hbm_to_vmem [thread:$0]  (!%p3353_p8), %s3397_s8, 1024, %s173_s10, %s161_s27  }
  0x43   : > { %p3900_p6 = scmp.ne.s32.totalorder %s3899_s5, 0 }
  0x44   : > { %s183_s26 = sand.u32 (!%p3900_p6), 1, %s3265_s13   ;;  %p3901_p10 = scmp.ne.s32.totalorder (!%p3900_p6), %s3897_s21, 0 }
  0x45   : > { %181 = sbr.rel (%p3900_p6) target bundleno = 611 (0x263), region = 32  ;;  %s2827_s28 = sshll.u32 (!%p3900_p6), %s183_s26, 11 }
  0x46   : > { %s184_s6 = scalar_lea.sflag (!%p3900_p6), [#allocation3], %s183_s26  ;;  %s3422_s7 = scalar_lea.vmem (!%p3900_p6), [#allocation2], %s2827_s28 }
  0x4c   : > { %3252 = dma.done.wait (%p3901_p10), %s184_s6, 32768  }
  0x4d   : > { %3254 = vsyncadd (%p3901_p10), %s184_s6, 4294934528  ;;  %s2828_s9 = sshll.u32 %s183_s26, 6  ;;  %s193_s30 = scalar_lea.sflag [#allocation5], %s183_s26 }
  0x4e   : > { %s3428_s29 = scalar_lea.vmem [#allocation4], %s2828_s9 }
  0x4f   : > { %3256 = dma.done.wait (%p3901_p10), %s193_s30, 1024  }
  0x50   : > { %3258 = vsyncadd (%p3901_p10), %s193_s30, 4294966272  ;;  %v236_v0 = vld [vmem:[%s3422_s7] sm:$0xff]  ;;  %v237_v2 = vld [vmem:[%s3422_s7 + $0x8] sm:$0xff]  ;;  %s2829_s27 = sshll.u32 %s2816_s16, 4 }
  0x51   : > { %v244_v1 = vld [vmem:[%s3422_s7 + $0x40] sm:$0xff]  ;;  %v245_v4 = vld [vmem:[%s3422_s7 + $0x48] sm:$0xff]  ;;  %p227_p7 = scmp.lt.s32.totalorder %s2829_s27, 31 }
  0x52   : > { %v2833_v3 = vcombine.high %v236_v0, %v244_v1  ;;  %v2832_v5 = vcombine.low %v236_v0, %v244_v1  ;;  %v252_v6 = vld [vmem:[%s3422_s7 + $0x80] sm:$0xff]  ;;  %v2835_v8 = vcombine.high %v237_v2, %v245_v4  ;;  %v2834_v9 = vcombine.low %v237_v2, %v245_v4  ;;  %v253_v11 = vld [vmem:[%s3422_s7 + $0x88] sm:$0xff] }
  0x53   : > { %v260_v7 = vld [vmem:[%s3422_s7 + $0xc0] sm:$0xff]  ;;  %v261_v12 = vld [vmem:[%s3422_s7 + $0xc8] sm:$0xff]  ;;  %s3907_s27 = smov (!%p227_p7, %s2829_s27), 31 }
  0x54   : > { %v2849_v10 = vcombine.high %v252_v6, %v260_v7  ;;  %v268_v13 = vld [vmem:[%s3422_s7 + $0x100] sm:$0xff]  ;;  %1857 = vmatprep.subr.bf16.mxu0 %v2833_v3  ;;  %v2851_v14 = vcombine.high %v253_v11, %v261_v12  ;;  %v269_v16 = vld [vmem:[%s3422_s7 + $0x108] sm:$0xff]  ;;  %1898 = vmatprep.subr.bf16.mxu1 %v2835_v8  ;;  %v2848_v18 = vcombine.low %v252_v6, %v260_v7  ;;  %s2830_s15 = sshll.u32 %s3907_s27, 3 }
  0x55   : > { %v276_v15 = vld [vmem:[%s3422_s7 + $0x140] sm:$0xff]  ;;  %v277_v17 = vld [vmem:[%s3422_s7 + $0x148] sm:$0xff]  ;;  %1858 = vmatpush1.bf16.msra.mxu0 %v2832_v5  ;;  %1899 = vmatpush1.bf16.msra.mxu1 %v2834_v9  ;;  %v2850_v19 = vcombine.low %v253_v11, %v261_v12  ;;  %s3768_s11 = scalar_lea.vmem %s3895_s3, %s2830_s15 }
  0x56   : > { %1859 = vmatprep.subr.bf16.mxu0 %v2849_v10  ;;  %v2865_v20 = vcombine.high %v268_v13, %v276_v15  ;;  %1900 = vmatprep.subr.bf16.mxu1 %v2851_v14  ;;  %v2867_v21 = vcombine.high %v269_v16, %v277_v17  ;;  %v284_v22 = vld [vmem:[%s3422_s7 + $0x180] sm:$0xff]  ;;  %v285_v24 = vld [vmem:[%s3422_s7 + $0x188] sm:$0xff]  ;;  %v2864_v26 = vcombine.low %v268_v13, %v276_v15 }
  0x57   : > { %v292_v23 = vld [vmem:[%s3422_s7 + $0x1c0] sm:$0xff]  ;;  %v293_v25 = vld [vmem:[%s3422_s7 + $0x1c8] sm:$0xff]  ;;  %v2866_v27 = vcombine.low %v269_v16, %v277_v17 }
  0x58   : > { %v2881_v28 = vcombine.high %v284_v22, %v292_v23  ;;  %v2883_v29 = vcombine.high %v285_v24, %v293_v25  ;;  %v300_v30 = vld [vmem:[%s3422_s7 + $0x200] sm:$0xff]  ;;  %v301_v32 = vld [vmem:[%s3422_s7 + $0x208] sm:$0xff]  ;;  %v2880_v34 = vcombine.low %v284_v22, %v292_v23  ;;  %v2882_v35 = vcombine.low %v285_v24, %v293_v25 }
  0x59   : > { %1860 = vmatpush1.bf16.msra.mxu0 %v2848_v18  ;;  %1901 = vmatpush1.bf16.msra.mxu1 %v2850_v19  ;;  %v308_v31 = vld [vmem:[%s3422_s7 + $0x240] sm:$0xff]  ;;  %v309_v33 = vld [vmem:[%s3422_s7 + $0x248] sm:$0xff] }
  0x5a   : > { %1861 = vmatprep.subr.bf16.mxu0 %v2865_v20  ;;  %1902 = vmatprep.subr.bf16.mxu1 %v2867_v21  ;;  %v2897_v36 = vcombine.high %v300_v30, %v308_v31  ;;  %v2899_v37 = vcombine.high %v301_v32, %v309_v33  ;;  %v316_v38 = vld [vmem:[%s3422_s7 + $0x280] sm:$0xff]  ;;  %v317_v40 = vld [vmem:[%s3422_s7 + $0x288] sm:$0xff]  ;;  %v2896_v42 = vcombine.low %v300_v30, %v308_v31 }
  0x5b   : > { %v324_v39 = vld [vmem:[%s3422_s7 + $0x2c0] sm:$0xff]  ;;  %v325_v41 = vld [vmem:[%s3422_s7 + $0x2c8] sm:$0xff]  ;;  %v2898_v43 = vcombine.low %v301_v32, %v309_v33 }
  0x5c   : > { %v2913_v44 = vcombine.high %v316_v38, %v324_v39  ;;  %v2915_v45 = vcombine.high %v317_v40, %v325_v41  ;;  %v332_v46 = vld [vmem:[%s3422_s7 + $0x300] sm:$0xff]  ;;  %v333_v48 = vld [vmem:[%s3422_s7 + $0x308] sm:$0xff]  ;;  %v2912_v50 = vcombine.low %v316_v38, %v324_v39  ;;  %v2914_v51 = vcombine.low %v317_v40, %v325_v41 }
  0x5d   : > { %1862 = vmatpush1.bf16.msra.mxu0 %v2864_v26  ;;  %1903 = vmatpush1.bf16.msra.mxu1 %v2866_v27  ;;  %v340_v47 = vld [vmem:[%s3422_s7 + $0x340] sm:$0xff]  ;;  %v341_v49 = vld [vmem:[%s3422_s7 + $0x348] sm:$0xff] }
  0x5e   : > { %1863 = vmatprep.subr.bf16.mxu0 %v2881_v28  ;;  %1904 = vmatprep.subr.bf16.mxu1 %v2883_v29  ;;  %v2929_v52 = vcombine.high %v332_v46, %v340_v47  ;;  %v233_v53 = vld [vmem:[%s3892_s0 + $0x8] sm:$0xff]  ;;  %v2931_v54 = vcombine.high %v333_v48, %v341_v49  ;;  %v348_v55 = vld [vmem:[%s3422_s7 + $0x380] sm:$0xff]  ;;  %v2928_v60 = vcombine.low %v332_v46, %v340_v47 }
  0x5f   : > { %v356_v56 = vld [vmem:[%s3422_s7 + $0x3c0] sm:$0xff]  ;;  %v3467_v57 = vpack.c.bf16 %v233_v53, %v233_v53  ;;  %v349_v58 = vld [vmem:[%s3422_s7 + $0x388] sm:$0xff]  ;;  %v2930_v61 = vcombine.low %v333_v48, %v341_v49 }
  0x60   : > { %v357_v59 = vld [vmem:[%s3422_s7 + $0x3c8] sm:$0xff]  ;;  %v2945_v62 = vcombine.high %v348_v55, %v356_v56  ;;  %v364_v0 = vld [vmem:[%s3422_s7 + $0x400] sm:$0xff]  ;;  %v2944_v4 = vcombine.low %v348_v55, %v356_v56 }
  0x61   : > { %1864 = vmatpush1.bf16.msra.mxu0 %v2880_v34  ;;  %1905 = vmatpush1.bf16.msra.mxu1 %v2882_v35  ;;  %v2947_v63 = vcombine.high %v349_v58, %v357_v59  ;;  %v372_v1 = vld [vmem:[%s3422_s7 + $0x440] sm:$0xff]  ;;  %v365_v2 = vld [vmem:[%s3422_s7 + $0x408] sm:$0xff]  ;;  %v2946_v5 = vcombine.low %v349_v58, %v357_v59 }
  0x62   : > { %1865 = vmatprep.subr.bf16.mxu0 %v2897_v36  ;;  %1906 = vmatprep.subr.bf16.mxu1 %v2899_v37  ;;  %v373_v3 = vld [vmem:[%s3422_s7 + $0x448] sm:$0xff]  ;;  %v2961_v6 = vcombine.high %v364_v0, %v372_v1  ;;  %v380_v8 = vld [vmem:[%s3422_s7 + $0x480] sm:$0xff]  ;;  %v2960_v12 = vcombine.low %v364_v0, %v372_v1  ;;  %v238_v1 = vld [vmem:[%s3422_s7 + $0x10] sm:$0xff] }
  0x63   : > { %1889 = vmatprep.mubr.bf16.mxu0 %v3467_v57  ;;  %1930 = vmatprep.mubr.bf16.mxu1 %v3467_v57  ;;  %v2963_v7 = vcombine.high %v365_v2, %v373_v3  ;;  %v388_v9 = vld [vmem:[%s3422_s7 + $0x4c0] sm:$0xff]  ;;  %v381_v10 = vld [vmem:[%s3422_s7 + $0x488] sm:$0xff]  ;;  %v2962_v13 = vcombine.low %v365_v2, %v373_v3  ;;  %v246_v2 = vld [vmem:[%s3422_s7 + $0x50] sm:$0xff] }
  0x64   : > { %v389_v11 = vld [vmem:[%s3422_s7 + $0x4c8] sm:$0xff]  ;;  %v2977_v14 = vcombine.high %v380_v8, %v388_v9  ;;  %v396_v16 = vld [vmem:[%s3422_s7 + $0x500] sm:$0xff]  ;;  %v2976_v20 = vcombine.low %v380_v8, %v388_v9  ;;  %v239_v3 = vld [vmem:[%s3422_s7 + $0x18] sm:$0xff]  ;;  %v2837_v8 = vcombine.high %v238_v1, %v246_v2 }
  0x65   : > { %1866 = vmatpush1.bf16.msra.mxu0 %v2896_v42  ;;  %1907 = vmatpush1.bf16.msra.mxu1 %v2898_v43  ;;  %v2979_v15 = vcombine.high %v381_v10, %v389_v11  ;;  %v404_v17 = vld [vmem:[%s3422_s7 + $0x540] sm:$0xff]  ;;  %v397_v18 = vld [vmem:[%s3422_s7 + $0x508] sm:$0xff]  ;;  %v2978_v21 = vcombine.low %v381_v10, %v389_v11  ;;  %v254_v10 = vld [vmem:[%s3422_s7 + $0x90] sm:$0xff] }
  0x66   : > { %1867 = vmatprep.subr.bf16.mxu0 %v2913_v44  ;;  %1908 = vmatprep.subr.bf16.mxu1 %v2915_v45  ;;  %v405_v19 = vld [vmem:[%s3422_s7 + $0x548] sm:$0xff]  ;;  %v2993_v22 = vcombine.high %v396_v16, %v404_v17  ;;  %v412_v24 = vld [vmem:[%s3422_s7 + $0x580] sm:$0xff]  ;;  %v2992_v28 = vcombine.low %v396_v16, %v404_v17  ;;  %v262_v11 = vld [vmem:[%s3422_s7 + $0xd0] sm:$0xff] }
  0x67   : > { %v2995_v23 = vcombine.high %v397_v18, %v405_v19  ;;  %v420_v25 = vld [vmem:[%s3422_s7 + $0x5c0] sm:$0xff]  ;;  %v413_v26 = vld [vmem:[%s3422_s7 + $0x588] sm:$0xff]  ;;  %v2994_v29 = vcombine.low %v397_v18, %v405_v19  ;;  %v2853_v17 = vcombine.high %v254_v10, %v262_v11  ;;  %v270_v19 = vld [vmem:[%s3422_s7 + $0x110] sm:$0xff] }
  0x68   : > { %v421_v27 = vld [vmem:[%s3422_s7 + $0x5c8] sm:$0xff]  ;;  %v3009_v30 = vcombine.high %v412_v24, %v420_v25  ;;  %v428_v32 = vld [vmem:[%s3422_s7 + $0x600] sm:$0xff]  ;;  %v3008_v36 = vcombine.low %v412_v24, %v420_v25 }
  0x69   : > { %1868 = vmatpush1.bf16.msra.mxu0 %v2912_v50  ;;  %1909 = vmatpush1.bf16.msra.mxu1 %v2914_v51  ;;  %v3011_v31 = vcombine.high %v413_v26, %v421_v27  ;;  %v436_v33 = vld [vmem:[%s3422_s7 + $0x640] sm:$0xff]  ;;  %v429_v34 = vld [vmem:[%s3422_s7 + $0x608] sm:$0xff]  ;;  %v3010_v37 = vcombine.low %v413_v26, %v421_v27  ;;  %v286_v27 = vld [vmem:[%s3422_s7 + $0x190] sm:$0xff] }
  0x6a   : > { %1869 = vmatprep.subr.bf16.mxu0 %v2929_v52  ;;  %1910 = vmatprep.subr.bf16.mxu1 %v2931_v54  ;;  %v437_v35 = vld [vmem:[%s3422_s7 + $0x648] sm:$0xff]  ;;  %v3025_v38 = vcombine.high %v428_v32, %v436_v33  ;;  %v444_v40 = vld [vmem:[%s3422_s7 + $0x680] sm:$0xff]  ;;  %v3024_v44 = vcombine.low %v428_v32, %v436_v33 }
  0x6b   : > { %v3027_v39 = vcombine.high %v429_v34, %v437_v35  ;;  %v452_v41 = vld [vmem:[%s3422_s7 + $0x6c0] sm:$0xff]  ;;  %v445_v42 = vld [vmem:[%s3422_s7 + $0x688] sm:$0xff]  ;;  %v3026_v45 = vcombine.low %v429_v34, %v437_v35  ;;  %v302_v35 = vld [vmem:[%s3422_s7 + $0x210] sm:$0xff] }
  0x6c   : > { %v453_v43 = vld [vmem:[%s3422_s7 + $0x6c8] sm:$0xff]  ;;  %v3041_v46 = vcombine.high %v444_v40, %v452_v41  ;;  %v460_v48 = vld [vmem:[%s3422_s7 + $0x700] sm:$0xff]  ;;  %v3040_v52 = vcombine.low %v444_v40, %v452_v41 }
  0x6d   : > { %1870 = vmatpush1.bf16.msra.mxu0 %v2928_v60  ;;  %1911 = vmatpush1.bf16.msra.mxu1 %v2930_v61  ;;  %v3043_v47 = vcombine.high %v445_v42, %v453_v43  ;;  %v468_v49 = vld [vmem:[%s3422_s7 + $0x740] sm:$0xff]  ;;  %v461_v50 = vld [vmem:[%s3422_s7 + $0x708] sm:$0xff]  ;;  %v3042_v53 = vcombine.low %v445_v42, %v453_v43  ;;  %v318_v43 = vld [vmem:[%s3422_s7 + $0x290] sm:$0xff] }
  0x6e   : > { %1871 = vmatprep.subr.bf16.mxu0 %v2945_v62  ;;  %1912 = vmatprep.subr.bf16.mxu1 %v2947_v63  ;;  %v469_v51 = vld [vmem:[%s3422_s7 + $0x748] sm:$0xff]  ;;  %v3057_v54 = vcombine.high %v460_v48, %v468_v49  ;;  %v476_v56 = vld [vmem:[%s3422_s7 + $0x780] sm:$0xff]  ;;  %v3056_v61 = vcombine.low %v460_v48, %v468_v49 }
  0x6f   : > { %v3059_v55 = vcombine.high %v461_v50, %v469_v51  ;;  %v484_v58 = vld [vmem:[%s3422_s7 + $0x7c0] sm:$0xff]  ;;  %v477_v59 = vld [vmem:[%s3422_s7 + $0x788] sm:$0xff]  ;;  %v3058_v62 = vcombine.low %v461_v50, %v469_v51  ;;  %v334_v51 = vld [vmem:[%s3422_s7 + $0x310] sm:$0xff] }
  0x70   : > { %v485_v60 = vld [vmem:[%s3422_s7 + $0x7c8] sm:$0xff]  ;;  %v3073_v63 = vcombine.high %v476_v56, %v484_v58 }
  0x71   : > { %1872 = vmatpush1.bf16.msra.mxu0 %v2944_v4  ;;  %1913 = vmatpush1.bf16.msra.mxu1 %v2946_v5  ;;  %v3075_v0 = vcombine.high %v477_v59, %v485_v60  ;;  %v247_v4 = vld [vmem:[%s3422_s7 + $0x58] sm:$0xff]  ;;  %v3072_v5 = vcombine.low %v476_v56, %v484_v58 }
  0x72   : > { %1873 = vmatprep.subr.bf16.mxu0 %v2961_v6  ;;  %1914 = vmatprep.subr.bf16.mxu1 %v2963_v7  ;;  %v232_v6 = vld [vmem:[%s3892_s0] sm:$0xff]  ;;  %v3074_v7 = vcombine.low %v477_v59, %v485_v60  ;;  %v2839_v9 = vcombine.high %v239_v3, %v247_v4  ;;  %v2838_v16 = vcombine.low %v239_v3, %v247_v4  ;;  %v350_v60 = vld [vmem:[%s3422_s7 + $0x390] sm:$0xff] }
  0x73   : > { %v366_v4 = vld [vmem:[%s3422_s7 + $0x410] sm:$0xff] }
  0x75   : > { %1874 = vmatpush1.bf16.msra.mxu0 %v2960_v12  ;;  %1915 = vmatpush1.bf16.msra.mxu1 %v2962_v13  ;;  %v3514_v12 = vpack.c.bf16 %v232_v6, %v232_v6  ;;  %v255_v13 = vld [vmem:[%s3422_s7 + $0x98] sm:$0xff] }
  0x76   : > { %1875 = vmatprep.subr.bf16.mxu0 %v2977_v14  ;;  %1916 = vmatprep.subr.bf16.mxu1 %v2979_v15  ;;  %v263_v14 = vld [vmem:[%s3422_s7 + $0xd8] sm:$0xff]  ;;  %v2836_v15 = vcombine.low %v238_v1, %v246_v2 }
  0x77   : > { %v2855_v18 = vcombine.high %v255_v13, %v263_v14  ;;  %v2854_v24 = vcombine.low %v255_v13, %v263_v14  ;;  %v367_v6 = vld [vmem:[%s3422_s7 + $0x418] sm:$0xff]  ;;  %v382_v13 = vld [vmem:[%s3422_s7 + $0x490] sm:$0xff] }
  0x78   : > { %v390_v14 = vld [vmem:[%s3422_s7 + $0x4d0] sm:$0xff] }
  0x79   : > { %1876 = vmatpush1.bf16.msra.mxu0 %v2976_v20  ;;  %1917 = vmatpush1.bf16.msra.mxu1 %v2978_v21  ;;  %v278_v20 = vld [vmem:[%s3422_s7 + $0x150] sm:$0xff]  ;;  %v271_v21 = vld [vmem:[%s3422_s7 + $0x118] sm:$0xff] }
  0x7a   : > { %1877 = vmatprep.subr.bf16.mxu0 %v2993_v22  ;;  %1918 = vmatprep.subr.bf16.mxu1 %v2995_v23  ;;  %v279_v22 = vld [vmem:[%s3422_s7 + $0x158] sm:$0xff]  ;;  %v2852_v23 = vcombine.low %v254_v10, %v262_v11  ;;  %v2869_v25 = vcombine.high %v270_v19, %v278_v20 }
  0x7b   : > { %v2871_v26 = vcombine.high %v271_v21, %v279_v22  ;;  %v2870_v32 = vcombine.low %v271_v21, %v279_v22  ;;  %v398_v21 = vld [vmem:[%s3422_s7 + $0x510] sm:$0xff] }
  0x7c   : > { %v406_v22 = vld [vmem:[%s3422_s7 + $0x550] sm:$0xff] }
  0x7d   : > { %1878 = vmatpush1.bf16.msra.mxu0 %v2992_v28  ;;  %1919 = vmatpush1.bf16.msra.mxu1 %v2994_v29  ;;  %v294_v28 = vld [vmem:[%s3422_s7 + $0x1d0] sm:$0xff]  ;;  %v287_v29 = vld [vmem:[%s3422_s7 + $0x198] sm:$0xff] }
  0x7e   : > { %1879 = vmatprep.subr.bf16.mxu0 %v3009_v30  ;;  %1920 = vmatprep.subr.bf16.mxu1 %v3011_v31  ;;  %v295_v30 = vld [vmem:[%s3422_s7 + $0x1d8] sm:$0xff]  ;;  %v2868_v31 = vcombine.low %v270_v19, %v278_v20  ;;  %v2885_v33 = vcombine.high %v286_v27, %v294_v28  ;;  %v2981_v19 = vcombine.high %v382_v13, %v390_v14 }
  0x7f   : > { %v2887_v34 = vcombine.high %v287_v29, %v295_v30  ;;  %v2886_v40 = vcombine.low %v287_v29, %v295_v30  ;;  %v414_v29 = vld [vmem:[%s3422_s7 + $0x590] sm:$0xff] }
  0x80   : > { %v422_v30 = vld [vmem:[%s3422_s7 + $0x5d0] sm:$0xff] }
  0x81   : > { %1880 = vmatpush1.bf16.msra.mxu0 %v3008_v36  ;;  %1921 = vmatpush1.bf16.msra.mxu1 %v3010_v37  ;;  %v310_v36 = vld [vmem:[%s3422_s7 + $0x250] sm:$0xff]  ;;  %v303_v37 = vld [vmem:[%s3422_s7 + $0x218] sm:$0xff] }
  0x82   : > { %1881 = vmatprep.subr.bf16.mxu0 %v3025_v38  ;;  %1922 = vmatprep.subr.bf16.mxu1 %v3027_v39  ;;  %v311_v38 = vld [vmem:[%s3422_s7 + $0x258] sm:$0xff]  ;;  %v2884_v39 = vcombine.low %v286_v27, %v294_v28  ;;  %v2901_v41 = vcombine.high %v302_v35, %v310_v36  ;;  %v2997_v27 = vcombine.high %v398_v21, %v406_v22 }
  0x83   : > { %v2903_v42 = vcombine.high %v303_v37, %v311_v38  ;;  %v2902_v48 = vcombine.low %v303_v37, %v311_v38  ;;  %v430_v37 = vld [vmem:[%s3422_s7 + $0x610] sm:$0xff] }
  0x84   : > { %v438_v38 = vld [vmem:[%s3422_s7 + $0x650] sm:$0xff] }
  0x85   : > { %1882 = vmatpush1.bf16.msra.mxu0 %v3024_v44  ;;  %1923 = vmatpush1.bf16.msra.mxu1 %v3026_v45  ;;  %v326_v44 = vld [vmem:[%s3422_s7 + $0x2d0] sm:$0xff]  ;;  %v319_v45 = vld [vmem:[%s3422_s7 + $0x298] sm:$0xff] }
  0x86   : > { %1883 = vmatprep.subr.bf16.mxu0 %v3041_v46  ;;  %1924 = vmatprep.subr.bf16.mxu1 %v3043_v47  ;;  %v327_v46 = vld [vmem:[%s3422_s7 + $0x2d8] sm:$0xff]  ;;  %v2900_v47 = vcombine.low %v302_v35, %v310_v36  ;;  %v2917_v49 = vcombine.high %v318_v43, %v326_v44  ;;  %v3013_v35 = vcombine.high %v414_v29, %v422_v30 }
  0x87   : > { %v2919_v50 = vcombine.high %v319_v45, %v327_v46  ;;  %v2918_v56 = vcombine.low %v319_v45, %v327_v46  ;;  %v446_v45 = vld [vmem:[%s3422_s7 + $0x690] sm:$0xff] }
  0x88   : > { %v454_v46 = vld [vmem:[%s3422_s7 + $0x6d0] sm:$0xff] }
  0x89   : > { %1884 = vmatpush1.bf16.msra.mxu0 %v3040_v52  ;;  %1925 = vmatpush1.bf16.msra.mxu1 %v3042_v53  ;;  %v342_v52 = vld [vmem:[%s3422_s7 + $0x350] sm:$0xff]  ;;  %v335_v53 = vld [vmem:[%s3422_s7 + $0x318] sm:$0xff] }
  0x8a   : > { %1885 = vmatprep.subr.bf16.mxu0 %v3057_v54  ;;  %1926 = vmatprep.subr.bf16.mxu1 %v3059_v55  ;;  %v343_v54 = vld [vmem:[%s3422_s7 + $0x358] sm:$0xff]  ;;  %v2916_v55 = vcombine.low %v318_v43, %v326_v44  ;;  %v2933_v58 = vcombine.high %v334_v51, %v342_v52  ;;  %v3029_v43 = vcombine.high %v430_v37, %v438_v38 }
  0x8b   : > { %v2935_v59 = vcombine.high %v335_v53, %v343_v54  ;;  %v2934_v1 = vcombine.low %v335_v53, %v343_v54  ;;  %v462_v53 = vld [vmem:[%s3422_s7 + $0x710] sm:$0xff] }
  0x8c   : > { %v470_v54 = vld [vmem:[%s3422_s7 + $0x750] sm:$0xff] }
  0x8d   : > { %1886 = vmatpush1.bf16.msra.mxu0 %v3056_v61  ;;  %1927 = vmatpush1.bf16.msra.mxu1 %v3058_v62  ;;  %v358_v61 = vld [vmem:[%s3422_s7 + $0x3d0] sm:$0xff]  ;;  %v351_v62 = vld [vmem:[%s3422_s7 + $0x398] sm:$0xff] }
  0x8e   : > { %1887 = vmatprep.subr.bf16.mxu0 %v3073_v63  ;;  %1928 = vmatprep.subr.bf16.mxu1 %v3075_v0  ;;  %v359_v63 = vld [vmem:[%s3422_s7 + $0x3d8] sm:$0xff]  ;;  %v2932_v0 = vcombine.low %v334_v51, %v342_v52  ;;  %v2949_v2 = vcombine.high %v350_v60, %v358_v61  ;;  %v3045_v51 = vcombine.high %v446_v45, %v454_v46 }
  0x8f   : > { %v2951_v3 = vcombine.high %v351_v62, %v359_v63 }
  0x91   : > { %1888 = vmatpush1.bf16.msra.mxu0 %v3072_v5  ;;  %1929 = vmatpush1.bf16.msra.mxu1 %v3074_v7  ;;  %v374_v5 = vld [vmem:[%s3422_s7 + $0x450] sm:$0xff]  ;;  %v375_v7 = vld [vmem:[%s3422_s7 + $0x458] sm:$0xff] }
  0x92   : > { %1939 = vmatprep.subr.bf16.mxu0 %v2837_v8  ;;  %1980 = vmatprep.subr.bf16.mxu1 %v2839_v9  ;;  %v2948_v8 = vcombine.low %v350_v60, %v358_v61  ;;  %v2950_v9 = vcombine.low %v351_v62, %v359_v63  ;;  %v2965_v10 = vcombine.high %v366_v4, %v374_v5  ;;  %v478_v62 = vld [vmem:[%s3422_s7 + $0x790] sm:$0xff] }
  0x93   : > { %v2967_v11 = vcombine.high %v367_v6, %v375_v7  ;;  %v3061_v60 = vcombine.high %v462_v53, %v470_v54  ;;  %v486_v63 = vld [vmem:[%s3422_s7 + $0x7d0] sm:$0xff] }
  0x94   : > { %1890 = vmatmul.mubr.bf16.vlgmr.msra.gmra.mrb[0].mxu0 %v3514_v12  ;;  %1931 = vmatmul.mubr.bf16.vlgmr.msra.gmra.mrb[0].mxu1 %v3514_v12 }
  0x95   : > { %1940 = vmatpush1.bf16.msra.mxu0 %v2836_v15  ;;  %1981 = vmatpush1.bf16.msra.mxu1 %v2838_v16  ;;  %v383_v15 = vld [vmem:[%s3422_s7 + $0x498] sm:$0xff] }
  0x96   : > { %1941 = vmatprep.subr.bf16.mxu0 %v2853_v17  ;;  %1982 = vmatprep.subr.bf16.mxu1 %v2855_v18  ;;  %v391_v16 = vld [vmem:[%s3422_s7 + $0x4d8] sm:$0xff]  ;;  %v2964_v17 = vcombine.low %v366_v4, %v374_v5  ;;  %v2966_v18 = vcombine.low %v367_v6, %v375_v7  ;;  %v3077_v4 = vcombine.high %v478_v62, %v486_v63  ;;  %v240_v6 = vld [vmem:[%s3422_s7 + $0x20] sm:$0xff] }
  0x97   : > { %1971 = vmatprep.mubr.bf16.mxu0 %v3467_v57  ;;  %2012 = vmatprep.mubr.bf16.mxu1 %v3467_v57  ;;  %v2983_v20 = vcombine.high %v383_v15, %v391_v16  ;;  %v248_v7 = vld [vmem:[%s3422_s7 + $0x60] sm:$0xff] }
  0x99   : > { %1942 = vmatpush1.bf16.msra.mxu0 %v2852_v23  ;;  %1983 = vmatpush1.bf16.msra.mxu1 %v2854_v24  ;;  %v399_v23 = vld [vmem:[%s3422_s7 + $0x518] sm:$0xff] }
  0x9a   : > { %1943 = vmatprep.subr.bf16.mxu0 %v2869_v25  ;;  %1984 = vmatprep.subr.bf16.mxu1 %v2871_v26  ;;  %v407_v24 = vld [vmem:[%s3422_s7 + $0x558] sm:$0xff]  ;;  %v2980_v25 = vcombine.low %v382_v13, %v390_v14  ;;  %v2982_v26 = vcombine.low %v383_v15, %v391_v16  ;;  %v2841_v13 = vcombine.high %v240_v6, %v248_v7  ;;  %v256_v15 = vld [vmem:[%s3422_s7 + $0xa0] sm:$0xff] }
  0x9b   : > { %v2999_v28 = vcombine.high %v399_v23, %v407_v24  ;;  %v264_v16 = vld [vmem:[%s3422_s7 + $0xe0] sm:$0xff] }
  0x9d   : > { %1944 = vmatpush1.bf16.msra.mxu0 %v2868_v31  ;;  %1985 = vmatpush1.bf16.msra.mxu1 %v2870_v32  ;;  %v415_v31 = vld [vmem:[%s3422_s7 + $0x598] sm:$0xff] }
  0x9e   : > { %1945 = vmatprep.subr.bf16.mxu0 %v2885_v33  ;;  %1986 = vmatprep.subr.bf16.mxu1 %v2887_v34  ;;  %v423_v32 = vld [vmem:[%s3422_s7 + $0x5d8] sm:$0xff]  ;;  %v2996_v33 = vcombine.low %v398_v21, %v406_v22  ;;  %v2998_v34 = vcombine.low %v399_v23, %v407_v24  ;;  %v2857_v21 = vcombine.high %v256_v15, %v264_v16  ;;  %v272_v23 = vld [vmem:[%s3422_s7 + $0x120] sm:$0xff] }
  0x9f   : > { %v3015_v36 = vcombine.high %v415_v31, %v423_v32  ;;  %v280_v24 = vld [vmem:[%s3422_s7 + $0x160] sm:$0xff] }
  0xa1   : > { %1946 = vmatpush1.bf16.msra.mxu0 %v2884_v39  ;;  %1987 = vmatpush1.bf16.msra.mxu1 %v2886_v40  ;;  %v431_v39 = vld [vmem:[%s3422_s7 + $0x618] sm:$0xff] }
  0xa2   : > { %1947 = vmatprep.subr.bf16.mxu0 %v2901_v41  ;;  %1988 = vmatprep.subr.bf16.mxu1 %v2903_v42  ;;  %v439_v40 = vld [vmem:[%s3422_s7 + $0x658] sm:$0xff]  ;;  %v3012_v41 = vcombine.low %v414_v29, %v422_v30  ;;  %v3014_v42 = vcombine.low %v415_v31, %v423_v32  ;;  %v2873_v29 = vcombine.high %v272_v23, %v280_v24  ;;  %v288_v31 = vld [vmem:[%s3422_s7 + $0x1a0] sm:$0xff] }
  0xa3   : > { %v3031_v44 = vcombine.high %v431_v39, %v439_v40  ;;  %v296_v32 = vld [vmem:[%s3422_s7 + $0x1e0] sm:$0xff] }
  0xa5   : > { %1948 = vmatpush1.bf16.msra.mxu0 %v2900_v47  ;;  %1989 = vmatpush1.bf16.msra.mxu1 %v2902_v48  ;;  %v447_v47 = vld [vmem:[%s3422_s7 + $0x698] sm:$0xff] }
  0xa6   : > { %1949 = vmatprep.subr.bf16.mxu0 %v2917_v49  ;;  %1990 = vmatprep.subr.bf16.mxu1 %v2919_v50  ;;  %v455_v48 = vld [vmem:[%s3422_s7 + $0x6d8] sm:$0xff]  ;;  %v3028_v49 = vcombine.low %v430_v37, %v438_v38  ;;  %v3030_v50 = vcombine.low %v431_v39, %v439_v40  ;;  %v2889_v37 = vcombine.high %v288_v31, %v296_v32  ;;  %v304_v39 = vld [vmem:[%s3422_s7 + $0x220] sm:$0xff] }
  0xa7   : > { %v3047_v52 = vcombine.high %v447_v47, %v455_v48  ;;  %v312_v40 = vld [vmem:[%s3422_s7 + $0x260] sm:$0xff] }
  0xa9   : > { %1950 = vmatpush1.bf16.msra.mxu0 %v2916_v55  ;;  %1991 = vmatpush1.bf16.msra.mxu1 %v2918_v56  ;;  %v463_v55 = vld [vmem:[%s3422_s7 + $0x718] sm:$0xff] }
  0xaa   : > { %1951 = vmatprep.subr.bf16.mxu0 %v2933_v58  ;;  %1992 = vmatprep.subr.bf16.mxu1 %v2935_v59  ;;  %v471_v56 = vld [vmem:[%s3422_s7 + $0x758] sm:$0xff]  ;;  %v3044_v58 = vcombine.low %v446_v45, %v454_v46  ;;  %v3046_v59 = vcombine.low %v447_v47, %v455_v48  ;;  %v2905_v45 = vcombine.high %v304_v39, %v312_v40  ;;  %v320_v47 = vld [vmem:[%s3422_s7 + $0x2a0] sm:$0xff] }
  0xab   : > { %v3063_v61 = vcombine.high %v463_v55, %v471_v56  ;;  %v328_v48 = vld [vmem:[%s3422_s7 + $0x2e0] sm:$0xff] }
  0xad   : > { %1952 = vmatpush1.bf16.msra.mxu0 %v2932_v0  ;;  %1993 = vmatpush1.bf16.msra.mxu1 %v2934_v1  ;;  %v479_v0 = vld [vmem:[%s3422_s7 + $0x798] sm:$0xff] }
  0xae   : > { %1953 = vmatprep.subr.bf16.mxu0 %v2949_v2  ;;  %1994 = vmatprep.subr.bf16.mxu1 %v2951_v3  ;;  %v487_v1 = vld [vmem:[%s3422_s7 + $0x7d8] sm:$0xff]  ;;  %v3060_v2 = vcombine.low %v462_v53, %v470_v54  ;;  %v3062_v3 = vcombine.low %v463_v55, %v471_v56  ;;  %v2921_v53 = vcombine.high %v320_v47, %v328_v48  ;;  %v336_v55 = vld [vmem:[%s3422_s7 + $0x320] sm:$0xff] }
  0xaf   : > { %v3079_v5 = vcombine.high %v479_v0, %v487_v1  ;;  %v344_v56 = vld [vmem:[%s3422_s7 + $0x360] sm:$0xff] }
  0xb1   : > { %1954 = vmatpush1.bf16.msra.mxu0 %v2948_v8  ;;  %1995 = vmatpush1.bf16.msra.mxu1 %v2950_v9  ;;  %v241_v8 = vld [vmem:[%s3422_s7 + $0x28] sm:$0xff] }
  0xb2   : > { %1955 = vmatprep.subr.bf16.mxu0 %v2965_v10  ;;  %1996 = vmatprep.subr.bf16.mxu1 %v2967_v11  ;;  %v249_v9 = vld [vmem:[%s3422_s7 + $0x68] sm:$0xff]  ;;  %v3076_v10 = vcombine.low %v478_v62, %v486_v63  ;;  %v3078_v11 = vcombine.low %v479_v0, %v487_v1  ;;  %v2937_v62 = vcombine.high %v336_v55, %v344_v56  ;;  %v352_v0 = vld [vmem:[%s3422_s7 + $0x3a0] sm:$0xff] }
  0xb3   : > { %v2843_v14 = vcombine.high %v241_v8, %v249_v9  ;;  %v360_v1 = vld [vmem:[%s3422_s7 + $0x3e0] sm:$0xff] }
  0xb5   : > { %1956 = vmatpush1.bf16.msra.mxu0 %v2964_v17  ;;  %1997 = vmatpush1.bf16.msra.mxu1 %v2966_v18  ;;  %v257_v17 = vld [vmem:[%s3422_s7 + $0xa8] sm:$0xff] }
  0xb6   : > { %1957 = vmatprep.subr.bf16.mxu0 %v2981_v19  ;;  %1998 = vmatprep.subr.bf16.mxu1 %v2983_v20  ;;  %v265_v18 = vld [vmem:[%s3422_s7 + $0xe8] sm:$0xff]  ;;  %v2840_v19 = vcombine.low %v240_v6, %v248_v7  ;;  %v2842_v20 = vcombine.low %v241_v8, %v249_v9  ;;  %v2953_v6 = vcombine.high %v352_v0, %v360_v1  ;;  %v368_v8 = vld [vmem:[%s3422_s7 + $0x420] sm:$0xff] }
  0xb7   : > { %v2859_v22 = vcombine.high %v257_v17, %v265_v18  ;;  %v376_v9 = vld [vmem:[%s3422_s7 + $0x460] sm:$0xff] }
  0xb9   : > { %1958 = vmatpush1.bf16.msra.mxu0 %v2980_v25  ;;  %1999 = vmatpush1.bf16.msra.mxu1 %v2982_v26  ;;  %v273_v25 = vld [vmem:[%s3422_s7 + $0x128] sm:$0xff] }
  0xba   : > { %1959 = vmatprep.subr.bf16.mxu0 %v2997_v27  ;;  %2000 = vmatprep.subr.bf16.mxu1 %v2999_v28  ;;  %v281_v26 = vld [vmem:[%s3422_s7 + $0x168] sm:$0xff]  ;;  %v2856_v27 = vcombine.low %v256_v15, %v264_v16  ;;  %v2858_v28 = vcombine.low %v257_v17, %v265_v18  ;;  %v2969_v15 = vcombine.high %v368_v8, %v376_v9  ;;  %v384_v17 = vld [vmem:[%s3422_s7 + $0x4a0] sm:$0xff] }
  0xbb   : > { %v2875_v30 = vcombine.high %v273_v25, %v281_v26  ;;  %v392_v18 = vld [vmem:[%s3422_s7 + $0x4e0] sm:$0xff] }
  0xbd   : > { %1960 = vmatpush1.bf16.msra.mxu0 %v2996_v33  ;;  %2001 = vmatpush1.bf16.msra.mxu1 %v2998_v34  ;;  %v289_v33 = vld [vmem:[%s3422_s7 + $0x1a8] sm:$0xff] }
  0xbe   : > { %1961 = vmatprep.subr.bf16.mxu0 %v3013_v35  ;;  %2002 = vmatprep.subr.bf16.mxu1 %v3015_v36  ;;  %v297_v34 = vld [vmem:[%s3422_s7 + $0x1e8] sm:$0xff]  ;;  %v2872_v35 = vcombine.low %v272_v23, %v280_v24  ;;  %v2874_v36 = vcombine.low %v273_v25, %v281_v26  ;;  %v2985_v23 = vcombine.high %v384_v17, %v392_v18  ;;  %v400_v25 = vld [vmem:[%s3422_s7 + $0x520] sm:$0xff] }
  0xbf   : > { %v2891_v38 = vcombine.high %v289_v33, %v297_v34  ;;  %v408_v26 = vld [vmem:[%s3422_s7 + $0x560] sm:$0xff] }
  0xc1   : > { %1962 = vmatpush1.bf16.msra.mxu0 %v3012_v41  ;;  %2003 = vmatpush1.bf16.msra.mxu1 %v3014_v42  ;;  %v305_v41 = vld [vmem:[%s3422_s7 + $0x228] sm:$0xff] }
  0xc2   : > { %1963 = vmatprep.subr.bf16.mxu0 %v3029_v43  ;;  %2004 = vmatprep.subr.bf16.mxu1 %v3031_v44  ;;  %v313_v42 = vld [vmem:[%s3422_s7 + $0x268] sm:$0xff]  ;;  %v2888_v43 = vcombine.low %v288_v31, %v296_v32  ;;  %v2890_v44 = vcombine.low %v289_v33, %v297_v34  ;;  %v3001_v31 = vcombine.high %v400_v25, %v408_v26  ;;  %v416_v33 = vld [vmem:[%s3422_s7 + $0x5a0] sm:$0xff] }
  0xc3   : > { %v2907_v46 = vcombine.high %v305_v41, %v313_v42  ;;  %v424_v34 = vld [vmem:[%s3422_s7 + $0x5e0] sm:$0xff] }
  0xc5   : > { %1964 = vmatpush1.bf16.msra.mxu0 %v3028_v49  ;;  %2005 = vmatpush1.bf16.msra.mxu1 %v3030_v50  ;;  %v321_v49 = vld [vmem:[%s3422_s7 + $0x2a8] sm:$0xff] }
  0xc6   : > { %1965 = vmatprep.subr.bf16.mxu0 %v3045_v51  ;;  %2006 = vmatprep.subr.bf16.mxu1 %v3047_v52  ;;  %v329_v50 = vld [vmem:[%s3422_s7 + $0x2e8] sm:$0xff]  ;;  %v2904_v51 = vcombine.low %v304_v39, %v312_v40  ;;  %v2906_v52 = vcombine.low %v305_v41, %v313_v42  ;;  %v3017_v39 = vcombine.high %v416_v33, %v424_v34  ;;  %v432_v41 = vld [vmem:[%s3422_s7 + $0x620] sm:$0xff] }
  0xc7   : > { %v2923_v54 = vcombine.high %v321_v49, %v329_v50  ;;  %v440_v42 = vld [vmem:[%s3422_s7 + $0x660] sm:$0xff] }
  0xc9   : > { %1966 = vmatpush1.bf16.msra.mxu0 %v3044_v58  ;;  %2007 = vmatpush1.bf16.msra.mxu1 %v3046_v59  ;;  %v337_v58 = vld [vmem:[%s3422_s7 + $0x328] sm:$0xff] }
  0xca   : > { %1967 = vmatprep.subr.bf16.mxu0 %v3061_v60  ;;  %2008 = vmatprep.subr.bf16.mxu1 %v3063_v61  ;;  %v345_v59 = vld [vmem:[%s3422_s7 + $0x368] sm:$0xff]  ;;  %v2920_v60 = vcombine.low %v320_v47, %v328_v48  ;;  %v2922_v61 = vcombine.low %v321_v49, %v329_v50  ;;  %v3033_v47 = vcombine.high %v432_v41, %v440_v42  ;;  %v448_v49 = vld [vmem:[%s3422_s7 + $0x6a0] sm:$0xff] }
  0xcb   : > { %v2939_v63 = vcombine.high %v337_v58, %v345_v59  ;;  %v456_v50 = vld [vmem:[%s3422_s7 + $0x6e0] sm:$0xff] }
  0xcd   : > { %1968 = vmatpush1.bf16.msra.mxu0 %v3060_v2  ;;  %2009 = vmatpush1.bf16.msra.mxu1 %v3062_v3  ;;  %v353_v2 = vld [vmem:[%s3422_s7 + $0x3a8] sm:$0xff] }
  0xce   : > { %1969 = vmatprep.subr.bf16.mxu0 %v3077_v4  ;;  %2010 = vmatprep.subr.bf16.mxu1 %v3079_v5  ;;  %v361_v3 = vld [vmem:[%s3422_s7 + $0x3e8] sm:$0xff]  ;;  %v2936_v4 = vcombine.low %v336_v55, %v344_v56  ;;  %v2938_v5 = vcombine.low %v337_v58, %v345_v59  ;;  %v3049_v55 = vcombine.high %v448_v49, %v456_v50  ;;  %v464_v58 = vld [vmem:[%s3422_s7 + $0x720] sm:$0xff] }
  0xcf   : > { %v2955_v7 = vcombine.high %v353_v2, %v361_v3  ;;  %v472_v59 = vld [vmem:[%s3422_s7 + $0x760] sm:$0xff] }
  0xd1   : > { %1970 = vmatpush1.bf16.msra.mxu0 %v3076_v10  ;;  %2011 = vmatpush1.bf16.msra.mxu1 %v3078_v11  ;;  %v369_v10 = vld [vmem:[%s3422_s7 + $0x428] sm:$0xff] }
  0xd2   : > { %2021 = vmatprep.subr.bf16.mxu0 %v2841_v13  ;;  %2062 = vmatprep.subr.bf16.mxu1 %v2843_v14  ;;  %v377_v11 = vld [vmem:[%s3422_s7 + $0x468] sm:$0xff]  ;;  %v2952_v13 = vcombine.low %v352_v0, %v360_v1  ;;  %v2954_v14 = vcombine.low %v353_v2, %v361_v3  ;;  %v3065_v0 = vcombine.high %v464_v58, %v472_v59  ;;  %v480_v2 = vld [vmem:[%s3422_s7 + $0x7a0] sm:$0xff] }
  0xd3   : > { %v2971_v16 = vcombine.high %v369_v10, %v377_v11  ;;  %v488_v3 = vld [vmem:[%s3422_s7 + $0x7e0] sm:$0xff] }
  0xd4   : > { %1972 = vmatmul.mubr.bf16.vlgmr.msra.gmra.mrb[4].mxu0 %v3514_v12  ;;  %2013 = vmatmul.mubr.bf16.vlgmr.msra.gmra.mrb[4].mxu1 %v3514_v12 }
  0xd5   : > { %2022 = vmatpush1.bf16.msra.mxu0 %v2840_v19  ;;  %2063 = vmatpush1.bf16.msra.mxu1 %v2842_v20  ;;  %v385_v19 = vld [vmem:[%s3422_s7 + $0x4a8] sm:$0xff] }
  0xd6   : > { %2023 = vmatprep.subr.bf16.mxu0 %v2857_v21  ;;  %2064 = vmatprep.subr.bf16.mxu1 %v2859_v22  ;;  %v393_v20 = vld [vmem:[%s3422_s7 + $0x4e8] sm:$0xff]  ;;  %v2968_v21 = vcombine.low %v368_v8, %v376_v9  ;;  %v2970_v22 = vcombine.low %v369_v10, %v377_v11  ;;  %v3081_v8 = vcombine.high %v480_v2, %v488_v3  ;;  %v242_v10 = vld [vmem:[%s3422_s7 + $0x30] sm:$0xff] }
  0xd7   : > { %2053 = vmatprep.mubr.bf16.mxu0 %v3467_v57  ;;  %2094 = vmatprep.mubr.bf16.mxu1 %v3467_v57  ;;  %v2987_v24 = vcombine.high %v385_v19, %v393_v20  ;;  %v250_v11 = vld [vmem:[%s3422_s7 + $0x70] sm:$0xff] }
  0xd9   : > { %2024 = vmatpush1.bf16.msra.mxu0 %v2856_v27  ;;  %2065 = vmatpush1.bf16.msra.mxu1 %v2858_v28  ;;  %v401_v27 = vld [vmem:[%s3422_s7 + $0x528] sm:$0xff] }
  0xda   : > { %2025 = vmatprep.subr.bf16.mxu0 %v2873_v29  ;;  %2066 = vmatprep.subr.bf16.mxu1 %v2875_v30  ;;  %v409_v28 = vld [vmem:[%s3422_s7 + $0x568] sm:$0xff]  ;;  %v2984_v29 = vcombine.low %v384_v17, %v392_v18  ;;  %v2986_v30 = vcombine.low %v385_v19, %v393_v20  ;;  %v2845_v17 = vcombine.high %v242_v10, %v250_v11  ;;  %v258_v19 = vld [vmem:[%s3422_s7 + $0xb0] sm:$0xff] }
  0xdb   : > { %v3003_v32 = vcombine.high %v401_v27, %v409_v28  ;;  %v266_v20 = vld [vmem:[%s3422_s7 + $0xf0] sm:$0xff] }
  0xdd   : > { %2026 = vmatpush1.bf16.msra.mxu0 %v2872_v35  ;;  %2067 = vmatpush1.bf16.msra.mxu1 %v2874_v36  ;;  %v417_v35 = vld [vmem:[%s3422_s7 + $0x5a8] sm:$0xff] }
  0xde   : > { %2027 = vmatprep.subr.bf16.mxu0 %v2889_v37  ;;  %2068 = vmatprep.subr.bf16.mxu1 %v2891_v38  ;;  %v425_v36 = vld [vmem:[%s3422_s7 + $0x5e8] sm:$0xff]  ;;  %v3000_v37 = vcombine.low %v400_v25, %v408_v26  ;;  %v3002_v38 = vcombine.low %v401_v27, %v409_v28  ;;  %v2861_v25 = vcombine.high %v258_v19, %v266_v20  ;;  %v274_v27 = vld [vmem:[%s3422_s7 + $0x130] sm:$0xff] }
  0xdf   : > { %v3019_v40 = vcombine.high %v417_v35, %v425_v36  ;;  %v282_v28 = vld [vmem:[%s3422_s7 + $0x170] sm:$0xff] }
  0xe1   : > { %2028 = vmatpush1.bf16.msra.mxu0 %v2888_v43  ;;  %2069 = vmatpush1.bf16.msra.mxu1 %v2890_v44  ;;  %v433_v43 = vld [vmem:[%s3422_s7 + $0x628] sm:$0xff] }
  0xe2   : > { %2029 = vmatprep.subr.bf16.mxu0 %v2905_v45  ;;  %2070 = vmatprep.subr.bf16.mxu1 %v2907_v46  ;;  %v441_v44 = vld [vmem:[%s3422_s7 + $0x668] sm:$0xff]  ;;  %v3016_v45 = vcombine.low %v416_v33, %v424_v34  ;;  %v3018_v46 = vcombine.low %v417_v35, %v425_v36  ;;  %v2877_v33 = vcombine.high %v274_v27, %v282_v28  ;;  %v290_v35 = vld [vmem:[%s3422_s7 + $0x1b0] sm:$0xff] }
  0xe3   : > { %v3035_v48 = vcombine.high %v433_v43, %v441_v44  ;;  %v298_v36 = vld [vmem:[%s3422_s7 + $0x1f0] sm:$0xff] }
  0xe5   : > { %2030 = vmatpush1.bf16.msra.mxu0 %v2904_v51  ;;  %2071 = vmatpush1.bf16.msra.mxu1 %v2906_v52  ;;  %v449_v51 = vld [vmem:[%s3422_s7 + $0x6a8] sm:$0xff] }
  0xe6   : > { %2031 = vmatprep.subr.bf16.mxu0 %v2921_v53  ;;  %2072 = vmatprep.subr.bf16.mxu1 %v2923_v54  ;;  %v457_v52 = vld [vmem:[%s3422_s7 + $0x6e8] sm:$0xff]  ;;  %v3032_v53 = vcombine.low %v432_v41, %v440_v42  ;;  %v3034_v54 = vcombine.low %v433_v43, %v441_v44  ;;  %v2893_v41 = vcombine.high %v290_v35, %v298_v36  ;;  %v306_v43 = vld [vmem:[%s3422_s7 + $0x230] sm:$0xff] }
  0xe7   : > { %v3051_v56 = vcombine.high %v449_v51, %v457_v52  ;;  %v314_v44 = vld [vmem:[%s3422_s7 + $0x270] sm:$0xff] }
  0xe9   : > { %2032 = vmatpush1.bf16.msra.mxu0 %v2920_v60  ;;  %2073 = vmatpush1.bf16.msra.mxu1 %v2922_v61  ;;  %v465_v60 = vld [vmem:[%s3422_s7 + $0x728] sm:$0xff] }
  0xea   : > { %2033 = vmatprep.subr.bf16.mxu0 %v2937_v62  ;;  %2074 = vmatprep.subr.bf16.mxu1 %v2939_v63  ;;  %v473_v61 = vld [vmem:[%s3422_s7 + $0x768] sm:$0xff]  ;;  %v3048_v62 = vcombine.low %v448_v49, %v456_v50  ;;  %v3050_v63 = vcombine.low %v449_v51, %v457_v52  ;;  %v322_v50 = vld [vmem:[%s3422_s7 + $0x2b0] sm:$0xff]  ;;  %v323_v52 = vld [vmem:[%s3422_s7 + $0x2b8] sm:$0xff] }
  0xeb   : > { %v3067_v1 = vcombine.high %v465_v60, %v473_v61  ;;  %v330_v51 = vld [vmem:[%s3422_s7 + $0x2f0] sm:$0xff] }
  0xed   : > { %2034 = vmatpush1.bf16.msra.mxu0 %v2936_v4  ;;  %2075 = vmatpush1.bf16.msra.mxu1 %v2938_v5  ;;  %v481_v4 = vld [vmem:[%s3422_s7 + $0x7a8] sm:$0xff] }
  0xee   : > { %2035 = vmatprep.subr.bf16.mxu0 %v2953_v6  ;;  %2076 = vmatprep.subr.bf16.mxu1 %v2955_v7  ;;  %v489_v5 = vld [vmem:[%s3422_s7 + $0x7e8] sm:$0xff]  ;;  %v3064_v6 = vcombine.low %v464_v58, %v472_v59  ;;  %v3066_v7 = vcombine.low %v465_v60, %v473_v61  ;;  %v338_v59 = vld [vmem:[%s3422_s7 + $0x330] sm:$0xff]  ;;  %v339_v61 = vld [vmem:[%s3422_s7 + $0x338] sm:$0xff] }
  0xef   : > { %v3083_v9 = vcombine.high %v481_v4, %v489_v5  ;;  %v346_v60 = vld [vmem:[%s3422_s7 + $0x370] sm:$0xff] }
  0xf1   : > { %2036 = vmatpush1.bf16.msra.mxu0 %v2952_v13  ;;  %2077 = vmatpush1.bf16.msra.mxu1 %v2954_v14  ;;  %v243_v13 = vld [vmem:[%s3422_s7 + $0x38] sm:$0xff] }
  0xf2   : > { %2037 = vmatprep.subr.bf16.mxu0 %v2969_v15  ;;  %2078 = vmatprep.subr.bf16.mxu1 %v2971_v16  ;;  %v251_v14 = vld [vmem:[%s3422_s7 + $0x78] sm:$0xff]  ;;  %v3080_v15 = vcombine.low %v480_v2, %v488_v3  ;;  %v3082_v16 = vcombine.low %v481_v4, %v489_v5  ;;  %v354_v3 = vld [vmem:[%s3422_s7 + $0x3b0] sm:$0xff] }
  0xf3   : > { %v2847_v18 = vcombine.high %v243_v13, %v251_v14  ;;  %v362_v4 = vld [vmem:[%s3422_s7 + $0x3f0] sm:$0xff]  ;;  %v355_v5 = vld [vmem:[%s3422_s7 + $0x3b8] sm:$0xff] }
  0xf5   : > { %2038 = vmatpush1.bf16.msra.mxu0 %v2968_v21  ;;  %2079 = vmatpush1.bf16.msra.mxu1 %v2970_v22  ;;  %v259_v21 = vld [vmem:[%s3422_s7 + $0xb8] sm:$0xff] }
  0xf6   : > { %2039 = vmatprep.subr.bf16.mxu0 %v2985_v23  ;;  %2080 = vmatprep.subr.bf16.mxu1 %v2987_v24  ;;  %v267_v22 = vld [vmem:[%s3422_s7 + $0xf8] sm:$0xff]  ;;  %v2844_v23 = vcombine.low %v242_v10, %v250_v11  ;;  %v2846_v24 = vcombine.low %v243_v13, %v251_v14  ;;  %v370_v11 = vld [vmem:[%s3422_s7 + $0x430] sm:$0xff] }
  0xf7   : > { %v2863_v26 = vcombine.high %v259_v21, %v267_v22  ;;  %v378_v13 = vld [vmem:[%s3422_s7 + $0x470] sm:$0xff]  ;;  %v371_v14 = vld [vmem:[%s3422_s7 + $0x438] sm:$0xff] }
  0xf9   : > { %2040 = vmatpush1.bf16.msra.mxu0 %v2984_v29  ;;  %2081 = vmatpush1.bf16.msra.mxu1 %v2986_v30  ;;  %v275_v29 = vld [vmem:[%s3422_s7 + $0x138] sm:$0xff] }
  0xfa   : > { %2041 = vmatprep.subr.bf16.mxu0 %v3001_v31  ;;  %2082 = vmatprep.subr.bf16.mxu1 %v3003_v32  ;;  %v283_v30 = vld [vmem:[%s3422_s7 + $0x178] sm:$0xff]  ;;  %v2860_v31 = vcombine.low %v258_v19, %v266_v20  ;;  %v2862_v32 = vcombine.low %v259_v21, %v267_v22  ;;  %v386_v20 = vld [vmem:[%s3422_s7 + $0x4b0] sm:$0xff] }
  0xfb   : > { %v2879_v34 = vcombine.high %v275_v29, %v283_v30  ;;  %v394_v21 = vld [vmem:[%s3422_s7 + $0x4f0] sm:$0xff]  ;;  %v387_v22 = vld [vmem:[%s3422_s7 + $0x4b8] sm:$0xff] }
  0xfd   : > { %2042 = vmatpush1.bf16.msra.mxu0 %v3000_v37  ;;  %2083 = vmatpush1.bf16.msra.mxu1 %v3002_v38  ;;  %v291_v37 = vld [vmem:[%s3422_s7 + $0x1b8] sm:$0xff] }
  0xfe   : > { %2043 = vmatprep.subr.bf16.mxu0 %v3017_v39  ;;  %2084 = vmatprep.subr.bf16.mxu1 %v3019_v40  ;;  %v299_v38 = vld [vmem:[%s3422_s7 + $0x1f8] sm:$0xff]  ;;  %v2876_v39 = vcombine.low %v274_v27, %v282_v28  ;;  %v2878_v40 = vcombine.low %v275_v29, %v283_v30  ;;  %v402_v28 = vld [vmem:[%s3422_s7 + $0x530] sm:$0xff] }
  0xff   : > { %v2895_v42 = vcombine.high %v291_v37, %v299_v38  ;;  %v410_v29 = vld [vmem:[%s3422_s7 + $0x570] sm:$0xff]  ;;  %v403_v30 = vld [vmem:[%s3422_s7 + $0x538] sm:$0xff] }
 0x101   : > { %2044 = vmatpush1.bf16.msra.mxu0 %v3016_v45  ;;  %2085 = vmatpush1.bf16.msra.mxu1 %v3018_v46  ;;  %v307_v45 = vld [vmem:[%s3422_s7 + $0x238] sm:$0xff] }
 0x102   : > { %2045 = vmatprep.subr.bf16.mxu0 %v3033_v47  ;;  %2086 = vmatprep.subr.bf16.mxu1 %v3035_v48  ;;  %v315_v46 = vld [vmem:[%s3422_s7 + $0x278] sm:$0xff]  ;;  %v2892_v47 = vcombine.low %v290_v35, %v298_v36  ;;  %v2909_v48 = vcombine.high %v306_v43, %v314_v44  ;;  %v418_v36 = vld [vmem:[%s3422_s7 + $0x5b0] sm:$0xff] }
 0x103   : > { %v2911_v49 = vcombine.high %v307_v45, %v315_v46 }
 0x105   : > { %2046 = vmatpush1.bf16.msra.mxu0 %v3032_v53  ;;  %2087 = vmatpush1.bf16.msra.mxu1 %v3034_v54  ;;  %v331_v53 = vld [vmem:[%s3422_s7 + $0x2f8] sm:$0xff]  ;;  %v2908_v54 = vcombine.low %v306_v43, %v314_v44  ;;  %v434_v44 = vld [vmem:[%s3422_s7 + $0x630] sm:$0xff] }
 0x106   : > { %2047 = vmatprep.subr.bf16.mxu0 %v3049_v55  ;;  %2088 = vmatprep.subr.bf16.mxu1 %v3051_v56  ;;  %v2910_v55 = vcombine.low %v307_v45, %v315_v46  ;;  %v2925_v56 = vcombine.high %v322_v50, %v330_v51  ;;  %v2927_v58 = vcombine.high %v323_v52, %v331_v53  ;;  %v442_v45 = vld [vmem:[%s3422_s7 + $0x670] sm:$0xff]  ;;  %v435_v46 = vld [vmem:[%s3422_s7 + $0x638] sm:$0xff] }
 0x109   : > { %2048 = vmatpush1.bf16.msra.mxu0 %v3048_v62  ;;  %2089 = vmatpush1.bf16.msra.mxu1 %v3050_v63  ;;  %v347_v62 = vld [vmem:[%s3422_s7 + $0x378] sm:$0xff]  ;;  %v2924_v63 = vcombine.low %v322_v50, %v330_v51  ;;  %v450_v51 = vld [vmem:[%s3422_s7 + $0x6b0] sm:$0xff] }
 0x10a   : > { %2049 = vmatprep.subr.bf16.mxu0 %v3065_v0  ;;  %2090 = vmatprep.subr.bf16.mxu1 %v3067_v1  ;;  %v2926_v0 = vcombine.low %v323_v52, %v331_v53  ;;  %v2941_v1 = vcombine.high %v338_v59, %v346_v60  ;;  %v2943_v2 = vcombine.high %v339_v61, %v347_v62  ;;  %v458_v52 = vld [vmem:[%s3422_s7 + $0x6f0] sm:$0xff]  ;;  %v451_v53 = vld [vmem:[%s3422_s7 + $0x6b8] sm:$0xff] }
 0x10d   : > { %2050 = vmatpush1.bf16.msra.mxu0 %v3064_v6  ;;  %2091 = vmatpush1.bf16.msra.mxu1 %v3066_v7  ;;  %v363_v6 = vld [vmem:[%s3422_s7 + $0x3f8] sm:$0xff]  ;;  %v2940_v7 = vcombine.low %v338_v59, %v346_v60  ;;  %v466_v60 = vld [vmem:[%s3422_s7 + $0x730] sm:$0xff] }
 0x10e   : > { %2051 = vmatprep.subr.bf16.mxu0 %v3081_v8  ;;  %2092 = vmatprep.subr.bf16.mxu1 %v3083_v9  ;;  %v2942_v8 = vcombine.low %v339_v61, %v347_v62  ;;  %v2957_v9 = vcombine.high %v354_v3, %v362_v4  ;;  %v2959_v10 = vcombine.high %v355_v5, %v363_v6  ;;  %v474_v61 = vld [vmem:[%s3422_s7 + $0x770] sm:$0xff]  ;;  %v467_v62 = vld [vmem:[%s3422_s7 + $0x738] sm:$0xff] }
 0x111   : > { %2052 = vmatpush1.bf16.msra.mxu0 %v3080_v15  ;;  %2093 = vmatpush1.bf16.msra.mxu1 %v3082_v16  ;;  %v379_v15 = vld [vmem:[%s3422_s7 + $0x478] sm:$0xff]  ;;  %v2956_v16 = vcombine.low %v354_v3, %v362_v4  ;;  %v482_v4 = vld [vmem:[%s3422_s7 + $0x7b0] sm:$0xff] }
 0x112   : > { %2103 = vmatprep.subr.bf16.mxu0 %v2845_v17  ;;  %2144 = vmatprep.subr.bf16.mxu1 %v2847_v18  ;;  %v2958_v17 = vcombine.low %v355_v5, %v363_v6  ;;  %v2973_v18 = vcombine.high %v370_v11, %v378_v13  ;;  %v2975_v19 = vcombine.high %v371_v14, %v379_v15  ;;  %v490_v5 = vld [vmem:[%s3422_s7 + $0x7f0] sm:$0xff]  ;;  %v483_v6 = vld [vmem:[%s3422_s7 + $0x7b8] sm:$0xff] }
 0x114   : > { %2054 = vmatmul.mubr.bf16.vlgmr.msra.gmra.mrb[8].mxu0 %v3514_v12  ;;  %2095 = vmatmul.mubr.bf16.vlgmr.msra.gmra.mrb[8].mxu1 %v3514_v12 }
 0x115   : > { %2104 = vmatpush1.bf16.msra.mxu0 %v2844_v23  ;;  %2145 = vmatpush1.bf16.msra.mxu1 %v2846_v24  ;;  %v395_v23 = vld [vmem:[%s3422_s7 + $0x4f8] sm:$0xff]  ;;  %v2972_v24 = vcombine.low %v370_v11, %v378_v13  ;;  %v3084_v13 = vcombine.low %v482_v4, %v490_v5 }
 0x116   : > { %2105 = vmatprep.subr.bf16.mxu0 %v2861_v25  ;;  %2146 = vmatprep.subr.bf16.mxu1 %v2863_v26  ;;  %v2974_v25 = vcombine.low %v371_v14, %v379_v15  ;;  %v2989_v26 = vcombine.high %v386_v20, %v394_v21  ;;  %v2991_v27 = vcombine.high %v387_v22, %v395_v23  ;;  %v497_v15 = vlaneseq }
 0x117   : > { %2135 = vmatprep.mubr.bf16.mxu0 %v3467_v57  ;;  %2176 = vmatprep.mubr.bf16.mxu1 %v3467_v57  ;;  %v2894_v57 = vcombine.low %v291_v37, %v299_v38  ;;  %v426_v37 = vld [vmem:[%s3422_s7 + $0x5f0] sm:$0xff]  ;;  %v419_v38 = vld [vmem:[%s3422_s7 + $0x5b8] sm:$0xff] }
 0x119   : > { %2106 = vmatpush1.bf16.msra.mxu0 %v2860_v31  ;;  %2147 = vmatpush1.bf16.msra.mxu1 %v2862_v32  ;;  %v411_v31 = vld [vmem:[%s3422_s7 + $0x578] sm:$0xff]  ;;  %v2988_v32 = vcombine.low %v386_v20, %v394_v21 }
 0x11a   : > { %2107 = vmatprep.subr.bf16.mxu0 %v2877_v33  ;;  %2148 = vmatprep.subr.bf16.mxu1 %v2879_v34  ;;  %v2990_v33 = vcombine.low %v387_v22, %v395_v23  ;;  %v3005_v34 = vcombine.high %v402_v28, %v410_v29  ;;  %v3007_v35 = vcombine.high %v403_v30, %v411_v31 }
 0x11d   : > { %2108 = vmatpush1.bf16.msra.mxu0 %v2876_v39  ;;  %2149 = vmatpush1.bf16.msra.mxu1 %v2878_v40  ;;  %v427_v39 = vld [vmem:[%s3422_s7 + $0x5f8] sm:$0xff]  ;;  %v3004_v40 = vcombine.low %v402_v28, %v410_v29 }
 0x11e   : > { %2109 = vmatprep.subr.bf16.mxu0 %v2893_v41  ;;  %2150 = vmatprep.subr.bf16.mxu1 %v2895_v42  ;;  %v3006_v41 = vcombine.low %v403_v30, %v411_v31  ;;  %v3021_v42 = vcombine.high %v418_v36, %v426_v37  ;;  %v3023_v43 = vcombine.high %v419_v38, %v427_v39 }
 0x121   : > { %2110 = vmatpush1.bf16.msra.mxu0 %v2892_v47  ;;  %2151 = vmatpush1.bf16.msra.mxu1 %v2894_v57  ;;  %v443_v47 = vld [vmem:[%s3422_s7 + $0x678] sm:$0xff]  ;;  %v3020_v57 = vcombine.low %v418_v36, %v426_v37 }
 0x122   : > { %2111 = vmatprep.subr.bf16.mxu0 %v2909_v48  ;;  %2152 = vmatprep.subr.bf16.mxu1 %v2911_v49  ;;  %v3022_v48 = vcombine.low %v419_v38, %v427_v39  ;;  %v3037_v49 = vcombine.high %v434_v44, %v442_v45  ;;  %v3039_v50 = vcombine.high %v435_v46, %v443_v47 }
 0x125   : > { %2112 = vmatpush1.bf16.msra.mxu0 %v2908_v54  ;;  %2153 = vmatpush1.bf16.msra.mxu1 %v2910_v55  ;;  %v459_v54 = vld [vmem:[%s3422_s7 + $0x6f8] sm:$0xff]  ;;  %v3036_v55 = vcombine.low %v434_v44, %v442_v45 }
 0x126   : > { %2113 = vmatprep.subr.bf16.mxu0 %v2925_v56  ;;  %2154 = vmatprep.subr.bf16.mxu1 %v2927_v58  ;;  %v3038_v56 = vcombine.low %v435_v46, %v443_v47  ;;  %v3053_v58 = vcombine.high %v450_v51, %v458_v52  ;;  %v3055_v59 = vcombine.high %v451_v53, %v459_v54 }
 0x129   : > { %2114 = vmatpush1.bf16.msra.mxu0 %v2924_v63  ;;  %2155 = vmatpush1.bf16.msra.mxu1 %v2926_v0  ;;  %v475_v63 = vld [vmem:[%s3422_s7 + $0x778] sm:$0xff]  ;;  %v3052_v0 = vcombine.low %v450_v51, %v458_v52 }
 0x12a   : > { %2115 = vmatprep.subr.bf16.mxu0 %v2941_v1  ;;  %2156 = vmatprep.subr.bf16.mxu1 %v2943_v2  ;;  %v3054_v1 = vcombine.low %v451_v53, %v459_v54  ;;  %v3069_v2 = vcombine.high %v466_v60, %v474_v61  ;;  %v3071_v3 = vcombine.high %v467_v62, %v475_v63 }
 0x12d   : > { %2116 = vmatpush1.bf16.msra.mxu0 %v2940_v7  ;;  %2157 = vmatpush1.bf16.msra.mxu1 %v2942_v8  ;;  %v491_v7 = vld [vmem:[%s3422_s7 + $0x7f8] sm:$0xff]  ;;  %v3068_v8 = vcombine.low %v466_v60, %v474_v61 }
 0x12e   : > { %2117 = vmatprep.subr.bf16.mxu0 %v2957_v9  ;;  %2158 = vmatprep.subr.bf16.mxu1 %v2959_v10  ;;  %v3070_v9 = vcombine.low %v467_v62, %v475_v63  ;;  %v3085_v10 = vcombine.high %v482_v4, %v490_v5  ;;  %v3087_v11 = vcombine.high %v483_v6, %v491_v7 }
 0x12f   : > { %v3086_v14 = vcombine.low %v483_v6, %v491_v7 }
 0x131   : > { %2118 = vmatpush1.bf16.msra.mxu0 %v2956_v16  ;;  %2159 = vmatpush1.bf16.msra.mxu1 %v2958_v17  ;;  %v3716_v16 = vshrl.u32 %v497_v15, 7 }
 0x132   : > { %2119 = vmatprep.subr.bf16.mxu0 %v2973_v18  ;;  %2160 = vmatprep.subr.bf16.mxu1 %v2975_v19  ;;  %v3722_v18 = vld [vmem:[%s3428_s29] ss:$4 sm:$0xff] }
 0x133   : > { %v3719_v17 = vsub.s32 0, %v3716_v16  ;;  %v3725_v19 = vsub.s32 2, %v3716_v16  ;;  %v3728_v20 = vsub.s32 1, %v3716_v16  ;;  %v3731_v21 = vsub.s32 3, %v3716_v16 }
 0x135   : > { %2120 = vmatpush1.bf16.msra.mxu0 %v2972_v24  ;;  %2161 = vmatpush1.bf16.msra.mxu1 %v2974_v25  ;;  %v508_v22 = vrot.slane %v3722_v18, %v3725_v19  ;;  %v504_v23 = vrot.slane %v3722_v18, %v3728_v20  ;;  %v512_v24 = vrot.slane %v3722_v18, %v3731_v21 }
 0x136   : > { %2121 = vmatprep.subr.bf16.mxu0 %v2989_v26  ;;  %2162 = vmatprep.subr.bf16.mxu1 %v2991_v27 }
 0x139   : > { %2122 = vmatpush1.bf16.msra.mxu0 %v2988_v32  ;;  %2163 = vmatpush1.bf16.msra.mxu1 %v2990_v33 }
 0x13a   : > { %2123 = vmatprep.subr.bf16.mxu0 %v3005_v34  ;;  %2164 = vmatprep.subr.bf16.mxu1 %v3007_v35 }
 0x13d   : > { %2124 = vmatpush1.bf16.msra.mxu0 %v3004_v40  ;;  %2165 = vmatpush1.bf16.msra.mxu1 %v3006_v41 }
 0x13e   : > { %2125 = vmatprep.subr.bf16.mxu0 %v3021_v42  ;;  %2166 = vmatprep.subr.bf16.mxu1 %v3023_v43 }
 0x141   : > { %2126 = vmatpush1.bf16.msra.mxu0 %v3020_v57  ;;  %2167 = vmatpush1.bf16.msra.mxu1 %v3022_v48 }
 0x142   : > { %2127 = vmatprep.subr.bf16.mxu0 %v3037_v49  ;;  %2168 = vmatprep.subr.bf16.mxu1 %v3039_v50 }
 0x145   : > { %2128 = vmatpush1.bf16.msra.mxu0 %v3036_v55  ;;  %2169 = vmatpush1.bf16.msra.mxu1 %v3038_v56 }
 0x146   : > { %2129 = vmatprep.subr.bf16.mxu0 %v3053_v58  ;;  %2170 = vmatprep.subr.bf16.mxu1 %v3055_v59 }
 0x149   : > { %2130 = vmatpush1.bf16.msra.mxu0 %v3052_v0  ;;  %2171 = vmatpush1.bf16.msra.mxu1 %v3054_v1 }
 0x14a   : > { %2131 = vmatprep.subr.bf16.mxu0 %v3069_v2  ;;  %2172 = vmatprep.subr.bf16.mxu1 %v3071_v3 }
 0x14d   : > { %2132 = vmatpush1.bf16.msra.mxu0 %v3068_v8  ;;  %2173 = vmatpush1.bf16.msra.mxu1 %v3070_v9 }
 0x14e   : > { %2133 = vmatprep.subr.bf16.mxu0 %v3085_v10  ;;  %2174 = vmatprep.subr.bf16.mxu1 %v3087_v11 }
 0x151   : > { %2134 = vmatpush1.bf16.msra.mxu0 %v3084_v13  ;;  %2175 = vmatpush1.bf16.msra.mxu1 %v3086_v14 }
 0x154   : > { %2136 = vmatmul.mubr.bf16.vlgmr.msra.gmra.mrb[12].mxu0 %v3514_v12  ;;  %2177 = vmatmul.mubr.bf16.vlgmr.msra.gmra.mrb[12].mxu1 %v3514_v12  ;;  %v500_v12 = vrot.slane %v3722_v18, %v3719_v17 }
 0x167   : > { %v1891_v25 = vpop.f32.mrb[0].mxu0  ;;  %v1932_v27 = vpop.f32.mrb[0].mxu1 }
 0x168   : > { %v1892_v26 = vadd.f32 %v1891_v25, %v500_v12  ;;  %v1893_v28 = vpop.f32.mrb[1].mxu0  ;;  %v1933_v29 = vadd.f32 %v1932_v27, %v508_v22  ;;  %v1934_v31 = vpop.f32.mrb[1].mxu1 }
 0x169   : > { %v1894_v30 = vadd.f32 %v1893_v28, %v504_v23  ;;  %v1895_v32 = vpop.f32.mrb[2].mxu0  ;;  %v1935_v34 = vadd.f32 %v1934_v31, %v512_v24  ;;  %v1936_v35 = vpop.f32.mrb[2].mxu1 }
 0x16a   : > { %v2185_v33 = vrot.slane %v1892_v26, 4  ;;  %v1896_v36 = vpop.f32.mrb[3].mxu0  ;;  %v2197_v37 = vrot.slane %v1933_v29, 4  ;;  %v1937_v39 = vpop.f32.mrb[3].mxu1 }
 0x16b   : > { %v2191_v38 = vrot.slane %v1894_v30, 4  ;;  %v2203_v41 = vrot.slane %v1935_v34, 4 }
 0x16c   : > { %v2186_v40 = vadd.f32 %v2185_v33, %v1892_v26  ;;  %v2198_v42 = vadd.f32 %v2197_v37, %v1933_v29 }
 0x16d   : > { %v2192_v43 = vadd.f32 %v2191_v38, %v1894_v30  ;;  %v2204_v45 = vadd.f32 %v2203_v41, %v1935_v34 }
 0x16e   : > { %v2187_v44 = vrot.slane %v2186_v40, 2  ;;  %v2199_v46 = vrot.slane %v2198_v42, 2 }
 0x16f   : > { %v2193_v47 = vrot.slane %v2192_v43, 2  ;;  %v2205_v48 = vrot.slane %v2204_v45, 2 }
 0x170   : > { %v2188_v57 = vadd.f32 %v2187_v44, %v2186_v40  ;;  %v2200_v49 = vadd.f32 %v2199_v46, %v2198_v42 }
 0x171   : > { %v2194_v50 = vadd.f32 %v2193_v47, %v2192_v43  ;;  %v2206_v52 = vadd.f32 %v2205_v48, %v2204_v45  ;;  %v3744_v47 = vld [vmem:[%s3428_s29 + $0x1] ss:$4 sm:$0xff] }
 0x172   : > { %v2189_v51 = vrot.slane %v2188_v57, 1  ;;  %v2201_v53 = vrot.slane %v2200_v49, 1  ;;  %v2499_v48 = vrot.slane %v3744_v47, %v3719_v17 }
 0x173   : > { %v2195_v54 = vrot.slane %v2194_v50, 1  ;;  %v2207_v56 = vrot.slane %v2206_v52, 1 }
 0x174   : > { %v2190_v55 = vadd.f32 %v2189_v51, %v2188_v57  ;;  %v2202_v58 = vadd.f32 %v2201_v53, %v2200_v49  ;;  %v3747_v57 = vld [vmem:[%s3428_s29 + $0x2] ss:$4 sm:$0xff] }
 0x175   : > { %v2196_v59 = vadd.f32 %v2195_v54, %v2194_v50  ;;  %v2208_v61 = vadd.f32 %v2207_v56, %v2206_v52  ;;  %v2507_v50 = vrot.slane %v3744_v47, %v3725_v19  ;;  %v2601_v53 = vrot.slane %v3747_v57, %v3719_v17 }
 0x176   : > { %v2282_v60 = vmul.f32 0.125, %v2190_v55  ;;  %v2284_v62 = vmul.f32 0.125, %v2202_v58  ;;  %v2503_v54 = vrot.slane %v3744_v47, %v3728_v20  ;;  %v2609_v58 = vrot.slane %v3747_v57, %v3725_v19 }
 0x177   : > { %v2283_v63 = vmul.f32 0.125, %v2196_v59  ;;  %v2285_v1 = vmul.f32 0.125, %v2208_v61  ;;  %v2511_v59 = vrot.slane %v3744_v47, %v3731_v21 }
 0x178   : > { %v2298_v0 = vsub.f32 %v1892_v26, %v2282_v60  ;;  %v2300_v2 = vsub.f32 %v1933_v29, %v2284_v62 }
 0x179   : > { %v2299_v3 = vsub.f32 %v1894_v30, %v2283_v63  ;;  %v2301_v5 = vsub.f32 %v1935_v34, %v2285_v1  ;;  %v2605_v63 = vrot.slane %v3747_v57, %v3728_v20 }
 0x17a   : > { %v2314_v4 = vmul.f32 %v2298_v0, %v2298_v0  ;;  %v2316_v6 = vmul.f32 %v2300_v2, %v2300_v2 }
 0x17b   : > { %v2315_v7 = vmul.f32 %v2299_v3, %v2299_v3  ;;  %v2317_v9 = vmul.f32 %v2301_v5, %v2301_v5 }
 0x17c   : > { %v2330_v8 = vrot.slane %v2314_v4, 4  ;;  %v2342_v10 = vrot.slane %v2316_v6, 4 }
 0x17d   : > { %v2336_v11 = vrot.slane %v2315_v7, 4  ;;  %v2348_v14 = vrot.slane %v2317_v9, 4 }
 0x17e   : > { %v2331_v13 = vadd.f32 %v2330_v8, %v2314_v4  ;;  %v2343_v15 = vadd.f32 %v2342_v10, %v2316_v6  ;;  %v2613_v4 = vrot.slane %v3747_v57, %v3731_v21 }
 0x17f   : > { %v2337_v12 = vadd.f32 %v2336_v11, %v2315_v7  ;;  %v2349_v23 = vadd.f32 %v2348_v14, %v2317_v9  ;;  %v3773_v14 = vsub.s32 4, %v3716_v16 }
 0x180   : > { %v2332_v22 = vrot.slane %v2331_v13, 2  ;;  %v2344_v24 = vrot.slane %v2343_v15, 2 }
 0x181   : > { %v2338_v25 = vrot.slane %v2337_v12, 2  ;;  %v2350_v27 = vrot.slane %v2349_v23, 2 }
 0x182   : > { %v2333_v26 = vadd.f32 %v2332_v22, %v2331_v13  ;;  %v2345_v28 = vadd.f32 %v2344_v24, %v2343_v15  ;;  %v3777_v15 = vsub.s32 6, %v3716_v16  ;;  %v3784_v22 = vsub.s32 7, %v3716_v16 }
 0x183   : > { %v2339_v29 = vadd.f32 %v2338_v25, %v2337_v12  ;;  %v2351_v31 = vadd.f32 %v2350_v27, %v2349_v23  ;;  %v3780_v12 = vsub.s32 5, %v3716_v16  ;;  %v516_v23 = vrot.slane %v3722_v18, %v3773_v14 }
 0x184   : > { %v2334_v30 = vrot.slane %v2333_v26, 1  ;;  %v2346_v32 = vrot.slane %v2345_v28, 1  ;;  %v524_v24 = vrot.slane %v3722_v18, %v3777_v15 }
 0x185   : > { %v2340_v33 = vrot.slane %v2339_v29, 1  ;;  %v2352_v35 = vrot.slane %v2351_v31, 1  ;;  %v520_v25 = vrot.slane %v3722_v18, %v3780_v12 }
 0x186   : > { %v2335_v34 = vadd.f32 %v2334_v30, %v2333_v26  ;;  %v2347_v36 = vadd.f32 %v2346_v32, %v2345_v28  ;;  %v528_v26 = vrot.slane %v3722_v18, %v3784_v22 }
 0x187   : > { %v2341_v37 = vadd.f32 %v2340_v33, %v2339_v29  ;;  %v2353_v39 = vadd.f32 %v2352_v35, %v2351_v31 }
 0x188   : > { %v2426_v38 = vmul.f32 0.125, %v2335_v34  ;;  %v2428_v40 = vmul.f32 0.125, %v2347_v36 }
 0x189   : > { %v2427_v41 = vmul.f32 0.125, %v2341_v37  ;;  %v2429_v43 = vmul.f32 0.125, %v2353_v39 }
 0x18a   : > { %v2442_v42 = vadd.f32 1e-05, %v2426_v38  ;;  %v2444_v44 = vadd.f32 1e-05, %v2428_v40 }
 0x18b   : > { %v2443_v45 = vadd.f32 1e-05, %v2427_v41  ;;  %v2445_v46 = vadd.f32 1e-05, %v2429_v43 }
 0x18c   : > { %3143 = vrsqrt.f32 %v2442_v42 }
 0x18d   : > { %3145 = vrsqrt.f32 %v2444_v44 }
 0x18e   : > { %3147 = vrsqrt.f32 %v2443_v45 }
 0x18f   : > { %3149 = vrsqrt.f32 %v2445_v46 }
 0x196   : > { %v3144_v49 = vpop.eup %3143 }
 0x197   : > { %v3146_v51 = vpop.eup %3145  ;;  %v2474_v52 = vmul.f32 %v3144_v49, %v2298_v0 }
 0x198   : > { %v3148_v55 = vpop.eup %3147  ;;  %v2476_v56 = vmul.f32 %v3146_v51, %v2300_v2 }
 0x199   : > { %v3150_v60 = vpop.eup %3149  ;;  %v2576_v61 = vmul.f32 %v2499_v48, %v2474_v52  ;;  %v2475_v62 = vmul.f32 %v3148_v55, %v2299_v3 }
 0x19a   : > { %v2578_v0 = vmul.f32 %v2507_v50, %v2476_v56  ;;  %v2477_v1 = vmul.f32 %v3150_v60, %v2301_v5 }
 0x19b   : > { %v2678_v6 = vadd.f32 %v2601_v53, %v2576_v61  ;;  %v2577_v2 = vmul.f32 %v2503_v54, %v2475_v62 }
 0x19c   : > { %v2680_v3 = vadd.f32 %v2609_v58, %v2578_v0  ;;  %v2579_v7 = vmul.f32 %v2511_v59, %v2477_v1 }
 0x19d   : > { %v2694_v8 = vmax.f32 %v2678_v6, 0.0  ;;  %v2679_v9 = vadd.f32 %v2605_v63, %v2577_v2 }
 0x19e   : > { %v2696_v10 = vmax.f32 %v2680_v3, 0.0  ;;  %v2681_v5 = vadd.f32 %v2613_v4, %v2579_v7 }
 0x19f   : > { %2710 = vst [vmem:[%s3768_s11] sm:$0xff] %v2694_v8  ;;  %v2695_v11 = vmax.f32 %v2679_v9, 0.0 }
 0x1a0   : > { %2712 = vst [vmem:[%s3768_s11 + $0x10] sm:$0xff] %v2696_v10  ;;  %v2697_v13 = vmax.f32 %v2681_v5, 0.0 }
 0x1a1   : > { %2711 = vst [vmem:[%s3768_s11 + $0x8] sm:$0xff] %v2695_v11 }
 0x1a2   : > { %2713 = vst [vmem:[%s3768_s11 + $0x18] sm:$0xff] %v2697_v13 }
 0x1a7   : > { %v1973_v27 = vpop.f32.mrb[4].mxu0  ;;  %v2014_v29 = vpop.f32.mrb[4].mxu1 }
 0x1a8   : > { %v1974_v28 = vadd.f32 %v1973_v27, %v516_v23  ;;  %v1975_v30 = vpop.f32.mrb[5].mxu0  ;;  %v2015_v31 = vadd.f32 %v2014_v29, %v524_v24  ;;  %v2016_v16 = vpop.f32.mrb[5].mxu1 }
 0x1a9   : > { %v1976_v32 = vadd.f32 %v1975_v30, %v520_v25  ;;  %v1977_v33 = vpop.f32.mrb[6].mxu0  ;;  %v2017_v35 = vadd.f32 %v2016_v16, %v528_v26  ;;  %v2018_v36 = vpop.f32.mrb[6].mxu1 }
 0x1aa   : > { %v2209_v34 = vrot.slane %v1974_v28, 4  ;;  %v1978_v37 = vpop.f32.mrb[7].mxu0  ;;  %v2221_v38 = vrot.slane %v2015_v31, 4  ;;  %v2019_v40 = vpop.f32.mrb[7].mxu1 }
 0x1ab   : > { %v2215_v39 = vrot.slane %v1976_v32, 4  ;;  %v2227_v42 = vrot.slane %v2017_v35, 4 }
 0x1ac   : > { %v2210_v41 = vadd.f32 %v2209_v34, %v1974_v28  ;;  %v2222_v43 = vadd.f32 %v2221_v38, %v2015_v31 }
 0x1ad   : > { %v2216_v44 = vadd.f32 %v2215_v39, %v1976_v32  ;;  %v2228_v45 = vadd.f32 %v2227_v42, %v2017_v35 }
 0x1ae   : > { %v2211_v18 = vrot.slane %v2210_v41, 2  ;;  %v2223_v46 = vrot.slane %v2222_v43, 2 }
 0x1af   : > { %v2217_v48 = vrot.slane %v2216_v44, 2  ;;  %v2229_v50 = vrot.slane %v2228_v45, 2 }
 0x1b0   : > { %v2212_v49 = vadd.f32 %v2211_v18, %v2210_v41  ;;  %v2224_v51 = vadd.f32 %v2223_v46, %v2222_v43 }
 0x1b1   : > { %v2218_v52 = vadd.f32 %v2217_v48, %v2216_v44  ;;  %v2230_v54 = vadd.f32 %v2229_v50, %v2228_v45 }
 0x1b2   : > { %v2213_v53 = vrot.slane %v2212_v49, 1  ;;  %v2225_v55 = vrot.slane %v2224_v51, 1 }
 0x1b3   : > { %v2219_v56 = vrot.slane %v2218_v52, 1  ;;  %v2231_v59 = vrot.slane %v2230_v54, 1 }
 0x1b4   : > { %v2214_v58 = vadd.f32 %v2213_v53, %v2212_v49  ;;  %v2226_v60 = vadd.f32 %v2225_v55, %v2224_v51 }
 0x1b5   : > { %v2220_v61 = vadd.f32 %v2219_v56, %v2218_v52  ;;  %v2232_v63 = vadd.f32 %v2231_v59, %v2230_v54  ;;  %v2515_v52 = vrot.slane %v3744_v47, %v3773_v14  ;;  %v2523_v54 = vrot.slane %v3744_v47, %v3777_v15 }
 0x1b6   : > { %v2286_v62 = vmul.f32 0.125, %v2214_v58  ;;  %v2288_v0 = vmul.f32 0.125, %v2226_v60  ;;  %v2617_v58 = vrot.slane %v3747_v57, %v3773_v14  ;;  %v2519_v59 = vrot.slane %v3744_v47, %v3780_v12 }
 0x1b7   : > { %v2287_v1 = vmul.f32 0.125, %v2220_v61  ;;  %v2289_v6 = vmul.f32 0.125, %v2232_v63  ;;  %v2527_v63 = vrot.slane %v3744_v47, %v3784_v22 }
 0x1b8   : > { %v2302_v4 = vsub.f32 %v1974_v28, %v2286_v62  ;;  %v2304_v2 = vsub.f32 %v2015_v31, %v2288_v0  ;;  %v2625_v62 = vrot.slane %v3747_v57, %v3777_v15 }
 0x1b9   : > { %v2303_v3 = vsub.f32 %v1976_v32, %v2287_v1  ;;  %v2305_v8 = vsub.f32 %v2017_v35, %v2289_v6 }
 0x1ba   : > { %v2318_v7 = vmul.f32 %v2302_v4, %v2302_v4  ;;  %v2320_v9 = vmul.f32 %v2304_v2, %v2304_v2 }
 0x1bb   : > { %v2319_v10 = vmul.f32 %v2303_v3, %v2303_v3  ;;  %v2321_v11 = vmul.f32 %v2305_v8, %v2305_v8 }
 0x1bc   : > { %v2354_v5 = vrot.slane %v2318_v7, 4  ;;  %v2366_v13 = vrot.slane %v2320_v9, 4 }
 0x1bd   : > { %v2360_v23 = vrot.slane %v2319_v10, 4  ;;  %v2372_v25 = vrot.slane %v2321_v11, 4 }
 0x1be   : > { %v2355_v24 = vadd.f32 %v2354_v5, %v2318_v7  ;;  %v2367_v26 = vadd.f32 %v2366_v13, %v2320_v9 }
 0x1bf   : > { %v2361_v27 = vadd.f32 %v2360_v23, %v2319_v10  ;;  %v2373_v30 = vadd.f32 %v2372_v25, %v2321_v11 }
 0x1c0   : > { %v2356_v29 = vrot.slane %v2355_v24, 2  ;;  %v2368_v16 = vrot.slane %v2367_v26, 2 }
 0x1c1   : > { %v2362_v33 = vrot.slane %v2361_v27, 2  ;;  %v2374_v34 = vrot.slane %v2373_v30, 2 }
 0x1c2   : > { %v2357_v28 = vadd.f32 %v2356_v29, %v2355_v24  ;;  %v2369_v31 = vadd.f32 %v2368_v16, %v2367_v26 }
 0x1c3   : > { %v2363_v32 = vadd.f32 %v2362_v33, %v2361_v27  ;;  %v2375_v35 = vadd.f32 %v2374_v34, %v2373_v30  ;;  %v3814_v27 = vld [vmem:[%s3428_s29 + $0x20] ss:$4 sm:$0xff] }
 0x1c4   : > { %v2358_v36 = vrot.slane %v2357_v28, 1  ;;  %v2370_v37 = vrot.slane %v2369_v31, 1  ;;  %v536_v29 = vrot.slane %v3814_v27, %v3728_v20  ;;  %v544_v30 = vrot.slane %v3814_v27, %v3731_v21 }
 0x1c5   : > { %v2364_v38 = vrot.slane %v2363_v32, 1  ;;  %v2376_v40 = vrot.slane %v2375_v35, 1 }
 0x1c6   : > { %v2359_v39 = vadd.f32 %v2358_v36, %v2357_v28  ;;  %v2371_v41 = vadd.f32 %v2370_v37, %v2369_v31 }
 0x1c7   : > { %v2365_v42 = vadd.f32 %v2364_v38, %v2363_v32  ;;  %v2377_v44 = vadd.f32 %v2376_v40, %v2375_v35 }
 0x1c8   : > { %v2430_v43 = vmul.f32 0.125, %v2359_v39  ;;  %v2432_v18 = vmul.f32 0.125, %v2371_v41 }
 0x1c9   : > { %v2431_v45 = vmul.f32 0.125, %v2365_v42  ;;  %v2433_v48 = vmul.f32 0.125, %v2377_v44 }
 0x1ca   : > { %v2446_v46 = vadd.f32 1e-05, %v2430_v43  ;;  %v2448_v49 = vadd.f32 1e-05, %v2432_v18 }
 0x1cb   : > { %v2447_v50 = vadd.f32 1e-05, %v2431_v45  ;;  %v2449_v51 = vadd.f32 1e-05, %v2433_v48 }
 0x1cc   : > { %3151 = vrsqrt.f32 %v2446_v46 }
 0x1cd   : > { %3153 = vrsqrt.f32 %v2448_v49 }
 0x1ce   : > { %3155 = vrsqrt.f32 %v2447_v50 }
 0x1cf   : > { %3157 = vrsqrt.f32 %v2449_v51 }
 0x1d6   : > { %v3152_v53 = vpop.eup %3151 }
 0x1d7   : > { %v3154_v55 = vpop.eup %3153  ;;  %v2478_v56 = vmul.f32 %v3152_v53, %v2302_v4  ;;  %v2621_v4 = vrot.slane %v3747_v57, %v3780_v12 }
 0x1d8   : > { %v3156_v60 = vpop.eup %3155  ;;  %v2480_v61 = vmul.f32 %v3154_v55, %v2304_v2  ;;  %v2629_v2 = vrot.slane %v3747_v57, %v3784_v22  ;;  %v540_v57 = vrot.slane %v3814_v27, %v3725_v19 }
 0x1d9   : > { %v3158_v0 = vpop.eup %3157  ;;  %v2580_v1 = vmul.f32 %v2515_v52, %v2478_v56  ;;  %v2479_v6 = vmul.f32 %v3156_v60, %v2303_v3 }
 0x1da   : > { %v2582_v7 = vmul.f32 %v2523_v54, %v2480_v61  ;;  %v2481_v9 = vmul.f32 %v3158_v0, %v2305_v8  ;;  %v532_v8 = vrot.slane %v3814_v27, %v3719_v17 }
 0x1db   : > { %v2682_v10 = vadd.f32 %v2617_v58, %v2580_v1  ;;  %v2581_v5 = vmul.f32 %v2519_v59, %v2479_v6 }
 0x1dc   : > { %v2684_v11 = vadd.f32 %v2625_v62, %v2582_v7  ;;  %v2583_v47 = vmul.f32 %v2527_v63, %v2481_v9 }
 0x1dd   : > { %v2698_v13 = vmax.f32 %v2682_v10, 0.0  ;;  %v2683_v23 = vadd.f32 %v2621_v4, %v2581_v5 }
 0x1de   : > { %v2700_v24 = vmax.f32 %v2684_v11, 0.0  ;;  %v2685_v25 = vadd.f32 %v2629_v2, %v2583_v47 }
 0x1df   : > { %2714 = vst [vmem:[%s3768_s11 + $0x20] sm:$0xff] %v2698_v13  ;;  %v2699_v3 = vmax.f32 %v2683_v23, 0.0 }
 0x1e0   : > { %2716 = vst [vmem:[%s3768_s11 + $0x30] sm:$0xff] %v2700_v24  ;;  %v2701_v26 = vmax.f32 %v2685_v25, 0.0 }
 0x1e1   : > { %2715 = vst [vmem:[%s3768_s11 + $0x28] sm:$0xff] %v2699_v3 }
 0x1e2   : > { %2717 = vst [vmem:[%s3768_s11 + $0x38] sm:$0xff] %v2701_v26 }
 0x1e7   : > { %v2055_v16 = vpop.f32.mrb[8].mxu0  ;;  %v2096_v28 = vpop.f32.mrb[8].mxu1 }
 0x1e8   : > { %v2056_v33 = vadd.f32 %v2055_v16, %v532_v8  ;;  %v2057_v34 = vpop.f32.mrb[9].mxu0  ;;  %v2097_v31 = vadd.f32 %v2096_v28, %v540_v57  ;;  %v2098_v36 = vpop.f32.mrb[9].mxu1 }
 0x1e9   : > { %v2058_v32 = vadd.f32 %v2057_v34, %v536_v29  ;;  %v2059_v35 = vpop.f32.mrb[10].mxu0  ;;  %v2099_v38 = vadd.f32 %v2098_v36, %v544_v30  ;;  %v2100_v39 = vpop.f32.mrb[10].mxu1 }
 0x1ea   : > { %v2233_v37 = vrot.slane %v2056_v33, 4  ;;  %v2060_v40 = vpop.f32.mrb[11].mxu0  ;;  %v2245_v41 = vrot.slane %v2097_v31, 4  ;;  %v2101_v43 = vpop.f32.mrb[11].mxu1 }
 0x1eb   : > { %v2239_v42 = vrot.slane %v2058_v32, 4  ;;  %v2251_v18 = vrot.slane %v2099_v38, 4 }
 0x1ec   : > { %v2234_v44 = vadd.f32 %v2233_v37, %v2056_v33  ;;  %v2246_v45 = vadd.f32 %v2245_v41, %v2097_v31 }
 0x1ed   : > { %v2240_v46 = vadd.f32 %v2239_v42, %v2058_v32  ;;  %v2252_v49 = vadd.f32 %v2251_v18, %v2099_v38 }
 0x1ee   : > { %v2235_v48 = vrot.slane %v2234_v44, 2  ;;  %v2247_v50 = vrot.slane %v2246_v45, 2 }
 0x1ef   : > { %v2241_v51 = vrot.slane %v2240_v46, 2  ;;  %v2253_v53 = vrot.slane %v2252_v49, 2 }
 0x1f0   : > { %v2236_v52 = vadd.f32 %v2235_v48, %v2234_v44  ;;  %v2248_v54 = vadd.f32 %v2247_v50, %v2246_v45 }
 0x1f1   : > { %v2242_v55 = vadd.f32 %v2241_v51, %v2240_v46  ;;  %v2254_v58 = vadd.f32 %v2253_v53, %v2252_v49 }
 0x1f2   : > { %v2237_v56 = vrot.slane %v2236_v52, 1  ;;  %v2249_v59 = vrot.slane %v2248_v54, 1 }
 0x1f3   : > { %v2243_v60 = vrot.slane %v2242_v55, 1  ;;  %v2255_v62 = vrot.slane %v2254_v58, 1 }
 0x1f4   : > { %v2238_v61 = vadd.f32 %v2237_v56, %v2236_v52  ;;  %v2250_v63 = vadd.f32 %v2249_v59, %v2248_v54  ;;  %v3826_v54 = vld [vmem:[%s3428_s29 + $0x21] ss:$4 sm:$0xff] }
 0x1f5   : > { %v2244_v0 = vadd.f32 %v2243_v60, %v2242_v55  ;;  %v2256_v6 = vadd.f32 %v2255_v62, %v2254_v58  ;;  %v3829_v55 = vld [vmem:[%s3428_s29 + $0x22] ss:$4 sm:$0xff]  ;;  %v2531_v56 = vrot.slane %v3826_v54, %v3719_v17  ;;  %v2539_v59 = vrot.slane %v3826_v54, %v3725_v19 }
 0x1f6   : > { %v2290_v1 = vmul.f32 0.125, %v2238_v61  ;;  %v2292_v4 = vmul.f32 0.125, %v2250_v63  ;;  %v2633_v62 = vrot.slane %v3829_v55, %v3719_v17  ;;  %v2535_v63 = vrot.slane %v3826_v54, %v3728_v20 }
 0x1f7   : > { %v2291_v7 = vmul.f32 0.125, %v2244_v0  ;;  %v2293_v2 = vmul.f32 0.125, %v2256_v6  ;;  %v2641_v6 = vrot.slane %v3829_v55, %v3725_v19 }
 0x1f8   : > { %v2306_v9 = vsub.f32 %v2056_v33, %v2290_v1  ;;  %v2308_v10 = vsub.f32 %v2097_v31, %v2292_v4  ;;  %v2543_v4 = vrot.slane %v3826_v54, %v3731_v21 }
 0x1f9   : > { %v2307_v5 = vsub.f32 %v2058_v32, %v2291_v7  ;;  %v2309_v47 = vsub.f32 %v2099_v38, %v2293_v2 }
 0x1fa   : > { %v2322_v11 = vmul.f32 %v2306_v9, %v2306_v9  ;;  %v2324_v13 = vmul.f32 %v2308_v10, %v2308_v10 }
 0x1fb   : > { %v2323_v23 = vmul.f32 %v2307_v5, %v2307_v5  ;;  %v2325_v25 = vmul.f32 %v2309_v47, %v2309_v47 }
 0x1fc   : > { %v2378_v24 = vrot.slane %v2322_v11, 4  ;;  %v2390_v3 = vrot.slane %v2324_v13, 4 }
 0x1fd   : > { %v2384_v26 = vrot.slane %v2323_v23, 4  ;;  %v2396_v57 = vrot.slane %v2325_v25, 4 }
 0x1fe   : > { %v2379_v8 = vadd.f32 %v2378_v24, %v2322_v11  ;;  %v2391_v29 = vadd.f32 %v2390_v3, %v2324_v13 }
 0x1ff   : > { %v2385_v30 = vadd.f32 %v2384_v26, %v2323_v23  ;;  %v2397_v28 = vadd.f32 %v2396_v57, %v2325_v25 }
 0x200   : > { %v2380_v16 = vrot.slane %v2379_v8, 2  ;;  %v2392_v34 = vrot.slane %v2391_v29, 2 }
 0x201   : > { %v2386_v36 = vrot.slane %v2385_v30, 2  ;;  %v2398_v35 = vrot.slane %v2397_v28, 2 }
 0x202   : > { %v2381_v33 = vadd.f32 %v2380_v16, %v2379_v8  ;;  %v2393_v31 = vadd.f32 %v2392_v34, %v2391_v29 }
 0x203   : > { %v2387_v32 = vadd.f32 %v2386_v36, %v2385_v30  ;;  %v2399_v38 = vadd.f32 %v2398_v35, %v2397_v28  ;;  %v560_v30 = vrot.slane %v3814_v27, %v3784_v22 }
 0x204   : > { %v2382_v37 = vrot.slane %v2381_v33, 1  ;;  %v2394_v39 = vrot.slane %v2393_v31, 1 }
 0x205   : > { %v2388_v40 = vrot.slane %v2387_v32, 1  ;;  %v2400_v42 = vrot.slane %v2399_v38, 1 }
 0x206   : > { %v2383_v41 = vadd.f32 %v2382_v37, %v2381_v33  ;;  %v2395_v43 = vadd.f32 %v2394_v39, %v2393_v31 }
 0x207   : > { %v2389_v44 = vadd.f32 %v2388_v40, %v2387_v32  ;;  %v2401_v45 = vadd.f32 %v2400_v42, %v2399_v38 }
 0x208   : > { %v2434_v18 = vmul.f32 0.125, %v2383_v41  ;;  %v2436_v46 = vmul.f32 0.125, %v2395_v43 }
 0x209   : > { %v2435_v48 = vmul.f32 0.125, %v2389_v44  ;;  %v2437_v50 = vmul.f32 0.125, %v2401_v45 }
 0x20a   : > { %v2450_v49 = vadd.f32 1e-05, %v2434_v18  ;;  %v2452_v51 = vadd.f32 1e-05, %v2436_v46 }
 0x20b   : > { %v2451_v52 = vadd.f32 1e-05, %v2435_v48  ;;  %v2453_v53 = vadd.f32 1e-05, %v2437_v50 }
 0x20c   : > { %3159 = vrsqrt.f32 %v2450_v49 }
 0x20d   : > { %3161 = vrsqrt.f32 %v2452_v51 }
 0x20e   : > { %3163 = vrsqrt.f32 %v2451_v52 }
 0x20f   : > { %3165 = vrsqrt.f32 %v2453_v53 }
 0x216   : > { %v3160_v58 = vpop.eup %3159 }
 0x217   : > { %v3162_v60 = vpop.eup %3161  ;;  %v2482_v61 = vmul.f32 %v3160_v58, %v2306_v9  ;;  %v2637_v9 = vrot.slane %v3829_v55, %v3728_v20  ;;  %v548_v20 = vrot.slane %v3814_v27, %v3773_v14 }
 0x218   : > { %v3164_v0 = vpop.eup %3163  ;;  %v2484_v1 = vmul.f32 %v3162_v60, %v2308_v10  ;;  %v2645_v10 = vrot.slane %v3829_v55, %v3731_v21  ;;  %v556_v21 = vrot.slane %v3814_v27, %v3777_v15 }
 0x219   : > { %v3166_v7 = vpop.eup %3165  ;;  %v2584_v2 = vmul.f32 %v2531_v56, %v2482_v61  ;;  %v2483_v11 = vmul.f32 %v3164_v0, %v2307_v5 }
 0x21a   : > { %v2586_v17 = vmul.f32 %v2539_v59, %v2484_v1  ;;  %v2485_v13 = vmul.f32 %v3166_v7, %v2309_v47  ;;  %v552_v47 = vrot.slane %v3814_v27, %v3780_v12 }
 0x21b   : > { %v2686_v23 = vadd.f32 %v2633_v62, %v2584_v2  ;;  %v2585_v19 = vmul.f32 %v2535_v63, %v2483_v11 }
 0x21c   : > { %v2688_v24 = vadd.f32 %v2641_v6, %v2586_v17  ;;  %v2587_v25 = vmul.f32 %v2543_v4, %v2485_v13 }
 0x21d   : > { %v2702_v3 = vmax.f32 %v2686_v23, 0.0  ;;  %v2687_v26 = vadd.f32 %v2637_v9, %v2585_v19 }
 0x21e   : > { %v2704_v8 = vmax.f32 %v2688_v24, 0.0  ;;  %v2689_v57 = vadd.f32 %v2645_v10, %v2587_v25 }
 0x21f   : > { %2718 = vst [vmem:[%s3768_s11 + $0x40] sm:$0xff] %v2702_v3  ;;  %v2703_v5 = vmax.f32 %v2687_v26, 0.0 }
 0x220   : > { %2720 = vst [vmem:[%s3768_s11 + $0x50] sm:$0xff] %v2704_v8  ;;  %v2705_v29 = vmax.f32 %v2689_v57, 0.0 }
 0x221   : > { %2719 = vst [vmem:[%s3768_s11 + $0x48] sm:$0xff] %v2703_v5 }
 0x222   : > { %2721 = vst [vmem:[%s3768_s11 + $0x58] sm:$0xff] %v2705_v29 }
 0x227   : > { %v2137_v16 = vpop.f32.mrb[12].mxu0  ;;  %v2178_v34 = vpop.f32.mrb[12].mxu1 }
 0x228   : > { %v2138_v28 = vadd.f32 %v2137_v16, %v548_v20  ;;  %v2139_v36 = vpop.f32.mrb[13].mxu0  ;;  %v2179_v33 = vadd.f32 %v2178_v34, %v556_v21  ;;  %v2180_v31 = vpop.f32.mrb[13].mxu1 }
 0x229   : > { %v2140_v35 = vadd.f32 %v2139_v36, %v552_v47  ;;  %v2141_v32 = vpop.f32.mrb[14].mxu0  ;;  %v2181_v38 = vadd.f32 %v2180_v31, %v560_v30  ;;  %v2182_v39 = vpop.f32.mrb[14].mxu1 }
 0x22a   : > { %v2257_v37 = vrot.slane %v2138_v28, 4  ;;  %v2142_v40 = vpop.f32.mrb[15].mxu0  ;;  %v2269_v41 = vrot.slane %v2179_v33, 4  ;;  %v2183_v43 = vpop.f32.mrb[15].mxu1 }
 0x22b   : > { %v2263_v42 = vrot.slane %v2140_v35, 4  ;;  %v2275_v18 = vrot.slane %v2181_v38, 4 }
 0x22c   : > { %v2258_v44 = vadd.f32 %v2257_v37, %v2138_v28  ;;  %v2270_v45 = vadd.f32 %v2269_v41, %v2179_v33 }
 0x22d   : > { %v2264_v46 = vadd.f32 %v2263_v42, %v2140_v35  ;;  %v2276_v48 = vadd.f32 %v2275_v18, %v2181_v38 }
 0x22e   : > { %v2259_v27 = vrot.slane %v2258_v44, 2  ;;  %v2271_v49 = vrot.slane %v2270_v45, 2 }
 0x22f   : > { %v2265_v50 = vrot.slane %v2264_v46, 2  ;;  %v2277_v52 = vrot.slane %v2276_v48, 2 }
 0x230   : > { %v2260_v51 = vadd.f32 %v2259_v27, %v2258_v44  ;;  %v2272_v53 = vadd.f32 %v2271_v49, %v2270_v45 }
 0x231   : > { %v2266_v56 = vadd.f32 %v2265_v50, %v2264_v46  ;;  %v2278_v59 = vadd.f32 %v2277_v52, %v2276_v48  ;;  %v2547_v50 = vrot.slane %v3826_v54, %v3773_v14  ;;  %v2555_v52 = vrot.slane %v3826_v54, %v3777_v15 }
 0x232   : > { %v2261_v58 = vrot.slane %v2260_v51, 1  ;;  %v2273_v60 = vrot.slane %v2272_v53, 1 }
 0x233   : > { %v2267_v61 = vrot.slane %v2266_v56, 1  ;;  %v2279_v63 = vrot.slane %v2278_v59, 1 }
 0x234   : > { %v2262_v62 = vadd.f32 %v2261_v58, %v2260_v51  ;;  %v2274_v0 = vadd.f32 %v2273_v60, %v2272_v53  ;;  %v2649_v58 = vrot.slane %v3829_v55, %v3773_v14 }
 0x235   : > { %v2268_v1 = vadd.f32 %v2267_v61, %v2266_v56  ;;  %v2280_v4 = vadd.f32 %v2279_v63, %v2278_v59  ;;  %v2551_v59 = vrot.slane %v3826_v54, %v3780_v12  ;;  %v2559_v63 = vrot.slane %v3826_v54, %v3784_v22 }
 0x236   : > { %v2294_v6 = vmul.f32 0.125, %v2262_v62  ;;  %v2296_v7 = vmul.f32 0.125, %v2274_v0  ;;  %v2657_v62 = vrot.slane %v3829_v55, %v3777_v15 }
 0x237   : > { %v2295_v2 = vmul.f32 0.125, %v2268_v1  ;;  %v2297_v9 = vmul.f32 0.125, %v2280_v4  ;;  %v2653_v4 = vrot.slane %v3829_v55, %v3780_v12 }
 0x238   : > { %v2310_v11 = vsub.f32 %v2138_v28, %v2294_v6  ;;  %v2312_v17 = vsub.f32 %v2179_v33, %v2296_v7 }
 0x239   : > { %v2311_v13 = vsub.f32 %v2140_v35, %v2295_v2  ;;  %v2313_v23 = vsub.f32 %v2181_v38, %v2297_v9  ;;  %v2661_v2 = vrot.slane %v3829_v55, %v3784_v22 }
 0x23a   : > { %v2326_v10 = vmul.f32 %v2310_v11, %v2310_v11  ;;  %v2328_v19 = vmul.f32 %v2312_v17, %v2312_v17 }
 0x23b   : > { %v2327_v24 = vmul.f32 %v2311_v13, %v2311_v13  ;;  %v2329_v3 = vmul.f32 %v2313_v23, %v2313_v23 }
 0x23c   : > { %v2402_v25 = vrot.slane %v2326_v10, 4  ;;  %v2414_v26 = vrot.slane %v2328_v19, 4 }
 0x23d   : > { %v2408_v8 = vrot.slane %v2327_v24, 4  ;;  %v2420_v5 = vrot.slane %v2329_v3, 4 }
 0x23e   : > { %v2403_v57 = vadd.f32 %v2402_v25, %v2326_v10  ;;  %v2415_v29 = vadd.f32 %v2414_v26, %v2328_v19 }
 0x23f   : > { %v2409_v20 = vadd.f32 %v2408_v8, %v2327_v24  ;;  %v2421_v47 = vadd.f32 %v2420_v5, %v2329_v3 }
 0x240   : > { %v2404_v21 = vrot.slane %v2403_v57, 2  ;;  %v2416_v30 = vrot.slane %v2415_v29, 2 }
 0x241   : > { %v2410_v16 = vrot.slane %v2409_v20, 2  ;;  %v2422_v34 = vrot.slane %v2421_v47, 2 }
 0x242   : > { %v2405_v28 = vadd.f32 %v2404_v21, %v2403_v57  ;;  %v2417_v36 = vadd.f32 %v2416_v30, %v2415_v29 }
 0x243   : > { %v2411_v33 = vadd.f32 %v2410_v16, %v2409_v20  ;;  %v2423_v31 = vadd.f32 %v2422_v34, %v2421_v47 }
 0x244   : > { %v2406_v35 = vrot.slane %v2405_v28, 1  ;;  %v2418_v32 = vrot.slane %v2417_v36, 1 }
 0x245   : > { %v2412_v37 = vrot.slane %v2411_v33, 1  ;;  %v2424_v39 = vrot.slane %v2423_v31, 1 }
 0x246   : > { %v2407_v38 = vadd.f32 %v2406_v35, %v2405_v28  ;;  %v2419_v40 = vadd.f32 %v2418_v32, %v2417_v36 }
 0x247   : > { %v2413_v41 = vadd.f32 %v2412_v37, %v2411_v33  ;;  %v2425_v43 = vadd.f32 %v2424_v39, %v2423_v31 }
 0x248   : > { %v2438_v42 = vmul.f32 0.125, %v2407_v38  ;;  %v2440_v44 = vmul.f32 0.125, %v2419_v40 }
 0x249   : > { %v2439_v18 = vmul.f32 0.125, %v2413_v41  ;;  %v2441_v46 = vmul.f32 0.125, %v2425_v43 }
 0x24a   : > { %v2454_v45 = vadd.f32 1e-05, %v2438_v42  ;;  %v2456_v27 = vadd.f32 1e-05, %v2440_v44 }
 0x24b   : > { %v2455_v48 = vadd.f32 1e-05, %v2439_v18  ;;  %v2457_v49 = vadd.f32 1e-05, %v2441_v46 }
 0x24c   : > { %3167 = vrsqrt.f32 %v2454_v45 }
 0x24d   : > { %3169 = vrsqrt.f32 %v2456_v27 }
 0x24e   : > { %3171 = vrsqrt.f32 %v2455_v48 }
 0x24f   : > { %3173 = vrsqrt.f32 %v2457_v49 }
 0x256   : > { %v3168_v51 = vpop.eup %3167 }
 0x257   : > { %v3170_v53 = vpop.eup %3169  ;;  %v2486_v56 = vmul.f32 %v3168_v51, %v2310_v11 }
 0x258   : > { %v3172_v60 = vpop.eup %3171  ;;  %v2488_v61 = vmul.f32 %v3170_v53, %v2312_v17 }
 0x259   : > { %v3174_v0 = vpop.eup %3173  ;;  %v2588_v1 = vmul.f32 %v2547_v50, %v2486_v56  ;;  %v2487_v6 = vmul.f32 %v3172_v60, %v2311_v13 }
 0x25a   : > { %v2590_v14 = vmul.f32 %v2555_v52, %v2488_v61  ;;  %v2489_v7 = vmul.f32 %v3174_v0, %v2313_v23 }
 0x25b   : > { %v2690_v11 = vadd.f32 %v2649_v58, %v2588_v1  ;;  %v2589_v15 = vmul.f32 %v2551_v59, %v2487_v6 }
 0x25c   : > { %v2692_v9 = vadd.f32 %v2657_v62, %v2590_v14  ;;  %v2591_v17 = vmul.f32 %v2559_v63, %v2489_v7 }
 0x25d   : > { %v2706_v54 = vmax.f32 %v2690_v11, 0.0  ;;  %v2691_v10 = vadd.f32 %v2653_v4, %v2589_v15 }
 0x25e   : > { %v2708_v19 = vmax.f32 %v2692_v9, 0.0  ;;  %v2693_v24 = vadd.f32 %v2661_v2, %v2591_v17 }
 0x25f   : > { %2722 = vst [vmem:[%s3768_s11 + $0x60] sm:$0xff] %v2706_v54  ;;  %v2707_v13 = vmax.f32 %v2691_v10, 0.0 }
 0x260   : > { %2724 = vst [vmem:[%s3768_s11 + $0x70] sm:$0xff] %v2708_v19  ;;  %v2709_v25 = vmax.f32 %v2693_v24, 0.0 }
 0x261   : > { %2723 = vst [vmem:[%s3768_s11 + $0x68] sm:$0xff] %v2707_v13 }
 0x262   : > { %2725 = vst [vmem:[%s3768_s11 + $0x78] sm:$0xff] %v2709_v25 }
 0x263 PF: > { %p16_p8 = scmp.ge.s32.totalorder %s3320_s17, 4   ;;  %s3902_s12 = smov %s3265_s13 }
 0x264   : > { %s3903_s13 = smov %s3269_s14  ;;  %s3904_s14 = smov %s3330_s20 }
 0x265   : > { %s3905_s15 = smov %s3320_s17  ;;  %18 = sbr.rel (!%p16_p8) target bundleno = 5 (0x5), region = 90 }
 0x26c   :  { %2748 = vsyncpa [#allocation3], 1 }
 0x26d   :  { %2750 = vsyncpa [#allocation3 + $0x1], 1 }
 0x26e   :  { %2751 = vsyncpa [#allocation5], 1 }
 0x26f   :  { %2753 = vsyncpa [#allocation5 + $0x1], 1 }

// kernel: _lambda_.5
= control target key start
LH: loop header
LB: loop body
LE: loop exit
PB: predicated region body
PF: predicated region fallthrough
CT: control target
= control target key end

     0   :  { %14 = vsyncpa [#allocation4], 0  ;;  %s6319_s0 = inlined_call_operand.vmem [shape: f32[8,2048], index: 0, kind: input, shape index: {}]   ;;  %s6320_s1 = inlined_call_operand.vmem [shape: bf16[2048,640], index: 1, kind: input, shape index: {}]   ;;  %s6321_s2 = inlined_call_operand.vmem [shape: f32[3,640], index: 2, kind: input, shape index: {}]   ;;  %s6322_s3 = inlined_call_operand.vmem [shape: f32[640,32], index: 3, kind: input, shape index: {}]   ;;  %s6323_s4 = inlined_call_operand.vmem [shape: f32[1,32], index: 4, kind: input, shape index: {}]   ;;  %s6324_s5 = inlined_call_operand.vmem [shape: f32[640,32], index: 5, kind: input, shape index: {}]   ;;  %s6325_s6 = inlined_call_operand.vmem [shape: f32[1,32], index: 6, kind: input, shape index: {}]   ;;  %s6326_s7 = inlined_call_operand.hbm [shape: f32[8,32], index: 7, kind: output, shape index: {0}]   ;;  %s6327_s8 = inlined_call_operand.hbm [shape: f32[8,32], index: 8, kind: output, shape index: {1}]  }
   0x1   :  { %15 = vsyncpa [#allocation6], 0  ;;  %s5250_s27 = smov 0  }
   0x2 LB: > { %s5256_s28 = sadd.s32 4294967295, %s5197_s27   ;;  %p3797_p0 = scmp.ge.s32.totalorder %s5197_s27, 1  ;;  %s5197_s27 = sphi %s5250_s27, %s21_s27  }
   0x3   : > { %p270_p1 = scmp.lt.s32.totalorder %s5197_s27, 3 }
   0x5   : > { %p271_p2 = pnand %p3797_p0, %p270_p1 }
   0x6   : > { %s3798_s29 = sshll.u32 (!%p271_p2), %s5256_s28, 3  ;;  %s3800_s30 = sshll.u32 (!%p271_p2), %s5256_s28, 7 }
   0x7   : > { %274 = sbr.rel (%p271_p2) target bundleno = 985 (0x3d9), region = 48  ;;  %p306_p3 = scmp.lt.s32.totalorder (!%p271_p2), %s3798_s29, 15 }
   0x8   : > { %p312_p4 = scmp.lt.s32.totalorder (!%p271_p2), %s3800_s30, 255  ;;  %p3802_p5 = scmp.ne.s32.totalorder (!%p271_p2), %s5256_s28, 0 }
   0xe   : > { %s6329_s29 = smov (!%p306_p3, %s3798_s29), 15  ;;  %s6331_s30 = smov (!%p312_p4, %s3800_s30), 255 }
   0xf   : > { %s3799_s9 = sshll.u32 %s6329_s29, 3  ;;  %s4642_s13 = smul.u32 20, %s6331_s30  ;;  %v5199_v0 = vmov (!%p3802_p5), 0.0  }
  0x10   : > { %s5265_s12 = scalar_lea.vmem %s6319_s0, %s3799_s9  ;;  %322 = sbr.rel (%p3802_p5) target bundleno = 23 (0x17), region = 52  ;;  %323 = vst [vmem:[#allocation2] sm:$0xff] (!%p3802_p5), %v5199_v0  ;;  %324 = vst [vmem:[#allocation2 + $0x8] sm:$0xff] (!%p3802_p5), %v5199_v0 }
  0x11   : > { %s5270_s16 = scalar_lea.vmem %s6320_s1, %s4642_s13  ;;  %325 = vst [vmem:[#allocation2 + $0x10] sm:$0xff] (!%p3802_p5), %v5199_v0  ;;  %326 = vst [vmem:[#allocation2 + $0x18] sm:$0xff] (!%p3802_p5), %v5199_v0 }
  0x12   : > { %327 = vst [vmem:[#allocation2 + $0x20] sm:$0xff] (!%p3802_p5), %v5199_v0 }
  0x17 PF: > { %v4669_v1 = vld [vmem:[%s5270_s16 + $0x4] ss:$20 sps:$4 sm:$0xff]   ;;  %v4673_v3 = vld [vmem:[%s5270_s16] ss:$20 sps:$4 sm:$0xff]   ;;  %v4679_v7 = vld [vmem:[%s5270_s16 + $0x28] ss:$20 sps:$4 sm:$0xff]  }
  0x18   : > { %v4671_v2 = vld [vmem:[%s5270_s16 + $0x284] ss:$20 sps:$4 sm:$0xff]   ;;  %2397 = vmatprep.subr.bf16.mxu0 %v4669_v1  ;;  %v4674_v4 = vld [vmem:[%s5270_s16 + $0x280] ss:$20 sps:$4 sm:$0xff]   ;;  %v4680_v8 = vld [vmem:[%s5270_s16 + $0x2a8] ss:$20 sps:$4 sm:$0xff]  }
  0x19   : > { %2438 = vmatprep.subr.bf16.mxu1 %v4671_v2  ;;  %v4675_v5 = vld [vmem:[%s5270_s16 + $0x2c] ss:$20 sps:$4 sm:$0xff]   ;;  %2398 = vmatpush1.bf16.msra.mxu0 %v4673_v3  ;;  %v4681_v9 = vld [vmem:[%s5270_s16 + $0x54] ss:$20 sps:$4 sm:$0xff]   ;;  %v4685_v11 = vld [vmem:[%s5270_s16 + $0x50] ss:$20 sps:$4 sm:$0xff]  }
  0x1a   : > { %2439 = vmatpush1.bf16.msra.mxu1 %v4674_v4  ;;  %v4677_v6 = vld [vmem:[%s5270_s16 + $0x2ac] ss:$20 sps:$4 sm:$0xff]   ;;  %2399 = vmatprep.subr.bf16.mxu0 %v4675_v5  ;;  %v4683_v10 = vld [vmem:[%s5270_s16 + $0x2d4] ss:$20 sps:$4 sm:$0xff]   ;;  %v4686_v12 = vld [vmem:[%s5270_s16 + $0x2d0] ss:$20 sps:$4 sm:$0xff]  }
  0x1b   : > { %2440 = vmatprep.subr.bf16.mxu1 %v4677_v6  ;;  %v4687_v13 = vld [vmem:[%s5270_s16 + $0x7c] ss:$20 sps:$4 sm:$0xff]   ;;  %v4691_v15 = vld [vmem:[%s5270_s16 + $0x78] ss:$20 sps:$4 sm:$0xff]   ;;  %v4697_v19 = vld [vmem:[%s5270_s16 + $0xa0] ss:$20 sps:$4 sm:$0xff]  }
  0x1c   : > { %v4689_v14 = vld [vmem:[%s5270_s16 + $0x2fc] ss:$20 sps:$4 sm:$0xff]   ;;  %v4692_v16 = vld [vmem:[%s5270_s16 + $0x2f8] ss:$20 sps:$4 sm:$0xff]   ;;  %v4698_v20 = vld [vmem:[%s5270_s16 + $0x320] ss:$20 sps:$4 sm:$0xff]  }
  0x1d   : > { %2400 = vmatpush1.bf16.msra.mxu0 %v4679_v7  ;;  %v4693_v17 = vld [vmem:[%s5270_s16 + $0xa4] ss:$20 sps:$4 sm:$0xff]   ;;  %v4699_v21 = vld [vmem:[%s5270_s16 + $0xcc] ss:$20 sps:$4 sm:$0xff]   ;;  %v4703_v23 = vld [vmem:[%s5270_s16 + $0xc8] ss:$20 sps:$4 sm:$0xff]  }
  0x1e   : > { %2441 = vmatpush1.bf16.msra.mxu1 %v4680_v8  ;;  %2401 = vmatprep.subr.bf16.mxu0 %v4681_v9  ;;  %v4695_v18 = vld [vmem:[%s5270_s16 + $0x324] ss:$20 sps:$4 sm:$0xff]   ;;  %v4701_v22 = vld [vmem:[%s5270_s16 + $0x34c] ss:$20 sps:$4 sm:$0xff]   ;;  %v4704_v24 = vld [vmem:[%s5270_s16 + $0x348] ss:$20 sps:$4 sm:$0xff]  }
  0x1f   : > { %2442 = vmatprep.subr.bf16.mxu1 %v4683_v10  ;;  %v4705_v25 = vld [vmem:[%s5270_s16 + $0xf4] ss:$20 sps:$4 sm:$0xff]   ;;  %v4709_v27 = vld [vmem:[%s5270_s16 + $0xf0] ss:$20 sps:$4 sm:$0xff]   ;;  %v4715_v31 = vld [vmem:[%s5270_s16 + $0x118] ss:$20 sps:$4 sm:$0xff]  }
  0x20   : > { %v4707_v26 = vld [vmem:[%s5270_s16 + $0x374] ss:$20 sps:$4 sm:$0xff]   ;;  %v4710_v28 = vld [vmem:[%s5270_s16 + $0x370] ss:$20 sps:$4 sm:$0xff]   ;;  %v4716_v32 = vld [vmem:[%s5270_s16 + $0x398] ss:$20 sps:$4 sm:$0xff]  }
  0x21   : > { %2402 = vmatpush1.bf16.msra.mxu0 %v4685_v11  ;;  %v4711_v29 = vld [vmem:[%s5270_s16 + $0x11c] ss:$20 sps:$4 sm:$0xff]   ;;  %v4717_v33 = vld [vmem:[%s5270_s16 + $0x144] ss:$20 sps:$4 sm:$0xff]   ;;  %v4721_v35 = vld [vmem:[%s5270_s16 + $0x140] ss:$20 sps:$4 sm:$0xff]  }
  0x22   : > { %2443 = vmatpush1.bf16.msra.mxu1 %v4686_v12  ;;  %2403 = vmatprep.subr.bf16.mxu0 %v4687_v13  ;;  %v4713_v30 = vld [vmem:[%s5270_s16 + $0x39c] ss:$20 sps:$4 sm:$0xff]   ;;  %v4719_v34 = vld [vmem:[%s5270_s16 + $0x3c4] ss:$20 sps:$4 sm:$0xff]   ;;  %v4722_v36 = vld [vmem:[%s5270_s16 + $0x3c0] ss:$20 sps:$4 sm:$0xff]  }
  0x23   : > { %2444 = vmatprep.subr.bf16.mxu1 %v4689_v14  ;;  %v4723_v37 = vld [vmem:[%s5270_s16 + $0x16c] ss:$20 sps:$4 sm:$0xff]   ;;  %v4727_v39 = vld [vmem:[%s5270_s16 + $0x168] ss:$20 sps:$4 sm:$0xff]   ;;  %v4733_v43 = vld [vmem:[%s5270_s16 + $0x190] ss:$20 sps:$4 sm:$0xff]  }
  0x24   : > { %v4725_v38 = vld [vmem:[%s5270_s16 + $0x3ec] ss:$20 sps:$4 sm:$0xff]   ;;  %v4728_v40 = vld [vmem:[%s5270_s16 + $0x3e8] ss:$20 sps:$4 sm:$0xff]   ;;  %v4734_v44 = vld [vmem:[%s5270_s16 + $0x410] ss:$20 sps:$4 sm:$0xff]  }
  0x25   : > { %2404 = vmatpush1.bf16.msra.mxu0 %v4691_v15  ;;  %v4729_v41 = vld [vmem:[%s5270_s16 + $0x194] ss:$20 sps:$4 sm:$0xff]   ;;  %v4735_v45 = vld [vmem:[%s5270_s16 + $0x1bc] ss:$20 sps:$4 sm:$0xff]   ;;  %v4739_v48 = vld [vmem:[%s5270_s16 + $0x1b8] ss:$20 sps:$4 sm:$0xff]  }
  0x26   : > { %2445 = vmatpush1.bf16.msra.mxu1 %v4692_v16  ;;  %2405 = vmatprep.subr.bf16.mxu0 %v4693_v17  ;;  %v4731_v42 = vld [vmem:[%s5270_s16 + $0x414] ss:$20 sps:$4 sm:$0xff]   ;;  %v4737_v46 = vld [vmem:[%s5270_s16 + $0x43c] ss:$20 sps:$4 sm:$0xff]   ;;  %v4740_v49 = vld [vmem:[%s5270_s16 + $0x438] ss:$20 sps:$4 sm:$0xff]  }
  0x27   : > { %2446 = vmatprep.subr.bf16.mxu1 %v4695_v18  ;;  %v329_v47 = vld [vmem:[%s5265_s12 + $0x8] sm:$0xff]  ;;  %v331_v51 = vld [vmem:[%s5265_s12 + $0x18] sm:$0xff]  ;;  %v4745_v55 = vld [vmem:[%s5270_s16 + $0x1e0] ss:$20 sps:$4 sm:$0xff]   ;;  %p4123_p6 = scmp.ne.s32.totalorder %s5256_s28, 1 }
  0x28   : > { %v5322_v50 = vpack.c.bf16 %v329_v47, %v329_v47  ;;  %v4741_v52 = vld [vmem:[%s5270_s16 + $0x1e4] ss:$20 sps:$4 sm:$0xff]   ;;  %v5326_v53 = vpack.c.bf16 %v331_v51, %v331_v51  ;;  %v4746_v56 = vld [vmem:[%s5270_s16 + $0x460] ss:$20 sps:$4 sm:$0xff]   ;;  %v4751_v59 = vld [vmem:[%s5270_s16 + $0x208] ss:$20 sps:$4 sm:$0xff]  }
  0x29   : > { %2406 = vmatpush1.bf16.msra.mxu0 %v4697_v19  ;;  %v4743_v54 = vld [vmem:[%s5270_s16 + $0x464] ss:$20 sps:$4 sm:$0xff]   ;;  %v4747_v57 = vld [vmem:[%s5270_s16 + $0x20c] ss:$20 sps:$4 sm:$0xff]   ;;  %v4752_v60 = vld [vmem:[%s5270_s16 + $0x488] ss:$20 sps:$4 sm:$0xff]  }
  0x2a   : > { %2447 = vmatpush1.bf16.msra.mxu1 %v4698_v20  ;;  %2407 = vmatprep.subr.bf16.mxu0 %v4699_v21  ;;  %v4749_v58 = vld [vmem:[%s5270_s16 + $0x48c] ss:$20 sps:$4 sm:$0xff]   ;;  %v4753_v61 = vld [vmem:[%s5270_s16 + $0x234] ss:$20 sps:$4 sm:$0xff]   ;;  %v4757_v63 = vld [vmem:[%s5270_s16 + $0x230] ss:$20 sps:$4 sm:$0xff]  }
  0x2b   : > { %2448 = vmatprep.subr.bf16.mxu1 %v4701_v22  ;;  %2429 = vmatprep.mubr.bf16.mxu0 %v5322_v50  ;;  %v4755_v62 = vld [vmem:[%s5270_s16 + $0x4b4] ss:$20 sps:$4 sm:$0xff]   ;;  %v4758_v0 = vld [vmem:[%s5270_s16 + $0x4b0] ss:$20 sps:$4 sm:$0xff]   ;;  %v4763_v3 = vld [vmem:[%s5270_s16 + $0x258] ss:$20 sps:$4 sm:$0xff]  }
  0x2c   : > { %2470 = vmatprep.mubr.bf16.mxu1 %v5326_v53  ;;  %v4759_v1 = vld [vmem:[%s5270_s16 + $0x25c] ss:$20 sps:$4 sm:$0xff]   ;;  %v4764_v4 = vld [vmem:[%s5270_s16 + $0x4d8] ss:$20 sps:$4 sm:$0xff]   ;;  %v328_v5 = vld [vmem:[%s5265_s12] sm:$0xff]  ;;  %vm5201_vm0 = vmmov (!%p4123_p6), 0  }
  0x2d   : > { %2408 = vmatpush1.bf16.msra.mxu0 %v4703_v23  ;;  %v4761_v2 = vld [vmem:[%s5270_s16 + $0x4dc] ss:$20 sps:$4 sm:$0xff]   ;;  %v4767_v7 = vld [vmem:[%s5270_s16 + $0x504] ss:$20 sps:$4 sm:$0xff]   ;;  %v5349_v9 = vpack.c.bf16 %v328_v5, %v328_v5  ;;  %v4765_v11 = vld [vmem:[%s5270_s16 + $0x500] ss:$20 sps:$4 sm:$0xff]  }
  0x2e   : > { %2449 = vmatpush1.bf16.msra.mxu1 %v4704_v24  ;;  %2409 = vmatprep.subr.bf16.mxu0 %v4705_v25  ;;  %v330_v6 = vld [vmem:[%s5265_s12 + $0x10] sm:$0xff]  ;;  %v4770_v8 = vld [vmem:[%s5270_s16 + $0x784] ss:$20 sps:$4 sm:$0xff]   ;;  %v4773_v13 = vld [vmem:[%s5270_s16 + $0x52c] ss:$20 sps:$4 sm:$0xff]   ;;  %vm3400_vm1 = vcmask (!%p4123_p6), 261120  }
  0x2f   : > { %2450 = vmatprep.subr.bf16.mxu1 %v4707_v26  ;;  %v5351_v10 = vpack.c.bf16 %v330_v6, %v330_v6  ;;  %v4768_v12 = vld [vmem:[%s5270_s16 + $0x780] ss:$20 sps:$4 sm:$0xff]   ;;  %v4771_v15 = vld [vmem:[%s5270_s16 + $0x528] ss:$20 sps:$4 sm:$0xff]   ;;  %v4777_v19 = vld [vmem:[%s5270_s16 + $0x550] ss:$20 sps:$4 sm:$0xff]  }
  0x30   : > { %v4776_v14 = vld [vmem:[%s5270_s16 + $0x7ac] ss:$20 sps:$4 sm:$0xff]   ;;  %v4774_v16 = vld [vmem:[%s5270_s16 + $0x7a8] ss:$20 sps:$4 sm:$0xff]   ;;  %v4780_v20 = vld [vmem:[%s5270_s16 + $0x7d0] ss:$20 sps:$4 sm:$0xff]  }
  0x31   : > { %2410 = vmatpush1.bf16.msra.mxu0 %v4709_v27  ;;  %v4779_v17 = vld [vmem:[%s5270_s16 + $0x554] ss:$20 sps:$4 sm:$0xff]   ;;  %v4785_v21 = vld [vmem:[%s5270_s16 + $0x57c] ss:$20 sps:$4 sm:$0xff]   ;;  %v4783_v23 = vld [vmem:[%s5270_s16 + $0x578] ss:$20 sps:$4 sm:$0xff]  }
  0x32   : > { %2451 = vmatpush1.bf16.msra.mxu1 %v4710_v28  ;;  %2411 = vmatprep.subr.bf16.mxu0 %v4711_v29  ;;  %v4782_v18 = vld [vmem:[%s5270_s16 + $0x7d4] ss:$20 sps:$4 sm:$0xff]   ;;  %v4788_v22 = vld [vmem:[%s5270_s16 + $0x7fc] ss:$20 sps:$4 sm:$0xff]   ;;  %v4786_v24 = vld [vmem:[%s5270_s16 + $0x7f8] ss:$20 sps:$4 sm:$0xff]  }
  0x33   : > { %2452 = vmatprep.subr.bf16.mxu1 %v4713_v30  ;;  %v4791_v25 = vld [vmem:[%s5270_s16 + $0x5a4] ss:$20 sps:$4 sm:$0xff]   ;;  %v4789_v27 = vld [vmem:[%s5270_s16 + $0x5a0] ss:$20 sps:$4 sm:$0xff]   ;;  %v4843_v5 = vld [vmem:[%s5270_s16 + $0x708] ss:$20 sps:$4 sm:$0xff]  }
  0x34   : > { %v4794_v26 = vld [vmem:[%s5270_s16 + $0x824] ss:$20 sps:$4 sm:$0xff]   ;;  %v4792_v28 = vld [vmem:[%s5270_s16 + $0x820] ss:$20 sps:$4 sm:$0xff]   ;;  %v4846_v6 = vld [vmem:[%s5270_s16 + $0x988] ss:$20 sps:$4 sm:$0xff]  }
  0x35   : > { %2412 = vmatpush1.bf16.msra.mxu0 %v4715_v31  ;;  %v4797_v29 = vld [vmem:[%s5270_s16 + $0x5cc] ss:$20 sps:$4 sm:$0xff]   ;;  %v4795_v31 = vld [vmem:[%s5270_s16 + $0x5c8] ss:$20 sps:$4 sm:$0xff]  }
  0x36   : > { %2453 = vmatpush1.bf16.msra.mxu1 %v4716_v32  ;;  %2413 = vmatprep.subr.bf16.mxu0 %v4717_v33  ;;  %v4800_v30 = vld [vmem:[%s5270_s16 + $0x84c] ss:$20 sps:$4 sm:$0xff]   ;;  %v4798_v32 = vld [vmem:[%s5270_s16 + $0x848] ss:$20 sps:$4 sm:$0xff]  }
  0x37   : > { %2454 = vmatprep.subr.bf16.mxu1 %v4719_v34  ;;  %v4803_v33 = vld [vmem:[%s5270_s16 + $0x5f4] ss:$20 sps:$4 sm:$0xff]   ;;  %v4824_v51 = vld [vmem:[%s5270_s16 + $0x8ec] ss:$20 sps:$4 sm:$0xff]  }
  0x38   : > { %v4806_v34 = vld [vmem:[%s5270_s16 + $0x874] ss:$20 sps:$4 sm:$0xff]  }
  0x39   : > { %2414 = vmatpush1.bf16.msra.mxu0 %v4721_v35  ;;  %v333_v35 = vld [vmem:[%s5265_s12 + $0x28] sm:$0xff]  ;;  %v4813_v47 = vld [vmem:[%s5270_s16 + $0x640] ss:$20 sps:$4 sm:$0xff]  }
  0x3a   : > { %2455 = vmatpush1.bf16.msra.mxu1 %v4722_v36  ;;  %2415 = vmatprep.subr.bf16.mxu0 %v4723_v37  ;;  %v4801_v36 = vld [vmem:[%s5270_s16 + $0x5f0] ss:$20 sps:$4 sm:$0xff]  }
  0x3b   : > { %2456 = vmatprep.subr.bf16.mxu1 %v4725_v38  ;;  %v4804_v37 = vld [vmem:[%s5270_s16 + $0x870] ss:$20 sps:$4 sm:$0xff]   ;;  %v5382_v38 = vpack.c.bf16 %v333_v35, %v333_v35  ;;  %v4879_v35 = vld [vmem:[%s5270_s16 + $0x80] ss:$20 sps:$4 sm:$0xff]  }
  0x3d   : > { %2416 = vmatpush1.bf16.msra.mxu0 %v4727_v39  ;;  %v335_v39 = vld [vmem:[%s5265_s12 + $0x38] sm:$0xff] }
  0x3e   : > { %2457 = vmatpush1.bf16.msra.mxu1 %v4728_v40  ;;  %2417 = vmatprep.subr.bf16.mxu0 %v4729_v41  ;;  %v4809_v40 = vld [vmem:[%s5270_s16 + $0x61c] ss:$20 sps:$4 sm:$0xff]   ;;  %v5386_v41 = vpack.c.bf16 %v335_v39, %v335_v39  ;;  %v4890_v39 = vld [vmem:[%s5270_s16 + $0x32c] ss:$20 sps:$4 sm:$0xff]  }
  0x3f   : > { %2458 = vmatprep.subr.bf16.mxu1 %v4731_v42  ;;  %v4812_v42 = vld [vmem:[%s5270_s16 + $0x89c] ss:$20 sps:$4 sm:$0xff]  }
  0x41   : > { %2418 = vmatpush1.bf16.msra.mxu0 %v4733_v43  ;;  %v4807_v43 = vld [vmem:[%s5270_s16 + $0x618] ss:$20 sps:$4 sm:$0xff]  }
  0x42   : > { %2459 = vmatpush1.bf16.msra.mxu1 %v4734_v44  ;;  %2419 = vmatprep.subr.bf16.mxu0 %v4735_v45  ;;  %v4810_v44 = vld [vmem:[%s5270_s16 + $0x898] ss:$20 sps:$4 sm:$0xff]  }
  0x43   : > { %2460 = vmatprep.subr.bf16.mxu1 %v4737_v46  ;;  %v4815_v45 = vld [vmem:[%s5270_s16 + $0x644] ss:$20 sps:$4 sm:$0xff]  }
  0x44   : > { %v4818_v46 = vld [vmem:[%s5270_s16 + $0x8c4] ss:$20 sps:$4 sm:$0xff]  }
  0x45   : > { %2420 = vmatpush1.bf16.msra.mxu0 %v4739_v48  ;;  %v4816_v48 = vld [vmem:[%s5270_s16 + $0x8c0] ss:$20 sps:$4 sm:$0xff]  }
  0x46   : > { %2461 = vmatpush1.bf16.msra.mxu1 %v4740_v49  ;;  %2421 = vmatprep.subr.bf16.mxu0 %v4741_v52  ;;  %v4821_v49 = vld [vmem:[%s5270_s16 + $0x66c] ss:$20 sps:$4 sm:$0xff]   ;;  %v4819_v52 = vld [vmem:[%s5270_s16 + $0x668] ss:$20 sps:$4 sm:$0xff]  }
  0x47   : > { %2462 = vmatprep.subr.bf16.mxu1 %v4743_v54  ;;  %v4822_v54 = vld [vmem:[%s5270_s16 + $0x8e8] ss:$20 sps:$4 sm:$0xff]  }
  0x49   : > { %2422 = vmatpush1.bf16.msra.mxu0 %v4745_v55  ;;  %v4827_v55 = vld [vmem:[%s5270_s16 + $0x694] ss:$20 sps:$4 sm:$0xff]  }
  0x4a   : > { %2463 = vmatpush1.bf16.msra.mxu1 %v4746_v56  ;;  %2423 = vmatprep.subr.bf16.mxu0 %v4747_v57  ;;  %v4830_v56 = vld [vmem:[%s5270_s16 + $0x914] ss:$20 sps:$4 sm:$0xff]   ;;  %v4825_v57 = vld [vmem:[%s5270_s16 + $0x690] ss:$20 sps:$4 sm:$0xff]  }
  0x4b   : > { %2464 = vmatprep.subr.bf16.mxu1 %v4749_v58  ;;  %v4828_v58 = vld [vmem:[%s5270_s16 + $0x910] ss:$20 sps:$4 sm:$0xff]  }
  0x4d   : > { %2424 = vmatpush1.bf16.msra.mxu0 %v4751_v59  ;;  %v4833_v59 = vld [vmem:[%s5270_s16 + $0x6bc] ss:$20 sps:$4 sm:$0xff]  }
  0x4e   : > { %2465 = vmatpush1.bf16.msra.mxu1 %v4752_v60  ;;  %2425 = vmatprep.subr.bf16.mxu0 %v4753_v61  ;;  %v4836_v60 = vld [vmem:[%s5270_s16 + $0x93c] ss:$20 sps:$4 sm:$0xff]   ;;  %v4831_v61 = vld [vmem:[%s5270_s16 + $0x6b8] ss:$20 sps:$4 sm:$0xff]  }
  0x4f   : > { %2466 = vmatprep.subr.bf16.mxu1 %v4755_v62  ;;  %v4834_v62 = vld [vmem:[%s5270_s16 + $0x938] ss:$20 sps:$4 sm:$0xff]  }
  0x51   : > { %2426 = vmatpush1.bf16.msra.mxu0 %v4757_v63  ;;  %v4839_v63 = vld [vmem:[%s5270_s16 + $0x6e4] ss:$20 sps:$4 sm:$0xff]  }
  0x52   : > { %2467 = vmatpush1.bf16.msra.mxu1 %v4758_v0  ;;  %2427 = vmatprep.subr.bf16.mxu0 %v4759_v1  ;;  %v4842_v0 = vld [vmem:[%s5270_s16 + $0x964] ss:$20 sps:$4 sm:$0xff]   ;;  %v4837_v1 = vld [vmem:[%s5270_s16 + $0x6e0] ss:$20 sps:$4 sm:$0xff]  }
  0x53   : > { %2468 = vmatprep.subr.bf16.mxu1 %v4761_v2  ;;  %v4840_v2 = vld [vmem:[%s5270_s16 + $0x960] ss:$20 sps:$4 sm:$0xff]  }
  0x55   : > { %2428 = vmatpush1.bf16.msra.mxu0 %v4763_v3  ;;  %v4845_v3 = vld [vmem:[%s5270_s16 + $0x70c] ss:$20 sps:$4 sm:$0xff]  }
  0x56   : > { %2469 = vmatpush1.bf16.msra.mxu1 %v4764_v4  ;;  %2479 = vmatprep.subr.bf16.mxu0 %v4767_v7  ;;  %v4848_v4 = vld [vmem:[%s5270_s16 + $0x98c] ss:$20 sps:$4 sm:$0xff]   ;;  %v4851_v7 = vld [vmem:[%s5270_s16 + $0x734] ss:$20 sps:$4 sm:$0xff]  }
  0x57   : > { %2520 = vmatprep.subr.bf16.mxu1 %v4770_v8  ;;  %v4854_v8 = vld [vmem:[%s5270_s16 + $0x9b4] ss:$20 sps:$4 sm:$0xff]  }
  0x58   : > { %2430 = vmatmul.mubr.bf16.vlgmr.msra.gmra.mrb[0].mxu0 %v5349_v9 }
  0x59   : > { %2471 = vmatmul.mubr.bf16.vlgmr.msra.gmra.mrb[0].mxu1 %v5351_v10  ;;  %2480 = vmatpush1.bf16.msra.mxu0 %v4765_v11  ;;  %v4849_v11 = vld [vmem:[%s5270_s16 + $0x730] ss:$20 sps:$4 sm:$0xff]  }
  0x5a   : > { %2521 = vmatpush1.bf16.msra.mxu1 %v4768_v12  ;;  %2481 = vmatprep.subr.bf16.mxu0 %v4773_v13  ;;  %v4852_v12 = vld [vmem:[%s5270_s16 + $0x9b0] ss:$20 sps:$4 sm:$0xff]  }
  0x5b   : > { %2522 = vmatprep.subr.bf16.mxu1 %v4776_v14  ;;  %2511 = vmatprep.mubr.bf16.mxu0 %v5382_v38  ;;  %v4857_v13 = vld [vmem:[%s5270_s16 + $0x75c] ss:$20 sps:$4 sm:$0xff]  }
  0x5c   : > { %2552 = vmatprep.mubr.bf16.mxu1 %v5386_v41  ;;  %v4860_v14 = vld [vmem:[%s5270_s16 + $0x9dc] ss:$20 sps:$4 sm:$0xff]  }
  0x5d   : > { %2482 = vmatpush1.bf16.msra.mxu0 %v4771_v15  ;;  %v4855_v15 = vld [vmem:[%s5270_s16 + $0x758] ss:$20 sps:$4 sm:$0xff]  }
  0x5e   : > { %2523 = vmatpush1.bf16.msra.mxu1 %v4774_v16  ;;  %2483 = vmatprep.subr.bf16.mxu0 %v4779_v17  ;;  %v4858_v16 = vld [vmem:[%s5270_s16 + $0x9d8] ss:$20 sps:$4 sm:$0xff]   ;;  %v332_v17 = vld [vmem:[%s5265_s12 + $0x20] sm:$0xff] }
  0x5f   : > { %2524 = vmatprep.subr.bf16.mxu1 %v4782_v18  ;;  %v334_v18 = vld [vmem:[%s5265_s12 + $0x30] sm:$0xff] }
  0x61   : > { %2484 = vmatpush1.bf16.msra.mxu0 %v4777_v19  ;;  %v4863_v19 = vld [vmem:[%s5270_s16 + $0xc] ss:$20 sps:$4 sm:$0xff]  }
  0x62   : > { %2525 = vmatpush1.bf16.msra.mxu1 %v4780_v20  ;;  %2485 = vmatprep.subr.bf16.mxu0 %v4785_v21  ;;  %v4866_v20 = vld [vmem:[%s5270_s16 + $0x28c] ss:$20 sps:$4 sm:$0xff]   ;;  %v5429_v21 = vpack.c.bf16 %v332_v17, %v332_v17  ;;  %v4939_v17 = vld [vmem:[%s5270_s16 + $0x210] ss:$20 sps:$4 sm:$0xff]  }
  0x63   : > { %2526 = vmatprep.subr.bf16.mxu1 %v4788_v22  ;;  %v5431_v22 = vpack.c.bf16 %v334_v18, %v334_v18  ;;  %v4942_v18 = vld [vmem:[%s5270_s16 + $0x490] ss:$20 sps:$4 sm:$0xff]  }
  0x65   : > { %2486 = vmatpush1.bf16.msra.mxu0 %v4783_v23  ;;  %v4861_v23 = vld [vmem:[%s5270_s16 + $0x8] ss:$20 sps:$4 sm:$0xff]  }
  0x66   : > { %2527 = vmatpush1.bf16.msra.mxu1 %v4786_v24  ;;  %2487 = vmatprep.subr.bf16.mxu0 %v4791_v25  ;;  %v4864_v24 = vld [vmem:[%s5270_s16 + $0x288] ss:$20 sps:$4 sm:$0xff]  }
  0x67   : > { %2528 = vmatprep.subr.bf16.mxu1 %v4794_v26  ;;  %v4869_v25 = vld [vmem:[%s5270_s16 + $0x34] ss:$20 sps:$4 sm:$0xff]  }
  0x68   : > { %v4872_v26 = vld [vmem:[%s5270_s16 + $0x2b4] ss:$20 sps:$4 sm:$0xff]  }
  0x69   : > { %2488 = vmatpush1.bf16.msra.mxu0 %v4789_v27  ;;  %v4867_v27 = vld [vmem:[%s5270_s16 + $0x30] ss:$20 sps:$4 sm:$0xff]  }
  0x6a   : > { %2529 = vmatpush1.bf16.msra.mxu1 %v4792_v28  ;;  %2489 = vmatprep.subr.bf16.mxu0 %v4797_v29  ;;  %v4870_v28 = vld [vmem:[%s5270_s16 + $0x2b0] ss:$20 sps:$4 sm:$0xff]  }
  0x6b   : > { %2530 = vmatprep.subr.bf16.mxu1 %v4800_v30  ;;  %v4875_v29 = vld [vmem:[%s5270_s16 + $0x5c] ss:$20 sps:$4 sm:$0xff]  }
  0x6c   : > { %v4878_v30 = vld [vmem:[%s5270_s16 + $0x2dc] ss:$20 sps:$4 sm:$0xff]  }
  0x6d   : > { %2490 = vmatpush1.bf16.msra.mxu0 %v4795_v31  ;;  %v4873_v31 = vld [vmem:[%s5270_s16 + $0x58] ss:$20 sps:$4 sm:$0xff]  }
  0x6e   : > { %2531 = vmatpush1.bf16.msra.mxu1 %v4798_v32  ;;  %2491 = vmatprep.subr.bf16.mxu0 %v4803_v33  ;;  %v4876_v32 = vld [vmem:[%s5270_s16 + $0x2d8] ss:$20 sps:$4 sm:$0xff]  }
  0x6f   : > { %2532 = vmatprep.subr.bf16.mxu1 %v4806_v34  ;;  %v4881_v33 = vld [vmem:[%s5270_s16 + $0x84] ss:$20 sps:$4 sm:$0xff]  }
  0x70   : > { %v4884_v34 = vld [vmem:[%s5270_s16 + $0x304] ss:$20 sps:$4 sm:$0xff]  }
  0x71   : > { %2492 = vmatpush1.bf16.msra.mxu0 %v4801_v36  ;;  %v4882_v36 = vld [vmem:[%s5270_s16 + $0x300] ss:$20 sps:$4 sm:$0xff]  }
  0x72   : > { %2533 = vmatpush1.bf16.msra.mxu1 %v4804_v37  ;;  %2493 = vmatprep.subr.bf16.mxu0 %v4809_v40  ;;  %v4887_v37 = vld [vmem:[%s5270_s16 + $0xac] ss:$20 sps:$4 sm:$0xff]   ;;  %v4885_v40 = vld [vmem:[%s5270_s16 + $0xa8] ss:$20 sps:$4 sm:$0xff]  }
  0x73   : > { %2534 = vmatprep.subr.bf16.mxu1 %v4812_v42  ;;  %v4888_v42 = vld [vmem:[%s5270_s16 + $0x328] ss:$20 sps:$4 sm:$0xff]  }
  0x75   : > { %2494 = vmatpush1.bf16.msra.mxu0 %v4807_v43  ;;  %v4893_v43 = vld [vmem:[%s5270_s16 + $0xd4] ss:$20 sps:$4 sm:$0xff]  }
  0x76   : > { %2535 = vmatpush1.bf16.msra.mxu1 %v4810_v44  ;;  %2495 = vmatprep.subr.bf16.mxu0 %v4815_v45  ;;  %v4896_v44 = vld [vmem:[%s5270_s16 + $0x354] ss:$20 sps:$4 sm:$0xff]   ;;  %v4891_v45 = vld [vmem:[%s5270_s16 + $0xd0] ss:$20 sps:$4 sm:$0xff]  }
  0x77   : > { %2536 = vmatprep.subr.bf16.mxu1 %v4818_v46  ;;  %v4894_v46 = vld [vmem:[%s5270_s16 + $0x350] ss:$20 sps:$4 sm:$0xff]  }
  0x79   : > { %2496 = vmatpush1.bf16.msra.mxu0 %v4813_v47  ;;  %v4899_v47 = vld [vmem:[%s5270_s16 + $0xfc] ss:$20 sps:$4 sm:$0xff]  }
  0x7a   : > { %2537 = vmatpush1.bf16.msra.mxu1 %v4816_v48  ;;  %2497 = vmatprep.subr.bf16.mxu0 %v4821_v49  ;;  %v4902_v48 = vld [vmem:[%s5270_s16 + $0x37c] ss:$20 sps:$4 sm:$0xff]   ;;  %v4897_v49 = vld [vmem:[%s5270_s16 + $0xf8] ss:$20 sps:$4 sm:$0xff]  }
  0x7b   : > { %2538 = vmatprep.subr.bf16.mxu1 %v4824_v51  ;;  %v4900_v51 = vld [vmem:[%s5270_s16 + $0x378] ss:$20 sps:$4 sm:$0xff]  }
  0x7d   : > { %2498 = vmatpush1.bf16.msra.mxu0 %v4819_v52  ;;  %v4905_v52 = vld [vmem:[%s5270_s16 + $0x124] ss:$20 sps:$4 sm:$0xff]  }
  0x7e   : > { %2539 = vmatpush1.bf16.msra.mxu1 %v4822_v54  ;;  %2499 = vmatprep.subr.bf16.mxu0 %v4827_v55  ;;  %v4908_v54 = vld [vmem:[%s5270_s16 + $0x3a4] ss:$20 sps:$4 sm:$0xff]   ;;  %v4903_v55 = vld [vmem:[%s5270_s16 + $0x120] ss:$20 sps:$4 sm:$0xff]  }
  0x7f   : > { %2540 = vmatprep.subr.bf16.mxu1 %v4830_v56  ;;  %v4906_v56 = vld [vmem:[%s5270_s16 + $0x3a0] ss:$20 sps:$4 sm:$0xff]  }
  0x81   : > { %2500 = vmatpush1.bf16.msra.mxu0 %v4825_v57  ;;  %v4911_v57 = vld [vmem:[%s5270_s16 + $0x14c] ss:$20 sps:$4 sm:$0xff]  }
  0x82   : > { %2541 = vmatpush1.bf16.msra.mxu1 %v4828_v58  ;;  %2501 = vmatprep.subr.bf16.mxu0 %v4833_v59  ;;  %v4914_v58 = vld [vmem:[%s5270_s16 + $0x3cc] ss:$20 sps:$4 sm:$0xff]   ;;  %v4909_v59 = vld [vmem:[%s5270_s16 + $0x148] ss:$20 sps:$4 sm:$0xff]  }
  0x83   : > { %2542 = vmatprep.subr.bf16.mxu1 %v4836_v60  ;;  %v4912_v60 = vld [vmem:[%s5270_s16 + $0x3c8] ss:$20 sps:$4 sm:$0xff]  }
  0x85   : > { %2502 = vmatpush1.bf16.msra.mxu0 %v4831_v61  ;;  %v4917_v61 = vld [vmem:[%s5270_s16 + $0x174] ss:$20 sps:$4 sm:$0xff]  }
  0x86   : > { %2543 = vmatpush1.bf16.msra.mxu1 %v4834_v62  ;;  %2503 = vmatprep.subr.bf16.mxu0 %v4839_v63  ;;  %v4920_v62 = vld [vmem:[%s5270_s16 + $0x3f4] ss:$20 sps:$4 sm:$0xff]   ;;  %v4915_v63 = vld [vmem:[%s5270_s16 + $0x170] ss:$20 sps:$4 sm:$0xff]  }
  0x87   : > { %2544 = vmatprep.subr.bf16.mxu1 %v4842_v0  ;;  %v4918_v0 = vld [vmem:[%s5270_s16 + $0x3f0] ss:$20 sps:$4 sm:$0xff]  }
  0x89   : > { %2504 = vmatpush1.bf16.msra.mxu0 %v4837_v1  ;;  %v4923_v1 = vld [vmem:[%s5270_s16 + $0x19c] ss:$20 sps:$4 sm:$0xff]  }
  0x8a   : > { %2545 = vmatpush1.bf16.msra.mxu1 %v4840_v2  ;;  %2505 = vmatprep.subr.bf16.mxu0 %v4845_v3  ;;  %v4926_v2 = vld [vmem:[%s5270_s16 + $0x41c] ss:$20 sps:$4 sm:$0xff]   ;;  %v4921_v3 = vld [vmem:[%s5270_s16 + $0x198] ss:$20 sps:$4 sm:$0xff]  }
  0x8b   : > { %2546 = vmatprep.subr.bf16.mxu1 %v4848_v4  ;;  %v4924_v4 = vld [vmem:[%s5270_s16 + $0x418] ss:$20 sps:$4 sm:$0xff]  }
  0x8d   : > { %2506 = vmatpush1.bf16.msra.mxu0 %v4843_v5  ;;  %v4929_v5 = vld [vmem:[%s5270_s16 + $0x1c4] ss:$20 sps:$4 sm:$0xff]  }
  0x8e   : > { %2547 = vmatpush1.bf16.msra.mxu1 %v4846_v6  ;;  %2507 = vmatprep.subr.bf16.mxu0 %v4851_v7  ;;  %v4932_v6 = vld [vmem:[%s5270_s16 + $0x444] ss:$20 sps:$4 sm:$0xff]   ;;  %v4927_v7 = vld [vmem:[%s5270_s16 + $0x1c0] ss:$20 sps:$4 sm:$0xff]  }
  0x8f   : > { %2548 = vmatprep.subr.bf16.mxu1 %v4854_v8  ;;  %v4930_v8 = vld [vmem:[%s5270_s16 + $0x440] ss:$20 sps:$4 sm:$0xff]  }
  0x91   : > { %2508 = vmatpush1.bf16.msra.mxu0 %v4849_v11  ;;  %v4935_v11 = vld [vmem:[%s5270_s16 + $0x1ec] ss:$20 sps:$4 sm:$0xff]  }
  0x92   : > { %2549 = vmatpush1.bf16.msra.mxu1 %v4852_v12  ;;  %2509 = vmatprep.subr.bf16.mxu0 %v4857_v13  ;;  %v4938_v12 = vld [vmem:[%s5270_s16 + $0x46c] ss:$20 sps:$4 sm:$0xff]   ;;  %v4933_v13 = vld [vmem:[%s5270_s16 + $0x1e8] ss:$20 sps:$4 sm:$0xff]  }
  0x93   : > { %2550 = vmatprep.subr.bf16.mxu1 %v4860_v14  ;;  %v4936_v14 = vld [vmem:[%s5270_s16 + $0x468] ss:$20 sps:$4 sm:$0xff]  }
  0x95   : > { %2510 = vmatpush1.bf16.msra.mxu0 %v4855_v15  ;;  %v4941_v15 = vld [vmem:[%s5270_s16 + $0x214] ss:$20 sps:$4 sm:$0xff]  }
  0x96   : > { %2551 = vmatpush1.bf16.msra.mxu1 %v4858_v16  ;;  %2561 = vmatprep.subr.bf16.mxu0 %v4863_v19  ;;  %v4944_v16 = vld [vmem:[%s5270_s16 + $0x494] ss:$20 sps:$4 sm:$0xff]   ;;  %v4947_v19 = vld [vmem:[%s5270_s16 + $0x23c] ss:$20 sps:$4 sm:$0xff]  }
  0x97   : > { %2602 = vmatprep.subr.bf16.mxu1 %v4866_v20  ;;  %v4950_v20 = vld [vmem:[%s5270_s16 + $0x4bc] ss:$20 sps:$4 sm:$0xff]  }
  0x98   : > { %2512 = vmatmul.mubr.bf16.vlgmr.msra.gmra.mrb[4].mxu0 %v5429_v21 }
  0x99   : > { %2553 = vmatmul.mubr.bf16.vlgmr.msra.gmra.mrb[4].mxu1 %v5431_v22  ;;  %2562 = vmatpush1.bf16.msra.mxu0 %v4861_v23  ;;  %v4945_v23 = vld [vmem:[%s5270_s16 + $0x238] ss:$20 sps:$4 sm:$0xff]  }
  0x9a   : > { %2603 = vmatpush1.bf16.msra.mxu1 %v4864_v24  ;;  %2563 = vmatprep.subr.bf16.mxu0 %v4869_v25  ;;  %v4948_v24 = vld [vmem:[%s5270_s16 + $0x4b8] ss:$20 sps:$4 sm:$0xff]  }
  0x9b   : > { %2604 = vmatprep.subr.bf16.mxu1 %v4872_v26  ;;  %2593 = vmatprep.mubr.bf16.mxu0 %v5322_v50  ;;  %v4953_v25 = vld [vmem:[%s5270_s16 + $0x264] ss:$20 sps:$4 sm:$0xff]  }
  0x9c   : > { %2634 = vmatprep.mubr.bf16.mxu1 %v5326_v53  ;;  %v4956_v26 = vld [vmem:[%s5270_s16 + $0x4e4] ss:$20 sps:$4 sm:$0xff]  }
  0x9d   : > { %2564 = vmatpush1.bf16.msra.mxu0 %v4867_v27  ;;  %v4951_v27 = vld [vmem:[%s5270_s16 + $0x260] ss:$20 sps:$4 sm:$0xff]  }
  0x9e   : > { %2605 = vmatpush1.bf16.msra.mxu1 %v4870_v28  ;;  %2565 = vmatprep.subr.bf16.mxu0 %v4875_v29  ;;  %v4954_v28 = vld [vmem:[%s5270_s16 + $0x4e0] ss:$20 sps:$4 sm:$0xff]  }
  0x9f   : > { %2606 = vmatprep.subr.bf16.mxu1 %v4878_v30  ;;  %v4959_v29 = vld [vmem:[%s5270_s16 + $0x50c] ss:$20 sps:$4 sm:$0xff]  }
  0xa0   : > { %v4962_v30 = vld [vmem:[%s5270_s16 + $0x78c] ss:$20 sps:$4 sm:$0xff]  }
  0xa1   : > { %2566 = vmatpush1.bf16.msra.mxu0 %v4873_v31  ;;  %v4957_v31 = vld [vmem:[%s5270_s16 + $0x508] ss:$20 sps:$4 sm:$0xff]  }
  0xa2   : > { %2607 = vmatpush1.bf16.msra.mxu1 %v4876_v32  ;;  %2567 = vmatprep.subr.bf16.mxu0 %v4881_v33  ;;  %v4960_v32 = vld [vmem:[%s5270_s16 + $0x788] ss:$20 sps:$4 sm:$0xff]  }
  0xa3   : > { %2608 = vmatprep.subr.bf16.mxu1 %v4884_v34  ;;  %v4965_v33 = vld [vmem:[%s5270_s16 + $0x534] ss:$20 sps:$4 sm:$0xff]  }
  0xa4   : > { %v4968_v34 = vld [vmem:[%s5270_s16 + $0x7b4] ss:$20 sps:$4 sm:$0xff]  }
  0xa5   : > { %2568 = vmatpush1.bf16.msra.mxu0 %v4879_v35  ;;  %v4963_v35 = vld [vmem:[%s5270_s16 + $0x530] ss:$20 sps:$4 sm:$0xff]  }
  0xa6   : > { %2609 = vmatpush1.bf16.msra.mxu1 %v4882_v36  ;;  %2569 = vmatprep.subr.bf16.mxu0 %v4887_v37  ;;  %v4966_v36 = vld [vmem:[%s5270_s16 + $0x7b0] ss:$20 sps:$4 sm:$0xff]  }
  0xa7   : > { %2610 = vmatprep.subr.bf16.mxu1 %v4890_v39  ;;  %v4971_v37 = vld [vmem:[%s5270_s16 + $0x55c] ss:$20 sps:$4 sm:$0xff]  }
  0xa8   : > { %v4974_v39 = vld [vmem:[%s5270_s16 + $0x7dc] ss:$20 sps:$4 sm:$0xff]  }
  0xa9   : > { %2570 = vmatpush1.bf16.msra.mxu0 %v4885_v40  ;;  %v4969_v40 = vld [vmem:[%s5270_s16 + $0x558] ss:$20 sps:$4 sm:$0xff]  }
  0xaa   : > { %2611 = vmatpush1.bf16.msra.mxu1 %v4888_v42  ;;  %2571 = vmatprep.subr.bf16.mxu0 %v4893_v43  ;;  %v4972_v42 = vld [vmem:[%s5270_s16 + $0x7d8] ss:$20 sps:$4 sm:$0xff]  }
  0xab   : > { %2612 = vmatprep.subr.bf16.mxu1 %v4896_v44  ;;  %v4977_v43 = vld [vmem:[%s5270_s16 + $0x584] ss:$20 sps:$4 sm:$0xff]  }
  0xac   : > { %v4980_v44 = vld [vmem:[%s5270_s16 + $0x804] ss:$20 sps:$4 sm:$0xff]  }
  0xad   : > { %2572 = vmatpush1.bf16.msra.mxu0 %v4891_v45  ;;  %v4975_v45 = vld [vmem:[%s5270_s16 + $0x580] ss:$20 sps:$4 sm:$0xff]  }
  0xae   : > { %2613 = vmatpush1.bf16.msra.mxu1 %v4894_v46  ;;  %2573 = vmatprep.subr.bf16.mxu0 %v4899_v47  ;;  %v4978_v46 = vld [vmem:[%s5270_s16 + $0x800] ss:$20 sps:$4 sm:$0xff]  }
  0xaf   : > { %2614 = vmatprep.subr.bf16.mxu1 %v4902_v48  ;;  %v4983_v47 = vld [vmem:[%s5270_s16 + $0x5ac] ss:$20 sps:$4 sm:$0xff]  }
  0xb0   : > { %v4986_v48 = vld [vmem:[%s5270_s16 + $0x82c] ss:$20 sps:$4 sm:$0xff]  }
  0xb1   : > { %2574 = vmatpush1.bf16.msra.mxu0 %v4897_v49  ;;  %v4981_v49 = vld [vmem:[%s5270_s16 + $0x5a8] ss:$20 sps:$4 sm:$0xff]  }
  0xb2   : > { %2615 = vmatpush1.bf16.msra.mxu1 %v4900_v51  ;;  %2575 = vmatprep.subr.bf16.mxu0 %v4905_v52  ;;  %v4984_v51 = vld [vmem:[%s5270_s16 + $0x828] ss:$20 sps:$4 sm:$0xff]  }
  0xb3   : > { %2616 = vmatprep.subr.bf16.mxu1 %v4908_v54  ;;  %v4989_v52 = vld [vmem:[%s5270_s16 + $0x5d4] ss:$20 sps:$4 sm:$0xff]  }
  0xb4   : > { %v4992_v54 = vld [vmem:[%s5270_s16 + $0x854] ss:$20 sps:$4 sm:$0xff]  }
  0xb5   : > { %2576 = vmatpush1.bf16.msra.mxu0 %v4903_v55  ;;  %v4987_v55 = vld [vmem:[%s5270_s16 + $0x5d0] ss:$20 sps:$4 sm:$0xff]  }
  0xb6   : > { %2617 = vmatpush1.bf16.msra.mxu1 %v4906_v56  ;;  %2577 = vmatprep.subr.bf16.mxu0 %v4911_v57  ;;  %v4990_v56 = vld [vmem:[%s5270_s16 + $0x850] ss:$20 sps:$4 sm:$0xff]  }
  0xb7   : > { %2618 = vmatprep.subr.bf16.mxu1 %v4914_v58  ;;  %v4995_v57 = vld [vmem:[%s5270_s16 + $0x5fc] ss:$20 sps:$4 sm:$0xff]  }
  0xb8   : > { %v4998_v58 = vld [vmem:[%s5270_s16 + $0x87c] ss:$20 sps:$4 sm:$0xff]  }
  0xb9   : > { %2578 = vmatpush1.bf16.msra.mxu0 %v4909_v59  ;;  %v4993_v59 = vld [vmem:[%s5270_s16 + $0x5f8] ss:$20 sps:$4 sm:$0xff]  }
  0xba   : > { %2619 = vmatpush1.bf16.msra.mxu1 %v4912_v60  ;;  %2579 = vmatprep.subr.bf16.mxu0 %v4917_v61  ;;  %v4996_v60 = vld [vmem:[%s5270_s16 + $0x878] ss:$20 sps:$4 sm:$0xff]  }
  0xbb   : > { %2620 = vmatprep.subr.bf16.mxu1 %v4920_v62  ;;  %v5001_v61 = vld [vmem:[%s5270_s16 + $0x624] ss:$20 sps:$4 sm:$0xff]  }
  0xbc   : > { %v5004_v62 = vld [vmem:[%s5270_s16 + $0x8a4] ss:$20 sps:$4 sm:$0xff]  }
  0xbd   : > { %2580 = vmatpush1.bf16.msra.mxu0 %v4915_v63  ;;  %v4999_v63 = vld [vmem:[%s5270_s16 + $0x620] ss:$20 sps:$4 sm:$0xff]  }
  0xbe   : > { %2621 = vmatpush1.bf16.msra.mxu1 %v4918_v0  ;;  %2581 = vmatprep.subr.bf16.mxu0 %v4923_v1  ;;  %v5002_v0 = vld [vmem:[%s5270_s16 + $0x8a0] ss:$20 sps:$4 sm:$0xff]  }
  0xbf   : > { %2622 = vmatprep.subr.bf16.mxu1 %v4926_v2  ;;  %v5007_v1 = vld [vmem:[%s5270_s16 + $0x64c] ss:$20 sps:$4 sm:$0xff]  }
  0xc0   : > { %v5010_v2 = vld [vmem:[%s5270_s16 + $0x8cc] ss:$20 sps:$4 sm:$0xff]  }
  0xc1   : > { %2582 = vmatpush1.bf16.msra.mxu0 %v4921_v3  ;;  %v5005_v3 = vld [vmem:[%s5270_s16 + $0x648] ss:$20 sps:$4 sm:$0xff]  }
  0xc2   : > { %2623 = vmatpush1.bf16.msra.mxu1 %v4924_v4  ;;  %2583 = vmatprep.subr.bf16.mxu0 %v4929_v5  ;;  %v5008_v4 = vld [vmem:[%s5270_s16 + $0x8c8] ss:$20 sps:$4 sm:$0xff]  }
  0xc3   : > { %2624 = vmatprep.subr.bf16.mxu1 %v4932_v6  ;;  %v5013_v5 = vld [vmem:[%s5270_s16 + $0x674] ss:$20 sps:$4 sm:$0xff]  }
  0xc4   : > { %v5016_v6 = vld [vmem:[%s5270_s16 + $0x8f4] ss:$20 sps:$4 sm:$0xff]  }
  0xc5   : > { %2584 = vmatpush1.bf16.msra.mxu0 %v4927_v7  ;;  %v5011_v7 = vld [vmem:[%s5270_s16 + $0x670] ss:$20 sps:$4 sm:$0xff]  }
  0xc6   : > { %2625 = vmatpush1.bf16.msra.mxu1 %v4930_v8  ;;  %2585 = vmatprep.subr.bf16.mxu0 %v4935_v11  ;;  %v5014_v8 = vld [vmem:[%s5270_s16 + $0x8f0] ss:$20 sps:$4 sm:$0xff]  }
  0xc7   : > { %2626 = vmatprep.subr.bf16.mxu1 %v4938_v12  ;;  %v5019_v11 = vld [vmem:[%s5270_s16 + $0x69c] ss:$20 sps:$4 sm:$0xff]  }
  0xc8   : > { %v5022_v12 = vld [vmem:[%s5270_s16 + $0x91c] ss:$20 sps:$4 sm:$0xff]  }
  0xc9   : > { %2586 = vmatpush1.bf16.msra.mxu0 %v4933_v13  ;;  %v5017_v13 = vld [vmem:[%s5270_s16 + $0x698] ss:$20 sps:$4 sm:$0xff]  }
  0xca   : > { %2627 = vmatpush1.bf16.msra.mxu1 %v4936_v14  ;;  %2587 = vmatprep.subr.bf16.mxu0 %v4941_v15  ;;  %v5020_v14 = vld [vmem:[%s5270_s16 + $0x918] ss:$20 sps:$4 sm:$0xff]  }
  0xcb   : > { %2628 = vmatprep.subr.bf16.mxu1 %v4944_v16  ;;  %v5025_v15 = vld [vmem:[%s5270_s16 + $0x6c4] ss:$20 sps:$4 sm:$0xff]  }
  0xcc   : > { %v5028_v16 = vld [vmem:[%s5270_s16 + $0x944] ss:$20 sps:$4 sm:$0xff]  }
  0xcd   : > { %2588 = vmatpush1.bf16.msra.mxu0 %v4939_v17  ;;  %v5023_v17 = vld [vmem:[%s5270_s16 + $0x6c0] ss:$20 sps:$4 sm:$0xff]  }
  0xce   : > { %2629 = vmatpush1.bf16.msra.mxu1 %v4942_v18  ;;  %2589 = vmatprep.subr.bf16.mxu0 %v4947_v19  ;;  %v5026_v18 = vld [vmem:[%s5270_s16 + $0x940] ss:$20 sps:$4 sm:$0xff]  }
  0xcf   : > { %2630 = vmatprep.subr.bf16.mxu1 %v4950_v20  ;;  %v5031_v19 = vld [vmem:[%s5270_s16 + $0x6ec] ss:$20 sps:$4 sm:$0xff]  }
  0xd0   : > { %v5034_v20 = vld [vmem:[%s5270_s16 + $0x96c] ss:$20 sps:$4 sm:$0xff]  }
  0xd1   : > { %2590 = vmatpush1.bf16.msra.mxu0 %v4945_v23  ;;  %v5029_v23 = vld [vmem:[%s5270_s16 + $0x6e8] ss:$20 sps:$4 sm:$0xff]  }
  0xd2   : > { %2631 = vmatpush1.bf16.msra.mxu1 %v4948_v24  ;;  %2591 = vmatprep.subr.bf16.mxu0 %v4953_v25  ;;  %v5032_v24 = vld [vmem:[%s5270_s16 + $0x968] ss:$20 sps:$4 sm:$0xff]  }
  0xd3   : > { %2632 = vmatprep.subr.bf16.mxu1 %v4956_v26  ;;  %v5037_v25 = vld [vmem:[%s5270_s16 + $0x714] ss:$20 sps:$4 sm:$0xff]  }
  0xd4   : > { %v5040_v26 = vld [vmem:[%s5270_s16 + $0x994] ss:$20 sps:$4 sm:$0xff]  }
  0xd5   : > { %2592 = vmatpush1.bf16.msra.mxu0 %v4951_v27  ;;  %v5035_v27 = vld [vmem:[%s5270_s16 + $0x710] ss:$20 sps:$4 sm:$0xff]  }
  0xd6   : > { %2633 = vmatpush1.bf16.msra.mxu1 %v4954_v28  ;;  %2643 = vmatprep.subr.bf16.mxu0 %v4959_v29  ;;  %v5038_v28 = vld [vmem:[%s5270_s16 + $0x990] ss:$20 sps:$4 sm:$0xff]  }
  0xd7   : > { %2684 = vmatprep.subr.bf16.mxu1 %v4962_v30  ;;  %v5043_v29 = vld [vmem:[%s5270_s16 + $0x73c] ss:$20 sps:$4 sm:$0xff]  }
  0xd8   : > { %2594 = vmatmul.mubr.bf16.vlgmr.msra.gmra.mrb[8].mxu0 %v5349_v9  ;;  %v5046_v30 = vld [vmem:[%s5270_s16 + $0x9bc] ss:$20 sps:$4 sm:$0xff]  }
  0xd9   : > { %2635 = vmatmul.mubr.bf16.vlgmr.msra.gmra.mrb[8].mxu1 %v5351_v10  ;;  %2644 = vmatpush1.bf16.msra.mxu0 %v4957_v31  ;;  %v5041_v31 = vld [vmem:[%s5270_s16 + $0x738] ss:$20 sps:$4 sm:$0xff]  }
  0xda   : > { %2685 = vmatpush1.bf16.msra.mxu1 %v4960_v32  ;;  %2645 = vmatprep.subr.bf16.mxu0 %v4965_v33  ;;  %v5044_v32 = vld [vmem:[%s5270_s16 + $0x9b8] ss:$20 sps:$4 sm:$0xff]  }
  0xdb   : > { %2686 = vmatprep.subr.bf16.mxu1 %v4968_v34  ;;  %2675 = vmatprep.mubr.bf16.mxu0 %v5382_v38  ;;  %v5049_v33 = vld [vmem:[%s5270_s16 + $0x764] ss:$20 sps:$4 sm:$0xff]  }
  0xdc   : > { %2716 = vmatprep.mubr.bf16.mxu1 %v5386_v41  ;;  %v5052_v34 = vld [vmem:[%s5270_s16 + $0x9e4] ss:$20 sps:$4 sm:$0xff]  }
  0xdd   : > { %2646 = vmatpush1.bf16.msra.mxu0 %v4963_v35  ;;  %v5047_v35 = vld [vmem:[%s5270_s16 + $0x760] ss:$20 sps:$4 sm:$0xff]  }
  0xde   : > { %2687 = vmatpush1.bf16.msra.mxu1 %v4966_v36  ;;  %2647 = vmatprep.subr.bf16.mxu0 %v4971_v37  ;;  %v5050_v36 = vld [vmem:[%s5270_s16 + $0x9e0] ss:$20 sps:$4 sm:$0xff]   ;;  %v5053_v37 = vld [vmem:[%s5270_s16 + $0x150] ss:$20 sps:$4 sm:$0xff]  }
  0xdf   : > { %2688 = vmatprep.subr.bf16.mxu1 %v4974_v39  ;;  %v5054_v39 = vld [vmem:[%s5270_s16 + $0x3d0] ss:$20 sps:$4 sm:$0xff]  }
  0xe1   : > { %2648 = vmatpush1.bf16.msra.mxu0 %v4969_v40  ;;  %v5055_v40 = vld [vmem:[%s5270_s16 + $0x10] ss:$20 sps:$4 sm:$0xff]  }
  0xe2   : > { %2689 = vmatpush1.bf16.msra.mxu1 %v4972_v42  ;;  %2649 = vmatprep.subr.bf16.mxu0 %v4977_v43  ;;  %v5056_v42 = vld [vmem:[%s5270_s16 + $0x290] ss:$20 sps:$4 sm:$0xff]   ;;  %v5057_v43 = vld [vmem:[%s5270_s16 + $0x178] ss:$20 sps:$4 sm:$0xff]  }
  0xe3   : > { %2690 = vmatprep.subr.bf16.mxu1 %v4980_v44  ;;  %v5058_v44 = vld [vmem:[%s5270_s16 + $0x3f8] ss:$20 sps:$4 sm:$0xff]  }
  0xe5   : > { %2650 = vmatpush1.bf16.msra.mxu0 %v4975_v45  ;;  %v5059_v45 = vld [vmem:[%s5270_s16 + $0x38] ss:$20 sps:$4 sm:$0xff]  }
  0xe6   : > { %2691 = vmatpush1.bf16.msra.mxu1 %v4978_v46  ;;  %2651 = vmatprep.subr.bf16.mxu0 %v4983_v47  ;;  %v5060_v46 = vld [vmem:[%s5270_s16 + $0x2b8] ss:$20 sps:$4 sm:$0xff]   ;;  %v5061_v47 = vld [vmem:[%s5270_s16 + $0x1a0] ss:$20 sps:$4 sm:$0xff]  }
  0xe7   : > { %2692 = vmatprep.subr.bf16.mxu1 %v4986_v48  ;;  %v5062_v48 = vld [vmem:[%s5270_s16 + $0x420] ss:$20 sps:$4 sm:$0xff]  }
  0xe9   : > { %2652 = vmatpush1.bf16.msra.mxu0 %v4981_v49  ;;  %v5063_v49 = vld [vmem:[%s5270_s16 + $0x60] ss:$20 sps:$4 sm:$0xff]  }
  0xea   : > { %2693 = vmatpush1.bf16.msra.mxu1 %v4984_v51  ;;  %2653 = vmatprep.subr.bf16.mxu0 %v4989_v52  ;;  %v5064_v51 = vld [vmem:[%s5270_s16 + $0x2e0] ss:$20 sps:$4 sm:$0xff]   ;;  %v5065_v52 = vld [vmem:[%s5270_s16 + $0x1c8] ss:$20 sps:$4 sm:$0xff]  }
  0xeb   : > { %2694 = vmatprep.subr.bf16.mxu1 %v4992_v54  ;;  %v5066_v54 = vld [vmem:[%s5270_s16 + $0x448] ss:$20 sps:$4 sm:$0xff]  }
  0xed   : > { %2654 = vmatpush1.bf16.msra.mxu0 %v4987_v55  ;;  %v5067_v55 = vld [vmem:[%s5270_s16 + $0x88] ss:$20 sps:$4 sm:$0xff]  }
  0xee   : > { %2695 = vmatpush1.bf16.msra.mxu1 %v4990_v56  ;;  %2655 = vmatprep.subr.bf16.mxu0 %v4995_v57  ;;  %v5070_v56 = vld [vmem:[%s5270_s16 + $0x470] ss:$20 sps:$4 sm:$0xff]  }
  0xef   : > { %2696 = vmatprep.subr.bf16.mxu1 %v4998_v58  ;;  %v5071_v57 = vld [vmem:[%s5270_s16 + $0xb0] ss:$20 sps:$4 sm:$0xff]  }
  0xf0   : > { %v5072_v58 = vld [vmem:[%s5270_s16 + $0x330] ss:$20 sps:$4 sm:$0xff]  }
  0xf1   : > { %2656 = vmatpush1.bf16.msra.mxu0 %v4993_v59  ;;  %v5073_v59 = vld [vmem:[%s5270_s16 + $0x218] ss:$20 sps:$4 sm:$0xff]  }
  0xf2   : > { %2697 = vmatpush1.bf16.msra.mxu1 %v4996_v60  ;;  %2657 = vmatprep.subr.bf16.mxu0 %v5001_v61  ;;  %v5074_v60 = vld [vmem:[%s5270_s16 + $0x498] ss:$20 sps:$4 sm:$0xff]  }
  0xf3   : > { %2698 = vmatprep.subr.bf16.mxu1 %v5004_v62  ;;  %v5075_v61 = vld [vmem:[%s5270_s16 + $0xd8] ss:$20 sps:$4 sm:$0xff]  }
  0xf4   : > { %v5076_v62 = vld [vmem:[%s5270_s16 + $0x358] ss:$20 sps:$4 sm:$0xff]  }
  0xf5   : > { %2658 = vmatpush1.bf16.msra.mxu0 %v4999_v63  ;;  %v5077_v63 = vld [vmem:[%s5270_s16 + $0x240] ss:$20 sps:$4 sm:$0xff]  }
  0xf6   : > { %2699 = vmatpush1.bf16.msra.mxu1 %v5002_v0  ;;  %2659 = vmatprep.subr.bf16.mxu0 %v5007_v1  ;;  %v5078_v0 = vld [vmem:[%s5270_s16 + $0x4c0] ss:$20 sps:$4 sm:$0xff]  }
  0xf7   : > { %2700 = vmatprep.subr.bf16.mxu1 %v5010_v2 }
  0xf9   : > { %2660 = vmatpush1.bf16.msra.mxu0 %v5005_v3 }
  0xfa   : > { %2701 = vmatpush1.bf16.msra.mxu1 %v5008_v4  ;;  %2661 = vmatprep.subr.bf16.mxu0 %v5013_v5 }
  0xfb   : > { %2702 = vmatprep.subr.bf16.mxu1 %v5016_v6 }
  0xfd   : > { %2662 = vmatpush1.bf16.msra.mxu0 %v5011_v7 }
  0xfe   : > { %2703 = vmatpush1.bf16.msra.mxu1 %v5014_v8  ;;  %2663 = vmatprep.subr.bf16.mxu0 %v5019_v11  ;;  %v5079_v11 = vld [vmem:[%s5270_s16 + $0x100] ss:$20 sps:$4 sm:$0xff]  }
  0xff   : > { %2704 = vmatprep.subr.bf16.mxu1 %v5022_v12  ;;  %v5080_v12 = vld [vmem:[%s5270_s16 + $0x380] ss:$20 sps:$4 sm:$0xff]  }
 0x101   : > { %2664 = vmatpush1.bf16.msra.mxu0 %v5017_v13 }
 0x102   : > { %2705 = vmatpush1.bf16.msra.mxu1 %v5020_v14  ;;  %2665 = vmatprep.subr.bf16.mxu0 %v5025_v15  ;;  %v5081_v15 = vld [vmem:[%s5270_s16 + $0x268] ss:$20 sps:$4 sm:$0xff]  }
 0x103   : > { %2706 = vmatprep.subr.bf16.mxu1 %v5028_v16  ;;  %v5082_v16 = vld [vmem:[%s5270_s16 + $0x4e8] ss:$20 sps:$4 sm:$0xff]  }
 0x105   : > { %2666 = vmatpush1.bf16.msra.mxu0 %v5023_v17  ;;  %v5083_v17 = vld [vmem:[%s5270_s16 + $0x128] ss:$20 sps:$4 sm:$0xff]  }
 0x106   : > { %2707 = vmatpush1.bf16.msra.mxu1 %v5026_v18  ;;  %2667 = vmatprep.subr.bf16.mxu0 %v5031_v19  ;;  %v5084_v18 = vld [vmem:[%s5270_s16 + $0x3a8] ss:$20 sps:$4 sm:$0xff]   ;;  %v5085_v19 = vld [vmem:[%s5270_s16 + $0x650] ss:$20 sps:$4 sm:$0xff]  }
 0x107   : > { %2708 = vmatprep.subr.bf16.mxu1 %v5034_v20  ;;  %v5086_v20 = vld [vmem:[%s5270_s16 + $0x8d0] ss:$20 sps:$4 sm:$0xff]  }
 0x109   : > { %2668 = vmatpush1.bf16.msra.mxu0 %v5029_v23  ;;  %v5087_v23 = vld [vmem:[%s5270_s16 + $0x510] ss:$20 sps:$4 sm:$0xff]  }
 0x10a   : > { %2709 = vmatpush1.bf16.msra.mxu1 %v5032_v24  ;;  %2669 = vmatprep.subr.bf16.mxu0 %v5037_v25  ;;  %v5088_v24 = vld [vmem:[%s5270_s16 + $0x790] ss:$20 sps:$4 sm:$0xff]   ;;  %v5089_v25 = vld [vmem:[%s5270_s16 + $0x678] ss:$20 sps:$4 sm:$0xff]  }
 0x10b   : > { %2710 = vmatprep.subr.bf16.mxu1 %v5040_v26  ;;  %v5090_v26 = vld [vmem:[%s5270_s16 + $0x8f8] ss:$20 sps:$4 sm:$0xff]  }
 0x10d   : > { %2670 = vmatpush1.bf16.msra.mxu0 %v5035_v27  ;;  %v5091_v27 = vld [vmem:[%s5270_s16 + $0x538] ss:$20 sps:$4 sm:$0xff]  }
 0x10e   : > { %2711 = vmatpush1.bf16.msra.mxu1 %v5038_v28  ;;  %2671 = vmatprep.subr.bf16.mxu0 %v5043_v29  ;;  %v5092_v28 = vld [vmem:[%s5270_s16 + $0x7b8] ss:$20 sps:$4 sm:$0xff]   ;;  %v5093_v29 = vld [vmem:[%s5270_s16 + $0x6a0] ss:$20 sps:$4 sm:$0xff]  }
 0x10f   : > { %2712 = vmatprep.subr.bf16.mxu1 %v5046_v30  ;;  %v5094_v30 = vld [vmem:[%s5270_s16 + $0x920] ss:$20 sps:$4 sm:$0xff]  }
 0x111   : > { %2672 = vmatpush1.bf16.msra.mxu0 %v5041_v31  ;;  %v5097_v31 = vld [vmem:[%s5270_s16 + $0x6c8] ss:$20 sps:$4 sm:$0xff]  }
 0x112   : > { %2713 = vmatpush1.bf16.msra.mxu1 %v5044_v32  ;;  %2673 = vmatprep.subr.bf16.mxu0 %v5049_v33  ;;  %v5098_v32 = vld [vmem:[%s5270_s16 + $0x948] ss:$20 sps:$4 sm:$0xff]  }
 0x113   : > { %2714 = vmatprep.subr.bf16.mxu1 %v5052_v34  ;;  %v5099_v33 = vld [vmem:[%s5270_s16 + $0x588] ss:$20 sps:$4 sm:$0xff]   ;;  %v5102_v34 = vld [vmem:[%s5270_s16 + $0x970] ss:$20 sps:$4 sm:$0xff]  }
 0x115   : > { %2674 = vmatpush1.bf16.msra.mxu0 %v5047_v35  ;;  %v5103_v35 = vld [vmem:[%s5270_s16 + $0x5b0] ss:$20 sps:$4 sm:$0xff]  }
 0x116   : > { %2715 = vmatpush1.bf16.msra.mxu1 %v5050_v36  ;;  %4134 = vmatprep.subr.bf16.mxu0 %v5053_v37  ;;  %v5104_v36 = vld [vmem:[%s5270_s16 + $0x830] ss:$20 sps:$4 sm:$0xff]   ;;  %v5105_v37 = vld [vmem:[%s5270_s16 + $0x718] ss:$20 sps:$4 sm:$0xff]  }
 0x117   : > { %4156 = vmatprep.subr.bf16.mxu1 %v5054_v39  ;;  %v5106_v39 = vld [vmem:[%s5270_s16 + $0x998] ss:$20 sps:$4 sm:$0xff]  }
 0x118   : > { %2676 = vmatmul.mubr.bf16.vlgmr.msra.gmra.mrb[12].mxu0 %v5429_v21 }
 0x119   : > { %2717 = vmatmul.mubr.bf16.vlgmr.msra.gmra.mrb[12].mxu1 %v5431_v22  ;;  %4135 = vmatpush3.bf16.msra.mxu0 %v5055_v40  ;;  %v5107_v40 = vld [vmem:[%s5270_s16 + $0x5d8] ss:$20 sps:$4 sm:$0xff]  }
 0x11a   : > { %4157 = vmatpush3.bf16.msra.mxu1 %v5056_v42  ;;  %4136 = vmatprep.subr.bf16.mxu0 %v5057_v43  ;;  %v5108_v42 = vld [vmem:[%s5270_s16 + $0x858] ss:$20 sps:$4 sm:$0xff]   ;;  %v5109_v43 = vld [vmem:[%s5270_s16 + $0x740] ss:$20 sps:$4 sm:$0xff]  }
 0x11b   : > { %4158 = vmatprep.subr.bf16.mxu1 %v5058_v44  ;;  %2757 = vmatprep.mubr.bf16.mxu0 %v5322_v50  ;;  %v5068_v50 = vld [vmem:[%s5270_s16 + $0x308] ss:$20 sps:$4 sm:$0xff]   ;;  %v5110_v44 = vld [vmem:[%s5270_s16 + $0x9c0] ss:$20 sps:$4 sm:$0xff]  }
 0x11c   : > { %2797 = vmatprep.mubr.bf16.mxu1 %v5326_v53  ;;  %v5069_v53 = vld [vmem:[%s5270_s16 + $0x1f0] ss:$20 sps:$4 sm:$0xff]  }
 0x11d   : > { %4137 = vmatpush3.bf16.msra.mxu0 %v5059_v45  ;;  %v5111_v45 = vld [vmem:[%s5270_s16 + $0x600] ss:$20 sps:$4 sm:$0xff]  }
 0x11e   : > { %4159 = vmatpush3.bf16.msra.mxu1 %v5060_v46  ;;  %4138 = vmatprep.subr.bf16.mxu0 %v5061_v47  ;;  %v5112_v46 = vld [vmem:[%s5270_s16 + $0x880] ss:$20 sps:$4 sm:$0xff]   ;;  %v5113_v47 = vld [vmem:[%s5270_s16 + $0x768] ss:$20 sps:$4 sm:$0xff]  }
 0x11f   : > { %4160 = vmatprep.subr.bf16.mxu1 %v5062_v48  ;;  %v5114_v48 = vld [vmem:[%s5270_s16 + $0x9e8] ss:$20 sps:$4 sm:$0xff]  }
 0x121   : > { %4139 = vmatpush3.bf16.msra.mxu0 %v5063_v49  ;;  %v5115_v49 = vld [vmem:[%s5270_s16 + $0x628] ss:$20 sps:$4 sm:$0xff]  }
 0x122   : > { %4161 = vmatpush3.bf16.msra.mxu1 %v5064_v51  ;;  %4140 = vmatprep.subr.bf16.mxu0 %v5065_v52  ;;  %v5116_v51 = vld [vmem:[%s5270_s16 + $0x8a8] ss:$20 sps:$4 sm:$0xff]  }
 0x123   : > { %4162 = vmatprep.subr.bf16.mxu1 %v5066_v54 }
 0x125   : > { %4141 = vmatpush3.bf16.msra.mxu0 %v5067_v55 }
 0x126   : > { %4163 = vmatpush3.bf16.msra.mxu1 %v5068_v50  ;;  %4142 = vmatprep.subr.bf16.mxu0 %v5069_v53 }
 0x127   : > { %4164 = vmatprep.subr.bf16.mxu1 %v5070_v56  ;;  %v344_v56 = vld [vmem:[#allocation2] sm:$0xff] }
 0x129   : > { %4143 = vmatpush3.bf16.msra.mxu0 %v5071_v57 }
 0x12a   : > { %4165 = vmatpush3.bf16.msra.mxu1 %v5072_v58  ;;  %4144 = vmatprep.subr.bf16.mxu0 %v5073_v59 }
 0x12b   : > { %4166 = vmatprep.subr.bf16.mxu1 %v5074_v60  ;;  %v2431_v1 = vpop.f32.mrb[0].mxu0 }
 0x12c   : > { %v2472_v2 = vpop.f32.mrb[0].mxu1  ;;  %v2433_v4 = vpop.f32.mrb[1].mxu0 }
 0x12d   : > { %v5597_v3 = vadd.f32 %v2472_v2, %v2431_v1  ;;  %v2474_v5 = vpop.f32.mrb[1].mxu1  ;;  %v2435_v7 = vpop.f32.mrb[2].mxu0  ;;  %4145 = vmatpush3.bf16.msra.mxu0 %v5075_v61  ;;  %v345_v61 = vld [vmem:[#allocation2 + $0x8] sm:$0xff] }
 0x12e   : > { %v5599_v6 = vadd.f32 %v2474_v5, %v2433_v4  ;;  %v2476_v8 = vpop.f32.mrb[2].mxu1  ;;  %4167 = vmatpush3.bf16.msra.mxu1 %v5076_v62  ;;  %v2436_v13 = vpop.f32.mrb[3].mxu0  ;;  %4146 = vmatprep.subr.bf16.mxu0 %v5077_v63 }
 0x12f   : > { %v2477_v14 = vpop.f32.mrb[3].mxu1  ;;  %4168 = vmatprep.subr.bf16.mxu1 %v5078_v0 }
 0x131   : > { %4147 = vmatpush3.bf16.msra.mxu0 %v5079_v11 }
 0x132   : > { %4169 = vmatpush3.bf16.msra.mxu1 %v5080_v12  ;;  %4148 = vmatprep.subr.bf16.mxu0 %v5081_v15 }
 0x133   : > { %4170 = vmatprep.subr.bf16.mxu1 %v5082_v16 }
 0x135   : > { %4149 = vmatpush3.bf16.msra.mxu0 %v5083_v17 }
 0x136   : > { %4171 = vmatpush3.bf16.msra.mxu1 %v5084_v18  ;;  %4178 = vmatprep.subr.bf16.mxu0 %v5085_v19  ;;  %v346_v18 = vld [vmem:[#allocation2 + $0x10] sm:$0xff] }
 0x137   : > { %4200 = vmatprep.subr.bf16.mxu1 %v5086_v20 }
 0x138   : > { %2758 = vmatmul.mubr.bf16.vlgmr.msra.gmra.mrb[16].mxu0 %v5349_v9  ;;  %v5095_v9 = vld [vmem:[%s5270_s16 + $0x560] ss:$20 sps:$4 sm:$0xff]  }
 0x139   : > { %2798 = vmatmul.mubr.bf16.vlgmr.msra.gmra.mrb[16].mxu1 %v5351_v10  ;;  %4179 = vmatpush3.bf16.msra.mxu0 %v5087_v23  ;;  %v5096_v10 = vld [vmem:[%s5270_s16 + $0x7e0] ss:$20 sps:$4 sm:$0xff]  }
 0x13a   : > { %4201 = vmatpush3.bf16.msra.mxu1 %v5088_v24  ;;  %4180 = vmatprep.subr.bf16.mxu0 %v5089_v25  ;;  %v347_v25 = vld [vmem:[#allocation2 + $0x18] sm:$0xff] }
 0x13b   : > { %4202 = vmatprep.subr.bf16.mxu1 %v5090_v26  ;;  %2837 = vmatprep.mubr.bf16.mxu0 %v5382_v38  ;;  %v5100_v38 = vld [vmem:[%s5270_s16 + $0x808] ss:$20 sps:$4 sm:$0xff]  }
 0x13c   : > { %2877 = vmatprep.mubr.bf16.mxu1 %v5386_v41  ;;  %v5101_v41 = vld [vmem:[%s5270_s16 + $0x6f0] ss:$20 sps:$4 sm:$0xff]  }
 0x13d   : > { %4181 = vmatpush3.bf16.msra.mxu0 %v5091_v27 }
 0x13e   : > { %4203 = vmatpush3.bf16.msra.mxu1 %v5092_v28  ;;  %4182 = vmatprep.subr.bf16.mxu0 %v5093_v29 }
 0x13f   : > { %4204 = vmatprep.subr.bf16.mxu1 %v5094_v30 }
 0x141   : > { %4183 = vmatpush3.bf16.msra.mxu0 %v5095_v9 }
 0x142   : > { %4205 = vmatpush3.bf16.msra.mxu1 %v5096_v10  ;;  %4184 = vmatprep.subr.bf16.mxu0 %v5097_v31 }
 0x143   : > { %4206 = vmatprep.subr.bf16.mxu1 %v5098_v32 }
 0x145   : > { %4185 = vmatpush3.bf16.msra.mxu0 %v5099_v33 }
 0x146   : > { %4207 = vmatpush3.bf16.msra.mxu1 %v5100_v38  ;;  %4186 = vmatprep.subr.bf16.mxu0 %v5101_v41 }
 0x147   : > { %4208 = vmatprep.subr.bf16.mxu1 %v5102_v34 }
 0x149   : > { %4187 = vmatpush3.bf16.msra.mxu0 %v5103_v35 }
 0x14a   : > { %4209 = vmatpush3.bf16.msra.mxu1 %v5104_v36  ;;  %4188 = vmatprep.subr.bf16.mxu0 %v5105_v37 }
 0x14b   : > { %4210 = vmatprep.subr.bf16.mxu1 %v5106_v39 }
 0x14d   : > { %4189 = vmatpush3.bf16.msra.mxu0 %v5107_v40 }
 0x14e   : > { %4211 = vmatpush3.bf16.msra.mxu1 %v5108_v42  ;;  %4190 = vmatprep.subr.bf16.mxu0 %v5109_v43 }
 0x14f   : > { %4212 = vmatprep.subr.bf16.mxu1 %v5110_v44 }
 0x151   : > { %4191 = vmatpush3.bf16.msra.mxu0 %v5111_v45 }
 0x152   : > { %4213 = vmatpush3.bf16.msra.mxu1 %v5112_v46  ;;  %4192 = vmatprep.subr.bf16.mxu0 %v5113_v47 }
 0x153   : > { %4214 = vmatprep.subr.bf16.mxu1 %v5114_v48 }
 0x155   : > { %4193 = vmatpush3.bf16.msra.mxu0 %v5115_v49 }
 0x156   : > { %4215 = vmatpush3.bf16.msra.mxu1 %v5116_v51 }
 0x158   : > { %2838 = vmatmul.mubr.bf16.vlgmr.msra.gmra.mrb[20].mxu0 %v5429_v21 }
 0x159   : > { %2878 = vmatmul.mubr.bf16.vlgmr.msra.gmra.mrb[20].mxu1 %v5431_v22 }
 0x16b   : > { %v2513_v52 = vpop.f32.mrb[4].mxu0 }
 0x16c   : > { %v2554_v54 = vpop.f32.mrb[4].mxu1  ;;  %v2514_v55 = vadd.f32 %v2513_v52, %v5597_v3  ;;  %v2515_v50 = vpop.f32.mrb[5].mxu0  ;;  %v348_v52 = vld [vmem:[#allocation2 + $0x20] sm:$0xff] }
 0x16d   : > { %v2556_v53 = vpop.f32.mrb[5].mxu1  ;;  %v2516_v57 = vadd.f32 %v2515_v50, %v5599_v6  ;;  %v2517_v58 = vpop.f32.mrb[6].mxu0  ;;  %v3119_v50 = vld [vmem:[%s6322_s3 + $0x80] sm:$0xff] (!%p4123_p6) }
 0x16e   : > { %v2558_v59 = vpop.f32.mrb[6].mxu1  ;;  %v2555_v60 = vadd.f32 %v2554_v54, %v2514_v55  ;;  %v2518_v62 = vpop.f32.mrb[7].mxu0  ;;  %v3104_v58 = vld [vmem:[%s6322_s3 + $0x8] sm:$0xff] (!%p4123_p6) }
 0x16f   : > { %v2559_v63 = vpop.f32.mrb[7].mxu1  ;;  %v2557_v0 = vadd.f32 %v2556_v53, %v2516_v57  ;;  %v3120_v53 = vld [vmem:[%s6322_s3 + $0x88] sm:$0xff] (!%p4123_p6)  ;;  %v3151_v59 = vld [vmem:[%s6322_s3 + $0x180] sm:$0xff] (!%p4123_p6) }
 0x170   : > { %v2885_v1 = vadd.f32 %v2555_v60, %v344_v56  ;;  %v3103_v56 = vld [vmem:[%s6322_s3] sm:$0xff] (!%p4123_p6)  ;;  %v4466_v57 = vpack.c.bf16 (!%p4123_p6), %v3120_v53, %v3119_v50  ;;  %v3152_v60 = vld [vmem:[%s6322_s3 + $0x188] sm:$0xff] (!%p4123_p6)  ;;  %v3121_v63 = vld [vmem:[%s6322_s3 + $0x90] sm:$0xff] (!%p4123_p6) }
 0x171   : > { %v2886_v21 = vadd.f32 %v2557_v0, %v345_v61  ;;  %v4468_v61 = vpack.c.bf16 (!%p4123_p6), %v3104_v58, %v3103_v56  ;;  %v4498_v62 = vpack.c.bf16 (!%p4123_p6), %v3152_v60, %v3151_v59  ;;  %v3122_v0 = vld [vmem:[%s6322_s3 + $0x98] sm:$0xff] (!%p4123_p6)  ;;  %v3113_v56 = vld [vmem:[%s6322_s3 + $0x50] sm:$0xff] (!%p4123_p6)  ;;  %v3131_v59 = vld [vmem:[%s6322_s3 + $0xe0] sm:$0xff] (!%p4123_p6) }
 0x172   : > { %2890 = vst [vmem:[#allocation2] sm:$0xff] %v2885_v1  ;;  %v3135_v1 = vld [vmem:[%s6322_s3 + $0x100] sm:$0xff] (!%p4123_p6)  ;;  %4467 = vmatprep.subr.bf16.mxu0 (!%p4123_p6), %v4466_v57  ;;  %v3162_v50 = vld [vmem:[%s6322_s3 + $0x1d8] sm:$0xff] (!%p4123_p6)  ;;  %v3132_v60 = vld [vmem:[%s6322_s3 + $0xe8] sm:$0xff] (!%p4123_p6) }
 0x173   : > { %2891 = vst [vmem:[#allocation2 + $0x8] sm:$0xff] %v2886_v21  ;;  %v4470_v21 = vpack.c.bf16 (!%p4123_p6), %v3122_v0, %v3121_v63  ;;  %4469 = vmatpush3.bf16.msra.mxu0 (!%p4123_p6), %v4468_v61  ;;  %4499 = vmatprep.subr.bf16.mxu1 (!%p4123_p6), %v4498_v62  ;;  %v3114_v57 = vld [vmem:[%s6322_s3 + $0x58] sm:$0xff] (!%p4123_p6)  ;;  %v3145_v0 = vld [vmem:[%s6322_s3 + $0x150] sm:$0xff] (!%p4123_p6) }
 0x175   : > { %4471 = vmatprep.subr.bf16.mxu0 (!%p4123_p6), %v4470_v21 }
 0x1ab   : > { %v2595_v22 = vpop.f32.mrb[8].mxu0 }
 0x1ac   : > { %v2636_v2 = vpop.f32.mrb[8].mxu1  ;;  %v2597_v3 = vpop.f32.mrb[9].mxu0 }
 0x1ad   : > { %v2637_v4 = vadd.f32 %v2636_v2, %v2595_v22  ;;  %v2638_v5 = vpop.f32.mrb[9].mxu1  ;;  %v2599_v8 = vpop.f32.mrb[10].mxu0  ;;  %v3136_v22 = vld [vmem:[%s6322_s3 + $0x108] sm:$0xff] (!%p4123_p6)  ;;  %v3105_v2 = vld [vmem:[%s6322_s3 + $0x10] sm:$0xff] (!%p4123_p6) }
 0x1ae   : > { %v2639_v7 = vadd.f32 %v2638_v5, %v2597_v3  ;;  %v2640_v11 = vpop.f32.mrb[10].mxu1  ;;  %v2600_v6 = vpop.f32.mrb[11].mxu0  ;;  %v4500_v3 = vpack.c.bf16 (!%p4123_p6), %v3136_v22, %v3135_v1  ;;  %v3154_v8 = vld [vmem:[%s6322_s3 + $0x198] sm:$0xff] (!%p4123_p6)  ;;  %v4488_v22 = vpack.c.bf16 (!%p4123_p6), %v3114_v57, %v3113_v56 }
 0x1af   : > { %v2641_v12 = vpop.f32.mrb[11].mxu1  ;;  %v3123_v11 = vld [vmem:[%s6322_s3 + $0xa0] sm:$0xff] (!%p4123_p6)  ;;  %v3146_v1 = vld [vmem:[%s6322_s3 + $0x158] sm:$0xff] (!%p4123_p6) }
 0x1b0   : > { %v3124_v12 = vld [vmem:[%s6322_s3 + $0xa8] sm:$0xff] (!%p4123_p6)  ;;  %4501 = vmatpush3.bf16.msra.mxu1 (!%p4123_p6), %v4500_v3 }
 0x1b1   : > { %v3164_v3 = vld [vmem:[%s6322_s3 + $0x1e8] sm:$0xff] (!%p4123_p6) }
 0x1eb   : > { %v2677_v13 = vpop.f32.mrb[12].mxu0 }
 0x1ec   : > { %v2718_v14 = vpop.f32.mrb[12].mxu1  ;;  %v2678_v15 = vadd.f32 %v2677_v13, %v2637_v4  ;;  %v2679_v16 = vpop.f32.mrb[13].mxu0  ;;  %v3106_v4 = vld [vmem:[%s6322_s3 + $0x18] sm:$0xff] (!%p4123_p6)  ;;  %v3137_v13 = vld [vmem:[%s6322_s3 + $0x110] sm:$0xff] (!%p4123_p6) }
 0x1ed   : > { %v2720_v17 = vpop.f32.mrb[13].mxu1  ;;  %v2680_v19 = vadd.f32 %v2679_v16, %v2639_v7  ;;  %v2681_v20 = vpop.f32.mrb[14].mxu0  ;;  %v4472_v5 = vpack.c.bf16 (!%p4123_p6), %v3106_v4, %v3105_v2  ;;  %v3153_v7 = vld [vmem:[%s6322_s3 + $0x190] sm:$0xff] (!%p4123_p6)  ;;  %v3115_v2 = vld [vmem:[%s6322_s3 + $0x60] sm:$0xff] (!%p4123_p6) }
 0x1ee   : > { %v2722_v23 = vpop.f32.mrb[14].mxu1  ;;  %v2719_v24 = vadd.f32 %v2718_v14, %v2678_v15  ;;  %v2682_v26 = vpop.f32.mrb[15].mxu0  ;;  %v4502_v6 = vpack.c.bf16 (!%p4123_p6), %v3154_v8, %v3153_v7  ;;  %v3138_v14 = vld [vmem:[%s6322_s3 + $0x118] sm:$0xff] (!%p4123_p6)  ;;  %v4474_v15 = vpack.c.bf16 (!%p4123_p6), %v3124_v12, %v3123_v11  ;;  %v3156_v20 = vld [vmem:[%s6322_s3 + $0x1a8] sm:$0xff] (!%p4123_p6)  ;;  %v3163_v4 = vld [vmem:[%s6322_s3 + $0x1e0] sm:$0xff] (!%p4123_p6)  ;;  %v4520_v12 = vpack.c.bf16 (!%p4123_p6), %v3146_v1, %v3145_v0 }
 0x1ef   : > { %v2723_v27 = vpop.f32.mrb[15].mxu1  ;;  %v2721_v28 = vadd.f32 %v2720_v17, %v2680_v19  ;;  %v4504_v16 = vpack.c.bf16 (!%p4123_p6), %v3138_v14, %v3137_v13  ;;  %v3107_v17 = vld [vmem:[%s6322_s3 + $0x20] sm:$0xff] (!%p4123_p6)  ;;  %v3125_v23 = vld [vmem:[%s6322_s3 + $0xb0] sm:$0xff] (!%p4123_p6)  ;;  %4473 = vmatpush3.bf16.msra.mxu0 (!%p4123_p6), %v4472_v5  ;;  %v4490_v5 = vpack.c.bf16 (!%p4123_p6), %v3132_v60, %v3131_v59  ;;  %v3116_v7 = vld [vmem:[%s6322_s3 + $0x68] sm:$0xff] (!%p4123_p6)  ;;  %v5200_v59 = vmov (!%p4123_p6), 0.0|0.0  }
 0x1f0   : > { %v2887_v29 = vadd.f32 %v2719_v24, %v346_v18  ;;  %v3108_v18 = vld [vmem:[%s6322_s3 + $0x28] sm:$0xff] (!%p4123_p6)  ;;  %v3155_v19 = vld [vmem:[%s6322_s3 + $0x1a0] sm:$0xff] (!%p4123_p6)  ;;  %4503 = vmatprep.subr.bf16.mxu1 (!%p4123_p6), %v4502_v6  ;;  %v3126_v24 = vld [vmem:[%s6322_s3 + $0xb8] sm:$0xff] (!%p4123_p6)  ;;  %4475 = vmatprep.subr.bf16.mxu0 (!%p4123_p6), %v4474_v15 }
 0x1f1   : > { %v2888_v30 = vadd.f32 %v2721_v28, %v347_v25  ;;  %v4476_v25 = vpack.c.bf16 (!%p4123_p6), %v3108_v18, %v3107_v17  ;;  %v4506_v26 = vpack.c.bf16 (!%p4123_p6), %v3156_v20, %v3155_v19  ;;  %v3139_v27 = vld [vmem:[%s6322_s3 + $0x120] sm:$0xff] (!%p4123_p6)  ;;  %v3140_v28 = vld [vmem:[%s6322_s3 + $0x128] sm:$0xff] (!%p4123_p6)  ;;  %4505 = vmatpush3.bf16.msra.mxu1 (!%p4123_p6), %v4504_v16  ;;  %v3133_v13 = vld [vmem:[%s6322_s3 + $0xf0] sm:$0xff] (!%p4123_p6)  ;;  %v4522_v18 = vpack.c.bf16 (!%p4123_p6), %v3164_v3, %v3163_v4 }
 0x1f2   : > { %2892 = vst [vmem:[#allocation2 + $0x10] sm:$0xff] %v2887_v29  ;;  %v3109_v29 = vld [vmem:[%s6322_s3 + $0x30] sm:$0xff] (!%p4123_p6)  ;;  %v2900_v8 = vld [vmem:[#allocation2 + $0x8] sm:$0xff] (!%p4123_p6)  ;;  %v3134_v14 = vld [vmem:[%s6322_s3 + $0xf8] sm:$0xff] (!%p4123_p6) }
 0x1f3   : > { %2893 = vst [vmem:[#allocation2 + $0x18] sm:$0xff] %v2888_v30  ;;  %v4478_v30 = vpack.c.bf16 (!%p4123_p6), %v3126_v24, %v3125_v23  ;;  %4507 = vmatprep.subr.bf16.mxu1 (!%p4123_p6), %v4506_v26  ;;  %4477 = vmatpush3.bf16.msra.mxu0 (!%p4123_p6), %v4476_v25  ;;  %v5824_v11 = vld [vmem:[%s6321_s2] ss:$4 sm:$0x1f] (!%p4123_p6)  ;;  %v4492_v25 = vpack.c.bf16 (!%p4123_p6), %v3116_v7, %v3115_v2  ;;  %v3166_v26 = vld [vmem:[%s6322_s3 + $0x1f8] sm:$0xff] (!%p4123_p6) }
 0x1f4   : > { %v3147_v15 = vld [vmem:[%s6322_s3 + $0x160] sm:$0xff] (!%p4123_p6)  ;;  %v3148_v19 = vld [vmem:[%s6322_s3 + $0x168] sm:$0xff] (!%p4123_p6)  ;;  %v3165_v20 = vld [vmem:[%s6322_s3 + $0x1f0] sm:$0xff] (!%p4123_p6) }
 0x1f5   : > { %4479 = vmatprep.subr.bf16.mxu0 (!%p4123_p6), %v4478_v30  ;;  %v2899_v23 = vld [vmem:[#allocation2] sm:$0xff] (!%p4123_p6) }
 0x1f9   : > { %v2901_v30 = vld [vmem:[#allocation2 + $0x10] sm:$0xff] (!%p4123_p6) }
 0x20b   : > { %v4150_v9 = vpop.f32.mrb[16].mxu0 }
 0x20c   : > { %v4172_v10 = vpop.f32.mrb[16].mxu1  ;;  %v4151_v31 = vpop.f32.mrb[17].mxu0 }
 0x20d   : > { %v4173_v32 = vpop.f32.mrb[17].mxu1  ;;  %v4152_v33 = vadd.f32 %v4151_v31, %v4150_v9  ;;  %v4153_v41 = vpop.f32.mrb[18].mxu0  ;;  %v3110_v9 = vld [vmem:[%s6322_s3 + $0x38] sm:$0xff] (!%p4123_p6) }
 0x20e   : > { %v4174_v38 = vadd.f32 %v4173_v32, %v4172_v10  ;;  %v4175_v34 = vpop.f32.mrb[18].mxu1  ;;  %v4154_v35 = vpop.f32.mrb[19].mxu0  ;;  %v3157_v10 = vld [vmem:[%s6322_s3 + $0x1b0] sm:$0xff] (!%p4123_p6)  ;;  %v3158_v31 = vld [vmem:[%s6322_s3 + $0x1b8] sm:$0xff] (!%p4123_p6)  ;;  %v4508_v32 = vpack.c.bf16 (!%p4123_p6), %v3140_v28, %v3139_v27  ;;  %v2906_v41 = vlaneseq (!%p4123_p6) }
 0x20f   : > { %v4176_v36 = vpop.f32.mrb[19].mxu1  ;;  %v4510_v34 = vpack.c.bf16 (!%p4123_p6), %v3158_v31, %v3157_v10  ;;  %v3141_v35 = vld [vmem:[%s6322_s3 + $0x130] sm:$0xff] (!%p4123_p6)  ;;  %v3118_v31 = vld [vmem:[%s6322_s3 + $0x78] sm:$0xff] (!%p4123_p6) }
 0x210   : > { %v2800_v37 = vadd.f32 %v4174_v38, %v4152_v33  ;;  %v3127_v33 = vld [vmem:[%s6322_s3 + $0xc0] sm:$0xff] (!%p4123_p6)  ;;  %v3128_v38 = vld [vmem:[%s6322_s3 + $0xc8] sm:$0xff] (!%p4123_p6)  ;;  %v3142_v36 = vld [vmem:[%s6322_s3 + $0x138] sm:$0xff] (!%p4123_p6)  ;;  %4509 = vmatpush3.bf16.msra.mxu1 (!%p4123_p6), %v4508_v32 }
 0x211   : > { %4511 = vmatprep.subr.bf16.mxu1 (!%p4123_p6), %v4510_v34  ;;  %v3117_v10 = vld [vmem:[%s6322_s3 + $0x70] sm:$0xff] (!%p4123_p6) }
 0x22b   : > { %v4194_v39 = vpop.f32.mrb[20].mxu0 }
 0x22c   : > { %v4216_v40 = vpop.f32.mrb[20].mxu1  ;;  %v4195_v42 = vpop.f32.mrb[21].mxu0 }
 0x22d   : > { %v4217_v43 = vpop.f32.mrb[21].mxu1  ;;  %v4196_v44 = vadd.f32 %v4195_v42, %v4194_v39  ;;  %v4197_v46 = vpop.f32.mrb[22].mxu0  ;;  %v3159_v39 = vld [vmem:[%s6322_s3 + $0x1c0] sm:$0xff] (!%p4123_p6)  ;;  %v4482_v42 = vpack.c.bf16 (!%p4123_p6), %v3128_v38, %v3127_v33  ;;  %v4524_v38 = vpack.c.bf16 (!%p4123_p6), %v3148_v19, %v3147_v15 }
 0x22e   : > { %v4218_v45 = vadd.f32 %v4217_v43, %v4216_v40  ;;  %v4219_v47 = vpop.f32.mrb[22].mxu1  ;;  %v4198_v48 = vpop.f32.mrb[23].mxu0  ;;  %v3160_v40 = vld [vmem:[%s6322_s3 + $0x1c8] sm:$0xff] (!%p4123_p6)  ;;  %v3111_v43 = vld [vmem:[%s6322_s3 + $0x40] sm:$0xff] (!%p4123_p6)  ;;  %v3129_v46 = vld [vmem:[%s6322_s3 + $0xd0] sm:$0xff] (!%p4123_p6) }
 0x22f   : > { %v4220_v49 = vpop.f32.mrb[23].mxu1  ;;  %v2840_v51 = vadd.f32 %v4196_v44, %v2800_v37  ;;  %2898 = sbr.rel (%p4123_p6) target bundleno = 937 (0x3a9), region = 56  ;;  %v4480_v37 = vpack.c.bf16 (!%p4123_p6), %v3110_v9, %v3109_v29  ;;  %v3112_v44 = vld [vmem:[%s6322_s3 + $0x48] sm:$0xff] (!%p4123_p6)  ;;  %v3130_v47 = vld [vmem:[%s6322_s3 + $0xd8] sm:$0xff] (!%p4123_p6)  ;;  %v5768_v48 = vshrl.u32 (!%p4123_p6), %v2906_v41, 7  ;;  %v4494_v9 = vpack.c.bf16 (!%p4123_p6), %v3134_v14, %v3133_v13 }
 0x230   : > { %v4514_v49 = vpack.c.bf16 (!%p4123_p6), %v3160_v40, %v3159_v39  ;;  %v4486_v53 = vpack.c.bf16 (!%p4123_p6), %v3130_v47, %v3129_v46  ;;  %v2902_v29 = vld [vmem:[#allocation2 + $0x18] sm:$0xff] (!%p4123_p6)  ;;  %v3419_v46 = vld [vmem:[%s6324_s5 + $0x88] sm:$0xff] (!%p4123_p6) }
 0x231   : > { %v2880_v54 = vadd.f32 %v4218_v45, %v2840_v51  ;;  %v4512_v45 = vpack.c.bf16 (!%p4123_p6), %v3142_v36, %v3141_v35  ;;  %v3143_v51 = vld [vmem:[%s6322_s3 + $0x140] sm:$0xff] (!%p4123_p6)  ;;  %4481 = vmatpush3.bf16.msra.mxu0 (!%p4123_p6), %v4480_v37  ;;  %v5795_v61 = vsub.s32 (!%p4123_p6), 1, %v5768_v48  ;;  %v5798_v62 = vsub.s32 (!%p4123_p6), 0, %v5768_v48  ;;  %v3149_v36 = vld [vmem:[%s6322_s3 + $0x170] sm:$0xff] (!%p4123_p6)  ;;  %v3150_v37 = vld [vmem:[%s6322_s3 + $0x178] sm:$0xff] (!%p4123_p6) }
 0x232   : > { %4483 = vmatprep.subr.bf16.mxu0 (!%p4123_p6), %v4482_v42  ;;  %v5807_v21 = vsub.s32 (!%p4123_p6), 3, %v5768_v48  ;;  %v5827_v6 = vsub.s32 (!%p4123_p6), 2, %v5768_v48  ;;  %v4526_v35 = vpack.c.bf16 (!%p4123_p6), %v3166_v26, %v3165_v20  ;;  %v4496_v42 = vpack.c.bf16 (!%p4123_p6), %v3118_v31, %v3117_v10 }
 0x233   : > { %v2889_v55 = vadd.f32 %v2880_v54, %v348_v52  ;;  %v3144_v52 = vld [vmem:[%s6322_s3 + $0x148] sm:$0xff] (!%p4123_p6)  ;;  %v4484_v54 = vpack.c.bf16 (!%p4123_p6), %v3112_v44, %v3111_v43  ;;  %4513 = vmatpush3.bf16.msra.mxu1 (!%p4123_p6), %v4512_v45  ;;  %v2913_v16 = vrot.slane (!%p4123_p6), %v5824_v11, %v5795_v61  ;;  %v2909_v17 = vrot.slane (!%p4123_p6), %v5824_v11, %v5798_v62  ;;  %v3418_v45 = vld [vmem:[%s6324_s5 + $0x80] sm:$0xff] (!%p4123_p6) }
 0x234   : > { %v4516_v58 = vpack.c.bf16 (!%p4123_p6), %v3144_v52, %v3143_v51  ;;  %4515 = vmatprep.subr.bf16.mxu1 (!%p4123_p6), %v4514_v49  ;;  %v2921_v24 = vrot.slane (!%p4123_p6), %v5824_v11, %v5807_v21  ;;  %v2917_v33 = vrot.slane (!%p4123_p6), %v5824_v11, %v5827_v6  ;;  %v4528_v52 = vpack.c.bf16 (!%p4123_p6), %v3150_v37, %v3149_v36 }
 0x235   : > { %2894 = vst [vmem:[#allocation2 + $0x20] sm:$0xff] %v2889_v55  ;;  %v3161_v55 = vld [vmem:[%s6322_s3 + $0x1d0] sm:$0xff] (!%p4123_p6)  ;;  %4485 = vmatpush3.bf16.msra.mxu0 (!%p4123_p6), %v4484_v54  ;;  %v2932_v27 = vadd.f32 (!%p4123_p6), %v2913_v16, %v2900_v8  ;;  %v2931_v28 = vadd.f32 (!%p4123_p6), %v2909_v17, %v2899_v23  ;;  %v5874_v56 = vsub.s32 (!%p4123_p6), 4, %v5768_v48 }
 0x236   : > { %v4518_v63 = vpack.c.bf16 %v3162_v50, %v3161_v55  ;;  %4487 = vmatprep.subr.bf16.mxu0 %v4486_v53  ;;  %v2934_v32 = vadd.f32 %v2921_v24, %v2902_v29  ;;  %v2933_v40 = vadd.f32 %v2917_v33, %v2901_v30  ;;  %v4554_v53 = vpack.c.bf16 %v3419_v46, %v3418_v45 }
 0x237   : > { %4517 = vmatpush3.bf16.msra.mxu1 %v4516_v58  ;;  %v2942_v41 = vrot.slane %v2932_v27, 4  ;;  %v2936_v34 = vrot.slane %v2931_v28, 4  ;;  %v2925_v4 = vrot.slane %v5824_v11, %v5874_v56 }
 0x238   : > { %4519 = vmatprep.subr.bf16.mxu1 %v4518_v63  ;;  %v2954_v39 = vrot.slane %v2934_v32, 4  ;;  %v2948_v49 = vrot.slane %v2933_v40, 4 }
 0x239   : > { %4489 = vmatpush3.bf16.msra.mxu0 %v4488_v22  ;;  %v2943_v43 = vadd.f32 %v2942_v41, %v2932_v27  ;;  %v2937_v44 = vadd.f32 %v2936_v34, %v2931_v28 }
 0x23a   : > { %4491 = vmatprep.subr.bf16.mxu0 %v4490_v5  ;;  %v2955_v47 = vadd.f32 %v2954_v39, %v2934_v32  ;;  %v2949_v50 = vadd.f32 %v2948_v49, %v2933_v40 }
 0x23b   : > { %4521 = vmatpush3.bf16.msra.mxu1 %v4520_v12  ;;  %v2944_v51 = vrot.slane %v2943_v43, 2  ;;  %v2938_v54 = vrot.slane %v2937_v44, 2 }
 0x23c   : > { %4523 = vmatprep.subr.bf16.mxu1 %v4522_v18  ;;  %v2956_v55 = vrot.slane %v2955_v47, 2  ;;  %v2950_v63 = vrot.slane %v2949_v50, 2  ;;  %v2903_v13 = vld [vmem:[#allocation2 + $0x20] sm:$0xff] }
 0x23d   : > { %4493 = vmatpush3.bf16.msra.mxu0 %v4492_v25  ;;  %v2945_v57 = vadd.f32 %v2944_v51, %v2943_v43  ;;  %v2939_v58 = vadd.f32 %v2938_v54, %v2937_v44  ;;  %v2935_v16 = vadd.f32 %v2925_v4, %v2903_v13  ;;  %v5902_v13 = vld [vmem:[%s6321_s2 + $0x1] ss:$4 sm:$0x1f] }
 0x23e   : > { %4495 = vmatprep.subr.bf16.mxu0 %v4494_v9  ;;  %v2957_v60 = vadd.f32 %v2956_v55, %v2955_v47  ;;  %v2951_v2 = vadd.f32 %v2950_v63, %v2949_v50 }
 0x23f   : > { %4525 = vmatpush3.bf16.msra.mxu1 %v4524_v38  ;;  %v2946_v0 = vrot.slane %v2945_v57, 1  ;;  %v2940_v1 = vrot.slane %v2939_v58, 1  ;;  %v2960_v23 = vrot.slane %v2935_v16, 4 }
 0x240   : > { %4527 = vmatprep.subr.bf16.mxu1 %v4526_v35  ;;  %v2958_v22 = vrot.slane %v2957_v60, 1  ;;  %v2952_v7 = vrot.slane %v2951_v2, 1 }
 0x241   : > { %4497 = vmatpush3.bf16.msra.mxu0 %v4496_v42  ;;  %v2947_v3 = vadd.f32 %v2946_v0, %v2945_v57  ;;  %v2941_v48 = vadd.f32 %v2940_v1, %v2939_v58  ;;  %v2961_v29 = vadd.f32 %v2960_v23, %v2935_v16  ;;  %v3038_v23 = vrot.slane %v5902_v13, %v5798_v62 }
 0x242   : > { %4530 = vmatprep.subr.bf16.mxu0 %v5200_v59  ;;  %v2959_v5 = vadd.f32 %v2958_v22, %v2957_v60  ;;  %v2953_v15 = vadd.f32 %v2952_v7, %v2951_v2 }
 0x243   : > { %4529 = vmatpush3.bf16.msra.mxu1 %v4528_v52  ;;  %v2968_v8 = vmul.f32 0.125, %v2947_v3  ;;  %v2967_v12 = vmul.f32 0.125, %v2941_v48  ;;  %v2962_v10 = vrot.slane %v2961_v29, 2 }
 0x244   : > { %4555 = vmatprep.subr.bf16.mxu1 %v4554_v53  ;;  %v2970_v14 = vmul.f32 0.125, %v2959_v5  ;;  %v2969_v20 = vmul.f32 0.125, %v2953_v15  ;;  %v5907_v15 = vld [vmem:[%s6321_s2 + $0x2] ss:$4 sm:$0x1f] }
 0x245   : > { %v5879_v17 = vsub.f32 %v2932_v27, %v2968_v8  ;;  %v5881_v18 = vsub.f32 %v2931_v28, %v2967_v12  ;;  %v2963_v41 = vadd.f32 %v2962_v10, %v2961_v29  ;;  %v3050_v29 = vrot.slane %v5902_v13, %v5807_v21 }
 0x246   : > { %v5883_v19 = vsub.f32 %v2934_v32, %v2970_v14  ;;  %v5891_v26 = vsub.f32 %v2933_v40, %v2969_v20  ;;  %v3046_v10 = vrot.slane %v5902_v13, %v5827_v6 }
 0x247   : > { %v2978_v11 = vmul.f32 %v5879_v17, %v5879_v17  ;;  %v2977_v24 = vmul.f32 %v5881_v18, %v5881_v18  ;;  %v2964_v39 = vrot.slane %v2963_v41, 1 }
 0x248   : > { %v2980_v25 = vmul.f32 %v5883_v19, %v5883_v19  ;;  %v2979_v9 = vmul.f32 %v5891_v26, %v5891_v26 }
 0x249   : > { %v2988_v27 = vrot.slane %v2978_v11, 4  ;;  %v2982_v30 = vrot.slane %v2977_v24, 4  ;;  %v2965_v45 = vadd.f32 %v2964_v39, %v2963_v41  ;;  %v3079_v41 = vrot.slane %v5907_v15, %v5827_v6  ;;  %v3403_v39 = vld [vmem:[%s6324_s5 + $0x8] sm:$0xff]  ;;  %v3420_v6 = vld [vmem:[%s6324_s5 + $0x90] sm:$0xff] }
 0x24a   : > { %v3000_v28 = vrot.slane %v2980_v25, 4  ;;  %v2994_v38 = vrot.slane %v2979_v9, 4 }
 0x24b   : > { %v2989_v31 = vadd.f32 %v2988_v27, %v2978_v11  ;;  %v2983_v32 = vadd.f32 %v2982_v30, %v2977_v24  ;;  %v2971_v52 = vmul.f32 0.125, %v2965_v45 }
 0x24c   : > { %v3001_v33 = vadd.f32 %v3000_v28, %v2980_v25  ;;  %v2995_v37 = vadd.f32 %v2994_v38, %v2979_v9  ;;  %v3075_v25 = vrot.slane %v5907_v15, %v5795_v61  ;;  %v3071_v9 = vrot.slane %v5907_v15, %v5798_v62  ;;  %v3167_v38 = vld [vmem:[%s6322_s3 + $0x200] sm:$0xff] }
 0x24d   : > { %v2990_v34 = vrot.slane %v2989_v31, 2  ;;  %v2984_v35 = vrot.slane %v2983_v32, 2  ;;  %v5895_v57 = vsub.f32 %v2935_v16, %v2971_v52  ;;  %v3042_v16 = vrot.slane %v5902_v13, %v5795_v61 }
 0x24e   : > { %v3002_v36 = vrot.slane %v3001_v33, 2  ;;  %v2996_v44 = vrot.slane %v2995_v37, 2  ;;  %v3083_v61 = vrot.slane %v5907_v15, %v5807_v21 }
 0x24f   : > { %v2991_v40 = vadd.f32 %v2990_v34, %v2989_v31  ;;  %v2985_v42 = vadd.f32 %v2984_v35, %v2983_v32  ;;  %v2981_v1 = vmul.f32 %v5895_v57, %v5895_v57 }
 0x250   : > { %v3003_v43 = vadd.f32 %v3002_v36, %v3001_v33  ;;  %v2997_v51 = vadd.f32 %v2996_v44, %v2995_v37  ;;  %v3402_v37 = vld [vmem:[%s6324_s5] sm:$0xff] }
 0x251   : > { %v2992_v46 = vrot.slane %v2991_v40, 1  ;;  %v2986_v47 = vrot.slane %v2985_v42, 1  ;;  %v3006_v48 = vrot.slane %v2981_v1, 4 }
 0x252   : > { %v3004_v49 = vrot.slane %v3003_v43, 1  ;;  %v2998_v53 = vrot.slane %v2997_v51, 1 }
 0x253   : > { %v2993_v54 = vadd.f32 %v2992_v46, %v2991_v40  ;;  %v2987_v55 = vadd.f32 %v2986_v47, %v2985_v42  ;;  %v3007_v7 = vadd.f32 %v3006_v48, %v2981_v1  ;;  %v3169_v46 = vld [vmem:[%s6322_s3 + $0x210] sm:$0xff]  ;;  %v3170_v47 = vld [vmem:[%s6322_s3 + $0x218] sm:$0xff]  ;;  %v3172_v1 = vld [vmem:[%s6322_s3 + $0x228] sm:$0xff] }
 0x254   : > { %v3005_v50 = vadd.f32 %v3004_v49, %v3003_v43  ;;  %v2999_v0 = vadd.f32 %v2998_v53, %v2997_v51  ;;  %v3421_v43 = vld [vmem:[%s6324_s5 + $0x98] sm:$0xff]  ;;  %v4556_v51 = vpack.c.bf16 %v3403_v39, %v3402_v37  ;;  %v3407_v48 = vld [vmem:[%s6324_s5 + $0x28] sm:$0xff]  ;;  %v3430_v39 = vld [vmem:[%s6324_s5 + $0xe0] sm:$0xff] }
 0x255   : > { %v3013_v58 = vmul.f32 0.125, %v2993_v54  ;;  %v3012_v60 = vmul.f32 0.125, %v2987_v55  ;;  %v3008_v8 = vrot.slane %v3007_v7, 2  ;;  %v4558_v55 = vpack.c.bf16 %v3421_v43, %v3420_v6  ;;  %v3405_v53 = vld [vmem:[%s6324_s5 + $0x18] sm:$0xff]  ;;  %v3414_v43 = vld [vmem:[%s6324_s5 + $0x60] sm:$0xff] }
 0x256   : > { %v3015_v63 = vmul.f32 0.125, %v3005_v50  ;;  %v3014_v3 = vmul.f32 0.125, %v2999_v0  ;;  %v3404_v50 = vld [vmem:[%s6324_s5 + $0x10] sm:$0xff]  ;;  %v3171_v0 = vld [vmem:[%s6322_s3 + $0x220] sm:$0xff] }
 0x257   : > { %v3018_v22 = vadd.f32 1e-05, %v3013_v58  ;;  %v3017_v2 = vadd.f32 1e-05, %v3012_v60  ;;  %v3009_v12 = vadd.f32 %v3008_v8, %v3007_v7  ;;  %v4534_v58 = vpack.c.bf16 %v3170_v47, %v3169_v46  ;;  %v3422_v60 = vld [vmem:[%s6324_s5 + $0xa0] sm:$0xff]  ;;  %v3424_v7 = vld [vmem:[%s6324_s5 + $0xb0] sm:$0xff] }
 0x258   : > { %v3020_v4 = vadd.f32 1e-05, %v3015_v63  ;;  %v3019_v5 = vadd.f32 1e-05, %v3014_v3  ;;  %v3423_v63 = vld [vmem:[%s6324_s5 + $0xa8] sm:$0xff]  ;;  %v3406_v3 = vld [vmem:[%s6324_s5 + $0x20] sm:$0xff] }
 0x259   : > { %5117 = vrsqrt.f32 %v3018_v22  ;;  %v3010_v14 = vrot.slane %v3009_v12, 1  ;;  %v4560_v22 = vpack.c.bf16 %v3405_v53, %v3404_v50  ;;  %v3425_v8 = vld [vmem:[%s6324_s5 + $0xb8] sm:$0xff]  ;;  %v3415_v46 = vld [vmem:[%s6324_s5 + $0x68] sm:$0xff]  ;;  %v3181_v53 = vld [vmem:[%s6322_s3 + $0x270] sm:$0xff] }
 0x25a   : > { %5119 = vrsqrt.f32 %v3017_v2  ;;  %v5202_v2 = vmov 0.0   ;;  %v3433_v50 = vld [vmem:[%s6324_s5 + $0xf8] sm:$0xff] }
 0x25b   : > { %5121 = vrsqrt.f32 %v3020_v4  ;;  %v3011_v27 = vadd.f32 %v3010_v14, %v3009_v12  ;;  %v4562_v4 = vpack.c.bf16 %v3423_v63, %v3422_v60  ;;  %v3173_v12 = vld [vmem:[%s6322_s3 + $0x230] sm:$0xff]  ;;  %v3174_v14 = vld [vmem:[%s6322_s3 + $0x238] sm:$0xff]  ;;  %v3451_v60 = vld [vmem:[%s6324_s5 + $0x188] sm:$0xff] }
 0x25c   : > { %5123 = vrsqrt.f32 %v3019_v5  ;;  %v4537_v5 = vpack.c.bf16 %v3172_v1, %v3171_v0  ;;  %v3416_v1 = vld [vmem:[%s6324_s5 + $0x70] sm:$0xff] }
 0x263   : > { %v5118_v20 = vpop.eup %5117 }
 0x264   : > { %v5120_v11 = vpop.eup %5119  ;;  %v3028_v24 = vmul.f32 %v5118_v20, %v5879_v17  ;;  %v4566_v20 = vpack.c.bf16 %v3425_v8, %v3424_v7  ;;  %v3452_v8 = vld [vmem:[%s6324_s5 + $0x190] sm:$0xff] }
 0x265   : > { %v5122_v30 = vpop.eup %5121  ;;  %v3027_v28 = vmul.f32 %v5120_v11, %v5881_v18  ;;  %v3168_v18 = vld [vmem:[%s6322_s3 + $0x208] sm:$0xff]  ;;  %v3409_v11 = vld [vmem:[%s6324_s5 + $0x38] sm:$0xff] }
 0x266   : > { %v5124_v31 = vpop.eup %5123  ;;  %v3061_v32 = vmul.f32 %v3042_v16, %v3028_v24  ;;  %v3030_v17 = vmul.f32 %v5122_v30, %v5883_v19  ;;  %v3016_v19 = vmul.f32 0.125, %v3011_v27  ;;  %v4531_v42 = vpack.c.bf16 %v3168_v18, %v3167_v38  ;;  %v3175_v27 = vld [vmem:[%s6322_s3 + $0x240] sm:$0xff]  ;;  %v3176_v30 = vld [vmem:[%s6322_s3 + $0x248] sm:$0xff]  ;;  %v3177_v38 = vld [vmem:[%s6322_s3 + $0x250] sm:$0xff] }
 0x267   : > { %v3060_v33 = vmul.f32 %v3038_v23, %v3027_v28  ;;  %v3029_v62 = vmul.f32 %v5124_v31, %v5891_v26  ;;  %v4564_v16 = vpack.c.bf16 %v3407_v48, %v3406_v3  ;;  %v3408_v23 = vld [vmem:[%s6324_s5 + $0x30] sm:$0xff]  ;;  %v4540_v24 = vpack.c.bf16 %v3174_v14, %v3173_v12  ;;  %v3411_v31 = vld [vmem:[%s6324_s5 + $0x48] sm:$0xff]  ;;  %v3178_v18 = vld [vmem:[%s6322_s3 + $0x258] sm:$0xff] }
 0x268   : > { %v3094_v34 = vadd.f32 %v3075_v25, %v3061_v32  ;;  %v3063_v35 = vmul.f32 %v3050_v29, %v3030_v17  ;;  %v3021_v52 = vadd.f32 1e-05, %v3016_v19  ;;  %v3426_v25 = vld [vmem:[%s6324_s5 + $0xc0] sm:$0xff]  ;;  %v3427_v29 = vld [vmem:[%s6324_s5 + $0xc8] sm:$0xff]  ;;  %v4568_v28 = vpack.c.bf16 %v3409_v11, %v3408_v23  ;;  %v3453_v12 = vld [vmem:[%s6324_s5 + $0x198] sm:$0xff] }
 0x269   : > { %v5935_v36 = vadd.f32 %v3071_v9, %v3060_v33  ;;  %v3062_v21 = vmul.f32 %v3046_v10, %v3029_v62  ;;  %v4570_v9 = vpack.c.bf16 %v3427_v29, %v3426_v25  ;;  %v3410_v10 = vld [vmem:[%s6324_s5 + $0x40] sm:$0xff]  ;;  %v4543_v17 = vpack.c.bf16 %v3176_v30, %v3175_v27  ;;  %v3429_v33 = vld [vmem:[%s6324_s5 + $0xd8] sm:$0xff]  ;;  %v3455_v30 = vld [vmem:[%s6324_s5 + $0x1a8] sm:$0xff] }
 0x26a   : > { %v3099_v40 = vmax.f32 %v3094_v34, 0.0  ;;  %v5943_v26 = vadd.f32 %v3083_v61, %v3063_v35  ;;  %5125 = vrsqrt.f32 %v3021_v52  ;;  %v3428_v61 = vld [vmem:[%s6324_s5 + $0xd0] sm:$0xff]  ;;  %v4572_v62 = vpack.c.bf16 %v3411_v31, %v3410_v10  ;;  %v3413_v35 = vld [vmem:[%s6324_s5 + $0x58] sm:$0xff]  ;;  %v3434_v48 = vld [vmem:[%s6324_s5 + $0x100] sm:$0xff] }
 0x26b   : > { %v3098_v44 = vmax.f32 %v5935_v36, 0.0  ;;  %v5952_v45 = vadd.f32 %v3079_v41, %v3062_v21  ;;  %v4574_v41 = vpack.c.bf16 %v3429_v33, %v3428_v61  ;;  %v3412_v34 = vld [vmem:[%s6324_s5 + $0x50] sm:$0xff]  ;;  %v3054_v21 = vrot.slane %v5902_v13, %v5874_v56  ;;  %v3437_v25 = vld [vmem:[%s6324_s5 + $0x118] sm:$0xff]  ;;  %v3454_v27 = vld [vmem:[%s6324_s5 + $0x1a0] sm:$0xff] }
 0x26c   : > { %3254 = vmatprep.mubr.f32.mxu0 %v3099_v40  ;;  %v3101_v49 = vmax.f32 %v5943_v26, 0.0  ;;  %v4546_v37 = vpack.c.bf16 %v3178_v18, %v3177_v38  ;;  %v4576_v13 = vpack.c.bf16 %v3413_v35, %v3412_v34  ;;  %v4590_v11 = vpack.c.bf16 %v3453_v12, %v3452_v8  ;;  %v3456_v26 = vld [vmem:[%s6324_s5 + $0x1b0] sm:$0xff]  ;;  %v3457_v36 = vld [vmem:[%s6324_s5 + $0x1b8] sm:$0xff]  ;;  %v3459_v34 = vld [vmem:[%s6324_s5 + $0x1c8] sm:$0xff] }
 0x26d   : > { %3255 = vmatmul.mubr.f32.vlgmr.msra.gmra.mrb[0].mxu0 %v3098_v44  ;;  %v3100_v54 = vmax.f32 %v5952_v45, 0.0  ;;  %v4594_v31 = vpack.c.bf16 %v3455_v30, %v3454_v27  ;;  %v4598_v38 = vpack.c.bf16 %v3457_v36, %v3456_v26  ;;  %v3440_v18 = vld [vmem:[%s6324_s5 + $0x130] sm:$0xff]  ;;  %v4126_v27 = vld [vmem:[%s6323_s4] ss:$0 sm:$0xff] }
 0x26e   : > { %4532 = vmatpush3.bf16.msra.mxu0 %v4531_v42  ;;  %3324 = vmatprep.mubr.f32.mxu1 %v3101_v49  ;;  %v3179_v42 = vld [vmem:[%s6322_s3 + $0x260] sm:$0xff]  ;;  %v3472_v35 = vld [vmem:[%s6324_s5 + $0x230] sm:$0xff] }
 0x26f   : > { %3325 = vmatmul.mubr.f32.vlgmr.msra.gmra.mrb[0].mxu1 %v3100_v54  ;;  %4533 = vmatprep.subr.bf16.mxu0 %v5200_v59  ;;  %v3448_v12 = vld [vmem:[%s6324_s5 + $0x170] sm:$0xff]  ;;  %v4127_v26 = vld [vmem:[%s6325_s6] ss:$0 sm:$0xff] }
 0x270   : > { %4557 = vmatpush3.bf16.msra.mxu1 %v4556_v51  ;;  %4428 = vmatprep.mubr.msk.f32.mxu0 %vm5201_vm0, %v5202_v2  ;;  %v3087_v51 = vrot.slane %v5907_v15, %v5874_v56  ;;  %v3182_v56 = vld [vmem:[%s6322_s3 + $0x278] sm:$0xff]  ;;  %v4580_v15 = vpack.c.bf16 %v3415_v46, %v3414_v43  ;;  %v3475_v43 = vld [vmem:[%s6324_s5 + $0x248] sm:$0xff] }
 0x271   : > { %4559 = vmatprep.subr.bf16.mxu1 %v4558_v55  ;;  %3553 = vmatprep.mubr.f32.mxu1 %v3099_v40  ;;  %v3431_v40 = vld [vmem:[%s6324_s5 + $0xe8] sm:$0xff]  ;;  %v3432_v55 = vld [vmem:[%s6324_s5 + $0xf0] sm:$0xff] }
 0x272   : > { %4535 = vmatpush3.bf16.msra.mxu0 %v4534_v58  ;;  %v4578_v6 = vpack.c.bf16 %v3431_v40, %v3430_v39  ;;  %v3450_v58 = vld [vmem:[%s6324_s5 + $0x180] sm:$0xff]  ;;  %v4582_v0 = vpack.c.bf16 %v3433_v50, %v3432_v55  ;;  %v3443_v40 = vld [vmem:[%s6324_s5 + $0x148] sm:$0xff] }
 0x273   : > { %4536 = vmatprep.subr.bf16.mxu0 %v5200_v59  ;;  %v4586_v3 = vpack.c.bf16 %v3451_v60, %v3450_v58  ;;  %v3442_v39 = vld [vmem:[%s6324_s5 + $0x140] sm:$0xff] }
 0x274   : > { %4561 = vmatpush3.bf16.msra.mxu1 %v4560_v22  ;;  %v5126_v32 = vpop.eup %5125  ;;  %v3417_v22 = vld [vmem:[%s6324_s5 + $0x78] sm:$0xff]  ;;  %v4604_v46 = vpack.c.bf16 %v3443_v40, %v3442_v39  ;;  %v3462_v50 = vld [vmem:[%s6324_s5 + $0x1e0] sm:$0xff] }
 0x275   : > { %4563 = vmatprep.subr.bf16.mxu1 %v4562_v4  ;;  %v3031_v19 = vmul.f32 %v5126_v32, %v5895_v57  ;;  %v3180_v57 = vld [vmem:[%s6322_s3 + $0x268] sm:$0xff]  ;;  %v4552_v4 = vpack.c.bf16 %v3182_v56, %v3181_v53  ;;  %v4584_v7 = vpack.c.bf16 %v3417_v22, %v3416_v1  ;;  %v3438_v32 = vld [vmem:[%s6324_s5 + $0x120] sm:$0xff]  ;;  %v3476_v56 = vld [vmem:[%s6324_s5 + $0x250] sm:$0xff] }
 0x276   : > { %4538 = vmatpush3.bf16.msra.mxu0 %v4537_v5  ;;  %v4549_v52 = vpack.c.bf16 %v3180_v57, %v3179_v42  ;;  %v3435_v5 = vld [vmem:[%s6324_s5 + $0x108] sm:$0xff]  ;;  %v3460_v57 = vld [vmem:[%s6324_s5 + $0x1d0] sm:$0xff] }
 0x277   : > { %4539 = vmatprep.subr.bf16.mxu0 %v5200_v59  ;;  %v3064_v47 = vmul.f32 %v3054_v21, %v3031_v19  ;;  %v4588_v23 = vpack.c.bf16 %v3435_v5, %v3434_v48  ;;  %v3473_v19 = vld [vmem:[%s6324_s5 + $0x238] sm:$0xff]  ;;  %v3463_v53 = vld [vmem:[%s6324_s5 + $0x1e8] sm:$0xff]  ;;  %v3478_v48 = vld [vmem:[%s6324_s5 + $0x260] sm:$0xff] }
 0x278   : > { %4565 = vmatpush3.bf16.msra.mxu1 %v4564_v16  ;;  %v3466_v16 = vld [vmem:[%s6324_s5 + $0x200] sm:$0xff]  ;;  %v4628_v42 = vpack.c.bf16 %v3473_v19, %v3472_v35  ;;  %v4610_v60 = vpack.c.bf16 %v3463_v53, %v3462_v50  ;;  %v3447_v1 = vld [vmem:[%s6324_s5 + $0x168] sm:$0xff] }
 0x279   : > { %4567 = vmatprep.subr.bf16.mxu1 %v4566_v20  ;;  %v6095_v63 = vadd.f32 %v3087_v51, %v3064_v47  ;;  %v3467_v20 = vld [vmem:[%s6324_s5 + $0x208] sm:$0xff]  ;;  %v3444_v51 = vld [vmem:[%s6324_s5 + $0x150] sm:$0xff] }
 0x27a   : > { %4541 = vmatpush3.bf16.msra.mxu0 %v4540_v24  ;;  %v3436_v24 = vld [vmem:[%s6324_s5 + $0x110] sm:$0xff]  ;;  %v4619_v29 = vpack.c.bf16 %v3467_v20, %v3466_v16  ;;  %v3479_v5 = vld [vmem:[%s6324_s5 + $0x268] sm:$0xff]  ;;  %v3449_v16 = vld [vmem:[%s6324_s5 + $0x178] sm:$0xff] }
 0x27b   : > { %4542 = vmatprep.subr.bf16.mxu0 %v5200_v59  ;;  %v3102_v14 = vmax.f32 %v6095_v63, 0.0  ;;  %v4592_v10 = vpack.c.bf16 %v3437_v25, %v3436_v24  ;;  %v4637_v20 = vpack.c.bf16 %v3479_v5, %v3478_v48  ;;  %v4616_v24 = vpack.c.bf16 %v3449_v16, %v3448_v12 }
 0x27c   : > { %4569 = vmatpush3.bf16.msra.mxu1 %v4568_v28  ;;  %v3468_v28 = vld [vmem:[%s6324_s5 + $0x210] sm:$0xff] }
 0x27d   : > { %4571 = vmatprep.subr.bf16.mxu1 %v4570_v9  ;;  %v3469_v9 = vld [vmem:[%s6324_s5 + $0x218] sm:$0xff] }
 0x27e   : > { %4544 = vmatpush3.bf16.msra.mxu0 %v4543_v17  ;;  %v3439_v17 = vld [vmem:[%s6324_s5 + $0x128] sm:$0xff]  ;;  %v4622_v61 = vpack.c.bf16 %v3469_v9, %v3468_v28 }
 0x27f   : > { %4545 = vmatprep.subr.bf16.mxu0 %v5200_v59  ;;  %v4596_v33 = vpack.c.bf16 %v3439_v17, %v3438_v32 }
 0x280   : > { %4573 = vmatpush3.bf16.msra.mxu1 %v4572_v62 }
 0x281   : > { %4575 = vmatprep.subr.bf16.mxu1 %v4574_v41  ;;  %v3458_v41 = vld [vmem:[%s6324_s5 + $0x1c0] sm:$0xff] }
 0x282   : > { %4547 = vmatpush3.bf16.msra.mxu0 %v4546_v37  ;;  %v4602_v37 = vpack.c.bf16 %v3459_v34, %v3458_v41 }
 0x283   : > { %4548 = vmatprep.subr.bf16.mxu0 %v5200_v59 }
 0x284   : > { %4577 = vmatpush3.bf16.msra.mxu1 %v4576_v13  ;;  %v3461_v13 = vld [vmem:[%s6324_s5 + $0x1d8] sm:$0xff] }
 0x285   : > { %4579 = vmatprep.subr.bf16.mxu1 %v4578_v6  ;;  %v3474_v6 = vld [vmem:[%s6324_s5 + $0x240] sm:$0xff]  ;;  %v4606_v47 = vpack.c.bf16 %v3461_v13, %v3460_v57 }
 0x286   : > { %4550 = vmatpush3.bf16.msra.mxu0 %v4549_v52  ;;  %v3445_v52 = vld [vmem:[%s6324_s5 + $0x158] sm:$0xff]  ;;  %v4631_v55 = vpack.c.bf16 %v3475_v43, %v3474_v6 }
 0x287   : > { %4551 = vmatprep.subr.bf16.mxu0 %v5200_v59  ;;  %v4608_v58 = vpack.c.bf16 %v3445_v52, %v3444_v51 }
 0x288   : > { %4581 = vmatpush3.bf16.msra.mxu1 %v4580_v15  ;;  %v3477_v15 = vld [vmem:[%s6324_s5 + $0x258] sm:$0xff] }
 0x289   : > { %4583 = vmatprep.subr.bf16.mxu1 %v4582_v0  ;;  %v3446_v0 = vld [vmem:[%s6324_s5 + $0x160] sm:$0xff]  ;;  %v4634_v22 = vpack.c.bf16 %v3477_v15, %v3476_v56 }
 0x28a   : > { %4553 = vmatpush3.bf16.msra.mxu0 %v4552_v4  ;;  %v3464_v4 = vld [vmem:[%s6324_s5 + $0x1f0] sm:$0xff] }
 0x28b   : > { %4587 = vmatprep.subr.bf16.mxu0 %v4586_v3  ;;  %v3465_v3 = vld [vmem:[%s6324_s5 + $0x1f8] sm:$0xff] }
 0x28c   : > { %4585 = vmatpush3.bf16.msra.mxu1 %v4584_v7  ;;  %v4612_v7 = vpack.c.bf16 %v3447_v1, %v3446_v0  ;;  %v4614_v8 = vpack.c.bf16 %v3465_v3, %v3464_v4 }
 0x28d   : > { %4429 = vmatmul.mubr.f32.vlgmr.msra.gmra.mrb[2].mxu0 %v3102_v14  ;;  %4618 = vmatprep.subr.bf16.mxu1 %v5200_v59 }
 0x28e   : > { %4589 = vmatpush3.bf16.msra.mxu0 %v4588_v23  ;;  %3623 = vmatprep.mubr.f32.mxu0 %v3101_v49  ;;  %v3471_v49 = vld [vmem:[%s6324_s5 + $0x228] sm:$0xff]  ;;  %v3480_v23 = vld [vmem:[%s6324_s5 + $0x270] sm:$0xff] }
 0x28f   : > { %4591 = vmatprep.subr.bf16.mxu0 %v4590_v11  ;;  %3554 = vmatmul.mubr.f32.vlgmr.msra.gmra.mrb[2].mxu1 %v3098_v44  ;;  %v3470_v44 = vld [vmem:[%s6324_s5 + $0x220] sm:$0xff]  ;;  %v3481_v11 = vld [vmem:[%s6324_s5 + $0x278] sm:$0xff] }
 0x290   : > { %4620 = vmatpush3.bf16.msra.mxu1 %v4619_v29  ;;  %4463 = vmatprep.mubr.msk.f32.mxu1 %vm5201_vm0, %v5202_v2  ;;  %v3441_v2 = vld [vmem:[%s6324_s5 + $0x138] sm:$0xff]  ;;  %v4625_v62 = vpack.c.bf16 %v3471_v49, %v3470_v44  ;;  %v4640_v25 = vpack.c.bf16 %v3481_v11, %v3480_v23 }
 0x291   : > { %4621 = vmatprep.subr.bf16.mxu1 %v5200_v59  ;;  %v4600_v21 = vpack.c.bf16 %v3441_v2, %v3440_v18 }
 0x292   : > { %4593 = vmatpush3.bf16.msra.mxu0 %v4592_v10 }
 0x293   : > { %4595 = vmatprep.subr.bf16.mxu0 %v4594_v31 }
 0x294   : > { %4623 = vmatpush3.bf16.msra.mxu1 %v4622_v61 }
 0x295   : > { %4624 = vmatprep.subr.bf16.mxu1 %v5200_v59 }
 0x296   : > { %4597 = vmatpush3.bf16.msra.mxu0 %v4596_v33 }
 0x297   : > { %4599 = vmatprep.subr.bf16.mxu0 %v4598_v38 }
 0x298   : > { %4626 = vmatpush3.bf16.msra.mxu1 %v4625_v62 }
 0x299   : > { %4627 = vmatprep.subr.bf16.mxu1 %v5200_v59 }
 0x29a   : > { %4601 = vmatpush3.bf16.msra.mxu0 %v4600_v21 }
 0x29b   : > { %4603 = vmatprep.subr.bf16.mxu0 %v4602_v37 }
 0x29c   : > { %4629 = vmatpush3.bf16.msra.mxu1 %v4628_v42 }
 0x29d   : > { %4630 = vmatprep.subr.bf16.mxu1 %v5200_v59 }
 0x29e   : > { %4605 = vmatpush3.bf16.msra.mxu0 %v4604_v46 }
 0x29f   : > { %4607 = vmatprep.subr.bf16.mxu0 %v4606_v47 }
 0x2a0   : > { %4632 = vmatpush3.bf16.msra.mxu1 %v4631_v55 }
 0x2a1   : > { %4633 = vmatprep.subr.bf16.mxu1 %v5200_v59 }
 0x2a2   : > { %4609 = vmatpush3.bf16.msra.mxu0 %v4608_v58 }
 0x2a3   : > { %4611 = vmatprep.subr.bf16.mxu0 %v4610_v60 }
 0x2a4   : > { %4635 = vmatpush3.bf16.msra.mxu1 %v4634_v22 }
 0x2a5   : > { %4636 = vmatprep.subr.bf16.mxu1 %v5200_v59 }
 0x2a6   : > { %4613 = vmatpush3.bf16.msra.mxu0 %v4612_v7 }
 0x2a7   : > { %4615 = vmatprep.subr.bf16.mxu0 %v4614_v8 }
 0x2a8   : > { %4638 = vmatpush3.bf16.msra.mxu1 %v4637_v20 }
 0x2a9   : > { %4639 = vmatprep.subr.bf16.mxu1 %v5200_v59 }
 0x2aa   : > { %4617 = vmatpush3.bf16.msra.mxu0 %v4616_v24 }
 0x2ac   : > { %4641 = vmatpush3.bf16.msra.mxu1 %v4640_v25 }
 0x2ad   : > { %3624 = vmatmul.mubr.f32.vlgmr.msra.gmra.mrb[4].mxu0 %v3100_v54 }
 0x2af   : > { %4464 = vmatmul.mubr.f32.vlgmr.msra.gmra.mrb[4].mxu1 %v3102_v14 }
 0x340   : > { %v4254_v29 = vpop.f32.mrb[0].mxu0 }
 0x341   : > { %v4255_v30 = vpop.f32.mrb[1].mxu0 }
 0x342   : > { %v4256_v28 = vadd.f32 %v4255_v30, %v4254_v29  ;;  %v4289_v9 = vpop.f32.mrb[0].mxu1 }
 0x343   : > { %v4290_v10 = vpop.f32.mrb[1].mxu1 }
 0x344   : > { %v3257_v31 = vadd.f32 %v4256_v28, %v4126_v27  ;;  %v4291_v32 = vadd.f32 %v4290_v10, %v4289_v9 }
 0x346   : > { %v3327_v59 = vadd.f32 %v4291_v32, %v3257_v31 }
 0x360   : > { %v3396_v17 = vpop.f32.mrb[2].mxu0 }
 0x361   : > { %v3397_v61 = vadd.f32 %v3396_v17, %v3327_v59  ;;  %v4430_v45 = vpop.f32.mrb[3].mxu0 }
 0x362   : > { %v4341_v54 = vpop.f32.mrb[2].mxu1 }
 0x363   : > { %3401 = vst.msk [vmem:[#allocation3] sm:$0xff] %vm3400_vm1, %v3397_v61  ;;  %v4342_v63 = vpop.f32.mrb[3].mxu1 }
 0x364   : > { %v4343_v14 = vadd.f32 %v4342_v63, %v4341_v54 }
 0x366   : > { %v3556_v49 = vadd.f32 %v4343_v14, %v4127_v26 }
 0x380   : > { %v4376_v36 = vpop.f32.mrb[4].mxu0 }
 0x381   : > { %v4377_v44 = vpop.f32.mrb[5].mxu0 }
 0x382   : > { %v4378_v33 = vadd.f32 %v4377_v44, %v4376_v36  ;;  %v3695_v38 = vpop.f32.mrb[4].mxu1 }
 0x383   : > { %v4465_v18 = vpop.f32.mrb[5].mxu1 }
 0x384   : > { %v3626_v2 = vadd.f32 %v4378_v33, %v3556_v49 }
 0x386   : > { %v3696_v62 = vadd.f32 %v3695_v38, %v3626_v2 }
 0x388   : > { %v3700_v41 = vmin.f32 %v3696_v62, 20.0  ;;  %vm3699_vm3 = vcmp.gt.f32.partialorder %v3696_v62, 20.0 }
 0x38a   : > { %v3701_v34 = vmul.f32 1.442695, %v3700_v41 }
 0x38c   : > { %5127 = vpow2.f32 %v3701_v34 }
 0x396   : > { %v5128_v35 = vpop.eup %5127 }
 0x397   : > { %v3703_v19 = vadd.f32 1.0, %v5128_v35  ;;  %v3706_v21 = vmul.f32 -0.5, %v5128_v35  ;;  %v3709_v39 = vand.u32 2147483647, %v5128_v35 }
 0x399   : > { %5129 = vlog2.f32 %v3703_v19  ;;  %v3707_v37 = vadd.f32 1.0, %v3706_v21  ;;  %vm3710_vm2 = vcmp.lt.f32.partialorder %v3709_v39, 0.0004427343 }
 0x39b   : > { %v3708_v57 = vmul.f32 %v5128_v35, %v3707_v37 }
 0x3a3   : > { %v5130_v40 = vpop.eup %5129 }
 0x3a4   : > { %v3705_v42 = vmul.f32 0.6931472, %v5130_v40 }
 0x3a6   : > { %v3711_v13 = vsel %vm3710_vm2, %v3708_v57, %v3705_v42 }
 0x3a7   : > { %v3712_v6 = vsel %vm3699_vm3, %v3696_v62, %v3711_v13 }
 0x3a8   : > { %3713 = vst.msk [vmem:[#allocation5] sm:$0xff] %vm3400_vm1, %v3712_v6 }
 0x3a9 PF: > { %p4651_p7 = scmp.eq.s32.totalorder %s5256_s28, 1  ;;  %s5203_s29 = smov [#allocation3]  }
 0x3aa   : > { %s3721_s30 = sshll.u32 %s5203_s29, 4  ;;  %s5204_s9 = smov [#allocation5]   ;;  %s3722_s30 = int_to_ptr.vmem [resolvable:$true] %s3721_s30 }
 0x3ab   : > { %s3732_s10 = sshll.u32 %s5204_s9, 4  ;;  %s5131_s11 = scalar_lea.vmem %s3722_s30, 128  ;;  %s3733_s10 = int_to_ptr.vmem [resolvable:$true] %s3732_s10 }
 0x3ac   : > { %p5132_p8 = scmp.ne.s32.totalorder %s3722_s30, %s5131_s11  ;;  %p5138_p11 = scmp.lt.s32.totalorder %s3722_s30, %s3722_s30 }
 0x3ad   : > { %p5139_p12 = scmp.lt.s32.totalorder %s5131_s11, %s5131_s11 }
 0x3ae   : > { %p5133_p9 = pnand %p5132_p8, %p4651_p7 }
 0x3af   : > { %p5140_p13 = por %p5139_p12, %p5138_p11 }
 0x3b0   : > { %p5134_p10 = pneg %p5133_p9 }
 0x3b2   : > { %p5141_p0 = pnand %p5140_p13, %p5134_p10 }
 0x3b4   : > { %5144 = shalt.err (!%p5141_p0)
}
 0x3b5   : > { %s5145_s14 = scalar_lea.hbm %s6326_s7, 128 }
 0x3b6   : > { %p5146_p1 = scmp.ne.s32.totalorder %s6326_s7, %s5145_s14  ;;  %p5151_p4 = scmp.lt.u32.totalorder %s5145_s14, %s6326_s7 }
 0x3b8   : > { %p5147_p2 = pnand %p5146_p1, %p4651_p7 }
 0x3ba   : > { %p5148_p3 = pneg %p5147_p2 }
 0x3bc   : > { %p5153_p5 = pnand %p5151_p4, %p5148_p3 }
 0x3be   : > { %5156 = shalt.err (!%p5153_p5)
}
 0x3bf   : > { %4644 = dma.vmem_to_hbm [thread:$0]  (%p4651_p7), %s3722_s30, 128, %s6326_s7, [#allocation4]  }
 0x3c0   : > { %s5157_s21 = scalar_lea.vmem %s3733_s10, 128  ;;  %p5164_p10 = scmp.lt.s32.totalorder %s3733_s10, %s3733_s10 }
 0x3c1   : > { %p5158_p6 = scmp.ne.s32.totalorder %s3733_s10, %s5157_s21  ;;  %p5165_p11 = scmp.lt.s32.totalorder %s5157_s21, %s5157_s21 }
 0x3c3   : > { %p5159_p8 = pnand %p5158_p6, %p4651_p7  ;;  %p5166_p12 = por %p5165_p11, %p5164_p10 }
 0x3c5   : > { %p5160_p9 = pneg %p5159_p8 }
 0x3c7   : > { %p5167_p13 = pnand %p5166_p12, %p5160_p9 }
 0x3c9   : > { %5170 = shalt.err (!%p5167_p13)
}
 0x3ca   : > { %s5171_s24 = scalar_lea.hbm %s6327_s8, 128 }
 0x3cb   : > { %p5172_p0 = scmp.ne.s32.totalorder %s6327_s8, %s5171_s24  ;;  %p5177_p3 = scmp.lt.u32.totalorder %s5171_s24, %s6327_s8 }
 0x3cd   : > { %p5173_p1 = pnand %p5172_p0, %p4651_p7 }
 0x3cf   : > { %p5174_p2 = pneg %p5173_p1 }
 0x3d1   : > { %p5179_p4 = pnand %p5177_p3, %p5174_p2 }
 0x3d3   : > { %5182 = shalt.err (!%p5179_p4)
}
 0x3d4   : > { %4646 = dma.vmem_to_hbm [thread:$0]  (%p4651_p7), %s3733_s10, 128, %s6327_s8, [#allocation6]  }
 0x3d5   : > { %5188 = dma.done.wait (%p4651_p7), [#allocation4], 128  }
 0x3d6   : > { %5190 = vsyncadd (%p4651_p7), [#allocation4], 4294967168 }
 0x3d7   : > { %5192 = dma.done.wait (%p4651_p7), [#allocation6], 128  }
 0x3d8   : > { %5194 = vsyncadd (%p4651_p7), [#allocation6], 4294967168 }
 0x3d9 PF: > { %s21_s27 = sadd.s32 1, %s5197_s27  }
 0x3da   : > { %p18_p5 = scmp.ge.s32.totalorder %s21_s27, 4  }
 0x3dc   :  { %20 = sbr.rel (!%p18_p5) target bundleno = 2 (0x2), region = 96 }
 0x3e3   :  { %3749 = vsyncpa [#allocation4], 1 }
 0x3e4   :  { %3751 = vsyncpa [#allocation4 + $0x1], 1 }
 0x3e5   :  { %3752 = vsyncpa [#allocation6], 1 }

// kernel: _lambda_.4
= control target key start
LH: loop header
LB: loop body
LE: loop exit
PB: predicated region body
PF: predicated region fallthrough
CT: control target
= control target key end

     0   :  { %s11209_s0 = inlined_call_operand.vmem [shape: f32[8,4096], index: 0, kind: input, shape index: {}]   ;;  %s11210_s1 = inlined_call_operand.hbm [shape: bf16[4096,2048], index: 1, kind: input, shape index: {}]   ;;  %s11211_s2 = inlined_call_operand.hbm [shape: f32[3,2048], index: 2, kind: input, shape index: {}]   ;;  %s11212_s3 = inlined_call_operand.vmem [shape: f32[8,2048], index: 3, kind: output, shape index: {}]  }
   0x1   :  { %11218 = sst [smem:[#allocation10_spill]] %s11210_s1 }
   0x2   :  { %8 = vsyncpa [#allocation4], 0 }
   0x3   :  { %10 = vsyncpa [#allocation4 + $0x1], 0 }
   0x4   :  { %11 = vsyncpa [#allocation6], 0 }
   0x5   :  { %13 = vsyncpa [#allocation6 + $0x1], 0  ;;  %s9599_s12 = smov 0   ;;  %s9601_s13 = smov 0  }
   0x6   :  { %s9603_s14 = smov 0   ;;  %s9605_s15 = smov 0  }
   0x7   :  { %s9607_s16 = smov 0   ;;  %s9609_s17 = smov 0  }
   0x8   :  { %s9611_s18 = smov 0   ;;  %s9613_s19 = smov 0  }
   0x9   :  { %s9615_s20 = smov 0   ;;  %s9617_s21 = smov 0  }
   0xa   :  { %s9619_s22 = smov 0  }
   0xb LB: > { %s28_s23 = sadd.s32 1, %s9563_s20  ;;  %s66_s24 = sadd.s32 1, %s9551_s17  ;;  %s9571_s22 = sphi %s9619_s22, %s19_s22   ;;  %s9567_s21 = sphi %s9617_s21, %s11244_s21   ;;  %s9563_s20 = sphi %s9615_s20, %s11243_s20   ;;  %s9559_s19 = sphi %s9613_s19, %s11242_s19   ;;  %s9555_s18 = sphi %s9611_s18, %s11241_s18   ;;  %s9551_s17 = sphi %s9609_s17, %s11240_s17   ;;  %s9547_s16 = sphi %s9607_s16, %s11239_s16   ;;  %s9543_s15 = sphi %s9605_s15, %s11238_s15   ;;  %s9539_s14 = sphi %s9603_s14, %s11237_s14   ;;  %s9535_s13 = sphi %s9601_s13, %s11236_s13   ;;  %s9531_s12 = sphi %s9599_s12, %s11235_s12  }
   0xc   : > { %p9656_p0 = scmp.ge.s32.totalorder %s28_s23, 2  ;;  %p73_p1 = scmp.ne.s32.totalorder %s9551_s17, %s9547_s16 }
   0xd   : > { %p11214_p2 = scmp.eq.s32.totalorder %s9571_s22, 0  ;;  %p11213_p4 = scmp.lt.s32.totalorder %s9571_s22, 4 }
   0xe   : > { %s11246_s23 = smov (%p9656_p0, %s28_s23), 0  ;;  %s164_s27 = sand.u32 1, %s9551_s17  }
   0xf   : > { %p75_p3 = por %p11214_p2, %p73_p1  ;;  %s61_s26 = ssub.s32 %s9563_s20, %s11246_s23 }
  0x10   : > { %s8250_s28 = sshll.u32 %s164_s27, 13  ;;  %s8252_s29 = sshll.u32 %s9567_s21, 3 }
  0x11   : > { %s9295_s30 = sshll.u32 %s9563_s20, 12  ;;  %s168_s4 = scalar_lea.vmem [#allocation3], %s8250_s28 }
  0x12   : > { %s178_s5 = sshll.u32 %s168_s4, 4  ;;  %s175_s6 = sadd.s32 %s9295_s30, %s8252_s29  ;;  %s9675_s5 = int_to_ptr.vmem [resolvable:$true] %s178_s5 }
  0x13   : > { %s8254_s7 = sshll.u32 %s175_s6, 6  ;;  %p9679_p5 = pnand %p11213_p4, %p75_p3 }
  0x14   : > { %s11221_s1 = sld [smem:[#allocation10_spill]]  ;;  %s9689_s28 = scalar_lea.sflag [#allocation4], %s164_s27 }
  0x15   : > { %p9419_p8 = pneg %p9679_p5 }
  0x1a   : > { %s9686_s11 = scalar_lea.hbm %s11221_s1, %s8254_s7  ;;  %s9422_s6 = scalar_lea.hbm %s11221_s1, 524288 }
  0x1b   : > { %s9417_s29 = scalar_lea.hbm %s9686_s11, 131072  ;;  %p9423_p11 = scmp.lt.u32.totalorder %s9686_s11, %s11221_s1 }
  0x1c   : > { %p9418_p7 = scmp.ne.s32.totalorder %s9686_s11, %s9417_s29  ;;  %p9424_p12 = scmp.lt.u32.totalorder %s9422_s6, %s9417_s29 }
  0x1d   : > { %p9426_p1 = scmp.lt.u32.totalorder %s9417_s29, %s9686_s11 }
  0x1e   : > { %p9420_p9 = pnand %p9419_p8, %p9418_p7  ;;  %p9425_p13 = por %p9424_p12, %p9423_p11 }
  0x20   : > { %p9421_p10 = pneg %p9420_p9  ;;  %p9427_p3 = por %p9426_p1, %p9425_p13 }
  0x22   : > { %p9428_p4 = pnand %p9427_p3, %p9421_p10 }
  0x24   : > { %9431 = shalt.err (!%p9428_p4)
}
  0x25   : > { %s9432_s27 = scalar_lea.vmem %s9675_s5, 131072  ;;  %s9573_s10 = smov [#allocation3]  }
  0x26   : > { %p9433_p7 = scmp.ne.s32.totalorder %s9675_s5, %s9432_s27  ;;  %s9437_s30 = sshll.u32 %s9573_s10, 4  ;;  %s9438_s30 = int_to_ptr.vmem [resolvable:$false] %s9437_s30 }
  0x27   : > { %s9439_s4 = scalar_lea.vmem %s9438_s30, 262144  ;;  %p9440_p6 = scmp.lt.s32.totalorder %s9675_s5, %s9438_s30 }
  0x28   : > { %p9435_p9 = pnand %p9433_p7, %p9419_p8  ;;  %p9441_p11 = scmp.lt.s32.totalorder %s9439_s4, %s9432_s27 }
  0x2a   : > { %p9436_p2 = pneg %p9435_p9  ;;  %p9442_p12 = por %p9441_p11, %p9440_p6 }
  0x2c   : > { %p9443_p13 = pnand %p9442_p12, %p9436_p2 }
  0x2e   : > { %9446 = shalt.err (!%p9443_p13)
}
  0x2f   : > { %s9574_s29 = smov 1024   ;;  %s9575_s6 = smov 512  }
  0x30   : > { %s9576_s7 = smov 32   ;;  %p205_p2 = scmp.lt.s32.totalorder %s9571_s22, 5 }
  0x31   : > { %9304 = dma.hbm_to_vmem [thread:$0]  (!%p9679_p5), %s9686_s11, 131072, %s9675_s5, %s9689_s28, %s9574_s29, %s9575_s6, %s9576_s7  }
  0x32   : > { %p11222_p4 = scmp.ge.s32.totalorder %s9571_s22, 1  ;;  %s8246_s27 = sadd.s32 4294967295, %s9571_s22  }
  0x33   : > { %s31_s10 = sadd.s32 1, %s9567_s21  ;;  %p79_p8 = scmp.ne.s32.totalorder %s9547_s16, %s9543_s15 }
  0x34   : > { %p9720_p6 = pnand %p11222_p4, %p205_p2  ;;  %s11248_s10 = smov (!%p9656_p0, %s31_s10), %s9567_s21 }
  0x35   : > { %p9731_p10 = scmp.eq.s32.totalorder %s8246_s27, 0  ;;  %p33_p5 = scmp.ge.s32.totalorder %s11248_s10, 2 }
  0x36   : > { %s92_s5 = sadd.s32 1, %s9539_s14  ;;  %p99_p3 = scmp.ne.s32.totalorder %s9539_s14, %s9535_s13 }
  0x37   : > { %p9738_p1 = por %p9731_p10, %p79_p8  ;;  %s11250_s10 = smov (%p33_p5, %s11248_s10), 0 }
  0x38   : > { %11226 = sst [smem:[#allocation9_spill]] %s11250_s10  ;;  %p11227_p0 = scmp.eq.s32.totalorder %s9571_s22, 0 }
  0x39   : > { %s11225_s11 = scalar_select %p9738_p1, 1, 0 }
  0x3a   : > { %p9748_p7 = por %p99_p3, %p11227_p0  ;;  %p105_p9 = scmp.ne.s32.totalorder %s9535_s13, %s9531_s12 }
  0x3b   : > { %s62_s25 = ssub.s32 %s9567_s21, %s11250_s10  ;;  %s188_s28 = sand.u32 1, %s9539_s14  }
  0x3c   : > { %s63_s30 = sor.u32 %s62_s25, %s61_s26  ;;  %p90_p11 = scmp.eq.s32.totalorder %s62_s25, 0 }
  0x3d   : > { %p64_p12 = scmp.eq.s32.totalorder %s63_s30, 0  ;;  %p9762_p13 = por %p105_p9, %p9731_p10 }
  0x3e   : > { %s9767_s29 = scalar_select %p90_p11, %s9539_s14, %s92_s5  }
  0x3f   : > { %s11229_s4 = scalar_select %p9762_p13, 1, 0 }
  0x40   : > { %s9772_s6 = scalar_select %p64_p12, %s9551_s17, %s66_s24  }
  0x41   : > { %s8255_s7 = sshll.u32 %s188_s28, 5  ;;  %s9296_s27 = sshll.u32 %s9567_s21, 9 }
  0x42   : > { %s9778_s10 = scalar_lea.hbm %s11211_s2, %s9296_s27  ;;  %s192_s26 = scalar_lea.vmem [#allocation5], %s8255_s7 }
  0x43   : > { %s200_s8 = sshll.u32 %s192_s26, 4  ;;  %p11230_p2 = scmp.lt.s32.totalorder %s9571_s22, 4  ;;  %s9780_s8 = int_to_ptr.vmem [resolvable:$true] %s200_s8 }
  0x44   : > { %s189_s5 = scalar_lea.sflag [#allocation6], %s188_s28  ;;  %s9447_s1 = scalar_lea.hbm %s9778_s10, 512 }
  0x45   : > { %p9786_p4 = pnand %p11230_p2, %p9748_p7  ;;  %p9448_p8 = scmp.ne.s32.totalorder %s9778_s10, %s9447_s1 }
  0x46   : > { %s9452_s15 = scalar_lea.hbm %s11211_s2, 1024  ;;  %p9453_p0 = scmp.lt.u32.totalorder %s9778_s10, %s11211_s2 }
  0x47   : > { %p9449_p10 = pneg %p9786_p4  ;;  %p9454_p7 = scmp.lt.u32.totalorder %s9452_s15, %s9447_s1 }
  0x48   : > { %p9456_p11 = scmp.lt.u32.totalorder %s9447_s1, %s9778_s10 }
  0x49   : > { %p9450_p5 = pnand %p9449_p10, %p9448_p8  ;;  %p9455_p9 = por %p9454_p7, %p9453_p0 }
  0x4b   : > { %p9451_p3 = pneg %p9450_p5  ;;  %p9457_p12 = por %p9456_p11, %p9455_p9 }
  0x4d   : > { %p9458_p2 = pnand %p9457_p12, %p9451_p3 }
  0x4f   : > { %9461 = shalt.err (!%p9458_p2)
}
  0x50   : > { %s9462_s28 = scalar_lea.vmem %s9780_s8, 512  ;;  %s9577_s12 = smov [#allocation5]  }
  0x51   : > { %p9463_p8 = scmp.ne.s32.totalorder %s9780_s8, %s9462_s28  ;;  %s9467_s26 = sshll.u32 %s9577_s12, 4  ;;  %s9468_s26 = int_to_ptr.vmem [resolvable:$false] %s9467_s26 }
  0x52   : > { %s9469_s25 = scalar_lea.vmem %s9468_s26, 1024  ;;  %p9470_p1 = scmp.lt.s32.totalorder %s9780_s8, %s9468_s26 }
  0x53   : > { %p9465_p5 = pnand %p9463_p8, %p9449_p10  ;;  %p9471_p0 = scmp.lt.s32.totalorder %s9469_s25, %s9462_s28 }
  0x55   : > { %p9466_p13 = pneg %p9465_p5  ;;  %p9472_p7 = por %p9471_p0, %p9470_p1 }
  0x57   : > { %p9473_p9 = pnand %p9472_p7, %p9466_p13 }
  0x59   : > { %9476 = shalt.err (!%p9473_p9)
}
  0x5a   : > { %9307 = dma.hbm_to_vmem [thread:$0]  (!%p9786_p4), %s9778_s10, 512, %s9780_s8, %s189_s5  }
  0x5b   : > { %209 = sbr.rel (%p9720_p6) target bundleno = 1432 (0x598), region = 32  ;;  %s211_s1 = sand.u32 (!%p9720_p6), 1, %s9547_s16  }
  0x5c   : > { %s8259_s30 = sshll.u32 (!%p9720_p6), %s211_s1, 13  ;;  %s212_s15 = scalar_lea.sflag (!%p9720_p6), [#allocation4], %s211_s1 }
  0x5d   : > { %s9818_s7 = scalar_lea.vmem (!%p9720_p6), [#allocation3], %s8259_s30  ;;  %p11232_p10 = scmp.ne.s32.totalorder (!%p9720_p6), %s11225_s11, 0 }
  0x62   : > { %9522 = dma.done.wait (%p11232_p10), %s212_s15, 131072  }
  0x63   : > { %9524 = vsyncadd (%p11232_p10), %s212_s15, 4294836224  ;;  %s220_s24 = sand.u32 1, %s9535_s13   ;;  %p11233_p6 = scmp.ne.s32.totalorder %s11229_s4, 0 }
  0x64   : > { %s8260_s27 = sshll.u32 %s220_s24, 5  ;;  %s221_s10 = scalar_lea.sflag [#allocation6], %s220_s24 }
  0x65   : > { %s9825_s8 = scalar_lea.vmem [#allocation5], %s8260_s27 }
  0x66   : > { %9526 = dma.done.wait (%p11233_p6), %s221_s10, 512  }
  0x67   : > { %9528 = vsyncadd (%p11233_p6), %s221_s10, 4294966784  ;;  %s8261_s9 = sshll.u32 %s9555_s18, 4  ;;  %s8263_s5 = sshll.u32 %s9559_s19, 3 }
  0x68   : > { %p258_p1 = scmp.lt.s32.totalorder %s8261_s9, 31  ;;  %p267_p13 = scmp.lt.s32.totalorder %s8263_s5, 15 }
  0x69   : > { %p8265_p4 = scmp.ne.s32.totalorder %s9555_s18, 0 }
  0x6a   : > { %s11252_s9 = smov (!%p258_p1, %s8261_s9), 31  ;;  %s11254_s5 = smov (!%p267_p13, %s8263_s5), 15 }
  0x6b   : > { %s8262_s11 = sshll.u32 %s11252_s9, 3  ;;  %s8264_s25 = sshll.u32 %s11254_s5, 3  ;;  %v9578_v0 = vmov (!%p8265_p4), 0.0  }
  0x6c   : > { %s9836_s26 = scalar_lea.vmem %s11209_s0, %s8262_s11  ;;  %s9841_s4 = scalar_lea.vmem %s11212_s3, %s8264_s25  ;;  %276 = vst [vmem:[#allocation2] sm:$0xff] (!%p8265_p4), %v9578_v0  ;;  %277 = vst [vmem:[#allocation2 + $0x8] sm:$0xff] (!%p8265_p4), %v9578_v0 }
  0x6d   : > { %275 = sbr.rel (%p8265_p4) target bundleno = 116 (0x74), region = 44  ;;  %278 = vst [vmem:[#allocation2 + $0x10] sm:$0xff] (!%p8265_p4), %v9578_v0  ;;  %279 = vst [vmem:[#allocation2 + $0x18] sm:$0xff] (!%p8265_p4), %v9578_v0 }
  0x6e   : > { %280 = vst [vmem:[#allocation2 + $0x20] sm:$0xff] (!%p8265_p4), %v9578_v0  ;;  %281 = vst [vmem:[#allocation2 + $0x28] sm:$0xff] (!%p8265_p4), %v9578_v0 }
  0x6f   : > { %282 = vst [vmem:[#allocation2 + $0x30] sm:$0xff] (!%p8265_p4), %v9578_v0  ;;  %283 = vst [vmem:[#allocation2 + $0x38] sm:$0xff] (!%p8265_p4), %v9578_v0 }
  0x74 PF: > { %v324_v1 = vld [vmem:[%s9818_s7] sm:$0xff]  ;;  %v285_v54 = vld [vmem:[%s9836_s26 + $0x8] sm:$0xff]  ;;  %v287_v55 = vld [vmem:[%s9836_s26 + $0x18] sm:$0xff]  ;;  %p9290_p3 = scmp.ne.s32.totalorder %s9555_s18, 1 }
  0x75   : > { %v328_v2 = vld [vmem:[%s9818_s7 + $0x20] sm:$0xff]  ;;  %v9876_v59 = vpack.c.bf16 %v285_v54, %v285_v54  ;;  %v9878_v60 = vpack.c.bf16 %v287_v55, %v287_v55 }
  0x76   : > { %v452_v3 = vld [vmem:[%s9818_s7 + $0x400] sm:$0xff]  ;;  %v8267_v4 = vcombine.high %v324_v1, %v328_v2  ;;  %v8266_v6 = vcombine.low %v324_v1, %v328_v2 }
  0x77   : > { %v456_v5 = vld [vmem:[%s9818_s7 + $0x420] sm:$0xff]  ;;  %6500 = vmatprep.mubr.bf16.mxu0 %v9876_v59  ;;  %6541 = vmatprep.mubr.bf16.mxu1 %v9878_v60 }
  0x78   : > { %v332_v7 = vld [vmem:[%s9818_s7 + $0x40] sm:$0xff]  ;;  %v8395_v9 = vcombine.high %v452_v3, %v456_v5  ;;  %v8394_v10 = vcombine.low %v452_v3, %v456_v5  ;;  %6468 = vmatprep.subr.bf16.mxu0 %v8267_v4 }
  0x79   : > { %v336_v8 = vld [vmem:[%s9818_s7 + $0x60] sm:$0xff]  ;;  %6469 = vmatpush1.bf16.msra.mxu0 %v8266_v6 }
  0x7a   : > { %v8275_v11 = vcombine.high %v332_v7, %v336_v8  ;;  %v460_v12 = vld [vmem:[%s9818_s7 + $0x440] sm:$0xff]  ;;  %6509 = vmatprep.subr.bf16.mxu1 %v8395_v9  ;;  %v8274_v19 = vcombine.low %v332_v7, %v336_v8 }
  0x7b   : > { %v464_v13 = vld [vmem:[%s9818_s7 + $0x460] sm:$0xff]  ;;  %6510 = vmatpush1.bf16.msra.mxu1 %v8394_v10 }
  0x7c   : > { %v340_v14 = vld [vmem:[%s9818_s7 + $0x80] sm:$0xff]  ;;  %v8403_v15 = vcombine.high %v460_v12, %v464_v13  ;;  %6470 = vmatprep.subr.bf16.mxu0 %v8275_v11  ;;  %v8402_v20 = vcombine.low %v460_v12, %v464_v13 }
  0x7d   : > { %v344_v16 = vld [vmem:[%s9818_s7 + $0xa0] sm:$0xff]  ;;  %6471 = vmatpush1.bf16.msra.mxu0 %v8274_v19 }
  0x7e   : > { %v468_v17 = vld [vmem:[%s9818_s7 + $0x480] sm:$0xff]  ;;  %v8283_v21 = vcombine.high %v340_v14, %v344_v16  ;;  %6511 = vmatprep.subr.bf16.mxu1 %v8403_v15  ;;  %v8282_v27 = vcombine.low %v340_v14, %v344_v16 }
  0x7f   : > { %v472_v18 = vld [vmem:[%s9818_s7 + $0x4a0] sm:$0xff]  ;;  %6512 = vmatpush1.bf16.msra.mxu1 %v8402_v20 }
  0x80   : > { %v8411_v22 = vcombine.high %v468_v17, %v472_v18  ;;  %v348_v23 = vld [vmem:[%s9818_s7 + $0xc0] sm:$0xff]  ;;  %6472 = vmatprep.subr.bf16.mxu0 %v8283_v21  ;;  %v8410_v28 = vcombine.low %v468_v17, %v472_v18 }
  0x81   : > { %v352_v24 = vld [vmem:[%s9818_s7 + $0xe0] sm:$0xff]  ;;  %6473 = vmatpush1.bf16.msra.mxu0 %v8282_v27 }
  0x82   : > { %v476_v25 = vld [vmem:[%s9818_s7 + $0x4c0] sm:$0xff]  ;;  %v8291_v29 = vcombine.high %v348_v23, %v352_v24  ;;  %6513 = vmatprep.subr.bf16.mxu1 %v8411_v22  ;;  %v8290_v35 = vcombine.low %v348_v23, %v352_v24 }
  0x83   : > { %v480_v26 = vld [vmem:[%s9818_s7 + $0x4e0] sm:$0xff]  ;;  %6514 = vmatpush1.bf16.msra.mxu1 %v8410_v28 }
  0x84   : > { %v8419_v30 = vcombine.high %v476_v25, %v480_v26  ;;  %v356_v31 = vld [vmem:[%s9818_s7 + $0x100] sm:$0xff]  ;;  %6474 = vmatprep.subr.bf16.mxu0 %v8291_v29  ;;  %v8418_v36 = vcombine.low %v476_v25, %v480_v26 }
  0x85   : > { %v360_v32 = vld [vmem:[%s9818_s7 + $0x120] sm:$0xff]  ;;  %6475 = vmatpush1.bf16.msra.mxu0 %v8290_v35 }
  0x86   : > { %v484_v33 = vld [vmem:[%s9818_s7 + $0x500] sm:$0xff]  ;;  %v8299_v37 = vcombine.high %v356_v31, %v360_v32  ;;  %6515 = vmatprep.subr.bf16.mxu1 %v8419_v30  ;;  %v8298_v43 = vcombine.low %v356_v31, %v360_v32 }
  0x87   : > { %v488_v34 = vld [vmem:[%s9818_s7 + $0x520] sm:$0xff]  ;;  %6516 = vmatpush1.bf16.msra.mxu1 %v8418_v36 }
  0x88   : > { %v8427_v38 = vcombine.high %v484_v33, %v488_v34  ;;  %v364_v39 = vld [vmem:[%s9818_s7 + $0x140] sm:$0xff]  ;;  %6476 = vmatprep.subr.bf16.mxu0 %v8299_v37  ;;  %v8426_v44 = vcombine.low %v484_v33, %v488_v34 }
  0x89   : > { %v368_v40 = vld [vmem:[%s9818_s7 + $0x160] sm:$0xff]  ;;  %6477 = vmatpush1.bf16.msra.mxu0 %v8298_v43 }
  0x8a   : > { %v492_v41 = vld [vmem:[%s9818_s7 + $0x540] sm:$0xff]  ;;  %v8307_v45 = vcombine.high %v364_v39, %v368_v40  ;;  %6517 = vmatprep.subr.bf16.mxu1 %v8427_v38  ;;  %v8306_v51 = vcombine.low %v364_v39, %v368_v40 }
  0x8b   : > { %v496_v42 = vld [vmem:[%s9818_s7 + $0x560] sm:$0xff]  ;;  %6518 = vmatpush1.bf16.msra.mxu1 %v8426_v44 }
  0x8c   : > { %v8435_v46 = vcombine.high %v492_v41, %v496_v42  ;;  %v372_v47 = vld [vmem:[%s9818_s7 + $0x180] sm:$0xff]  ;;  %6478 = vmatprep.subr.bf16.mxu0 %v8307_v45  ;;  %v8434_v52 = vcombine.low %v492_v41, %v496_v42 }
  0x8d   : > { %v376_v48 = vld [vmem:[%s9818_s7 + $0x1a0] sm:$0xff]  ;;  %6479 = vmatpush1.bf16.msra.mxu0 %v8306_v51 }
  0x8e   : > { %v500_v49 = vld [vmem:[%s9818_s7 + $0x580] sm:$0xff]  ;;  %v8315_v53 = vcombine.high %v372_v47, %v376_v48  ;;  %6519 = vmatprep.subr.bf16.mxu1 %v8435_v46  ;;  %v8314_v63 = vcombine.low %v372_v47, %v376_v48 }
  0x8f   : > { %v504_v50 = vld [vmem:[%s9818_s7 + $0x5a0] sm:$0xff]  ;;  %6520 = vmatpush1.bf16.msra.mxu1 %v8434_v52 }
  0x90   : > { %v8443_v56 = vcombine.high %v500_v49, %v504_v50  ;;  %v380_v57 = vld [vmem:[%s9818_s7 + $0x1c0] sm:$0xff]  ;;  %6480 = vmatprep.subr.bf16.mxu0 %v8315_v53  ;;  %v8442_v0 = vcombine.low %v500_v49, %v504_v50 }
  0x91   : > { %v384_v58 = vld [vmem:[%s9818_s7 + $0x1e0] sm:$0xff]  ;;  %6481 = vmatpush1.bf16.msra.mxu0 %v8314_v63 }
  0x92   : > { %v508_v61 = vld [vmem:[%s9818_s7 + $0x5c0] sm:$0xff]  ;;  %v8323_v1 = vcombine.high %v380_v57, %v384_v58  ;;  %6521 = vmatprep.subr.bf16.mxu1 %v8443_v56  ;;  %v8322_v7 = vcombine.low %v380_v57, %v384_v58 }
  0x93   : > { %v512_v62 = vld [vmem:[%s9818_s7 + $0x5e0] sm:$0xff]  ;;  %6522 = vmatpush1.bf16.msra.mxu1 %v8442_v0 }
  0x94   : > { %v8451_v2 = vcombine.high %v508_v61, %v512_v62  ;;  %v388_v3 = vld [vmem:[%s9818_s7 + $0x200] sm:$0xff]  ;;  %6482 = vmatprep.subr.bf16.mxu0 %v8323_v1  ;;  %v8450_v8 = vcombine.low %v508_v61, %v512_v62 }
  0x95   : > { %v392_v4 = vld [vmem:[%s9818_s7 + $0x220] sm:$0xff]  ;;  %6483 = vmatpush1.bf16.msra.mxu0 %v8322_v7 }
  0x96   : > { %v516_v5 = vld [vmem:[%s9818_s7 + $0x600] sm:$0xff]  ;;  %v8331_v9 = vcombine.high %v388_v3, %v392_v4  ;;  %6523 = vmatprep.subr.bf16.mxu1 %v8451_v2  ;;  %v8330_v15 = vcombine.low %v388_v3, %v392_v4 }
  0x97   : > { %v520_v6 = vld [vmem:[%s9818_s7 + $0x620] sm:$0xff]  ;;  %6524 = vmatpush1.bf16.msra.mxu1 %v8450_v8 }
  0x98   : > { %v8459_v10 = vcombine.high %v516_v5, %v520_v6  ;;  %v396_v11 = vld [vmem:[%s9818_s7 + $0x240] sm:$0xff]  ;;  %6484 = vmatprep.subr.bf16.mxu0 %v8331_v9  ;;  %v8458_v16 = vcombine.low %v516_v5, %v520_v6 }
  0x99   : > { %v400_v12 = vld [vmem:[%s9818_s7 + $0x260] sm:$0xff]  ;;  %6485 = vmatpush1.bf16.msra.mxu0 %v8330_v15 }
  0x9a   : > { %v524_v13 = vld [vmem:[%s9818_s7 + $0x640] sm:$0xff]  ;;  %v8339_v17 = vcombine.high %v396_v11, %v400_v12  ;;  %6525 = vmatprep.subr.bf16.mxu1 %v8459_v10  ;;  %v8338_v23 = vcombine.low %v396_v11, %v400_v12  ;;  %v286_v12 = vld [vmem:[%s9836_s26 + $0x10] sm:$0xff] }
  0x9b   : > { %v528_v14 = vld [vmem:[%s9818_s7 + $0x660] sm:$0xff]  ;;  %6526 = vmatpush1.bf16.msra.mxu1 %v8458_v16 }
  0x9c   : > { %v8467_v18 = vcombine.high %v524_v13, %v528_v14  ;;  %v404_v19 = vld [vmem:[%s9818_s7 + $0x280] sm:$0xff]  ;;  %6486 = vmatprep.subr.bf16.mxu0 %v8339_v17  ;;  %v8466_v24 = vcombine.low %v524_v13, %v528_v14 }
  0x9d   : > { %v408_v20 = vld [vmem:[%s9818_s7 + $0x2a0] sm:$0xff]  ;;  %6487 = vmatpush1.bf16.msra.mxu0 %v8338_v23  ;;  %v291_v23 = vld [vmem:[%s9836_s26 + $0x38] sm:$0xff] }
  0x9e   : > { %v532_v21 = vld [vmem:[%s9818_s7 + $0x680] sm:$0xff]  ;;  %v8347_v25 = vcombine.high %v404_v19, %v408_v20  ;;  %6527 = vmatprep.subr.bf16.mxu1 %v8467_v18  ;;  %v8346_v31 = vcombine.low %v404_v19, %v408_v20  ;;  %v289_v20 = vld [vmem:[%s9836_s26 + $0x28] sm:$0xff] }
  0x9f   : > { %v536_v22 = vld [vmem:[%s9818_s7 + $0x6a0] sm:$0xff]  ;;  %6528 = vmatpush1.bf16.msra.mxu1 %v8466_v24 }
  0xa0   : > { %v8475_v26 = vcombine.high %v532_v21, %v536_v22  ;;  %v412_v27 = vld [vmem:[%s9818_s7 + $0x2c0] sm:$0xff]  ;;  %6488 = vmatprep.subr.bf16.mxu0 %v8347_v25  ;;  %v8474_v32 = vcombine.low %v532_v21, %v536_v22  ;;  %v9929_v21 = vpack.c.bf16 %v286_v12, %v286_v12 }
  0xa1   : > { %v416_v28 = vld [vmem:[%s9818_s7 + $0x2e0] sm:$0xff]  ;;  %6489 = vmatpush1.bf16.msra.mxu0 %v8346_v31 }
  0xa2   : > { %v540_v29 = vld [vmem:[%s9818_s7 + $0x6c0] sm:$0xff]  ;;  %v8355_v33 = vcombine.high %v412_v27, %v416_v28  ;;  %6529 = vmatprep.subr.bf16.mxu1 %v8475_v26  ;;  %v8354_v39 = vcombine.low %v412_v27, %v416_v28 }
  0xa3   : > { %v544_v30 = vld [vmem:[%s9818_s7 + $0x6e0] sm:$0xff]  ;;  %6530 = vmatpush1.bf16.msra.mxu1 %v8474_v32  ;;  %v9939_v32 = vpack.c.bf16 %v291_v23, %v291_v23 }
  0xa4   : > { %v8483_v34 = vcombine.high %v540_v29, %v544_v30  ;;  %v420_v35 = vld [vmem:[%s9818_s7 + $0x300] sm:$0xff]  ;;  %6490 = vmatprep.subr.bf16.mxu0 %v8355_v33  ;;  %v8482_v40 = vcombine.low %v540_v29, %v544_v30  ;;  %v9934_v29 = vpack.c.bf16 %v289_v20, %v289_v20 }
  0xa5   : > { %v424_v36 = vld [vmem:[%s9818_s7 + $0x320] sm:$0xff]  ;;  %6491 = vmatpush1.bf16.msra.mxu0 %v8354_v39 }
  0xa6   : > { %v548_v37 = vld [vmem:[%s9818_s7 + $0x700] sm:$0xff]  ;;  %v8363_v41 = vcombine.high %v420_v35, %v424_v36  ;;  %6531 = vmatprep.subr.bf16.mxu1 %v8483_v34  ;;  %v8362_v47 = vcombine.low %v420_v35, %v424_v36 }
  0xa7   : > { %v552_v38 = vld [vmem:[%s9818_s7 + $0x720] sm:$0xff]  ;;  %6532 = vmatpush1.bf16.msra.mxu1 %v8482_v40 }
  0xa8   : > { %v8491_v42 = vcombine.high %v548_v37, %v552_v38  ;;  %v428_v43 = vld [vmem:[%s9818_s7 + $0x340] sm:$0xff]  ;;  %6492 = vmatprep.subr.bf16.mxu0 %v8363_v41  ;;  %v8490_v48 = vcombine.low %v548_v37, %v552_v38 }
  0xa9   : > { %v432_v44 = vld [vmem:[%s9818_s7 + $0x360] sm:$0xff]  ;;  %6493 = vmatpush1.bf16.msra.mxu0 %v8362_v47 }
  0xaa   : > { %v556_v45 = vld [vmem:[%s9818_s7 + $0x740] sm:$0xff]  ;;  %v8371_v49 = vcombine.high %v428_v43, %v432_v44  ;;  %6533 = vmatprep.subr.bf16.mxu1 %v8491_v42  ;;  %v8370_v55 = vcombine.low %v428_v43, %v432_v44 }
  0xab   : > { %v560_v46 = vld [vmem:[%s9818_s7 + $0x760] sm:$0xff]  ;;  %6534 = vmatpush1.bf16.msra.mxu1 %v8490_v48 }
  0xac   : > { %v8499_v50 = vcombine.high %v556_v45, %v560_v46  ;;  %v436_v51 = vld [vmem:[%s9818_s7 + $0x380] sm:$0xff]  ;;  %6494 = vmatprep.subr.bf16.mxu0 %v8371_v49  ;;  %v8498_v56 = vcombine.low %v556_v45, %v560_v46 }
  0xad   : > { %v440_v52 = vld [vmem:[%s9818_s7 + $0x3a0] sm:$0xff]  ;;  %6495 = vmatpush1.bf16.msra.mxu0 %v8370_v55 }
  0xae   : > { %v564_v53 = vld [vmem:[%s9818_s7 + $0x780] sm:$0xff]  ;;  %v8379_v57 = vcombine.high %v436_v51, %v440_v52  ;;  %6535 = vmatprep.subr.bf16.mxu1 %v8499_v50  ;;  %v8378_v1 = vcombine.low %v436_v51, %v440_v52 }
  0xaf   : > { %v568_v54 = vld [vmem:[%s9818_s7 + $0x7a0] sm:$0xff]  ;;  %6536 = vmatpush1.bf16.msra.mxu1 %v8498_v56 }
  0xb0   : > { %v8507_v58 = vcombine.high %v564_v53, %v568_v54  ;;  %v444_v61 = vld [vmem:[%s9818_s7 + $0x3c0] sm:$0xff]  ;;  %6496 = vmatprep.subr.bf16.mxu0 %v8379_v57  ;;  %v8506_v2 = vcombine.low %v564_v53, %v568_v54 }
  0xb1   : > { %v448_v62 = vld [vmem:[%s9818_s7 + $0x3e0] sm:$0xff]  ;;  %6497 = vmatpush1.bf16.msra.mxu0 %v8378_v1 }
  0xb2   : > { %v572_v63 = vld [vmem:[%s9818_s7 + $0x7c0] sm:$0xff]  ;;  %v8387_v3 = vcombine.high %v444_v61, %v448_v62  ;;  %6537 = vmatprep.subr.bf16.mxu1 %v8507_v58  ;;  %v8386_v9 = vcombine.low %v444_v61, %v448_v62 }
  0xb3   : > { %v576_v0 = vld [vmem:[%s9818_s7 + $0x7e0] sm:$0xff]  ;;  %6538 = vmatpush1.bf16.msra.mxu1 %v8506_v2 }
  0xb4   : > { %v8515_v4 = vcombine.high %v572_v63, %v576_v0  ;;  %v580_v5 = vld [vmem:[%s9818_s7 + $0x800] sm:$0xff]  ;;  %6498 = vmatprep.subr.bf16.mxu0 %v8387_v3  ;;  %v8514_v11 = vcombine.low %v572_v63, %v576_v0 }
  0xb5   : > { %v584_v6 = vld [vmem:[%s9818_s7 + $0x820] sm:$0xff]  ;;  %6499 = vmatpush1.bf16.msra.mxu0 %v8386_v9 }
  0xb6   : > { %v708_v7 = vld [vmem:[%s9818_s7 + $0xc00] sm:$0xff]  ;;  %v8523_v13 = vcombine.high %v580_v5, %v584_v6  ;;  %6539 = vmatprep.subr.bf16.mxu1 %v8515_v4  ;;  %v8522_v22 = vcombine.low %v580_v5, %v584_v6 }
  0xb7   : > { %v712_v8 = vld [vmem:[%s9818_s7 + $0xc20] sm:$0xff]  ;;  %6540 = vmatpush1.bf16.msra.mxu1 %v8514_v11 }
  0xb8   : > { %v284_v10 = vld [vmem:[%s9836_s26] sm:$0xff]  ;;  %v8651_v14 = vcombine.high %v708_v7, %v712_v8  ;;  %6550 = vmatprep.subr.bf16.mxu0 %v8523_v13  ;;  %v8650_v24 = vcombine.low %v708_v7, %v712_v8 }
  0xb9   : > { %v588_v15 = vld [vmem:[%s9818_s7 + $0x840] sm:$0xff]  ;;  %v9924_v17 = vpack.c.bf16 %v284_v10, %v284_v10 }
  0xba   : > { %v592_v16 = vld [vmem:[%s9818_s7 + $0x860] sm:$0xff]  ;;  %6591 = vmatprep.subr.bf16.mxu1 %v8651_v14  ;;  %6542 = vmatmul.mubr.bf16.vlgmr.msra.gmra.mrb[0].mxu1 %v9929_v21 }
  0xbb   : > { %v716_v18 = vld [vmem:[%s9818_s7 + $0xc40] sm:$0xff]  ;;  %v8531_v25 = vcombine.high %v588_v15, %v592_v16  ;;  %6501 = vmatmul.mubr.bf16.vlgmr.msra.gmra.mrb[0].mxu0 %v9924_v17  ;;  %v8530_v33 = vcombine.low %v588_v15, %v592_v16  ;;  %6592 = vmatpush1.bf16.msra.mxu1 %v8650_v24 }
  0xbc   : > { %v720_v19 = vld [vmem:[%s9818_s7 + $0xc60] sm:$0xff]  ;;  %6551 = vmatpush1.bf16.msra.mxu0 %v8522_v22  ;;  %6582 = vmatprep.mubr.bf16.mxu0 %v9934_v29 }
  0xbd   : > { %v8659_v26 = vcombine.high %v716_v18, %v720_v19  ;;  %v596_v27 = vld [vmem:[%s9818_s7 + $0x880] sm:$0xff]  ;;  %6552 = vmatprep.subr.bf16.mxu0 %v8531_v25  ;;  %v8658_v34 = vcombine.low %v716_v18, %v720_v19  ;;  %6623 = vmatprep.mubr.bf16.mxu1 %v9939_v32 }
  0xbe   : > { %v600_v28 = vld [vmem:[%s9818_s7 + $0x8a0] sm:$0xff] }
  0xbf   : > { %v724_v30 = vld [vmem:[%s9818_s7 + $0xc80] sm:$0xff]  ;;  %v8539_v35 = vcombine.high %v596_v27, %v600_v28  ;;  %6593 = vmatprep.subr.bf16.mxu1 %v8659_v26  ;;  %v8538_v41 = vcombine.low %v596_v27, %v600_v28 }
  0xc0   : > { %v728_v31 = vld [vmem:[%s9818_s7 + $0xca0] sm:$0xff]  ;;  %6553 = vmatpush1.bf16.msra.mxu0 %v8530_v33  ;;  %6594 = vmatpush1.bf16.msra.mxu1 %v8658_v34 }
  0xc1   : > { %v8667_v36 = vcombine.high %v724_v30, %v728_v31  ;;  %v604_v37 = vld [vmem:[%s9818_s7 + $0x8c0] sm:$0xff]  ;;  %6554 = vmatprep.subr.bf16.mxu0 %v8539_v35  ;;  %v8666_v42 = vcombine.low %v724_v30, %v728_v31 }
  0xc2   : > { %v608_v38 = vld [vmem:[%s9818_s7 + $0x8e0] sm:$0xff] }
  0xc3   : > { %v732_v39 = vld [vmem:[%s9818_s7 + $0xcc0] sm:$0xff]  ;;  %v8547_v43 = vcombine.high %v604_v37, %v608_v38  ;;  %6595 = vmatprep.subr.bf16.mxu1 %v8667_v36  ;;  %v8546_v49 = vcombine.low %v604_v37, %v608_v38 }
  0xc4   : > { %v736_v40 = vld [vmem:[%s9818_s7 + $0xce0] sm:$0xff]  ;;  %6555 = vmatpush1.bf16.msra.mxu0 %v8538_v41  ;;  %6596 = vmatpush1.bf16.msra.mxu1 %v8666_v42 }
  0xc5   : > { %v8675_v44 = vcombine.high %v732_v39, %v736_v40  ;;  %v612_v45 = vld [vmem:[%s9818_s7 + $0x900] sm:$0xff]  ;;  %6556 = vmatprep.subr.bf16.mxu0 %v8547_v43  ;;  %v8674_v50 = vcombine.low %v732_v39, %v736_v40 }
  0xc6   : > { %v616_v46 = vld [vmem:[%s9818_s7 + $0x920] sm:$0xff] }
  0xc7   : > { %v740_v47 = vld [vmem:[%s9818_s7 + $0xd00] sm:$0xff]  ;;  %v8555_v51 = vcombine.high %v612_v45, %v616_v46  ;;  %6597 = vmatprep.subr.bf16.mxu1 %v8675_v44  ;;  %v8554_v57 = vcombine.low %v612_v45, %v616_v46 }
  0xc8   : > { %v744_v48 = vld [vmem:[%s9818_s7 + $0xd20] sm:$0xff]  ;;  %6557 = vmatpush1.bf16.msra.mxu0 %v8546_v49  ;;  %6598 = vmatpush1.bf16.msra.mxu1 %v8674_v50 }
  0xc9   : > { %v8683_v52 = vcombine.high %v740_v47, %v744_v48  ;;  %v620_v53 = vld [vmem:[%s9818_s7 + $0x940] sm:$0xff]  ;;  %6558 = vmatprep.subr.bf16.mxu0 %v8555_v51  ;;  %v8682_v58 = vcombine.low %v740_v47, %v744_v48 }
  0xca   : > { %v624_v54 = vld [vmem:[%s9818_s7 + $0x960] sm:$0xff] }
  0xcb   : > { %v748_v55 = vld [vmem:[%s9818_s7 + $0xd40] sm:$0xff]  ;;  %v8563_v61 = vcombine.high %v620_v53, %v624_v54  ;;  %6599 = vmatprep.subr.bf16.mxu1 %v8683_v52  ;;  %v8562_v3 = vcombine.low %v620_v53, %v624_v54 }
  0xcc   : > { %v752_v56 = vld [vmem:[%s9818_s7 + $0xd60] sm:$0xff]  ;;  %6559 = vmatpush1.bf16.msra.mxu0 %v8554_v57  ;;  %6600 = vmatpush1.bf16.msra.mxu1 %v8682_v58 }
  0xcd   : > { %v8691_v62 = vcombine.high %v748_v55, %v752_v56  ;;  %v628_v63 = vld [vmem:[%s9818_s7 + $0x980] sm:$0xff]  ;;  %6560 = vmatprep.subr.bf16.mxu0 %v8563_v61  ;;  %v8690_v4 = vcombine.low %v748_v55, %v752_v56 }
  0xce   : > { %v632_v0 = vld [vmem:[%s9818_s7 + $0x9a0] sm:$0xff] }
  0xcf   : > { %v756_v1 = vld [vmem:[%s9818_s7 + $0xd80] sm:$0xff]  ;;  %v8571_v5 = vcombine.high %v628_v63, %v632_v0  ;;  %6601 = vmatprep.subr.bf16.mxu1 %v8691_v62  ;;  %v8570_v11 = vcombine.low %v628_v63, %v632_v0 }
  0xd0   : > { %v760_v2 = vld [vmem:[%s9818_s7 + $0xda0] sm:$0xff]  ;;  %6561 = vmatpush1.bf16.msra.mxu0 %v8562_v3  ;;  %6602 = vmatpush1.bf16.msra.mxu1 %v8690_v4 }
  0xd1   : > { %v8699_v6 = vcombine.high %v756_v1, %v760_v2  ;;  %v636_v7 = vld [vmem:[%s9818_s7 + $0x9c0] sm:$0xff]  ;;  %6562 = vmatprep.subr.bf16.mxu0 %v8571_v5  ;;  %v8698_v12 = vcombine.low %v756_v1, %v760_v2 }
  0xd2   : > { %v640_v8 = vld [vmem:[%s9818_s7 + $0x9e0] sm:$0xff] }
  0xd3   : > { %v764_v9 = vld [vmem:[%s9818_s7 + $0xdc0] sm:$0xff]  ;;  %v8579_v13 = vcombine.high %v636_v7, %v640_v8  ;;  %6603 = vmatprep.subr.bf16.mxu1 %v8699_v6  ;;  %v8578_v20 = vcombine.low %v636_v7, %v640_v8 }
  0xd4   : > { %v768_v10 = vld [vmem:[%s9818_s7 + $0xde0] sm:$0xff]  ;;  %6563 = vmatpush1.bf16.msra.mxu0 %v8570_v11  ;;  %6604 = vmatpush1.bf16.msra.mxu1 %v8698_v12 }
  0xd5   : > { %v8707_v14 = vcombine.high %v764_v9, %v768_v10  ;;  %v644_v15 = vld [vmem:[%s9818_s7 + $0xa00] sm:$0xff]  ;;  %6564 = vmatprep.subr.bf16.mxu0 %v8579_v13  ;;  %v8706_v22 = vcombine.low %v764_v9, %v768_v10 }
  0xd6   : > { %v648_v16 = vld [vmem:[%s9818_s7 + $0xa20] sm:$0xff] }
  0xd7   : > { %v772_v18 = vld [vmem:[%s9818_s7 + $0xe00] sm:$0xff]  ;;  %v8587_v23 = vcombine.high %v644_v15, %v648_v16  ;;  %6605 = vmatprep.subr.bf16.mxu1 %v8707_v14  ;;  %v8586_v30 = vcombine.low %v644_v15, %v648_v16 }
  0xd8   : > { %v776_v19 = vld [vmem:[%s9818_s7 + $0xe20] sm:$0xff]  ;;  %6565 = vmatpush1.bf16.msra.mxu0 %v8578_v20  ;;  %6606 = vmatpush1.bf16.msra.mxu1 %v8706_v22 }
  0xd9   : > { %v8715_v24 = vcombine.high %v772_v18, %v776_v19  ;;  %v652_v25 = vld [vmem:[%s9818_s7 + $0xa40] sm:$0xff]  ;;  %6566 = vmatprep.subr.bf16.mxu0 %v8587_v23  ;;  %v8714_v31 = vcombine.low %v772_v18, %v776_v19 }
  0xda   : > { %v656_v26 = vld [vmem:[%s9818_s7 + $0xa60] sm:$0xff] }
  0xdb   : > { %v780_v27 = vld [vmem:[%s9818_s7 + $0xe40] sm:$0xff]  ;;  %v8595_v33 = vcombine.high %v652_v25, %v656_v26  ;;  %6607 = vmatprep.subr.bf16.mxu1 %v8715_v24  ;;  %v8594_v39 = vcombine.low %v652_v25, %v656_v26 }
  0xdc   : > { %v784_v28 = vld [vmem:[%s9818_s7 + $0xe60] sm:$0xff]  ;;  %6567 = vmatpush1.bf16.msra.mxu0 %v8586_v30  ;;  %6608 = vmatpush1.bf16.msra.mxu1 %v8714_v31  ;;  %v290_v31 = vld [vmem:[%s9836_s26 + $0x30] sm:$0xff] }
  0xdd   : > { %v8723_v34 = vcombine.high %v780_v27, %v784_v28  ;;  %v660_v35 = vld [vmem:[%s9818_s7 + $0xa80] sm:$0xff]  ;;  %6568 = vmatprep.subr.bf16.mxu0 %v8595_v33  ;;  %v8722_v40 = vcombine.low %v780_v27, %v784_v28 }
  0xde   : > { %v664_v36 = vld [vmem:[%s9818_s7 + $0xaa0] sm:$0xff] }
  0xdf   : > { %v788_v37 = vld [vmem:[%s9818_s7 + $0xe80] sm:$0xff]  ;;  %v8603_v41 = vcombine.high %v660_v35, %v664_v36  ;;  %6609 = vmatprep.subr.bf16.mxu1 %v8723_v34  ;;  %v8602_v47 = vcombine.low %v660_v35, %v664_v36 }
  0xe0   : > { %v792_v38 = vld [vmem:[%s9818_s7 + $0xea0] sm:$0xff]  ;;  %6569 = vmatpush1.bf16.msra.mxu0 %v8594_v39  ;;  %6610 = vmatpush1.bf16.msra.mxu1 %v8722_v40  ;;  %v293_v40 = vld [vmem:[%s9836_s26 + $0x48] sm:$0xff] }
  0xe1   : > { %v8731_v42 = vcombine.high %v788_v37, %v792_v38  ;;  %v668_v43 = vld [vmem:[%s9818_s7 + $0xac0] sm:$0xff]  ;;  %6570 = vmatprep.subr.bf16.mxu0 %v8603_v41  ;;  %v8730_v48 = vcombine.low %v788_v37, %v792_v38  ;;  %v10009_v41 = vpack.c.bf16 %v290_v31, %v290_v31 }
  0xe2   : > { %v672_v44 = vld [vmem:[%s9818_s7 + $0xae0] sm:$0xff] }
  0xe3   : > { %v796_v45 = vld [vmem:[%s9818_s7 + $0xec0] sm:$0xff]  ;;  %v8611_v49 = vcombine.high %v668_v43, %v672_v44  ;;  %6611 = vmatprep.subr.bf16.mxu1 %v8731_v42  ;;  %v8610_v55 = vcombine.low %v668_v43, %v672_v44  ;;  %v295_v43 = vld [vmem:[%s9836_s26 + $0x58] sm:$0xff] }
  0xe4   : > { %v800_v46 = vld [vmem:[%s9818_s7 + $0xee0] sm:$0xff]  ;;  %6571 = vmatpush1.bf16.msra.mxu0 %v8602_v47  ;;  %6612 = vmatpush1.bf16.msra.mxu1 %v8730_v48 }
  0xe5   : > { %v8739_v50 = vcombine.high %v796_v45, %v800_v46  ;;  %v676_v51 = vld [vmem:[%s9818_s7 + $0xb00] sm:$0xff]  ;;  %6572 = vmatprep.subr.bf16.mxu0 %v8611_v49  ;;  %v8738_v56 = vcombine.low %v796_v45, %v800_v46  ;;  %v10014_v49 = vpack.c.bf16 %v293_v40, %v293_v40 }
  0xe6   : > { %v680_v52 = vld [vmem:[%s9818_s7 + $0xb20] sm:$0xff] }
  0xe7   : > { %v804_v53 = vld [vmem:[%s9818_s7 + $0xf00] sm:$0xff]  ;;  %v8619_v57 = vcombine.high %v676_v51, %v680_v52  ;;  %6613 = vmatprep.subr.bf16.mxu1 %v8739_v50  ;;  %v8618_v1 = vcombine.low %v676_v51, %v680_v52  ;;  %v10019_v52 = vpack.c.bf16 %v295_v43, %v295_v43 }
  0xe8   : > { %v808_v54 = vld [vmem:[%s9818_s7 + $0xf20] sm:$0xff]  ;;  %6573 = vmatpush1.bf16.msra.mxu0 %v8610_v55  ;;  %6614 = vmatpush1.bf16.msra.mxu1 %v8738_v56 }
  0xe9   : > { %v8747_v58 = vcombine.high %v804_v53, %v808_v54  ;;  %v684_v61 = vld [vmem:[%s9818_s7 + $0xb40] sm:$0xff]  ;;  %6574 = vmatprep.subr.bf16.mxu0 %v8619_v57  ;;  %v8746_v2 = vcombine.low %v804_v53, %v808_v54 }
  0xea   : > { %v688_v62 = vld [vmem:[%s9818_s7 + $0xb60] sm:$0xff] }
  0xeb   : > { %v812_v63 = vld [vmem:[%s9818_s7 + $0xf40] sm:$0xff]  ;;  %v8627_v3 = vcombine.high %v684_v61, %v688_v62  ;;  %6615 = vmatprep.subr.bf16.mxu1 %v8747_v58  ;;  %v8626_v9 = vcombine.low %v684_v61, %v688_v62 }
  0xec   : > { %v816_v0 = vld [vmem:[%s9818_s7 + $0xf60] sm:$0xff]  ;;  %6575 = vmatpush1.bf16.msra.mxu0 %v8618_v1  ;;  %6616 = vmatpush1.bf16.msra.mxu1 %v8746_v2 }
  0xed   : > { %v8755_v4 = vcombine.high %v812_v63, %v816_v0  ;;  %v692_v5 = vld [vmem:[%s9818_s7 + $0xb80] sm:$0xff]  ;;  %6576 = vmatprep.subr.bf16.mxu0 %v8627_v3  ;;  %v8754_v10 = vcombine.low %v812_v63, %v816_v0 }
  0xee   : > { %v696_v6 = vld [vmem:[%s9818_s7 + $0xba0] sm:$0xff] }
  0xef   : > { %v820_v7 = vld [vmem:[%s9818_s7 + $0xf80] sm:$0xff]  ;;  %v8635_v11 = vcombine.high %v692_v5, %v696_v6  ;;  %6617 = vmatprep.subr.bf16.mxu1 %v8755_v4  ;;  %v8634_v18 = vcombine.low %v692_v5, %v696_v6 }
  0xf0   : > { %v824_v8 = vld [vmem:[%s9818_s7 + $0xfa0] sm:$0xff]  ;;  %6577 = vmatpush1.bf16.msra.mxu0 %v8626_v9  ;;  %6618 = vmatpush1.bf16.msra.mxu1 %v8754_v10 }
  0xf1   : > { %v8763_v12 = vcombine.high %v820_v7, %v824_v8  ;;  %v700_v13 = vld [vmem:[%s9818_s7 + $0xbc0] sm:$0xff]  ;;  %6578 = vmatprep.subr.bf16.mxu0 %v8635_v11  ;;  %v8762_v19 = vcombine.low %v820_v7, %v824_v8 }
  0xf2   : > { %v704_v14 = vld [vmem:[%s9818_s7 + $0xbe0] sm:$0xff] }
  0xf3   : > { %v828_v15 = vld [vmem:[%s9818_s7 + $0xfc0] sm:$0xff]  ;;  %v8643_v20 = vcombine.high %v700_v13, %v704_v14  ;;  %6619 = vmatprep.subr.bf16.mxu1 %v8763_v12  ;;  %v8642_v27 = vcombine.low %v700_v13, %v704_v14 }
  0xf4   : > { %v832_v16 = vld [vmem:[%s9818_s7 + $0xfe0] sm:$0xff]  ;;  %6579 = vmatpush1.bf16.msra.mxu0 %v8634_v18  ;;  %6620 = vmatpush1.bf16.msra.mxu1 %v8762_v19 }
  0xf5   : > { %v8771_v22 = vcombine.high %v828_v15, %v832_v16  ;;  %v836_v23 = vld [vmem:[%s9818_s7 + $0x1000] sm:$0xff]  ;;  %6580 = vmatprep.subr.bf16.mxu0 %v8643_v20  ;;  %v8770_v30 = vcombine.low %v828_v15, %v832_v16 }
  0xf6   : > { %v840_v24 = vld [vmem:[%s9818_s7 + $0x1020] sm:$0xff] }
  0xf7   : > { %v964_v25 = vld [vmem:[%s9818_s7 + $0x1400] sm:$0xff]  ;;  %v8779_v33 = vcombine.high %v836_v23, %v840_v24  ;;  %6621 = vmatprep.subr.bf16.mxu1 %v8771_v22  ;;  %v8778_v42 = vcombine.low %v836_v23, %v840_v24 }
  0xf8   : > { %v968_v26 = vld [vmem:[%s9818_s7 + $0x1420] sm:$0xff]  ;;  %6581 = vmatpush1.bf16.msra.mxu0 %v8642_v27  ;;  %6622 = vmatpush1.bf16.msra.mxu1 %v8770_v30 }
  0xf9   : > { %v288_v28 = vld [vmem:[%s9836_s26 + $0x20] sm:$0xff]  ;;  %v8907_v34 = vcombine.high %v964_v25, %v968_v26  ;;  %6632 = vmatprep.subr.bf16.mxu0 %v8779_v33  ;;  %v8906_v44 = vcombine.low %v964_v25, %v968_v26 }
  0xfa   : > { %v844_v35 = vld [vmem:[%s9818_s7 + $0x1040] sm:$0xff]  ;;  %v10004_v37 = vpack.c.bf16 %v288_v28, %v288_v28 }
  0xfb   : > { %v848_v36 = vld [vmem:[%s9818_s7 + $0x1060] sm:$0xff]  ;;  %6673 = vmatprep.subr.bf16.mxu1 %v8907_v34  ;;  %6624 = vmatmul.mubr.bf16.vlgmr.msra.gmra.mrb[4].mxu1 %v10009_v41 }
  0xfc   : > { %v972_v38 = vld [vmem:[%s9818_s7 + $0x1440] sm:$0xff]  ;;  %v8787_v45 = vcombine.high %v844_v35, %v848_v36  ;;  %6583 = vmatmul.mubr.bf16.vlgmr.msra.gmra.mrb[4].mxu0 %v10004_v37  ;;  %v8786_v53 = vcombine.low %v844_v35, %v848_v36  ;;  %6674 = vmatpush1.bf16.msra.mxu1 %v8906_v44 }
  0xfd   : > { %v976_v39 = vld [vmem:[%s9818_s7 + $0x1460] sm:$0xff]  ;;  %6633 = vmatpush1.bf16.msra.mxu0 %v8778_v42  ;;  %6664 = vmatprep.mubr.bf16.mxu0 %v10014_v49 }
  0xfe   : > { %v8915_v46 = vcombine.high %v972_v38, %v976_v39  ;;  %v852_v47 = vld [vmem:[%s9818_s7 + $0x1080] sm:$0xff]  ;;  %6634 = vmatprep.subr.bf16.mxu0 %v8787_v45  ;;  %v8914_v54 = vcombine.low %v972_v38, %v976_v39  ;;  %6705 = vmatprep.mubr.bf16.mxu1 %v10019_v52 }
  0xff   : > { %v856_v48 = vld [vmem:[%s9818_s7 + $0x10a0] sm:$0xff] }
 0x100   : > { %v980_v50 = vld [vmem:[%s9818_s7 + $0x1480] sm:$0xff]  ;;  %v8795_v55 = vcombine.high %v852_v47, %v856_v48  ;;  %6675 = vmatprep.subr.bf16.mxu1 %v8915_v46  ;;  %v8794_v63 = vcombine.low %v852_v47, %v856_v48 }
 0x101   : > { %v984_v51 = vld [vmem:[%s9818_s7 + $0x14a0] sm:$0xff]  ;;  %6635 = vmatpush1.bf16.msra.mxu0 %v8786_v53  ;;  %6676 = vmatpush1.bf16.msra.mxu1 %v8914_v54 }
 0x102   : > { %v8923_v56 = vcombine.high %v980_v50, %v984_v51  ;;  %v860_v57 = vld [vmem:[%s9818_s7 + $0x10c0] sm:$0xff]  ;;  %6636 = vmatprep.subr.bf16.mxu0 %v8795_v55  ;;  %v8922_v0 = vcombine.low %v980_v50, %v984_v51 }
 0x103   : > { %v864_v58 = vld [vmem:[%s9818_s7 + $0x10e0] sm:$0xff] }
 0x104   : > { %v988_v61 = vld [vmem:[%s9818_s7 + $0x14c0] sm:$0xff]  ;;  %v8803_v1 = vcombine.high %v860_v57, %v864_v58  ;;  %6677 = vmatprep.subr.bf16.mxu1 %v8923_v56  ;;  %v8802_v7 = vcombine.low %v860_v57, %v864_v58 }
 0x105   : > { %v992_v62 = vld [vmem:[%s9818_s7 + $0x14e0] sm:$0xff]  ;;  %6637 = vmatpush1.bf16.msra.mxu0 %v8794_v63  ;;  %6678 = vmatpush1.bf16.msra.mxu1 %v8922_v0 }
 0x106   : > { %v8931_v2 = vcombine.high %v988_v61, %v992_v62  ;;  %v868_v3 = vld [vmem:[%s9818_s7 + $0x1100] sm:$0xff]  ;;  %6638 = vmatprep.subr.bf16.mxu0 %v8803_v1  ;;  %v8930_v8 = vcombine.low %v988_v61, %v992_v62 }
 0x107   : > { %v872_v4 = vld [vmem:[%s9818_s7 + $0x1120] sm:$0xff] }
 0x108   : > { %v996_v5 = vld [vmem:[%s9818_s7 + $0x1500] sm:$0xff]  ;;  %v8811_v9 = vcombine.high %v868_v3, %v872_v4  ;;  %6679 = vmatprep.subr.bf16.mxu1 %v8931_v2  ;;  %v8810_v15 = vcombine.low %v868_v3, %v872_v4 }
 0x109   : > { %v1000_v6 = vld [vmem:[%s9818_s7 + $0x1520] sm:$0xff]  ;;  %6639 = vmatpush1.bf16.msra.mxu0 %v8802_v7  ;;  %6680 = vmatpush1.bf16.msra.mxu1 %v8930_v8 }
 0x10a   : > { %v8939_v10 = vcombine.high %v996_v5, %v1000_v6  ;;  %v876_v11 = vld [vmem:[%s9818_s7 + $0x1140] sm:$0xff]  ;;  %6640 = vmatprep.subr.bf16.mxu0 %v8811_v9  ;;  %v8938_v16 = vcombine.low %v996_v5, %v1000_v6 }
 0x10b   : > { %v880_v12 = vld [vmem:[%s9818_s7 + $0x1160] sm:$0xff] }
 0x10c   : > { %v1004_v13 = vld [vmem:[%s9818_s7 + $0x1540] sm:$0xff]  ;;  %v8819_v18 = vcombine.high %v876_v11, %v880_v12  ;;  %6681 = vmatprep.subr.bf16.mxu1 %v8939_v10  ;;  %v8818_v25 = vcombine.low %v876_v11, %v880_v12 }
 0x10d   : > { %v1008_v14 = vld [vmem:[%s9818_s7 + $0x1560] sm:$0xff]  ;;  %6641 = vmatpush1.bf16.msra.mxu0 %v8810_v15  ;;  %6682 = vmatpush1.bf16.msra.mxu1 %v8938_v16 }
 0x10e   : > { %v8947_v19 = vcombine.high %v1004_v13, %v1008_v14  ;;  %v884_v20 = vld [vmem:[%s9818_s7 + $0x1180] sm:$0xff]  ;;  %6642 = vmatprep.subr.bf16.mxu0 %v8819_v18  ;;  %v8946_v26 = vcombine.low %v1004_v13, %v1008_v14 }
 0x10f   : > { %v888_v22 = vld [vmem:[%s9818_s7 + $0x11a0] sm:$0xff] }
 0x110   : > { %v1012_v23 = vld [vmem:[%s9818_s7 + $0x1580] sm:$0xff]  ;;  %v8827_v27 = vcombine.high %v884_v20, %v888_v22  ;;  %6683 = vmatprep.subr.bf16.mxu1 %v8947_v19  ;;  %v8826_v35 = vcombine.low %v884_v20, %v888_v22 }
 0x111   : > { %v1016_v24 = vld [vmem:[%s9818_s7 + $0x15a0] sm:$0xff]  ;;  %6643 = vmatpush1.bf16.msra.mxu0 %v8818_v25  ;;  %6684 = vmatpush1.bf16.msra.mxu1 %v8946_v26 }
 0x112   : > { %v8955_v28 = vcombine.high %v1012_v23, %v1016_v24  ;;  %v892_v30 = vld [vmem:[%s9818_s7 + $0x11c0] sm:$0xff]  ;;  %6644 = vmatprep.subr.bf16.mxu0 %v8827_v27  ;;  %v8954_v36 = vcombine.low %v1012_v23, %v1016_v24 }
 0x113   : > { %v896_v31 = vld [vmem:[%s9818_s7 + $0x11e0] sm:$0xff] }
 0x114   : > { %v1020_v33 = vld [vmem:[%s9818_s7 + $0x15c0] sm:$0xff]  ;;  %v8835_v38 = vcombine.high %v892_v30, %v896_v31  ;;  %6685 = vmatprep.subr.bf16.mxu1 %v8955_v28  ;;  %v8834_v45 = vcombine.low %v892_v30, %v896_v31 }
 0x115   : > { %v1024_v34 = vld [vmem:[%s9818_s7 + $0x15e0] sm:$0xff]  ;;  %6645 = vmatpush1.bf16.msra.mxu0 %v8826_v35  ;;  %6686 = vmatpush1.bf16.msra.mxu1 %v8954_v36 }
 0x116   : > { %v8963_v39 = vcombine.high %v1020_v33, %v1024_v34  ;;  %v900_v40 = vld [vmem:[%s9818_s7 + $0x1200] sm:$0xff]  ;;  %6646 = vmatprep.subr.bf16.mxu0 %v8835_v38  ;;  %v8962_v46 = vcombine.low %v1020_v33, %v1024_v34 }
 0x117   : > { %v904_v42 = vld [vmem:[%s9818_s7 + $0x1220] sm:$0xff] }
 0x118   : > { %v1028_v43 = vld [vmem:[%s9818_s7 + $0x1600] sm:$0xff]  ;;  %v8843_v47 = vcombine.high %v900_v40, %v904_v42  ;;  %6687 = vmatprep.subr.bf16.mxu1 %v8963_v39  ;;  %v8842_v55 = vcombine.low %v900_v40, %v904_v42 }
 0x119   : > { %v1032_v44 = vld [vmem:[%s9818_s7 + $0x1620] sm:$0xff]  ;;  %6647 = vmatpush1.bf16.msra.mxu0 %v8834_v45  ;;  %6688 = vmatpush1.bf16.msra.mxu1 %v8962_v46 }
 0x11a   : > { %v8971_v48 = vcombine.high %v1028_v43, %v1032_v44  ;;  %v908_v50 = vld [vmem:[%s9818_s7 + $0x1240] sm:$0xff]  ;;  %6648 = vmatprep.subr.bf16.mxu0 %v8843_v47  ;;  %v8970_v56 = vcombine.low %v1028_v43, %v1032_v44 }
 0x11b   : > { %v912_v51 = vld [vmem:[%s9818_s7 + $0x1260] sm:$0xff] }
 0x11c   : > { %v1036_v53 = vld [vmem:[%s9818_s7 + $0x1640] sm:$0xff]  ;;  %v8851_v57 = vcombine.high %v908_v50, %v912_v51  ;;  %6689 = vmatprep.subr.bf16.mxu1 %v8971_v48  ;;  %v8850_v1 = vcombine.low %v908_v50, %v912_v51 }
 0x11d   : > { %v1040_v54 = vld [vmem:[%s9818_s7 + $0x1660] sm:$0xff]  ;;  %6649 = vmatpush1.bf16.msra.mxu0 %v8842_v55  ;;  %6690 = vmatpush1.bf16.msra.mxu1 %v8970_v56 }
 0x11e   : > { %v8979_v58 = vcombine.high %v1036_v53, %v1040_v54  ;;  %v916_v61 = vld [vmem:[%s9818_s7 + $0x1280] sm:$0xff]  ;;  %6650 = vmatprep.subr.bf16.mxu0 %v8851_v57  ;;  %v8978_v2 = vcombine.low %v1036_v53, %v1040_v54 }
 0x11f   : > { %v920_v62 = vld [vmem:[%s9818_s7 + $0x12a0] sm:$0xff] }
 0x120   : > { %v1044_v63 = vld [vmem:[%s9818_s7 + $0x1680] sm:$0xff]  ;;  %v8859_v3 = vcombine.high %v916_v61, %v920_v62  ;;  %6691 = vmatprep.subr.bf16.mxu1 %v8979_v58  ;;  %v8858_v9 = vcombine.low %v916_v61, %v920_v62  ;;  %v294_v62 = vld [vmem:[%s9836_s26 + $0x50] sm:$0xff] }
 0x121   : > { %v1048_v0 = vld [vmem:[%s9818_s7 + $0x16a0] sm:$0xff]  ;;  %6651 = vmatpush1.bf16.msra.mxu0 %v8850_v1  ;;  %6692 = vmatpush1.bf16.msra.mxu1 %v8978_v2 }
 0x122   : > { %v8987_v4 = vcombine.high %v1044_v63, %v1048_v0  ;;  %v924_v5 = vld [vmem:[%s9818_s7 + $0x12c0] sm:$0xff]  ;;  %6652 = vmatprep.subr.bf16.mxu0 %v8859_v3  ;;  %v8986_v10 = vcombine.low %v1044_v63, %v1048_v0 }
 0x123   : > { %v928_v6 = vld [vmem:[%s9818_s7 + $0x12e0] sm:$0xff] }
 0x124   : > { %v1052_v7 = vld [vmem:[%s9818_s7 + $0x16c0] sm:$0xff]  ;;  %v8867_v11 = vcombine.high %v924_v5, %v928_v6  ;;  %6693 = vmatprep.subr.bf16.mxu1 %v8987_v4  ;;  %v8866_v18 = vcombine.low %v924_v5, %v928_v6  ;;  %v297_v6 = vld [vmem:[%s9836_s26 + $0x68] sm:$0xff] }
 0x125   : > { %v1056_v8 = vld [vmem:[%s9818_s7 + $0x16e0] sm:$0xff]  ;;  %6653 = vmatpush1.bf16.msra.mxu0 %v8858_v9  ;;  %6694 = vmatpush1.bf16.msra.mxu1 %v8986_v10  ;;  %v299_v9 = vld [vmem:[%s9836_s26 + $0x78] sm:$0xff] }
 0x126   : > { %v8995_v12 = vcombine.high %v1052_v7, %v1056_v8  ;;  %v932_v13 = vld [vmem:[%s9818_s7 + $0x1300] sm:$0xff]  ;;  %6654 = vmatprep.subr.bf16.mxu0 %v8867_v11  ;;  %v8994_v19 = vcombine.low %v1052_v7, %v1056_v8  ;;  %v10089_v7 = vpack.c.bf16 %v294_v62, %v294_v62 }
 0x127   : > { %v936_v14 = vld [vmem:[%s9818_s7 + $0x1320] sm:$0xff] }
 0x128   : > { %v1060_v15 = vld [vmem:[%s9818_s7 + $0x1700] sm:$0xff]  ;;  %v8875_v20 = vcombine.high %v932_v13, %v936_v14  ;;  %6695 = vmatprep.subr.bf16.mxu1 %v8995_v12  ;;  %v8874_v27 = vcombine.low %v932_v13, %v936_v14 }
 0x129   : > { %v1064_v16 = vld [vmem:[%s9818_s7 + $0x1720] sm:$0xff]  ;;  %6655 = vmatpush1.bf16.msra.mxu0 %v8866_v18  ;;  %6696 = vmatpush1.bf16.msra.mxu1 %v8994_v19  ;;  %v10099_v19 = vpack.c.bf16 %v299_v9, %v299_v9 }
 0x12a   : > { %v9003_v22 = vcombine.high %v1060_v15, %v1064_v16  ;;  %v940_v23 = vld [vmem:[%s9818_s7 + $0x1340] sm:$0xff]  ;;  %6656 = vmatprep.subr.bf16.mxu0 %v8875_v20  ;;  %v9002_v28 = vcombine.low %v1060_v15, %v1064_v16  ;;  %v10094_v15 = vpack.c.bf16 %v297_v6, %v297_v6 }
 0x12b   : > { %v944_v24 = vld [vmem:[%s9818_s7 + $0x1360] sm:$0xff] }
 0x12c   : > { %v1068_v25 = vld [vmem:[%s9818_s7 + $0x1740] sm:$0xff]  ;;  %v8883_v30 = vcombine.high %v940_v23, %v944_v24  ;;  %6697 = vmatprep.subr.bf16.mxu1 %v9003_v22  ;;  %v8882_v38 = vcombine.low %v940_v23, %v944_v24 }
 0x12d   : > { %v1072_v26 = vld [vmem:[%s9818_s7 + $0x1760] sm:$0xff]  ;;  %6657 = vmatpush1.bf16.msra.mxu0 %v8874_v27  ;;  %6698 = vmatpush1.bf16.msra.mxu1 %v9002_v28 }
 0x12e   : > { %v9011_v31 = vcombine.high %v1068_v25, %v1072_v26  ;;  %v948_v33 = vld [vmem:[%s9818_s7 + $0x1380] sm:$0xff]  ;;  %6658 = vmatprep.subr.bf16.mxu0 %v8883_v30  ;;  %v9010_v39 = vcombine.low %v1068_v25, %v1072_v26 }
 0x12f   : > { %v952_v34 = vld [vmem:[%s9818_s7 + $0x13a0] sm:$0xff] }
 0x130   : > { %v1076_v35 = vld [vmem:[%s9818_s7 + $0x1780] sm:$0xff]  ;;  %v8891_v40 = vcombine.high %v948_v33, %v952_v34  ;;  %6699 = vmatprep.subr.bf16.mxu1 %v9011_v31  ;;  %v8890_v47 = vcombine.low %v948_v33, %v952_v34 }
 0x131   : > { %v1080_v36 = vld [vmem:[%s9818_s7 + $0x17a0] sm:$0xff]  ;;  %6659 = vmatpush1.bf16.msra.mxu0 %v8882_v38  ;;  %6700 = vmatpush1.bf16.msra.mxu1 %v9010_v39 }
 0x132   : > { %v9019_v42 = vcombine.high %v1076_v35, %v1080_v36  ;;  %v956_v43 = vld [vmem:[%s9818_s7 + $0x13c0] sm:$0xff]  ;;  %6660 = vmatprep.subr.bf16.mxu0 %v8891_v40  ;;  %v9018_v48 = vcombine.low %v1076_v35, %v1080_v36 }
 0x133   : > { %v960_v44 = vld [vmem:[%s9818_s7 + $0x13e0] sm:$0xff] }
 0x134   : > { %v1084_v45 = vld [vmem:[%s9818_s7 + $0x17c0] sm:$0xff]  ;;  %v8899_v50 = vcombine.high %v956_v43, %v960_v44  ;;  %6701 = vmatprep.subr.bf16.mxu1 %v9019_v42  ;;  %v8898_v57 = vcombine.low %v956_v43, %v960_v44 }
 0x135   : > { %v1088_v46 = vld [vmem:[%s9818_s7 + $0x17e0] sm:$0xff]  ;;  %6661 = vmatpush1.bf16.msra.mxu0 %v8890_v47  ;;  %6702 = vmatpush1.bf16.msra.mxu1 %v9018_v48 }
 0x136   : > { %v9027_v51 = vcombine.high %v1084_v45, %v1088_v46  ;;  %v1092_v53 = vld [vmem:[%s9818_s7 + $0x1800] sm:$0xff]  ;;  %6662 = vmatprep.subr.bf16.mxu0 %v8899_v50  ;;  %v9026_v61 = vcombine.low %v1084_v45, %v1088_v46 }
 0x137   : > { %v1096_v54 = vld [vmem:[%s9818_s7 + $0x1820] sm:$0xff] }
 0x138   : > { %v1220_v55 = vld [vmem:[%s9818_s7 + $0x1c00] sm:$0xff]  ;;  %v9035_v63 = vcombine.high %v1092_v53, %v1096_v54  ;;  %6703 = vmatprep.subr.bf16.mxu1 %v9027_v51  ;;  %v9034_v8 = vcombine.low %v1092_v53, %v1096_v54 }
 0x139   : > { %v1224_v56 = vld [vmem:[%s9818_s7 + $0x1c20] sm:$0xff]  ;;  %6663 = vmatpush1.bf16.msra.mxu0 %v8898_v57  ;;  %6704 = vmatpush1.bf16.msra.mxu1 %v9026_v61 }
 0x13a   : > { %v292_v58 = vld [vmem:[%s9836_s26 + $0x40] sm:$0xff]  ;;  %v9163_v0 = vcombine.high %v1220_v55, %v1224_v56  ;;  %6714 = vmatprep.subr.bf16.mxu0 %v9035_v63  ;;  %v9162_v10 = vcombine.low %v1220_v55, %v1224_v56 }
 0x13b   : > { %v1100_v1 = vld [vmem:[%s9818_s7 + $0x1840] sm:$0xff]  ;;  %v10084_v3 = vpack.c.bf16 %v292_v58, %v292_v58 }
 0x13c   : > { %v1104_v2 = vld [vmem:[%s9818_s7 + $0x1860] sm:$0xff]  ;;  %6755 = vmatprep.subr.bf16.mxu1 %v9163_v0  ;;  %6706 = vmatmul.mubr.bf16.vlgmr.msra.gmra.mrb[8].mxu1 %v10089_v7 }
 0x13d   : > { %v1228_v4 = vld [vmem:[%s9818_s7 + $0x1c40] sm:$0xff]  ;;  %v9043_v11 = vcombine.high %v1100_v1, %v1104_v2  ;;  %6665 = vmatmul.mubr.bf16.vlgmr.msra.gmra.mrb[8].mxu0 %v10084_v3  ;;  %v9042_v20 = vcombine.low %v1100_v1, %v1104_v2  ;;  %6756 = vmatpush1.bf16.msra.mxu1 %v9162_v10 }
 0x13e   : > { %v1232_v5 = vld [vmem:[%s9818_s7 + $0x1c60] sm:$0xff]  ;;  %6715 = vmatpush1.bf16.msra.mxu0 %v9034_v8  ;;  %6746 = vmatprep.mubr.bf16.mxu0 %v10094_v15 }
 0x13f   : > { %v9171_v12 = vcombine.high %v1228_v4, %v1232_v5  ;;  %v1108_v13 = vld [vmem:[%s9818_s7 + $0x1880] sm:$0xff]  ;;  %6716 = vmatprep.subr.bf16.mxu0 %v9043_v11  ;;  %v9170_v22 = vcombine.low %v1228_v4, %v1232_v5  ;;  %6787 = vmatprep.mubr.bf16.mxu1 %v10099_v19 }
 0x140   : > { %v1112_v14 = vld [vmem:[%s9818_s7 + $0x18a0] sm:$0xff] }
 0x141   : > { %v1236_v16 = vld [vmem:[%s9818_s7 + $0x1c80] sm:$0xff]  ;;  %v9051_v23 = vcombine.high %v1108_v13, %v1112_v14  ;;  %6757 = vmatprep.subr.bf16.mxu1 %v9171_v12  ;;  %v9050_v30 = vcombine.low %v1108_v13, %v1112_v14 }
 0x142   : > { %v1240_v18 = vld [vmem:[%s9818_s7 + $0x1ca0] sm:$0xff]  ;;  %6717 = vmatpush1.bf16.msra.mxu0 %v9042_v20  ;;  %6758 = vmatpush1.bf16.msra.mxu1 %v9170_v22 }
 0x143   : > { %v9179_v24 = vcombine.high %v1236_v16, %v1240_v18  ;;  %v1116_v25 = vld [vmem:[%s9818_s7 + $0x18c0] sm:$0xff]  ;;  %6718 = vmatprep.subr.bf16.mxu0 %v9051_v23  ;;  %v9178_v31 = vcombine.low %v1236_v16, %v1240_v18 }
 0x144   : > { %v1120_v26 = vld [vmem:[%s9818_s7 + $0x18e0] sm:$0xff] }
 0x145   : > { %v1244_v27 = vld [vmem:[%s9818_s7 + $0x1cc0] sm:$0xff]  ;;  %v9059_v33 = vcombine.high %v1116_v25, %v1120_v26  ;;  %6759 = vmatprep.subr.bf16.mxu1 %v9179_v24  ;;  %v9058_v40 = vcombine.low %v1116_v25, %v1120_v26 }
 0x146   : > { %v1248_v28 = vld [vmem:[%s9818_s7 + $0x1ce0] sm:$0xff]  ;;  %6719 = vmatpush1.bf16.msra.mxu0 %v9050_v30  ;;  %6760 = vmatpush1.bf16.msra.mxu1 %v9178_v31 }
 0x147   : > { %v9187_v34 = vcombine.high %v1244_v27, %v1248_v28  ;;  %v1124_v35 = vld [vmem:[%s9818_s7 + $0x1900] sm:$0xff]  ;;  %6720 = vmatprep.subr.bf16.mxu0 %v9059_v33  ;;  %v9186_v42 = vcombine.low %v1244_v27, %v1248_v28 }
 0x148   : > { %v1128_v36 = vld [vmem:[%s9818_s7 + $0x1920] sm:$0xff] }
 0x149   : > { %v1252_v38 = vld [vmem:[%s9818_s7 + $0x1d00] sm:$0xff]  ;;  %v9067_v43 = vcombine.high %v1124_v35, %v1128_v36  ;;  %6761 = vmatprep.subr.bf16.mxu1 %v9187_v34  ;;  %v9066_v50 = vcombine.low %v1124_v35, %v1128_v36 }
 0x14a   : > { %v1256_v39 = vld [vmem:[%s9818_s7 + $0x1d20] sm:$0xff]  ;;  %6721 = vmatpush1.bf16.msra.mxu0 %v9058_v40  ;;  %6762 = vmatpush1.bf16.msra.mxu1 %v9186_v42 }
 0x14b   : > { %v9195_v44 = vcombine.high %v1252_v38, %v1256_v39  ;;  %v1132_v45 = vld [vmem:[%s9818_s7 + $0x1940] sm:$0xff]  ;;  %6722 = vmatprep.subr.bf16.mxu0 %v9067_v43  ;;  %v9194_v51 = vcombine.low %v1252_v38, %v1256_v39 }
 0x14c   : > { %v1136_v46 = vld [vmem:[%s9818_s7 + $0x1960] sm:$0xff] }
 0x14d   : > { %v1260_v47 = vld [vmem:[%s9818_s7 + $0x1d40] sm:$0xff]  ;;  %v9075_v53 = vcombine.high %v1132_v45, %v1136_v46  ;;  %6763 = vmatprep.subr.bf16.mxu1 %v9195_v44  ;;  %v9074_v61 = vcombine.low %v1132_v45, %v1136_v46 }
 0x14e   : > { %v1264_v48 = vld [vmem:[%s9818_s7 + $0x1d60] sm:$0xff]  ;;  %6723 = vmatpush1.bf16.msra.mxu0 %v9066_v50  ;;  %6764 = vmatpush1.bf16.msra.mxu1 %v9194_v51 }
 0x14f   : > { %v9203_v54 = vcombine.high %v1260_v47, %v1264_v48  ;;  %v1140_v55 = vld [vmem:[%s9818_s7 + $0x1980] sm:$0xff]  ;;  %6724 = vmatprep.subr.bf16.mxu0 %v9075_v53  ;;  %v9202_v62 = vcombine.low %v1260_v47, %v1264_v48 }
 0x150   : > { %v1144_v56 = vld [vmem:[%s9818_s7 + $0x19a0] sm:$0xff] }
 0x151   : > { %v1268_v57 = vld [vmem:[%s9818_s7 + $0x1d80] sm:$0xff]  ;;  %v9083_v63 = vcombine.high %v1140_v55, %v1144_v56  ;;  %6765 = vmatprep.subr.bf16.mxu1 %v9203_v54  ;;  %v9082_v6 = vcombine.low %v1140_v55, %v1144_v56 }
 0x152   : > { %v1272_v58 = vld [vmem:[%s9818_s7 + $0x1da0] sm:$0xff]  ;;  %6725 = vmatpush1.bf16.msra.mxu0 %v9074_v61  ;;  %6766 = vmatpush1.bf16.msra.mxu1 %v9202_v62 }
 0x153   : > { %v9211_v0 = vcombine.high %v1268_v57, %v1272_v58  ;;  %v1148_v1 = vld [vmem:[%s9818_s7 + $0x19c0] sm:$0xff]  ;;  %6726 = vmatprep.subr.bf16.mxu0 %v9083_v63  ;;  %v9210_v8 = vcombine.low %v1268_v57, %v1272_v58 }
 0x154   : > { %v1152_v2 = vld [vmem:[%s9818_s7 + $0x19e0] sm:$0xff] }
 0x155   : > { %v1276_v4 = vld [vmem:[%s9818_s7 + $0x1dc0] sm:$0xff]  ;;  %v9091_v9 = vcombine.high %v1148_v1, %v1152_v2  ;;  %6767 = vmatprep.subr.bf16.mxu1 %v9211_v0  ;;  %v9090_v16 = vcombine.low %v1148_v1, %v1152_v2 }
 0x156   : > { %v1280_v5 = vld [vmem:[%s9818_s7 + $0x1de0] sm:$0xff]  ;;  %6727 = vmatpush1.bf16.msra.mxu0 %v9082_v6  ;;  %6768 = vmatpush1.bf16.msra.mxu1 %v9210_v8 }
 0x157   : > { %v9219_v10 = vcombine.high %v1276_v4, %v1280_v5  ;;  %v1156_v11 = vld [vmem:[%s9818_s7 + $0x1a00] sm:$0xff]  ;;  %6728 = vmatprep.subr.bf16.mxu0 %v9091_v9  ;;  %v9218_v18 = vcombine.low %v1276_v4, %v1280_v5 }
 0x158   : > { %v1160_v12 = vld [vmem:[%s9818_s7 + $0x1a20] sm:$0xff] }
 0x159   : > { %v1284_v13 = vld [vmem:[%s9818_s7 + $0x1e00] sm:$0xff]  ;;  %v9099_v20 = vcombine.high %v1156_v11, %v1160_v12  ;;  %6769 = vmatprep.subr.bf16.mxu1 %v9219_v10  ;;  %v9098_v27 = vcombine.low %v1156_v11, %v1160_v12 }
 0x15a   : > { %v1288_v14 = vld [vmem:[%s9818_s7 + $0x1e20] sm:$0xff]  ;;  %6729 = vmatpush1.bf16.msra.mxu0 %v9090_v16  ;;  %6770 = vmatpush1.bf16.msra.mxu1 %v9218_v18 }
 0x15b   : > { %v9227_v22 = vcombine.high %v1284_v13, %v1288_v14  ;;  %v1164_v23 = vld [vmem:[%s9818_s7 + $0x1a40] sm:$0xff]  ;;  %6730 = vmatprep.subr.bf16.mxu0 %v9099_v20  ;;  %v9226_v28 = vcombine.low %v1284_v13, %v1288_v14 }
 0x15c   : > { %v1168_v24 = vld [vmem:[%s9818_s7 + $0x1a60] sm:$0xff] }
 0x15d   : > { %v1292_v25 = vld [vmem:[%s9818_s7 + $0x1e40] sm:$0xff]  ;;  %v9107_v30 = vcombine.high %v1164_v23, %v1168_v24  ;;  %6771 = vmatprep.subr.bf16.mxu1 %v9227_v22  ;;  %v9106_v38 = vcombine.low %v1164_v23, %v1168_v24 }
 0x15e   : > { %v1296_v26 = vld [vmem:[%s9818_s7 + $0x1e60] sm:$0xff]  ;;  %6731 = vmatpush1.bf16.msra.mxu0 %v9098_v27  ;;  %6772 = vmatpush1.bf16.msra.mxu1 %v9226_v28 }
 0x15f   : > { %v9235_v31 = vcombine.high %v1292_v25, %v1296_v26  ;;  %v1172_v33 = vld [vmem:[%s9818_s7 + $0x1a80] sm:$0xff]  ;;  %6732 = vmatprep.subr.bf16.mxu0 %v9107_v30  ;;  %v9234_v39 = vcombine.low %v1292_v25, %v1296_v26  ;;  %v325_v30 = vld [vmem:[%s9818_s7 + $0x8] sm:$0xff] }
 0x160   : > { %v1176_v34 = vld [vmem:[%s9818_s7 + $0x1aa0] sm:$0xff] }
 0x161   : > { %v1300_v35 = vld [vmem:[%s9818_s7 + $0x1e80] sm:$0xff]  ;;  %v9115_v40 = vcombine.high %v1172_v33, %v1176_v34  ;;  %6773 = vmatprep.subr.bf16.mxu1 %v9235_v31  ;;  %v9114_v47 = vcombine.low %v1172_v33, %v1176_v34  ;;  %v329_v31 = vld [vmem:[%s9818_s7 + $0x28] sm:$0xff] }
 0x162   : > { %v1304_v36 = vld [vmem:[%s9818_s7 + $0x1ea0] sm:$0xff]  ;;  %6733 = vmatpush1.bf16.msra.mxu0 %v9106_v38  ;;  %6774 = vmatpush1.bf16.msra.mxu1 %v9234_v39  ;;  %v453_v33 = vld [vmem:[%s9818_s7 + $0x408] sm:$0xff]  ;;  %v298_v39 = vld [vmem:[%s9836_s26 + $0x70] sm:$0xff] }
 0x163   : > { %v9243_v42 = vcombine.high %v1300_v35, %v1304_v36  ;;  %v1180_v43 = vld [vmem:[%s9818_s7 + $0x1ac0] sm:$0xff]  ;;  %6734 = vmatprep.subr.bf16.mxu0 %v9115_v40  ;;  %v9242_v48 = vcombine.low %v1300_v35, %v1304_v36  ;;  %v457_v34 = vld [vmem:[%s9818_s7 + $0x428] sm:$0xff]  ;;  %v8269_v40 = vcombine.high %v325_v30, %v329_v31 }
 0x164   : > { %v1184_v44 = vld [vmem:[%s9818_s7 + $0x1ae0] sm:$0xff] }
 0x165   : > { %v1308_v45 = vld [vmem:[%s9818_s7 + $0x1ec0] sm:$0xff]  ;;  %v9123_v50 = vcombine.high %v1180_v43, %v1184_v44  ;;  %6775 = vmatprep.subr.bf16.mxu1 %v9243_v42  ;;  %v9122_v57 = vcombine.low %v1180_v43, %v1184_v44  ;;  %v8397_v42 = vcombine.high %v453_v33, %v457_v34  ;;  %v333_v43 = vld [vmem:[%s9818_s7 + $0x48] sm:$0xff] }
 0x166   : > { %v1312_v46 = vld [vmem:[%s9818_s7 + $0x1ee0] sm:$0xff]  ;;  %6735 = vmatpush1.bf16.msra.mxu0 %v9114_v47  ;;  %6776 = vmatpush1.bf16.msra.mxu1 %v9242_v48  ;;  %v337_v44 = vld [vmem:[%s9818_s7 + $0x68] sm:$0xff]  ;;  %v10168_v48 = vpack.c.bf16 %v298_v39, %v298_v39 }
 0x167   : > { %v9251_v51 = vcombine.high %v1308_v45, %v1312_v46  ;;  %v1188_v53 = vld [vmem:[%s9818_s7 + $0x1b00] sm:$0xff]  ;;  %6736 = vmatprep.subr.bf16.mxu0 %v9123_v50  ;;  %v9250_v58 = vcombine.low %v1308_v45, %v1312_v46  ;;  %v461_v46 = vld [vmem:[%s9818_s7 + $0x448] sm:$0xff]  ;;  %v8268_v50 = vcombine.low %v325_v30, %v329_v31 }
 0x168   : > { %v1192_v54 = vld [vmem:[%s9818_s7 + $0x1b20] sm:$0xff]  ;;  %v465_v47 = vld [vmem:[%s9818_s7 + $0x468] sm:$0xff] }
 0x169   : > { %v1316_v55 = vld [vmem:[%s9818_s7 + $0x1f00] sm:$0xff]  ;;  %v9131_v61 = vcombine.high %v1188_v53, %v1192_v54  ;;  %6777 = vmatprep.subr.bf16.mxu1 %v9251_v51  ;;  %v9130_v4 = vcombine.low %v1188_v53, %v1192_v54  ;;  %v8396_v51 = vcombine.low %v453_v33, %v457_v34  ;;  %v8277_v53 = vcombine.high %v333_v43, %v337_v44  ;;  %v373_v33 = vld [vmem:[%s9818_s7 + $0x188] sm:$0xff] }
 0x16a   : > { %v1320_v56 = vld [vmem:[%s9818_s7 + $0x1f20] sm:$0xff]  ;;  %6737 = vmatpush1.bf16.msra.mxu0 %v9122_v57  ;;  %6778 = vmatpush1.bf16.msra.mxu1 %v9250_v58  ;;  %v8405_v54 = vcombine.high %v461_v46, %v465_v47  ;;  %v469_v57 = vld [vmem:[%s9818_s7 + $0x488] sm:$0xff] }
 0x16b   : > { %v9259_v62 = vcombine.high %v1316_v55, %v1320_v56  ;;  %v1196_v63 = vld [vmem:[%s9818_s7 + $0x1b40] sm:$0xff]  ;;  %6738 = vmatprep.subr.bf16.mxu0 %v9131_v61  ;;  %v9258_v5 = vcombine.low %v1316_v55, %v1320_v56  ;;  %v341_v55 = vld [vmem:[%s9818_s7 + $0x88] sm:$0xff]  ;;  %v8276_v61 = vcombine.low %v333_v43, %v337_v44 }
 0x16c   : > { %v1200_v0 = vld [vmem:[%s9818_s7 + $0x1b60] sm:$0xff]  ;;  %v345_v56 = vld [vmem:[%s9818_s7 + $0xa8] sm:$0xff] }
 0x16d   : > { %v1324_v1 = vld [vmem:[%s9818_s7 + $0x1f40] sm:$0xff]  ;;  %v9139_v6 = vcombine.high %v1196_v63, %v1200_v0  ;;  %6779 = vmatprep.subr.bf16.mxu1 %v9259_v62  ;;  %v9138_v13 = vcombine.low %v1196_v63, %v1200_v0  ;;  %v473_v58 = vld [vmem:[%s9818_s7 + $0x4a8] sm:$0xff]  ;;  %v8404_v62 = vcombine.low %v461_v46, %v465_v47  ;;  %v8285_v63 = vcombine.high %v341_v55, %v345_v56 }
 0x16e   : > { %v1328_v2 = vld [vmem:[%s9818_s7 + $0x1f60] sm:$0xff]  ;;  %6739 = vmatpush1.bf16.msra.mxu0 %v9130_v4  ;;  %6780 = vmatpush1.bf16.msra.mxu1 %v9258_v5  ;;  %v8413_v0 = vcombine.high %v469_v57, %v473_v58  ;;  %v477_v4 = vld [vmem:[%s9818_s7 + $0x4c8] sm:$0xff] }
 0x16f   : > { %v9267_v8 = vcombine.high %v1324_v1, %v1328_v2  ;;  %v1204_v9 = vld [vmem:[%s9818_s7 + $0x1b80] sm:$0xff]  ;;  %6740 = vmatprep.subr.bf16.mxu0 %v9139_v6  ;;  %v9266_v14 = vcombine.low %v1324_v1, %v1328_v2  ;;  %v349_v1 = vld [vmem:[%s9818_s7 + $0xc8] sm:$0xff]  ;;  %v8284_v6 = vcombine.low %v341_v55, %v345_v56 }
 0x170   : > { %v1208_v10 = vld [vmem:[%s9818_s7 + $0x1ba0] sm:$0xff]  ;;  %v353_v2 = vld [vmem:[%s9818_s7 + $0xe8] sm:$0xff] }
 0x171   : > { %v1332_v11 = vld [vmem:[%s9818_s7 + $0x1f80] sm:$0xff]  ;;  %v9147_v16 = vcombine.high %v1204_v9, %v1208_v10  ;;  %6781 = vmatprep.subr.bf16.mxu1 %v9267_v8  ;;  %v9146_v25 = vcombine.low %v1204_v9, %v1208_v10  ;;  %v481_v5 = vld [vmem:[%s9818_s7 + $0x4e8] sm:$0xff]  ;;  %v8412_v8 = vcombine.low %v469_v57, %v473_v58  ;;  %v8293_v9 = vcombine.high %v349_v1, %v353_v2 }
 0x172   : > { %v1336_v12 = vld [vmem:[%s9818_s7 + $0x1fa0] sm:$0xff]  ;;  %6741 = vmatpush1.bf16.msra.mxu0 %v9138_v13  ;;  %6782 = vmatpush1.bf16.msra.mxu1 %v9266_v14  ;;  %v8421_v10 = vcombine.high %v477_v4, %v481_v5  ;;  %v485_v13 = vld [vmem:[%s9818_s7 + $0x508] sm:$0xff] }
 0x173   : > { %v9275_v18 = vcombine.high %v1332_v11, %v1336_v12  ;;  %v1212_v20 = vld [vmem:[%s9818_s7 + $0x1bc0] sm:$0xff]  ;;  %6742 = vmatprep.subr.bf16.mxu0 %v9147_v16  ;;  %v9274_v26 = vcombine.low %v1332_v11, %v1336_v12  ;;  %v357_v11 = vld [vmem:[%s9818_s7 + $0x108] sm:$0xff]  ;;  %v8292_v16 = vcombine.low %v349_v1, %v353_v2 }
 0x174   : > { %v1216_v22 = vld [vmem:[%s9818_s7 + $0x1be0] sm:$0xff]  ;;  %v361_v12 = vld [vmem:[%s9818_s7 + $0x128] sm:$0xff] }
 0x175   : > { %v1340_v23 = vld [vmem:[%s9818_s7 + $0x1fc0] sm:$0xff]  ;;  %v9155_v27 = vcombine.high %v1212_v20, %v1216_v22  ;;  %6783 = vmatprep.subr.bf16.mxu1 %v9275_v18  ;;  %v9154_v35 = vcombine.low %v1212_v20, %v1216_v22  ;;  %v489_v14 = vld [vmem:[%s9818_s7 + $0x528] sm:$0xff]  ;;  %v8420_v18 = vcombine.low %v477_v4, %v481_v5  ;;  %v8301_v20 = vcombine.high %v357_v11, %v361_v12 }
 0x176   : > { %v1344_v24 = vld [vmem:[%s9818_s7 + $0x1fe0] sm:$0xff]  ;;  %6743 = vmatpush1.bf16.msra.mxu0 %v9146_v25  ;;  %6784 = vmatpush1.bf16.msra.mxu1 %v9274_v26  ;;  %v8429_v22 = vcombine.high %v485_v13, %v489_v14  ;;  %v493_v25 = vld [vmem:[%s9818_s7 + $0x548] sm:$0xff] }
 0x177   : > { %v9283_v28 = vcombine.high %v1340_v23, %v1344_v24  ;;  %v296_v36 = vld [vmem:[%s9836_s26 + $0x60] sm:$0xff]  ;;  %6744 = vmatprep.subr.bf16.mxu0 %v9155_v27  ;;  %v9282_v38 = vcombine.low %v1340_v23, %v1344_v24  ;;  %v365_v23 = vld [vmem:[%s9818_s7 + $0x148] sm:$0xff]  ;;  %v8300_v27 = vcombine.low %v357_v11, %v361_v12 }
 0x178   : > { %v10164_v45 = vpack.c.bf16 %v296_v36, %v296_v36  ;;  %v369_v24 = vld [vmem:[%s9818_s7 + $0x168] sm:$0xff] }
 0x179   : > { %6785 = vmatprep.subr.bf16.mxu1 %v9283_v28  ;;  %v497_v26 = vld [vmem:[%s9818_s7 + $0x568] sm:$0xff]  ;;  %v8428_v28 = vcombine.low %v485_v13, %v489_v14  ;;  %v8309_v30 = vcombine.high %v365_v23, %v369_v24 }
 0x17a   : > { %6745 = vmatpush1.bf16.msra.mxu0 %v9154_v35  ;;  %6786 = vmatpush1.bf16.msra.mxu1 %v9282_v38  ;;  %v8437_v31 = vcombine.high %v493_v25, %v497_v26  ;;  %v377_v34 = vld [vmem:[%s9818_s7 + $0x1a8] sm:$0xff]  ;;  %v8308_v38 = vcombine.low %v365_v23, %v369_v24  ;;  %v8436_v39 = vcombine.low %v493_v25, %v497_v26 }
 0x17b   : > { %6796 = vmatprep.subr.bf16.mxu0 %v8269_v40  ;;  %6837 = vmatprep.subr.bf16.mxu1 %v8397_v42  ;;  %v501_v35 = vld [vmem:[%s9818_s7 + $0x588] sm:$0xff]  ;;  %v8317_v40 = vcombine.high %v373_v33, %v377_v34  ;;  %v8316_v57 = vcombine.low %v373_v33, %v377_v34 }
 0x17c   : > { %v505_v36 = vld [vmem:[%s9818_s7 + $0x5a8] sm:$0xff] }
 0x17d   : > { %6747 = vmatmul.mubr.bf16.vlgmr.msra.gmra.mrb[12].mxu0 %v10164_v45  ;;  %6788 = vmatmul.mubr.bf16.vlgmr.msra.gmra.mrb[12].mxu1 %v10168_v48  ;;  %v8445_v43 = vcombine.high %v501_v35, %v505_v36  ;;  %v381_v44 = vld [vmem:[%s9818_s7 + $0x1c8] sm:$0xff] }
 0x17e   : > { %6797 = vmatpush1.bf16.msra.mxu0 %v8268_v50  ;;  %6838 = vmatpush1.bf16.msra.mxu1 %v8396_v51  ;;  %v385_v46 = vld [vmem:[%s9818_s7 + $0x1e8] sm:$0xff] }
 0x17f   : > { %6798 = vmatprep.subr.bf16.mxu0 %v8277_v53  ;;  %6839 = vmatprep.subr.bf16.mxu1 %v8405_v54  ;;  %v509_v51 = vld [vmem:[%s9818_s7 + $0x5c8] sm:$0xff] }
 0x180   : > { %6828 = vmatprep.mubr.bf16.mxu0 %v9876_v59  ;;  %6869 = vmatprep.mubr.bf16.mxu1 %v9878_v60  ;;  %v513_v53 = vld [vmem:[%s9818_s7 + $0x5e8] sm:$0xff] }
 0x181   : > { %v8453_v2 = vcombine.high %v509_v51, %v513_v53  ;;  %v389_v4 = vld [vmem:[%s9818_s7 + $0x208] sm:$0xff] }
 0x182   : > { %6799 = vmatpush1.bf16.msra.mxu0 %v8276_v61  ;;  %6840 = vmatpush1.bf16.msra.mxu1 %v8404_v62  ;;  %v393_v5 = vld [vmem:[%s9818_s7 + $0x228] sm:$0xff] }
 0x183   : > { %6800 = vmatprep.subr.bf16.mxu0 %v8285_v63  ;;  %6841 = vmatprep.subr.bf16.mxu1 %v8413_v0  ;;  %v8444_v63 = vcombine.low %v501_v35, %v505_v36  ;;  %v8325_v0 = vcombine.high %v381_v44, %v385_v46  ;;  %v8333_v11 = vcombine.high %v389_v4, %v393_v5  ;;  %v397_v13 = vld [vmem:[%s9818_s7 + $0x248] sm:$0xff] }
 0x184   : > { %v401_v14 = vld [vmem:[%s9818_s7 + $0x268] sm:$0xff] }
 0x185   : > { %v8341_v23 = vcombine.high %v397_v13, %v401_v14  ;;  %v405_v25 = vld [vmem:[%s9818_s7 + $0x288] sm:$0xff] }
 0x186   : > { %6801 = vmatpush1.bf16.msra.mxu0 %v8284_v6  ;;  %6842 = vmatpush1.bf16.msra.mxu1 %v8412_v8  ;;  %v517_v6 = vld [vmem:[%s9818_s7 + $0x608] sm:$0xff] }
 0x187   : > { %6802 = vmatprep.subr.bf16.mxu0 %v8293_v9  ;;  %6843 = vmatprep.subr.bf16.mxu1 %v8421_v10  ;;  %v521_v8 = vld [vmem:[%s9818_s7 + $0x628] sm:$0xff]  ;;  %v8324_v9 = vcombine.low %v381_v44, %v385_v46  ;;  %v8452_v10 = vcombine.low %v509_v51, %v513_v53 }
 0x188   : > { %v8461_v12 = vcombine.high %v517_v6, %v521_v8  ;;  %v409_v26 = vld [vmem:[%s9818_s7 + $0x2a8] sm:$0xff] }
 0x189   : > { %v8349_v33 = vcombine.high %v405_v25, %v409_v26  ;;  %v413_v35 = vld [vmem:[%s9818_s7 + $0x2c8] sm:$0xff] }
 0x18a   : > { %6803 = vmatpush1.bf16.msra.mxu0 %v8292_v16  ;;  %6844 = vmatpush1.bf16.msra.mxu1 %v8420_v18  ;;  %v525_v16 = vld [vmem:[%s9818_s7 + $0x648] sm:$0xff] }
 0x18b   : > { %6804 = vmatprep.subr.bf16.mxu0 %v8301_v20  ;;  %6845 = vmatprep.subr.bf16.mxu1 %v8429_v22  ;;  %v529_v18 = vld [vmem:[%s9818_s7 + $0x668] sm:$0xff]  ;;  %v8332_v20 = vcombine.low %v389_v4, %v393_v5  ;;  %v8460_v22 = vcombine.low %v517_v6, %v521_v8 }
 0x18c   : > { %v8469_v24 = vcombine.high %v525_v16, %v529_v18  ;;  %v417_v36 = vld [vmem:[%s9818_s7 + $0x2e8] sm:$0xff] }
 0x18d   : > { %v6543_v47 = vpop.f32.mrb[0].mxu1  ;;  %v421_v46 = vld [vmem:[%s9818_s7 + $0x308] sm:$0xff]  ;;  %v8356_v53 = vcombine.low %v413_v35, %v417_v36 }
 0x18e   : > { %6805 = vmatpush1.bf16.msra.mxu0 %v8300_v27  ;;  %6846 = vmatpush1.bf16.msra.mxu1 %v8428_v28  ;;  %v6502_v42 = vpop.f32.mrb[0].mxu0  ;;  %v6545_v55 = vpop.f32.mrb[1].mxu1  ;;  %v533_v27 = vld [vmem:[%s9818_s7 + $0x688] sm:$0xff] }
 0x18f   : > { %6806 = vmatprep.subr.bf16.mxu0 %v8309_v30  ;;  %6847 = vmatprep.subr.bf16.mxu1 %v8437_v31  ;;  %v6504_v50 = vpop.f32.mrb[1].mxu0  ;;  %v10198_v54 = vadd.f32 %v6543_v47, %v6502_v42  ;;  %v6547_v61 = vpop.f32.mrb[2].mxu1  ;;  %v537_v28 = vld [vmem:[%s9818_s7 + $0x6a8] sm:$0xff]  ;;  %v8340_v30 = vcombine.low %v397_v13, %v401_v14  ;;  %v8468_v31 = vcombine.low %v525_v16, %v529_v18 }
 0x190   : > { %v6506_v56 = vpop.f32.mrb[2].mxu0  ;;  %v10200_v58 = vadd.f32 %v6545_v55, %v6504_v50  ;;  %v6548_v1 = vpop.f32.mrb[3].mxu1  ;;  %v8477_v34 = vcombine.high %v533_v27, %v537_v28  ;;  %v8476_v42 = vcombine.low %v533_v27, %v537_v28  ;;  %v425_v47 = vld [vmem:[%s9818_s7 + $0x328] sm:$0xff] }
 0x191   : > { %v6507_v62 = vpop.f32.mrb[3].mxu0  ;;  %v549_v50 = vld [vmem:[%s9818_s7 + $0x708] sm:$0xff]  ;;  %v8365_v56 = vcombine.high %v421_v46, %v425_v47  ;;  %v8364_v1 = vcombine.low %v421_v46, %v425_v47 }
 0x192   : > { %6807 = vmatpush1.bf16.msra.mxu0 %v8308_v38  ;;  %6848 = vmatpush1.bf16.msra.mxu1 %v8436_v39  ;;  %v541_v38 = vld [vmem:[%s9818_s7 + $0x6c8] sm:$0xff] }
 0x193   : > { %6808 = vmatprep.subr.bf16.mxu0 %v8317_v40  ;;  %6849 = vmatprep.subr.bf16.mxu1 %v8445_v43  ;;  %v545_v39 = vld [vmem:[%s9818_s7 + $0x6e8] sm:$0xff]  ;;  %v8348_v40 = vcombine.low %v405_v25, %v409_v26  ;;  %v8357_v43 = vcombine.high %v413_v35, %v417_v36 }
 0x194   : > { %v8485_v44 = vcombine.high %v541_v38, %v545_v39  ;;  %v553_v51 = vld [vmem:[%s9818_s7 + $0x728] sm:$0xff]  ;;  %v8484_v55 = vcombine.low %v541_v38, %v545_v39 }
 0x195   : > { %v429_v61 = vld [vmem:[%s9818_s7 + $0x348] sm:$0xff] }
 0x196   : > { %6809 = vmatpush1.bf16.msra.mxu0 %v8316_v57  ;;  %6850 = vmatpush1.bf16.msra.mxu1 %v8444_v63  ;;  %v8493_v57 = vcombine.high %v549_v50, %v553_v51  ;;  %v433_v62 = vld [vmem:[%s9818_s7 + $0x368] sm:$0xff] }
 0x197   : > { %6810 = vmatprep.subr.bf16.mxu0 %v8325_v0  ;;  %6851 = vmatprep.subr.bf16.mxu1 %v8453_v2  ;;  %v557_v63 = vld [vmem:[%s9818_s7 + $0x748] sm:$0xff]  ;;  %v8492_v2 = vcombine.low %v549_v50, %v553_v51  ;;  %v8373_v4 = vcombine.high %v429_v61, %v433_v62 }
 0x198   : > { %v561_v0 = vld [vmem:[%s9818_s7 + $0x768] sm:$0xff] }
 0x199   : > { %v8501_v5 = vcombine.high %v557_v63, %v561_v0  ;;  %v437_v6 = vld [vmem:[%s9818_s7 + $0x388] sm:$0xff] }
 0x19a   : > { %6811 = vmatpush1.bf16.msra.mxu0 %v8324_v9  ;;  %6852 = vmatpush1.bf16.msra.mxu1 %v8452_v10  ;;  %v441_v8 = vld [vmem:[%s9818_s7 + $0x3a8] sm:$0xff] }
 0x19b   : > { %6812 = vmatprep.subr.bf16.mxu0 %v8333_v11  ;;  %6853 = vmatprep.subr.bf16.mxu1 %v8461_v12  ;;  %v565_v9 = vld [vmem:[%s9818_s7 + $0x788] sm:$0xff]  ;;  %v8372_v11 = vcombine.low %v429_v61, %v433_v62  ;;  %v8500_v12 = vcombine.low %v557_v63, %v561_v0  ;;  %v8381_v13 = vcombine.high %v437_v6, %v441_v8 }
 0x19c   : > { %v569_v10 = vld [vmem:[%s9818_s7 + $0x7a8] sm:$0xff] }
 0x19d   : > { %v8509_v14 = vcombine.high %v565_v9, %v569_v10  ;;  %v445_v16 = vld [vmem:[%s9818_s7 + $0x3c8] sm:$0xff] }
 0x19e   : > { %6813 = vmatpush1.bf16.msra.mxu0 %v8332_v20  ;;  %6854 = vmatpush1.bf16.msra.mxu1 %v8460_v22  ;;  %v449_v18 = vld [vmem:[%s9818_s7 + $0x3e8] sm:$0xff] }
 0x19f   : > { %6814 = vmatprep.subr.bf16.mxu0 %v8341_v23  ;;  %6855 = vmatprep.subr.bf16.mxu1 %v8469_v24  ;;  %v573_v20 = vld [vmem:[%s9818_s7 + $0x7c8] sm:$0xff]  ;;  %v8380_v23 = vcombine.low %v437_v6, %v441_v8  ;;  %v8508_v24 = vcombine.low %v565_v9, %v569_v10  ;;  %v8389_v25 = vcombine.high %v445_v16, %v449_v18 }
 0x1a0   : > { %v577_v22 = vld [vmem:[%s9818_s7 + $0x7e8] sm:$0xff] }
 0x1a1   : > { %v8517_v26 = vcombine.high %v573_v20, %v577_v22  ;;  %v581_v27 = vld [vmem:[%s9818_s7 + $0x808] sm:$0xff] }
 0x1a2   : > { %6815 = vmatpush1.bf16.msra.mxu0 %v8340_v30  ;;  %6856 = vmatpush1.bf16.msra.mxu1 %v8468_v31  ;;  %v585_v28 = vld [vmem:[%s9818_s7 + $0x828] sm:$0xff] }
 0x1a3   : > { %6816 = vmatprep.subr.bf16.mxu0 %v8349_v33  ;;  %6857 = vmatprep.subr.bf16.mxu1 %v8477_v34  ;;  %v709_v30 = vld [vmem:[%s9818_s7 + $0xc08] sm:$0xff]  ;;  %v8388_v33 = vcombine.low %v445_v16, %v449_v18  ;;  %v8516_v34 = vcombine.low %v573_v20, %v577_v22  ;;  %v8525_v35 = vcombine.high %v581_v27, %v585_v28 }
 0x1a4   : > { %v713_v31 = vld [vmem:[%s9818_s7 + $0xc28] sm:$0xff] }
 0x1a5   : > { %v8653_v36 = vcombine.high %v709_v30, %v713_v31  ;;  %v589_v38 = vld [vmem:[%s9818_s7 + $0x848] sm:$0xff] }
 0x1a6   : > { %6817 = vmatpush1.bf16.msra.mxu0 %v8348_v40  ;;  %6858 = vmatpush1.bf16.msra.mxu1 %v8476_v42  ;;  %v593_v39 = vld [vmem:[%s9818_s7 + $0x868] sm:$0xff] }
 0x1a7   : > { %6818 = vmatprep.subr.bf16.mxu0 %v8357_v43  ;;  %6859 = vmatprep.subr.bf16.mxu1 %v8485_v44  ;;  %v717_v40 = vld [vmem:[%s9818_s7 + $0xc48] sm:$0xff]  ;;  %v8524_v43 = vcombine.low %v581_v27, %v585_v28  ;;  %v8652_v44 = vcombine.low %v709_v30, %v713_v31  ;;  %v8533_v46 = vcombine.high %v589_v38, %v593_v39 }
 0x1a8   : > { %v721_v42 = vld [vmem:[%s9818_s7 + $0xc68] sm:$0xff] }
 0x1a9   : > { %v8661_v47 = vcombine.high %v717_v40, %v721_v42  ;;  %v597_v50 = vld [vmem:[%s9818_s7 + $0x888] sm:$0xff] }
 0x1aa   : > { %6819 = vmatpush1.bf16.msra.mxu0 %v8356_v53  ;;  %6860 = vmatpush1.bf16.msra.mxu1 %v8484_v55  ;;  %v601_v51 = vld [vmem:[%s9818_s7 + $0x8a8] sm:$0xff] }
 0x1ab   : > { %6820 = vmatprep.subr.bf16.mxu0 %v8365_v56  ;;  %6861 = vmatprep.subr.bf16.mxu1 %v8493_v57  ;;  %v725_v53 = vld [vmem:[%s9818_s7 + $0xc88] sm:$0xff]  ;;  %v8532_v56 = vcombine.low %v589_v38, %v593_v39  ;;  %v8660_v57 = vcombine.low %v717_v40, %v721_v42  ;;  %v8541_v61 = vcombine.high %v597_v50, %v601_v51 }
 0x1ac   : > { %v729_v55 = vld [vmem:[%s9818_s7 + $0xca8] sm:$0xff] }
 0x1ad   : > { %v8669_v62 = vcombine.high %v725_v53, %v729_v55  ;;  %v605_v63 = vld [vmem:[%s9818_s7 + $0x8c8] sm:$0xff] }
 0x1ae   : > { %6821 = vmatpush1.bf16.msra.mxu0 %v8364_v1  ;;  %6862 = vmatpush1.bf16.msra.mxu1 %v8492_v2  ;;  %v609_v0 = vld [vmem:[%s9818_s7 + $0x8e8] sm:$0xff] }
 0x1af   : > { %6822 = vmatprep.subr.bf16.mxu0 %v8373_v4  ;;  %6863 = vmatprep.subr.bf16.mxu1 %v8501_v5  ;;  %v733_v1 = vld [vmem:[%s9818_s7 + $0xcc8] sm:$0xff]  ;;  %v8540_v4 = vcombine.low %v597_v50, %v601_v51  ;;  %v8668_v5 = vcombine.low %v725_v53, %v729_v55  ;;  %v8549_v6 = vcombine.high %v605_v63, %v609_v0 }
 0x1b0   : > { %v737_v2 = vld [vmem:[%s9818_s7 + $0xce8] sm:$0xff] }
 0x1b1   : > { %v8677_v8 = vcombine.high %v733_v1, %v737_v2  ;;  %v613_v9 = vld [vmem:[%s9818_s7 + $0x908] sm:$0xff] }
 0x1b2   : > { %6823 = vmatpush1.bf16.msra.mxu0 %v8372_v11  ;;  %6864 = vmatpush1.bf16.msra.mxu1 %v8500_v12  ;;  %v617_v10 = vld [vmem:[%s9818_s7 + $0x928] sm:$0xff] }
 0x1b3   : > { %6824 = vmatprep.subr.bf16.mxu0 %v8381_v13  ;;  %6865 = vmatprep.subr.bf16.mxu1 %v8509_v14  ;;  %v741_v11 = vld [vmem:[%s9818_s7 + $0xd08] sm:$0xff]  ;;  %v8548_v13 = vcombine.low %v605_v63, %v609_v0  ;;  %v8676_v14 = vcombine.low %v733_v1, %v737_v2  ;;  %v8557_v16 = vcombine.high %v613_v9, %v617_v10 }
 0x1b4   : > { %v745_v12 = vld [vmem:[%s9818_s7 + $0xd28] sm:$0xff] }
 0x1b5   : > { %v8685_v18 = vcombine.high %v741_v11, %v745_v12  ;;  %v621_v20 = vld [vmem:[%s9818_s7 + $0x948] sm:$0xff] }
 0x1b6   : > { %6825 = vmatpush1.bf16.msra.mxu0 %v8380_v23  ;;  %6866 = vmatpush1.bf16.msra.mxu1 %v8508_v24  ;;  %v625_v22 = vld [vmem:[%s9818_s7 + $0x968] sm:$0xff] }
 0x1b7   : > { %6826 = vmatprep.subr.bf16.mxu0 %v8389_v25  ;;  %6867 = vmatprep.subr.bf16.mxu1 %v8517_v26  ;;  %v749_v23 = vld [vmem:[%s9818_s7 + $0xd48] sm:$0xff]  ;;  %v8556_v25 = vcombine.low %v613_v9, %v617_v10  ;;  %v8684_v26 = vcombine.low %v741_v11, %v745_v12  ;;  %v8565_v27 = vcombine.high %v621_v20, %v625_v22 }
 0x1b8   : > { %v753_v24 = vld [vmem:[%s9818_s7 + $0xd68] sm:$0xff] }
 0x1b9   : > { %v8693_v28 = vcombine.high %v749_v23, %v753_v24  ;;  %v629_v30 = vld [vmem:[%s9818_s7 + $0x988] sm:$0xff] }
 0x1ba   : > { %6827 = vmatpush1.bf16.msra.mxu0 %v8388_v33  ;;  %6868 = vmatpush1.bf16.msra.mxu1 %v8516_v34  ;;  %v633_v31 = vld [vmem:[%s9818_s7 + $0x9a8] sm:$0xff] }
 0x1bb   : > { %6878 = vmatprep.subr.bf16.mxu0 %v8525_v35  ;;  %6919 = vmatprep.subr.bf16.mxu1 %v8653_v36  ;;  %v757_v33 = vld [vmem:[%s9818_s7 + $0xd88] sm:$0xff]  ;;  %v8564_v35 = vcombine.low %v621_v20, %v625_v22  ;;  %v8692_v36 = vcombine.low %v749_v23, %v753_v24  ;;  %v8573_v38 = vcombine.high %v629_v30, %v633_v31 }
 0x1bc   : > { %v761_v34 = vld [vmem:[%s9818_s7 + $0xda8] sm:$0xff] }
 0x1bd   : > { %6829 = vmatmul.mubr.bf16.vlgmr.msra.gmra.mrb[16].mxu0 %v9924_v17  ;;  %6870 = vmatmul.mubr.bf16.vlgmr.msra.gmra.mrb[16].mxu1 %v9929_v21  ;;  %v8701_v40 = vcombine.high %v757_v33, %v761_v34  ;;  %v637_v42 = vld [vmem:[%s9818_s7 + $0x9c8] sm:$0xff] }
 0x1be   : > { %6879 = vmatpush1.bf16.msra.mxu0 %v8524_v43  ;;  %6920 = vmatpush1.bf16.msra.mxu1 %v8652_v44  ;;  %v641_v43 = vld [vmem:[%s9818_s7 + $0x9e8] sm:$0xff] }
 0x1bf   : > { %6880 = vmatprep.subr.bf16.mxu0 %v8533_v46  ;;  %6921 = vmatprep.subr.bf16.mxu1 %v8661_v47  ;;  %v765_v50 = vld [vmem:[%s9818_s7 + $0xdc8] sm:$0xff]  ;;  %v8581_v0 = vcombine.high %v637_v42, %v641_v43  ;;  %v8580_v9 = vcombine.low %v637_v42, %v641_v43 }
 0x1c0   : > { %6910 = vmatprep.mubr.bf16.mxu0 %v9934_v29  ;;  %6951 = vmatprep.mubr.bf16.mxu1 %v9939_v32  ;;  %v769_v51 = vld [vmem:[%s9818_s7 + $0xde8] sm:$0xff] }
 0x1c1   : > { %v8709_v2 = vcombine.high %v765_v50, %v769_v51  ;;  %v8708_v10 = vcombine.low %v765_v50, %v769_v51  ;;  %v805_v50 = vld [vmem:[%s9818_s7 + $0xf08] sm:$0xff] }
 0x1c2   : > { %6881 = vmatpush1.bf16.msra.mxu0 %v8532_v56  ;;  %6922 = vmatpush1.bf16.msra.mxu1 %v8660_v57  ;;  %v8572_v57 = vcombine.low %v629_v30, %v633_v31  ;;  %v809_v51 = vld [vmem:[%s9818_s7 + $0xf28] sm:$0xff] }
 0x1c3   : > { %6882 = vmatprep.subr.bf16.mxu0 %v8541_v61  ;;  %6923 = vmatprep.subr.bf16.mxu1 %v8669_v62 }
 0x1c6   : > { %6883 = vmatpush1.bf16.msra.mxu0 %v8540_v4  ;;  %6924 = vmatpush1.bf16.msra.mxu1 %v8668_v5  ;;  %v645_v4 = vld [vmem:[%s9818_s7 + $0xa08] sm:$0xff] }
 0x1c7   : > { %6884 = vmatprep.subr.bf16.mxu0 %v8549_v6  ;;  %6925 = vmatprep.subr.bf16.mxu1 %v8677_v8  ;;  %v649_v5 = vld [vmem:[%s9818_s7 + $0xa28] sm:$0xff] }
 0x1c8   : > { %v773_v6 = vld [vmem:[%s9818_s7 + $0xe08] sm:$0xff]  ;;  %v8589_v11 = vcombine.high %v645_v4, %v649_v5  ;;  %v8588_v20 = vcombine.low %v645_v4, %v649_v5 }
 0x1c9   : > { %v777_v8 = vld [vmem:[%s9818_s7 + $0xe28] sm:$0xff] }
 0x1ca   : > { %6885 = vmatpush1.bf16.msra.mxu0 %v8548_v13  ;;  %6926 = vmatpush1.bf16.msra.mxu1 %v8676_v14  ;;  %v8717_v12 = vcombine.high %v773_v6, %v777_v8  ;;  %v653_v13 = vld [vmem:[%s9818_s7 + $0xa48] sm:$0xff]  ;;  %v8716_v22 = vcombine.low %v773_v6, %v777_v8 }
 0x1cb   : > { %6886 = vmatprep.subr.bf16.mxu0 %v8557_v16  ;;  %6927 = vmatprep.subr.bf16.mxu1 %v8685_v18  ;;  %v657_v14 = vld [vmem:[%s9818_s7 + $0xa68] sm:$0xff] }
 0x1cc   : > { %v781_v16 = vld [vmem:[%s9818_s7 + $0xe48] sm:$0xff]  ;;  %v8597_v23 = vcombine.high %v653_v13, %v657_v14  ;;  %v8596_v30 = vcombine.low %v653_v13, %v657_v14 }
 0x1cd   : > { %v785_v18 = vld [vmem:[%s9818_s7 + $0xe68] sm:$0xff] }
 0x1ce   : > { %6887 = vmatpush1.bf16.msra.mxu0 %v8556_v25  ;;  %6928 = vmatpush1.bf16.msra.mxu1 %v8684_v26  ;;  %v6625_v46 = vpop.f32.mrb[4].mxu1  ;;  %v8725_v24 = vcombine.high %v781_v16, %v785_v18  ;;  %v661_v25 = vld [vmem:[%s9818_s7 + $0xa88] sm:$0xff]  ;;  %v8724_v31 = vcombine.low %v781_v16, %v785_v18 }
 0x1cf   : > { %6888 = vmatprep.subr.bf16.mxu0 %v8565_v27  ;;  %v6584_v39 = vpop.f32.mrb[4].mxu0  ;;  %6929 = vmatprep.subr.bf16.mxu1 %v8693_v28  ;;  %v6627_v55 = vpop.f32.mrb[5].mxu1  ;;  %v665_v26 = vld [vmem:[%s9818_s7 + $0xaa8] sm:$0xff] }
 0x1d0   : > { %v6585_v44 = vadd.f32 %v6584_v39, %v10198_v54  ;;  %v6586_v47 = vpop.f32.mrb[5].mxu0  ;;  %v6629_v62 = vpop.f32.mrb[6].mxu1  ;;  %v8700_v54 = vcombine.low %v757_v33, %v761_v34  ;;  %v789_v27 = vld [vmem:[%s9818_s7 + $0xe88] sm:$0xff]  ;;  %v8605_v33 = vcombine.high %v661_v25, %v665_v26 }
 0x1d1   : > { %v6587_v53 = vadd.f32 %v6586_v47, %v10200_v58  ;;  %v6588_v56 = vpop.f32.mrb[6].mxu0  ;;  %v6630_v58 = vpop.f32.mrb[7].mxu1  ;;  %v793_v28 = vld [vmem:[%s9818_s7 + $0xea8] sm:$0xff] }
 0x1d2   : > { %6889 = vmatpush1.bf16.msra.mxu0 %v8564_v35  ;;  %v10272_v61 = vadd.f32 %v6625_v46, %v6585_v44  ;;  %6930 = vmatpush1.bf16.msra.mxu1 %v8692_v36  ;;  %v6589_v63 = vpop.f32.mrb[7].mxu0  ;;  %v8733_v34 = vcombine.high %v789_v27, %v793_v28  ;;  %v669_v35 = vld [vmem:[%s9818_s7 + $0xac8] sm:$0xff]  ;;  %v8732_v42 = vcombine.low %v789_v27, %v793_v28 }
 0x1d3   : > { %6890 = vmatprep.subr.bf16.mxu0 %v8573_v38  ;;  %v10274_v1 = vadd.f32 %v6627_v55, %v6587_v53  ;;  %6931 = vmatprep.subr.bf16.mxu1 %v8701_v40  ;;  %v673_v36 = vld [vmem:[%s9818_s7 + $0xae8] sm:$0xff]  ;;  %v8604_v40 = vcombine.low %v661_v25, %v665_v26 }
 0x1d4   : > { %v797_v38 = vld [vmem:[%s9818_s7 + $0xec8] sm:$0xff]  ;;  %v8613_v43 = vcombine.high %v669_v35, %v673_v36  ;;  %v8612_v53 = vcombine.low %v669_v35, %v673_v36 }
 0x1d5   : > { %v801_v39 = vld [vmem:[%s9818_s7 + $0xee8] sm:$0xff] }
 0x1d6   : > { %6891 = vmatpush1.bf16.msra.mxu0 %v8572_v57  ;;  %6932 = vmatpush1.bf16.msra.mxu1 %v8700_v54  ;;  %v8741_v44 = vcombine.high %v797_v38, %v801_v39  ;;  %v677_v46 = vld [vmem:[%s9818_s7 + $0xb08] sm:$0xff]  ;;  %v8740_v55 = vcombine.low %v797_v38, %v801_v39  ;;  %v8749_v57 = vcombine.high %v805_v50, %v809_v51 }
 0x1d7   : > { %6892 = vmatprep.subr.bf16.mxu0 %v8581_v0  ;;  %6933 = vmatprep.subr.bf16.mxu1 %v8709_v2  ;;  %v681_v47 = vld [vmem:[%s9818_s7 + $0xb28] sm:$0xff]  ;;  %v8748_v2 = vcombine.low %v805_v50, %v809_v51 }
 0x1d8   : > { %v8621_v56 = vcombine.high %v677_v46, %v681_v47  ;;  %v685_v62 = vld [vmem:[%s9818_s7 + $0xb48] sm:$0xff]  ;;  %v8620_v58 = vcombine.low %v677_v46, %v681_v47 }
 0x1d9   : > { %v689_v63 = vld [vmem:[%s9818_s7 + $0xb68] sm:$0xff] }
 0x1da   : > { %6893 = vmatpush1.bf16.msra.mxu0 %v8580_v9  ;;  %6934 = vmatpush1.bf16.msra.mxu1 %v8708_v10  ;;  %v813_v54 = vld [vmem:[%s9818_s7 + $0xf48] sm:$0xff]  ;;  %v8629_v4 = vcombine.high %v685_v62, %v689_v63 }
 0x1db   : > { %6894 = vmatprep.subr.bf16.mxu0 %v8589_v11  ;;  %6935 = vmatprep.subr.bf16.mxu1 %v8717_v12  ;;  %v817_v0 = vld [vmem:[%s9818_s7 + $0xf68] sm:$0xff]  ;;  %v8628_v11 = vcombine.low %v685_v62, %v689_v63 }
 0x1dc   : > { %v8757_v5 = vcombine.high %v813_v54, %v817_v0  ;;  %v693_v6 = vld [vmem:[%s9818_s7 + $0xb88] sm:$0xff]  ;;  %v8756_v12 = vcombine.low %v813_v54, %v817_v0 }
 0x1dd   : > { %v697_v8 = vld [vmem:[%s9818_s7 + $0xba8] sm:$0xff] }
 0x1de   : > { %6895 = vmatpush1.bf16.msra.mxu0 %v8588_v20  ;;  %6936 = vmatpush1.bf16.msra.mxu1 %v8716_v22  ;;  %v821_v9 = vld [vmem:[%s9818_s7 + $0xf88] sm:$0xff]  ;;  %v8637_v13 = vcombine.high %v693_v6, %v697_v8 }
 0x1df   : > { %6896 = vmatprep.subr.bf16.mxu0 %v8597_v23  ;;  %6937 = vmatprep.subr.bf16.mxu1 %v8725_v24  ;;  %v825_v10 = vld [vmem:[%s9818_s7 + $0xfa8] sm:$0xff]  ;;  %v8636_v23 = vcombine.low %v693_v6, %v697_v8 }
 0x1e0   : > { %v8765_v14 = vcombine.high %v821_v9, %v825_v10  ;;  %v701_v16 = vld [vmem:[%s9818_s7 + $0xbc8] sm:$0xff]  ;;  %v8764_v24 = vcombine.low %v821_v9, %v825_v10 }
 0x1e1   : > { %v705_v18 = vld [vmem:[%s9818_s7 + $0xbe8] sm:$0xff] }
 0x1e2   : > { %6897 = vmatpush1.bf16.msra.mxu0 %v8596_v30  ;;  %6938 = vmatpush1.bf16.msra.mxu1 %v8724_v31  ;;  %v829_v20 = vld [vmem:[%s9818_s7 + $0xfc8] sm:$0xff]  ;;  %v8645_v25 = vcombine.high %v701_v16, %v705_v18 }
 0x1e3   : > { %6898 = vmatprep.subr.bf16.mxu0 %v8605_v33  ;;  %6939 = vmatprep.subr.bf16.mxu1 %v8733_v34  ;;  %v833_v22 = vld [vmem:[%s9818_s7 + $0xfe8] sm:$0xff]  ;;  %v8644_v33 = vcombine.low %v701_v16, %v705_v18 }
 0x1e4   : > { %v8773_v26 = vcombine.high %v829_v20, %v833_v22  ;;  %v837_v27 = vld [vmem:[%s9818_s7 + $0x1008] sm:$0xff]  ;;  %v8772_v34 = vcombine.low %v829_v20, %v833_v22 }
 0x1e5   : > { %v841_v28 = vld [vmem:[%s9818_s7 + $0x1028] sm:$0xff] }
 0x1e6   : > { %6899 = vmatpush1.bf16.msra.mxu0 %v8604_v40  ;;  %6940 = vmatpush1.bf16.msra.mxu1 %v8732_v42  ;;  %v965_v30 = vld [vmem:[%s9818_s7 + $0x1408] sm:$0xff]  ;;  %v8781_v35 = vcombine.high %v837_v27, %v841_v28 }
 0x1e7   : > { %6900 = vmatprep.subr.bf16.mxu0 %v8613_v43  ;;  %6941 = vmatprep.subr.bf16.mxu1 %v8741_v44  ;;  %v969_v31 = vld [vmem:[%s9818_s7 + $0x1428] sm:$0xff]  ;;  %v8780_v43 = vcombine.low %v837_v27, %v841_v28 }
 0x1e8   : > { %v8909_v36 = vcombine.high %v965_v30, %v969_v31  ;;  %v845_v38 = vld [vmem:[%s9818_s7 + $0x1048] sm:$0xff]  ;;  %v8908_v44 = vcombine.low %v965_v30, %v969_v31 }
 0x1e9   : > { %v849_v39 = vld [vmem:[%s9818_s7 + $0x1068] sm:$0xff] }
 0x1ea   : > { %6901 = vmatpush1.bf16.msra.mxu0 %v8612_v53  ;;  %6942 = vmatpush1.bf16.msra.mxu1 %v8740_v55  ;;  %v973_v40 = vld [vmem:[%s9818_s7 + $0x1448] sm:$0xff]  ;;  %v8789_v46 = vcombine.high %v845_v38, %v849_v39 }
 0x1eb   : > { %6902 = vmatprep.subr.bf16.mxu0 %v8621_v56  ;;  %6943 = vmatprep.subr.bf16.mxu1 %v8749_v57  ;;  %v977_v42 = vld [vmem:[%s9818_s7 + $0x1468] sm:$0xff]  ;;  %v8788_v56 = vcombine.low %v845_v38, %v849_v39 }
 0x1ec   : > { %v8917_v47 = vcombine.high %v973_v40, %v977_v42  ;;  %v853_v50 = vld [vmem:[%s9818_s7 + $0x1088] sm:$0xff]  ;;  %v8916_v57 = vcombine.low %v973_v40, %v977_v42 }
 0x1ed   : > { %v857_v51 = vld [vmem:[%s9818_s7 + $0x10a8] sm:$0xff] }
 0x1ee   : > { %6903 = vmatpush1.bf16.msra.mxu0 %v8620_v58  ;;  %6944 = vmatpush1.bf16.msra.mxu1 %v8748_v2  ;;  %v981_v53 = vld [vmem:[%s9818_s7 + $0x1488] sm:$0xff]  ;;  %v8797_v62 = vcombine.high %v853_v50, %v857_v51 }
 0x1ef   : > { %6904 = vmatprep.subr.bf16.mxu0 %v8629_v4  ;;  %6945 = vmatprep.subr.bf16.mxu1 %v8757_v5  ;;  %v985_v55 = vld [vmem:[%s9818_s7 + $0x14a8] sm:$0xff]  ;;  %v8796_v4 = vcombine.low %v853_v50, %v857_v51 }
 0x1f0   : > { %v8925_v63 = vcombine.high %v981_v53, %v985_v55  ;;  %v861_v54 = vld [vmem:[%s9818_s7 + $0x10c8] sm:$0xff]  ;;  %v8924_v5 = vcombine.low %v981_v53, %v985_v55 }
 0x1f1   : > { %v865_v0 = vld [vmem:[%s9818_s7 + $0x10e8] sm:$0xff] }
 0x1f2   : > { %6905 = vmatpush1.bf16.msra.mxu0 %v8628_v11  ;;  %6946 = vmatpush1.bf16.msra.mxu1 %v8756_v12  ;;  %v989_v58 = vld [vmem:[%s9818_s7 + $0x14c8] sm:$0xff]  ;;  %v8805_v6 = vcombine.high %v861_v54, %v865_v0 }
 0x1f3   : > { %6906 = vmatprep.subr.bf16.mxu0 %v8637_v13  ;;  %6947 = vmatprep.subr.bf16.mxu1 %v8765_v14  ;;  %v993_v2 = vld [vmem:[%s9818_s7 + $0x14e8] sm:$0xff]  ;;  %v8804_v13 = vcombine.low %v861_v54, %v865_v0 }
 0x1f4   : > { %v8933_v8 = vcombine.high %v989_v58, %v993_v2  ;;  %v869_v9 = vld [vmem:[%s9818_s7 + $0x1108] sm:$0xff]  ;;  %v8932_v14 = vcombine.low %v989_v58, %v993_v2 }
 0x1f5   : > { %v873_v10 = vld [vmem:[%s9818_s7 + $0x1128] sm:$0xff] }
 0x1f6   : > { %6907 = vmatpush1.bf16.msra.mxu0 %v8636_v23  ;;  %6948 = vmatpush1.bf16.msra.mxu1 %v8764_v24  ;;  %v997_v11 = vld [vmem:[%s9818_s7 + $0x1508] sm:$0xff]  ;;  %v8813_v16 = vcombine.high %v869_v9, %v873_v10 }
 0x1f7   : > { %6908 = vmatprep.subr.bf16.mxu0 %v8645_v25  ;;  %6949 = vmatprep.subr.bf16.mxu1 %v8773_v26  ;;  %v1001_v12 = vld [vmem:[%s9818_s7 + $0x1528] sm:$0xff]  ;;  %v8812_v25 = vcombine.low %v869_v9, %v873_v10 }
 0x1f8   : > { %v8941_v18 = vcombine.high %v997_v11, %v1001_v12  ;;  %v877_v20 = vld [vmem:[%s9818_s7 + $0x1148] sm:$0xff]  ;;  %v8940_v26 = vcombine.low %v997_v11, %v1001_v12 }
 0x1f9   : > { %v881_v22 = vld [vmem:[%s9818_s7 + $0x1168] sm:$0xff] }
 0x1fa   : > { %6909 = vmatpush1.bf16.msra.mxu0 %v8644_v33  ;;  %6950 = vmatpush1.bf16.msra.mxu1 %v8772_v34  ;;  %v1005_v23 = vld [vmem:[%s9818_s7 + $0x1548] sm:$0xff]  ;;  %v8821_v27 = vcombine.high %v877_v20, %v881_v22 }
 0x1fb   : > { %6960 = vmatprep.subr.bf16.mxu0 %v8781_v35  ;;  %7001 = vmatprep.subr.bf16.mxu1 %v8909_v36  ;;  %v1009_v24 = vld [vmem:[%s9818_s7 + $0x1568] sm:$0xff]  ;;  %v8820_v35 = vcombine.low %v877_v20, %v881_v22 }
 0x1fc   : > { %v8949_v28 = vcombine.high %v1005_v23, %v1009_v24  ;;  %v885_v30 = vld [vmem:[%s9818_s7 + $0x1188] sm:$0xff]  ;;  %v8948_v36 = vcombine.low %v1005_v23, %v1009_v24 }
 0x1fd   : > { %6911 = vmatmul.mubr.bf16.vlgmr.msra.gmra.mrb[20].mxu0 %v10004_v37  ;;  %6952 = vmatmul.mubr.bf16.vlgmr.msra.gmra.mrb[20].mxu1 %v10009_v41  ;;  %v889_v31 = vld [vmem:[%s9818_s7 + $0x11a8] sm:$0xff] }
 0x1fe   : > { %6961 = vmatpush1.bf16.msra.mxu0 %v8780_v43  ;;  %7002 = vmatpush1.bf16.msra.mxu1 %v8908_v44  ;;  %v1013_v33 = vld [vmem:[%s9818_s7 + $0x1588] sm:$0xff]  ;;  %v8829_v38 = vcombine.high %v885_v30, %v889_v31 }
 0x1ff   : > { %6962 = vmatprep.subr.bf16.mxu0 %v8789_v46  ;;  %7003 = vmatprep.subr.bf16.mxu1 %v8917_v47  ;;  %v1017_v34 = vld [vmem:[%s9818_s7 + $0x15a8] sm:$0xff] }
 0x200   : > { %6992 = vmatprep.mubr.bf16.mxu0 %v10014_v49  ;;  %7033 = vmatprep.mubr.bf16.mxu1 %v10019_v52  ;;  %v8957_v40 = vcombine.high %v1013_v33, %v1017_v34  ;;  %v893_v42 = vld [vmem:[%s9818_s7 + $0x11c8] sm:$0xff] }
 0x201   : > { %v897_v43 = vld [vmem:[%s9818_s7 + $0x11e8] sm:$0xff] }
 0x202   : > { %6963 = vmatpush1.bf16.msra.mxu0 %v8788_v56  ;;  %7004 = vmatpush1.bf16.msra.mxu1 %v8916_v57  ;;  %v1021_v50 = vld [vmem:[%s9818_s7 + $0x15c8] sm:$0xff]  ;;  %v8828_v57 = vcombine.low %v885_v30, %v889_v31  ;;  %v8837_v0 = vcombine.high %v893_v42, %v897_v43  ;;  %v8836_v9 = vcombine.low %v893_v42, %v897_v43 }
 0x203   : > { %6964 = vmatprep.subr.bf16.mxu0 %v8797_v62  ;;  %7005 = vmatprep.subr.bf16.mxu1 %v8925_v63  ;;  %v1025_v51 = vld [vmem:[%s9818_s7 + $0x15e8] sm:$0xff] }
 0x204   : > { %v8965_v2 = vcombine.high %v1021_v50, %v1025_v51  ;;  %v8964_v10 = vcombine.low %v1021_v50, %v1025_v51  ;;  %v1061_v50 = vld [vmem:[%s9818_s7 + $0x1708] sm:$0xff] }
 0x205   : > { %v1065_v51 = vld [vmem:[%s9818_s7 + $0x1728] sm:$0xff] }
 0x206   : > { %6965 = vmatpush1.bf16.msra.mxu0 %v8796_v4  ;;  %7006 = vmatpush1.bf16.msra.mxu1 %v8924_v5  ;;  %v901_v4 = vld [vmem:[%s9818_s7 + $0x1208] sm:$0xff] }
 0x207   : > { %6966 = vmatprep.subr.bf16.mxu0 %v8805_v6  ;;  %7007 = vmatprep.subr.bf16.mxu1 %v8933_v8  ;;  %v905_v5 = vld [vmem:[%s9818_s7 + $0x1228] sm:$0xff] }
 0x208   : > { %v1029_v6 = vld [vmem:[%s9818_s7 + $0x1608] sm:$0xff]  ;;  %v8845_v11 = vcombine.high %v901_v4, %v905_v5  ;;  %v8844_v20 = vcombine.low %v901_v4, %v905_v5 }
 0x209   : > { %v1033_v8 = vld [vmem:[%s9818_s7 + $0x1628] sm:$0xff] }
 0x20a   : > { %6967 = vmatpush1.bf16.msra.mxu0 %v8804_v13  ;;  %7008 = vmatpush1.bf16.msra.mxu1 %v8932_v14  ;;  %v8973_v12 = vcombine.high %v1029_v6, %v1033_v8  ;;  %v909_v13 = vld [vmem:[%s9818_s7 + $0x1248] sm:$0xff]  ;;  %v8972_v22 = vcombine.low %v1029_v6, %v1033_v8 }
 0x20b   : > { %6968 = vmatprep.subr.bf16.mxu0 %v8813_v16  ;;  %7009 = vmatprep.subr.bf16.mxu1 %v8941_v18  ;;  %v913_v14 = vld [vmem:[%s9818_s7 + $0x1268] sm:$0xff] }
 0x20c   : > { %v1037_v16 = vld [vmem:[%s9818_s7 + $0x1648] sm:$0xff]  ;;  %v8853_v23 = vcombine.high %v909_v13, %v913_v14  ;;  %v8852_v30 = vcombine.low %v909_v13, %v913_v14 }
 0x20d   : > { %v1041_v18 = vld [vmem:[%s9818_s7 + $0x1668] sm:$0xff] }
 0x20e   : > { %6969 = vmatpush1.bf16.msra.mxu0 %v8812_v25  ;;  %7010 = vmatpush1.bf16.msra.mxu1 %v8940_v26  ;;  %v8981_v24 = vcombine.high %v1037_v16, %v1041_v18  ;;  %v917_v25 = vld [vmem:[%s9818_s7 + $0x1288] sm:$0xff]  ;;  %v8980_v31 = vcombine.low %v1037_v16, %v1041_v18 }
 0x20f   : > { %6970 = vmatprep.subr.bf16.mxu0 %v8821_v27  ;;  %7011 = vmatprep.subr.bf16.mxu1 %v8949_v28  ;;  %v6707_v46 = vpop.f32.mrb[8].mxu1  ;;  %v921_v26 = vld [vmem:[%s9818_s7 + $0x12a8] sm:$0xff] }
 0x210   : > { %v6666_v39 = vpop.f32.mrb[8].mxu0  ;;  %v6709_v55 = vpop.f32.mrb[9].mxu1  ;;  %v1045_v27 = vld [vmem:[%s9818_s7 + $0x1688] sm:$0xff] }
 0x211   : > { %v6667_v44 = vadd.f32 %v6666_v39, %v10272_v61  ;;  %v6668_v47 = vpop.f32.mrb[9].mxu0  ;;  %v6711_v63 = vpop.f32.mrb[10].mxu1  ;;  %v8956_v61 = vcombine.low %v1013_v33, %v1017_v34  ;;  %v1049_v28 = vld [vmem:[%s9818_s7 + $0x16a8] sm:$0xff]  ;;  %v8861_v33 = vcombine.high %v917_v25, %v921_v26 }
 0x212   : > { %v6669_v53 = vadd.f32 %v6668_v47, %v10274_v1  ;;  %v6670_v56 = vpop.f32.mrb[10].mxu0  ;;  %6971 = vmatpush1.bf16.msra.mxu0 %v8820_v35  ;;  %7012 = vmatpush1.bf16.msra.mxu1 %v8948_v36  ;;  %v6712_v1 = vpop.f32.mrb[11].mxu1  ;;  %v8989_v34 = vcombine.high %v1045_v27, %v1049_v28  ;;  %v925_v35 = vld [vmem:[%s9818_s7 + $0x12c8] sm:$0xff]  ;;  %v8988_v42 = vcombine.low %v1045_v27, %v1049_v28 }
 0x213   : > { %v10346_v62 = vadd.f32 %v6707_v46, %v6667_v44  ;;  %v6671_v54 = vpop.f32.mrb[11].mxu0  ;;  %6972 = vmatprep.subr.bf16.mxu0 %v8829_v38  ;;  %7013 = vmatprep.subr.bf16.mxu1 %v8957_v40  ;;  %v929_v36 = vld [vmem:[%s9818_s7 + $0x12e8] sm:$0xff]  ;;  %v8860_v40 = vcombine.low %v917_v25, %v921_v26 }
 0x214   : > { %v10348_v58 = vadd.f32 %v6709_v55, %v6669_v53  ;;  %v1053_v38 = vld [vmem:[%s9818_s7 + $0x16c8] sm:$0xff]  ;;  %v8869_v43 = vcombine.high %v925_v35, %v929_v36  ;;  %v8868_v53 = vcombine.low %v925_v35, %v929_v36 }
 0x215   : > { %v1057_v39 = vld [vmem:[%s9818_s7 + $0x16e8] sm:$0xff] }
 0x216   : > { %6973 = vmatpush1.bf16.msra.mxu0 %v8828_v57  ;;  %7014 = vmatpush1.bf16.msra.mxu1 %v8956_v61  ;;  %v8997_v44 = vcombine.high %v1053_v38, %v1057_v39  ;;  %v933_v46 = vld [vmem:[%s9818_s7 + $0x1308] sm:$0xff]  ;;  %v8996_v55 = vcombine.low %v1053_v38, %v1057_v39  ;;  %v9005_v57 = vcombine.high %v1061_v50, %v1065_v51 }
 0x217   : > { %6974 = vmatprep.subr.bf16.mxu0 %v8837_v0  ;;  %7015 = vmatprep.subr.bf16.mxu1 %v8965_v2  ;;  %v937_v47 = vld [vmem:[%s9818_s7 + $0x1328] sm:$0xff]  ;;  %v9004_v2 = vcombine.low %v1061_v50, %v1065_v51 }
 0x218   : > { %v8877_v56 = vcombine.high %v933_v46, %v937_v47  ;;  %v941_v63 = vld [vmem:[%s9818_s7 + $0x1348] sm:$0xff]  ;;  %v8876_v1 = vcombine.low %v933_v46, %v937_v47 }
 0x219   : > { %v945_v54 = vld [vmem:[%s9818_s7 + $0x1368] sm:$0xff] }
 0x21a   : > { %6975 = vmatpush1.bf16.msra.mxu0 %v8836_v9  ;;  %7016 = vmatpush1.bf16.msra.mxu1 %v8964_v10  ;;  %v1069_v61 = vld [vmem:[%s9818_s7 + $0x1748] sm:$0xff]  ;;  %v8885_v4 = vcombine.high %v941_v63, %v945_v54 }
 0x21b   : > { %6976 = vmatprep.subr.bf16.mxu0 %v8845_v11  ;;  %7017 = vmatprep.subr.bf16.mxu1 %v8973_v12  ;;  %v1073_v0 = vld [vmem:[%s9818_s7 + $0x1768] sm:$0xff]  ;;  %v8884_v11 = vcombine.low %v941_v63, %v945_v54 }
 0x21c   : > { %v9013_v5 = vcombine.high %v1069_v61, %v1073_v0  ;;  %v949_v6 = vld [vmem:[%s9818_s7 + $0x1388] sm:$0xff]  ;;  %v9012_v12 = vcombine.low %v1069_v61, %v1073_v0 }
 0x21d   : > { %v953_v8 = vld [vmem:[%s9818_s7 + $0x13a8] sm:$0xff] }
 0x21e   : > { %6977 = vmatpush1.bf16.msra.mxu0 %v8844_v20  ;;  %7018 = vmatpush1.bf16.msra.mxu1 %v8972_v22  ;;  %v1077_v9 = vld [vmem:[%s9818_s7 + $0x1788] sm:$0xff]  ;;  %v8893_v13 = vcombine.high %v949_v6, %v953_v8 }
 0x21f   : > { %6978 = vmatprep.subr.bf16.mxu0 %v8853_v23  ;;  %7019 = vmatprep.subr.bf16.mxu1 %v8981_v24  ;;  %v1081_v10 = vld [vmem:[%s9818_s7 + $0x17a8] sm:$0xff]  ;;  %v8892_v23 = vcombine.low %v949_v6, %v953_v8 }
 0x220   : > { %v9021_v14 = vcombine.high %v1077_v9, %v1081_v10  ;;  %v957_v16 = vld [vmem:[%s9818_s7 + $0x13c8] sm:$0xff]  ;;  %v9020_v24 = vcombine.low %v1077_v9, %v1081_v10 }
 0x221   : > { %v961_v18 = vld [vmem:[%s9818_s7 + $0x13e8] sm:$0xff] }
 0x222   : > { %6979 = vmatpush1.bf16.msra.mxu0 %v8852_v30  ;;  %7020 = vmatpush1.bf16.msra.mxu1 %v8980_v31  ;;  %v1085_v20 = vld [vmem:[%s9818_s7 + $0x17c8] sm:$0xff]  ;;  %v8901_v25 = vcombine.high %v957_v16, %v961_v18 }
 0x223   : > { %6980 = vmatprep.subr.bf16.mxu0 %v8861_v33  ;;  %7021 = vmatprep.subr.bf16.mxu1 %v8989_v34  ;;  %v1089_v22 = vld [vmem:[%s9818_s7 + $0x17e8] sm:$0xff]  ;;  %v8900_v33 = vcombine.low %v957_v16, %v961_v18 }
 0x224   : > { %v9029_v26 = vcombine.high %v1085_v20, %v1089_v22  ;;  %v1093_v27 = vld [vmem:[%s9818_s7 + $0x1808] sm:$0xff]  ;;  %v9028_v34 = vcombine.low %v1085_v20, %v1089_v22 }
 0x225   : > { %v1097_v28 = vld [vmem:[%s9818_s7 + $0x1828] sm:$0xff] }
 0x226   : > { %6981 = vmatpush1.bf16.msra.mxu0 %v8860_v40  ;;  %7022 = vmatpush1.bf16.msra.mxu1 %v8988_v42  ;;  %v1221_v30 = vld [vmem:[%s9818_s7 + $0x1c08] sm:$0xff]  ;;  %v9037_v35 = vcombine.high %v1093_v27, %v1097_v28 }
 0x227   : > { %6982 = vmatprep.subr.bf16.mxu0 %v8869_v43  ;;  %7023 = vmatprep.subr.bf16.mxu1 %v8997_v44  ;;  %v1225_v31 = vld [vmem:[%s9818_s7 + $0x1c28] sm:$0xff]  ;;  %v9036_v43 = vcombine.low %v1093_v27, %v1097_v28 }
 0x228   : > { %v9165_v36 = vcombine.high %v1221_v30, %v1225_v31  ;;  %v1101_v38 = vld [vmem:[%s9818_s7 + $0x1848] sm:$0xff]  ;;  %v9164_v44 = vcombine.low %v1221_v30, %v1225_v31 }
 0x229   : > { %v1105_v39 = vld [vmem:[%s9818_s7 + $0x1868] sm:$0xff] }
 0x22a   : > { %6983 = vmatpush1.bf16.msra.mxu0 %v8868_v53  ;;  %7024 = vmatpush1.bf16.msra.mxu1 %v8996_v55  ;;  %v1229_v40 = vld [vmem:[%s9818_s7 + $0x1c48] sm:$0xff]  ;;  %v9045_v46 = vcombine.high %v1101_v38, %v1105_v39 }
 0x22b   : > { %6984 = vmatprep.subr.bf16.mxu0 %v8877_v56  ;;  %7025 = vmatprep.subr.bf16.mxu1 %v9005_v57  ;;  %v1233_v42 = vld [vmem:[%s9818_s7 + $0x1c68] sm:$0xff]  ;;  %v9044_v56 = vcombine.low %v1101_v38, %v1105_v39 }
 0x22c   : > { %v9173_v47 = vcombine.high %v1229_v40, %v1233_v42  ;;  %v1109_v50 = vld [vmem:[%s9818_s7 + $0x1888] sm:$0xff]  ;;  %v9172_v57 = vcombine.low %v1229_v40, %v1233_v42 }
 0x22d   : > { %v1113_v51 = vld [vmem:[%s9818_s7 + $0x18a8] sm:$0xff] }
 0x22e   : > { %6985 = vmatpush1.bf16.msra.mxu0 %v8876_v1  ;;  %7026 = vmatpush1.bf16.msra.mxu1 %v9004_v2  ;;  %v1237_v53 = vld [vmem:[%s9818_s7 + $0x1c88] sm:$0xff]  ;;  %v9053_v63 = vcombine.high %v1109_v50, %v1113_v51 }
 0x22f   : > { %6986 = vmatprep.subr.bf16.mxu0 %v8885_v4  ;;  %7027 = vmatprep.subr.bf16.mxu1 %v9013_v5  ;;  %v1241_v55 = vld [vmem:[%s9818_s7 + $0x1ca8] sm:$0xff]  ;;  %v9052_v4 = vcombine.low %v1109_v50, %v1113_v51 }
 0x230   : > { %v9181_v54 = vcombine.high %v1237_v53, %v1241_v55  ;;  %v1117_v61 = vld [vmem:[%s9818_s7 + $0x18c8] sm:$0xff]  ;;  %v9180_v5 = vcombine.low %v1237_v53, %v1241_v55  ;;  %v316_v53 = vld [vmem:[#allocation2] sm:$0xff] }
 0x231   : > { %v1121_v0 = vld [vmem:[%s9818_s7 + $0x18e8] sm:$0xff] }
 0x232   : > { %6987 = vmatpush1.bf16.msra.mxu0 %v8884_v11  ;;  %7028 = vmatpush1.bf16.msra.mxu1 %v9012_v12  ;;  %v1245_v1 = vld [vmem:[%s9818_s7 + $0x1cc8] sm:$0xff]  ;;  %v9061_v6 = vcombine.high %v1117_v61, %v1121_v0 }
 0x233   : > { %6988 = vmatprep.subr.bf16.mxu0 %v8893_v13  ;;  %7029 = vmatprep.subr.bf16.mxu1 %v9021_v14  ;;  %v1249_v2 = vld [vmem:[%s9818_s7 + $0x1ce8] sm:$0xff]  ;;  %v9060_v13 = vcombine.low %v1117_v61, %v1121_v0 }
 0x234   : > { %v9189_v8 = vcombine.high %v1245_v1, %v1249_v2  ;;  %v1125_v9 = vld [vmem:[%s9818_s7 + $0x1908] sm:$0xff]  ;;  %v9188_v14 = vcombine.low %v1245_v1, %v1249_v2 }
 0x235   : > { %v1129_v10 = vld [vmem:[%s9818_s7 + $0x1928] sm:$0xff] }
 0x236   : > { %6989 = vmatpush1.bf16.msra.mxu0 %v8892_v23  ;;  %7030 = vmatpush1.bf16.msra.mxu1 %v9020_v24  ;;  %v1253_v11 = vld [vmem:[%s9818_s7 + $0x1d08] sm:$0xff]  ;;  %v9069_v16 = vcombine.high %v1125_v9, %v1129_v10 }
 0x237   : > { %6990 = vmatprep.subr.bf16.mxu0 %v8901_v25  ;;  %7031 = vmatprep.subr.bf16.mxu1 %v9029_v26  ;;  %v1257_v12 = vld [vmem:[%s9818_s7 + $0x1d28] sm:$0xff]  ;;  %v9068_v25 = vcombine.low %v1125_v9, %v1129_v10 }
 0x238   : > { %v9197_v18 = vcombine.high %v1253_v11, %v1257_v12  ;;  %v1133_v20 = vld [vmem:[%s9818_s7 + $0x1948] sm:$0xff]  ;;  %v9196_v26 = vcombine.low %v1253_v11, %v1257_v12 }
 0x239   : > { %v1137_v22 = vld [vmem:[%s9818_s7 + $0x1968] sm:$0xff] }
 0x23a   : > { %6991 = vmatpush1.bf16.msra.mxu0 %v8900_v33  ;;  %7032 = vmatpush1.bf16.msra.mxu1 %v9028_v34  ;;  %v1261_v23 = vld [vmem:[%s9818_s7 + $0x1d48] sm:$0xff]  ;;  %v9077_v27 = vcombine.high %v1133_v20, %v1137_v22 }
 0x23b   : > { %7042 = vmatprep.subr.bf16.mxu0 %v9037_v35  ;;  %7083 = vmatprep.subr.bf16.mxu1 %v9165_v36  ;;  %v1265_v24 = vld [vmem:[%s9818_s7 + $0x1d68] sm:$0xff]  ;;  %v9076_v35 = vcombine.low %v1133_v20, %v1137_v22 }
 0x23c   : > { %v9205_v28 = vcombine.high %v1261_v23, %v1265_v24  ;;  %v1141_v30 = vld [vmem:[%s9818_s7 + $0x1988] sm:$0xff]  ;;  %v9204_v36 = vcombine.low %v1261_v23, %v1265_v24 }
 0x23d   : > { %6993 = vmatmul.mubr.bf16.vlgmr.msra.gmra.mrb[24].mxu0 %v10084_v3  ;;  %7034 = vmatmul.mubr.bf16.vlgmr.msra.gmra.mrb[24].mxu1 %v10089_v7  ;;  %v1145_v31 = vld [vmem:[%s9818_s7 + $0x19a8] sm:$0xff] }
 0x23e   : > { %7043 = vmatpush1.bf16.msra.mxu0 %v9036_v43  ;;  %7084 = vmatpush1.bf16.msra.mxu1 %v9164_v44  ;;  %v1269_v33 = vld [vmem:[%s9818_s7 + $0x1d88] sm:$0xff]  ;;  %v9085_v38 = vcombine.high %v1141_v30, %v1145_v31 }
 0x23f   : > { %7044 = vmatprep.subr.bf16.mxu0 %v9045_v46  ;;  %7085 = vmatprep.subr.bf16.mxu1 %v9173_v47  ;;  %v1273_v34 = vld [vmem:[%s9818_s7 + $0x1da8] sm:$0xff] }
 0x240   : > { %7074 = vmatprep.mubr.bf16.mxu0 %v10094_v15  ;;  %7115 = vmatprep.mubr.bf16.mxu1 %v10099_v19  ;;  %v9213_v40 = vcombine.high %v1269_v33, %v1273_v34  ;;  %v1149_v42 = vld [vmem:[%s9818_s7 + $0x19c8] sm:$0xff]  ;;  %v9212_v1 = vcombine.low %v1269_v33, %v1273_v34 }
 0x241   : > { %v1153_v43 = vld [vmem:[%s9818_s7 + $0x19e8] sm:$0xff] }
 0x242   : > { %7045 = vmatpush1.bf16.msra.mxu0 %v9044_v56  ;;  %7086 = vmatpush1.bf16.msra.mxu1 %v9172_v57  ;;  %v1277_v50 = vld [vmem:[%s9818_s7 + $0x1dc8] sm:$0xff]  ;;  %v9093_v2 = vcombine.high %v1149_v42, %v1153_v43 }
 0x243   : > { %7046 = vmatprep.subr.bf16.mxu0 %v9053_v63  ;;  %7087 = vmatprep.subr.bf16.mxu1 %v9181_v54  ;;  %v1281_v51 = vld [vmem:[%s9818_s7 + $0x1de8] sm:$0xff]  ;;  %v9084_v63 = vcombine.low %v1141_v30, %v1145_v31 }
 0x244   : > { %v317_v61 = vld [vmem:[#allocation2 + $0x8] sm:$0xff] }
 0x245   : > { %v1285_v10 = vld [vmem:[%s9818_s7 + $0x1e08] sm:$0xff] }
 0x246   : > { %7047 = vmatpush1.bf16.msra.mxu0 %v9052_v4  ;;  %7088 = vmatpush1.bf16.msra.mxu1 %v9180_v5  ;;  %v1289_v11 = vld [vmem:[%s9818_s7 + $0x1e28] sm:$0xff] }
 0x247   : > { %7048 = vmatprep.subr.bf16.mxu0 %v9061_v6  ;;  %7089 = vmatprep.subr.bf16.mxu1 %v9189_v8  ;;  %v1157_v6 = vld [vmem:[%s9818_s7 + $0x1a08] sm:$0xff] }
 0x248   : > { %v1161_v8 = vld [vmem:[%s9818_s7 + $0x1a28] sm:$0xff] }
 0x249   : > { %v1165_v20 = vld [vmem:[%s9818_s7 + $0x1a48] sm:$0xff] }
 0x24a   : > { %7049 = vmatpush1.bf16.msra.mxu0 %v9060_v13  ;;  %7090 = vmatpush1.bf16.msra.mxu1 %v9188_v14  ;;  %v9092_v13 = vcombine.low %v1149_v42, %v1153_v43  ;;  %v9220_v14 = vcombine.low %v1277_v50, %v1281_v51  ;;  %v1169_v22 = vld [vmem:[%s9818_s7 + $0x1a68] sm:$0xff] }
 0x24b   : > { %7050 = vmatprep.subr.bf16.mxu0 %v9069_v16  ;;  %7091 = vmatprep.subr.bf16.mxu1 %v9197_v18  ;;  %v9101_v16 = vcombine.high %v1157_v6, %v1161_v8  ;;  %v9229_v18 = vcombine.high %v1285_v10, %v1289_v11  ;;  %v1293_v23 = vld [vmem:[%s9818_s7 + $0x1e48] sm:$0xff] }
 0x24c   : > { %v1297_v24 = vld [vmem:[%s9818_s7 + $0x1e68] sm:$0xff] }
 0x24d   : > { %v1173_v30 = vld [vmem:[%s9818_s7 + $0x1a88] sm:$0xff] }
 0x24e   : > { %7051 = vmatpush1.bf16.msra.mxu0 %v9068_v25  ;;  %7092 = vmatpush1.bf16.msra.mxu1 %v9196_v26  ;;  %v9100_v25 = vcombine.low %v1157_v6, %v1161_v8  ;;  %v9228_v26 = vcombine.low %v1285_v10, %v1289_v11  ;;  %v1177_v31 = vld [vmem:[%s9818_s7 + $0x1aa8] sm:$0xff] }
 0x24f   : > { %7052 = vmatprep.subr.bf16.mxu0 %v9077_v27  ;;  %7093 = vmatprep.subr.bf16.mxu1 %v9205_v28  ;;  %v9109_v27 = vcombine.high %v1165_v20, %v1169_v22  ;;  %v9237_v28 = vcombine.high %v1293_v23, %v1297_v24  ;;  %v1301_v33 = vld [vmem:[%s9818_s7 + $0x1e88] sm:$0xff] }
 0x250   : > { %v6748_v39 = vpop.f32.mrb[12].mxu0  ;;  %v6789_v46 = vpop.f32.mrb[12].mxu1  ;;  %v1305_v34 = vld [vmem:[%s9818_s7 + $0x1ea8] sm:$0xff] }
 0x251   : > { %v6749_v44 = vadd.f32 %v6748_v39, %v10346_v62  ;;  %v6750_v47 = vpop.f32.mrb[13].mxu0  ;;  %v6791_v56 = vpop.f32.mrb[13].mxu1  ;;  %v9245_v39 = vcombine.high %v1301_v33, %v1305_v34  ;;  %v1185_v42 = vld [vmem:[%s9818_s7 + $0x1ae8] sm:$0xff] }
 0x252   : > { %v6751_v55 = vadd.f32 %v6750_v47, %v10348_v58  ;;  %v6752_v57 = vpop.f32.mrb[14].mxu0  ;;  %7053 = vmatpush1.bf16.msra.mxu0 %v9076_v35  ;;  %v6793_v0 = vpop.f32.mrb[14].mxu1  ;;  %7094 = vmatpush1.bf16.msra.mxu1 %v9204_v36  ;;  %v9221_v58 = vcombine.high %v1277_v50, %v1281_v51  ;;  %v9108_v35 = vcombine.low %v1165_v20, %v1169_v22  ;;  %v1309_v43 = vld [vmem:[%s9818_s7 + $0x1ec8] sm:$0xff] }
 0x253   : > { %v6790_v54 = vadd.f32 %v6789_v46, %v6749_v44  ;;  %v6753_v62 = vpop.f32.mrb[15].mxu0  ;;  %7054 = vmatprep.subr.bf16.mxu0 %v9085_v38  ;;  %v6794_v5 = vpop.f32.mrb[15].mxu1  ;;  %7095 = vmatprep.subr.bf16.mxu1 %v9213_v40  ;;  %v9236_v36 = vcombine.low %v1293_v23, %v1297_v24  ;;  %v9117_v38 = vcombine.high %v1173_v30, %v1177_v31  ;;  %v1181_v40 = vld [vmem:[%s9818_s7 + $0x1ac8] sm:$0xff] }
 0x254   : > { %v6792_v4 = vadd.f32 %v6791_v56, %v6751_v55  ;;  %v1313_v44 = vld [vmem:[%s9818_s7 + $0x1ee8] sm:$0xff]  ;;  %v9116_v46 = vcombine.low %v1173_v30, %v1177_v31  ;;  %v9244_v47 = vcombine.low %v1301_v33, %v1305_v34  ;;  %v9125_v50 = vcombine.high %v1181_v40, %v1185_v42  ;;  %v326_v30 = vld [vmem:[%s9818_s7 + $0x10] sm:$0xff] }
 0x255   : > { %v7780_v9 = vadd.f32 %v6790_v54, %v316_v53  ;;  %v9253_v51 = vcombine.high %v1309_v43, %v1313_v44  ;;  %v1189_v53 = vld [vmem:[%s9818_s7 + $0x1b08] sm:$0xff]  ;;  %v9252_v54 = vcombine.low %v1309_v43, %v1313_v44  ;;  %v330_v31 = vld [vmem:[%s9818_s7 + $0x30] sm:$0xff] }
 0x256   : > { %v7781_v12 = vadd.f32 %v6792_v4, %v317_v61  ;;  %7055 = vmatpush1.bf16.msra.mxu0 %v9084_v63  ;;  %7096 = vmatpush1.bf16.msra.mxu1 %v9212_v1  ;;  %v1193_v55 = vld [vmem:[%s9818_s7 + $0x1b28] sm:$0xff]  ;;  %v9124_v63 = vcombine.low %v1181_v40, %v1185_v42  ;;  %v454_v33 = vld [vmem:[%s9818_s7 + $0x410] sm:$0xff] }
 0x257   : > { %7788 = vst [vmem:[#allocation2] sm:$0xff] %v7780_v9  ;;  %7056 = vmatprep.subr.bf16.mxu0 %v9093_v2  ;;  %7097 = vmatprep.subr.bf16.mxu1 %v9221_v58  ;;  %v1317_v56 = vld [vmem:[%s9818_s7 + $0x1f08] sm:$0xff]  ;;  %v9133_v61 = vcombine.high %v1189_v53, %v1193_v55  ;;  %v9132_v5 = vcombine.low %v1189_v53, %v1193_v55  ;;  %v458_v34 = vld [vmem:[%s9818_s7 + $0x430] sm:$0xff] }
 0x258   : > { %7789 = vst [vmem:[#allocation2 + $0x8] sm:$0xff] %v7781_v12  ;;  %v1321_v57 = vld [vmem:[%s9818_s7 + $0x1f28] sm:$0xff]  ;;  %v334_v40 = vld [vmem:[%s9818_s7 + $0x50] sm:$0xff] }
 0x259   : > { %v9261_v0 = vcombine.high %v1317_v56, %v1321_v57  ;;  %v1197_v62 = vld [vmem:[%s9818_s7 + $0x1b48] sm:$0xff]  ;;  %v9260_v58 = vcombine.low %v1317_v56, %v1321_v57  ;;  %v338_v42 = vld [vmem:[%s9818_s7 + $0x70] sm:$0xff] }
 0x25a   : > { %7057 = vmatpush1.bf16.msra.mxu0 %v9092_v13  ;;  %7098 = vmatpush1.bf16.msra.mxu1 %v9220_v14  ;;  %v1201_v1 = vld [vmem:[%s9818_s7 + $0x1b68] sm:$0xff]  ;;  %v462_v43 = vld [vmem:[%s9818_s7 + $0x450] sm:$0xff] }
 0x25b   : > { %7058 = vmatprep.subr.bf16.mxu0 %v9101_v16  ;;  %7099 = vmatprep.subr.bf16.mxu1 %v9229_v18  ;;  %v1325_v2 = vld [vmem:[%s9818_s7 + $0x1f48] sm:$0xff]  ;;  %v9141_v6 = vcombine.high %v1197_v62, %v1201_v1  ;;  %v9140_v13 = vcombine.low %v1197_v62, %v1201_v1  ;;  %v466_v44 = vld [vmem:[%s9818_s7 + $0x470] sm:$0xff] }
 0x25c   : > { %v1329_v4 = vld [vmem:[%s9818_s7 + $0x1f68] sm:$0xff]  ;;  %v342_v53 = vld [vmem:[%s9818_s7 + $0x90] sm:$0xff] }
 0x25d   : > { %v9269_v8 = vcombine.high %v1325_v2, %v1329_v4  ;;  %v1205_v9 = vld [vmem:[%s9818_s7 + $0x1b88] sm:$0xff]  ;;  %v9268_v14 = vcombine.low %v1325_v2, %v1329_v4  ;;  %v346_v55 = vld [vmem:[%s9818_s7 + $0xb0] sm:$0xff] }
 0x25e   : > { %7059 = vmatpush1.bf16.msra.mxu0 %v9100_v25  ;;  %7100 = vmatpush1.bf16.msra.mxu1 %v9228_v26  ;;  %v1209_v10 = vld [vmem:[%s9818_s7 + $0x1ba8] sm:$0xff]  ;;  %v470_v56 = vld [vmem:[%s9818_s7 + $0x490] sm:$0xff] }
 0x25f   : > { %7060 = vmatprep.subr.bf16.mxu0 %v9109_v27  ;;  %7101 = vmatprep.subr.bf16.mxu1 %v9237_v28  ;;  %v1333_v11 = vld [vmem:[%s9818_s7 + $0x1f88] sm:$0xff]  ;;  %v9149_v16 = vcombine.high %v1205_v9, %v1209_v10  ;;  %v9148_v25 = vcombine.low %v1205_v9, %v1209_v10  ;;  %v474_v57 = vld [vmem:[%s9818_s7 + $0x4b0] sm:$0xff] }
 0x260   : > { %v1337_v12 = vld [vmem:[%s9818_s7 + $0x1fa8] sm:$0xff]  ;;  %v350_v62 = vld [vmem:[%s9818_s7 + $0xd0] sm:$0xff] }
 0x261   : > { %v9277_v18 = vcombine.high %v1333_v11, %v1337_v12  ;;  %v1213_v20 = vld [vmem:[%s9818_s7 + $0x1bc8] sm:$0xff]  ;;  %v9276_v26 = vcombine.low %v1333_v11, %v1337_v12  ;;  %v354_v1 = vld [vmem:[%s9818_s7 + $0xf0] sm:$0xff] }
 0x262   : > { %7061 = vmatpush1.bf16.msra.mxu0 %v9108_v35  ;;  %7102 = vmatpush1.bf16.msra.mxu1 %v9236_v36  ;;  %v1217_v22 = vld [vmem:[%s9818_s7 + $0x1be8] sm:$0xff]  ;;  %v478_v2 = vld [vmem:[%s9818_s7 + $0x4d0] sm:$0xff] }
 0x263   : > { %7062 = vmatprep.subr.bf16.mxu0 %v9117_v38  ;;  %7103 = vmatprep.subr.bf16.mxu1 %v9245_v39  ;;  %v1341_v23 = vld [vmem:[%s9818_s7 + $0x1fc8] sm:$0xff]  ;;  %v9157_v27 = vcombine.high %v1213_v20, %v1217_v22  ;;  %v9156_v35 = vcombine.low %v1213_v20, %v1217_v22  ;;  %v8271_v38 = vcombine.high %v326_v30, %v330_v31  ;;  %v482_v4 = vld [vmem:[%s9818_s7 + $0x4f0] sm:$0xff] }
 0x264   : > { %v1345_v24 = vld [vmem:[%s9818_s7 + $0x1fe8] sm:$0xff]  ;;  %v8399_v39 = vcombine.high %v454_v33, %v458_v34  ;;  %v358_v9 = vld [vmem:[%s9818_s7 + $0x110] sm:$0xff] }
 0x265   : > { %v9285_v28 = vcombine.high %v1341_v23, %v1345_v24  ;;  %v9284_v36 = vcombine.low %v1341_v23, %v1345_v24  ;;  %v362_v10 = vld [vmem:[%s9818_s7 + $0x130] sm:$0xff] }
 0x266   : > { %7063 = vmatpush1.bf16.msra.mxu0 %v9116_v46  ;;  %7104 = vmatpush1.bf16.msra.mxu1 %v9244_v47  ;;  %v8270_v46 = vcombine.low %v326_v30, %v330_v31  ;;  %v8398_v47 = vcombine.low %v454_v33, %v458_v34  ;;  %v486_v11 = vld [vmem:[%s9818_s7 + $0x510] sm:$0xff] }
 0x267   : > { %7064 = vmatprep.subr.bf16.mxu0 %v9125_v50  ;;  %7105 = vmatprep.subr.bf16.mxu1 %v9253_v51  ;;  %v8279_v50 = vcombine.high %v334_v40, %v338_v42  ;;  %v8407_v51 = vcombine.high %v462_v43, %v466_v44  ;;  %v490_v12 = vld [vmem:[%s9818_s7 + $0x530] sm:$0xff] }
 0x268   : > { %v366_v20 = vld [vmem:[%s9818_s7 + $0x150] sm:$0xff] }
 0x269   : > { %v370_v22 = vld [vmem:[%s9818_s7 + $0x170] sm:$0xff] }
 0x26a   : > { %7065 = vmatpush1.bf16.msra.mxu0 %v9124_v63  ;;  %7106 = vmatpush1.bf16.msra.mxu1 %v9252_v54  ;;  %v8278_v63 = vcombine.low %v334_v40, %v338_v42  ;;  %v8406_v54 = vcombine.low %v462_v43, %v466_v44  ;;  %v494_v23 = vld [vmem:[%s9818_s7 + $0x550] sm:$0xff] }
 0x26b   : > { %7066 = vmatprep.subr.bf16.mxu0 %v9133_v61  ;;  %7107 = vmatprep.subr.bf16.mxu1 %v9261_v0  ;;  %v8287_v61 = vcombine.high %v342_v53, %v346_v55  ;;  %v8415_v0 = vcombine.high %v470_v56, %v474_v57  ;;  %v498_v24 = vld [vmem:[%s9818_s7 + $0x570] sm:$0xff] }
 0x26c   : > { %v374_v30 = vld [vmem:[%s9818_s7 + $0x190] sm:$0xff] }
 0x26d   : > { %v378_v31 = vld [vmem:[%s9818_s7 + $0x1b0] sm:$0xff] }
 0x26e   : > { %7067 = vmatpush1.bf16.msra.mxu0 %v9132_v5  ;;  %7108 = vmatpush1.bf16.msra.mxu1 %v9260_v58  ;;  %v8286_v5 = vcombine.low %v342_v53, %v346_v55  ;;  %v8414_v58 = vcombine.low %v470_v56, %v474_v57  ;;  %v502_v33 = vld [vmem:[%s9818_s7 + $0x590] sm:$0xff]  ;;  %v8318_v56 = vcombine.low %v374_v30, %v378_v31 }
 0x26f   : > { %7068 = vmatprep.subr.bf16.mxu0 %v9141_v6  ;;  %7109 = vmatprep.subr.bf16.mxu1 %v9269_v8  ;;  %v8295_v6 = vcombine.high %v350_v62, %v354_v1  ;;  %v8423_v8 = vcombine.high %v478_v2, %v482_v4  ;;  %v506_v34 = vld [vmem:[%s9818_s7 + $0x5b0] sm:$0xff] }
 0x270   : > { %v8447_v40 = vcombine.high %v502_v33, %v506_v34  ;;  %v382_v42 = vld [vmem:[%s9818_s7 + $0x1d0] sm:$0xff] }
 0x271   : > { %v386_v43 = vld [vmem:[%s9818_s7 + $0x1f0] sm:$0xff] }
 0x272   : > { %7069 = vmatpush1.bf16.msra.mxu0 %v9140_v13  ;;  %7110 = vmatpush1.bf16.msra.mxu1 %v9268_v14  ;;  %v8294_v13 = vcombine.low %v350_v62, %v354_v1  ;;  %v8422_v14 = vcombine.low %v478_v2, %v482_v4  ;;  %v390_v2 = vld [vmem:[%s9818_s7 + $0x210] sm:$0xff] }
 0x273   : > { %7070 = vmatprep.subr.bf16.mxu0 %v9149_v16  ;;  %7111 = vmatprep.subr.bf16.mxu1 %v9277_v18  ;;  %v8303_v16 = vcombine.high %v358_v9, %v362_v10  ;;  %v8431_v18 = vcombine.high %v486_v11, %v490_v12  ;;  %v394_v4 = vld [vmem:[%s9818_s7 + $0x230] sm:$0xff] }
 0x276   : > { %7071 = vmatpush1.bf16.msra.mxu0 %v9148_v25  ;;  %7112 = vmatpush1.bf16.msra.mxu1 %v9276_v26  ;;  %v8302_v25 = vcombine.low %v358_v9, %v362_v10  ;;  %v8430_v26 = vcombine.low %v486_v11, %v490_v12  ;;  %v8335_v9 = vcombine.high %v390_v2, %v394_v4  ;;  %v398_v11 = vld [vmem:[%s9818_s7 + $0x250] sm:$0xff] }
 0x277   : > { %7072 = vmatprep.subr.bf16.mxu0 %v9157_v27  ;;  %7113 = vmatprep.subr.bf16.mxu1 %v9285_v28  ;;  %v8311_v27 = vcombine.high %v366_v20, %v370_v22  ;;  %v8439_v28 = vcombine.high %v494_v23, %v498_v24  ;;  %v402_v12 = vld [vmem:[%s9818_s7 + $0x270] sm:$0xff] }
 0x27a   : > { %7073 = vmatpush1.bf16.msra.mxu0 %v9156_v35  ;;  %7114 = vmatpush1.bf16.msra.mxu1 %v9284_v36  ;;  %v8310_v35 = vcombine.low %v366_v20, %v370_v22  ;;  %v8438_v36 = vcombine.low %v494_v23, %v498_v24  ;;  %v8343_v20 = vcombine.high %v398_v11, %v402_v12  ;;  %v406_v23 = vld [vmem:[%s9818_s7 + $0x290] sm:$0xff] }
 0x27b   : > { %7124 = vmatprep.subr.bf16.mxu0 %v8271_v38  ;;  %7165 = vmatprep.subr.bf16.mxu1 %v8399_v39  ;;  %v8319_v38 = vcombine.high %v374_v30, %v378_v31  ;;  %v410_v24 = vld [vmem:[%s9818_s7 + $0x2b0] sm:$0xff] }
 0x27c   : > { %v8351_v30 = vcombine.high %v406_v23, %v410_v24 }
 0x27d   : > { %7075 = vmatmul.mubr.bf16.vlgmr.msra.gmra.mrb[28].mxu0 %v10164_v45  ;;  %7116 = vmatmul.mubr.bf16.vlgmr.msra.gmra.mrb[28].mxu1 %v10168_v48 }
 0x27e   : > { %7125 = vmatpush1.bf16.msra.mxu0 %v8270_v46  ;;  %7166 = vmatpush1.bf16.msra.mxu1 %v8398_v47  ;;  %v510_v47 = vld [vmem:[%s9818_s7 + $0x5d0] sm:$0xff] }
 0x27f   : > { %7126 = vmatprep.subr.bf16.mxu0 %v8279_v50  ;;  %7167 = vmatprep.subr.bf16.mxu1 %v8407_v51  ;;  %v514_v50 = vld [vmem:[%s9818_s7 + $0x5f0] sm:$0xff] }
 0x280   : > { %7156 = vmatprep.mubr.bf16.mxu0 %v9876_v59  ;;  %7197 = vmatprep.mubr.bf16.mxu1 %v9878_v60  ;;  %v8455_v1 = vcombine.high %v510_v47, %v514_v50 }
 0x282   : > { %7127 = vmatpush1.bf16.msra.mxu0 %v8278_v63  ;;  %7168 = vmatpush1.bf16.msra.mxu1 %v8406_v54 }
 0x283   : > { %7128 = vmatprep.subr.bf16.mxu0 %v8287_v61  ;;  %7169 = vmatprep.subr.bf16.mxu1 %v8415_v0  ;;  %v8446_v61 = vcombine.low %v502_v33, %v506_v34  ;;  %v8327_v0 = vcombine.high %v382_v42, %v386_v43  ;;  %v414_v33 = vld [vmem:[%s9818_s7 + $0x2d0] sm:$0xff] }
 0x284   : > { %v418_v34 = vld [vmem:[%s9818_s7 + $0x2f0] sm:$0xff] }
 0x286   : > { %7129 = vmatpush1.bf16.msra.mxu0 %v8286_v5  ;;  %7170 = vmatpush1.bf16.msra.mxu1 %v8414_v58  ;;  %v518_v5 = vld [vmem:[%s9818_s7 + $0x610] sm:$0xff] }
 0x287   : > { %7130 = vmatprep.subr.bf16.mxu0 %v8295_v6  ;;  %7171 = vmatprep.subr.bf16.mxu1 %v8423_v8  ;;  %v522_v58 = vld [vmem:[%s9818_s7 + $0x630] sm:$0xff]  ;;  %v8326_v6 = vcombine.low %v382_v42, %v386_v43  ;;  %v8454_v8 = vcombine.low %v510_v47, %v514_v50  ;;  %v8358_v50 = vcombine.low %v414_v33, %v418_v34 }
 0x288   : > { %v8463_v10 = vcombine.high %v518_v5, %v522_v58  ;;  %v422_v43 = vld [vmem:[%s9818_s7 + $0x310] sm:$0xff] }
 0x289   : > { %v554_v47 = vld [vmem:[%s9818_s7 + $0x730] sm:$0xff] }
 0x28a   : > { %7131 = vmatpush1.bf16.msra.mxu0 %v8294_v13  ;;  %7172 = vmatpush1.bf16.msra.mxu1 %v8422_v14  ;;  %v526_v13 = vld [vmem:[%s9818_s7 + $0x650] sm:$0xff] }
 0x28b   : > { %7132 = vmatprep.subr.bf16.mxu0 %v8303_v16  ;;  %7173 = vmatprep.subr.bf16.mxu1 %v8431_v18  ;;  %v530_v14 = vld [vmem:[%s9818_s7 + $0x670] sm:$0xff]  ;;  %v8334_v16 = vcombine.low %v390_v2, %v394_v4  ;;  %v8462_v18 = vcombine.low %v518_v5, %v522_v58 }
 0x28c   : > { %v8471_v22 = vcombine.high %v526_v13, %v530_v14  ;;  %v438_v5 = vld [vmem:[%s9818_s7 + $0x390] sm:$0xff] }
 0x28d   : > { %v442_v58 = vld [vmem:[%s9818_s7 + $0x3b0] sm:$0xff] }
 0x28e   : > { %7133 = vmatpush1.bf16.msra.mxu0 %v8302_v25  ;;  %7174 = vmatpush1.bf16.msra.mxu1 %v8430_v26  ;;  %v534_v25 = vld [vmem:[%s9818_s7 + $0x690] sm:$0xff] }
 0x28f   : > { %7134 = vmatprep.subr.bf16.mxu0 %v8311_v27  ;;  %7175 = vmatprep.subr.bf16.mxu1 %v8439_v28  ;;  %v538_v26 = vld [vmem:[%s9818_s7 + $0x6b0] sm:$0xff]  ;;  %v8342_v27 = vcombine.low %v398_v11, %v402_v12  ;;  %v8470_v28 = vcombine.low %v526_v13, %v530_v14  ;;  %v8383_v11 = vcombine.high %v438_v5, %v442_v58 }
 0x290   : > { %v6830_v39 = vpop.f32.mrb[16].mxu0  ;;  %v6871_v44 = vpop.f32.mrb[16].mxu1  ;;  %v8479_v31 = vcombine.high %v534_v25, %v538_v26  ;;  %v446_v13 = vld [vmem:[%s9818_s7 + $0x3d0] sm:$0xff] }
 0x291   : > { %v6832_v46 = vpop.f32.mrb[17].mxu0  ;;  %v10488_v51 = vadd.f32 %v6871_v44, %v6830_v39  ;;  %v6873_v53 = vpop.f32.mrb[17].mxu1  ;;  %v8478_v39 = vcombine.low %v534_v25, %v538_v26  ;;  %v426_v44 = vld [vmem:[%s9818_s7 + $0x330] sm:$0xff] }
 0x292   : > { %v6834_v55 = vpop.f32.mrb[18].mxu0  ;;  %7135 = vmatpush1.bf16.msra.mxu0 %v8310_v35  ;;  %v10490_v57 = vadd.f32 %v6873_v53, %v6832_v46  ;;  %v6875_v63 = vpop.f32.mrb[18].mxu1  ;;  %7176 = vmatpush1.bf16.msra.mxu1 %v8438_v36  ;;  %v542_v35 = vld [vmem:[%s9818_s7 + $0x6d0] sm:$0xff] }
 0x293   : > { %v6835_v54 = vpop.f32.mrb[19].mxu0  ;;  %7136 = vmatprep.subr.bf16.mxu0 %v8319_v38  ;;  %v6876_v62 = vpop.f32.mrb[19].mxu1  ;;  %7177 = vmatprep.subr.bf16.mxu1 %v8447_v40  ;;  %v546_v36 = vld [vmem:[%s9818_s7 + $0x6f0] sm:$0xff]  ;;  %v8350_v38 = vcombine.low %v406_v23, %v410_v24  ;;  %v8359_v40 = vcombine.high %v414_v33, %v418_v34  ;;  %v8367_v55 = vcombine.high %v422_v43, %v426_v44 }
 0x294   : > { %v8487_v42 = vcombine.high %v542_v35, %v546_v36  ;;  %v550_v46 = vld [vmem:[%s9818_s7 + $0x710] sm:$0xff]  ;;  %v8486_v53 = vcombine.low %v542_v35, %v546_v36  ;;  %v8366_v62 = vcombine.low %v422_v43, %v426_v44 }
 0x295   : > { %v430_v63 = vld [vmem:[%s9818_s7 + $0x350] sm:$0xff] }
 0x296   : > { %7137 = vmatpush1.bf16.msra.mxu0 %v8318_v56  ;;  %7178 = vmatpush1.bf16.msra.mxu1 %v8446_v61  ;;  %v8495_v56 = vcombine.high %v550_v46, %v554_v47  ;;  %v434_v54 = vld [vmem:[%s9818_s7 + $0x370] sm:$0xff] }
 0x297   : > { %7138 = vmatprep.subr.bf16.mxu0 %v8327_v0  ;;  %7179 = vmatprep.subr.bf16.mxu1 %v8455_v1  ;;  %v558_v61 = vld [vmem:[%s9818_s7 + $0x750] sm:$0xff]  ;;  %v8494_v1 = vcombine.low %v550_v46, %v554_v47  ;;  %v8375_v2 = vcombine.high %v430_v63, %v434_v54 }
 0x298   : > { %v562_v0 = vld [vmem:[%s9818_s7 + $0x770] sm:$0xff] }
 0x299   : > { %v8503_v4 = vcombine.high %v558_v61, %v562_v0  ;;  %v450_v14 = vld [vmem:[%s9818_s7 + $0x3f0] sm:$0xff] }
 0x29a   : > { %7139 = vmatpush1.bf16.msra.mxu0 %v8326_v6  ;;  %7180 = vmatpush1.bf16.msra.mxu1 %v8454_v8  ;;  %v566_v6 = vld [vmem:[%s9818_s7 + $0x790] sm:$0xff]  ;;  %v8391_v23 = vcombine.high %v446_v13, %v450_v14 }
 0x29b   : > { %7140 = vmatprep.subr.bf16.mxu0 %v8335_v9  ;;  %7181 = vmatprep.subr.bf16.mxu1 %v8463_v10  ;;  %v570_v8 = vld [vmem:[%s9818_s7 + $0x7b0] sm:$0xff]  ;;  %v8374_v9 = vcombine.low %v430_v63, %v434_v54  ;;  %v8502_v10 = vcombine.low %v558_v61, %v562_v0 }
 0x29c   : > { %v8511_v12 = vcombine.high %v566_v6, %v570_v8  ;;  %v582_v25 = vld [vmem:[%s9818_s7 + $0x810] sm:$0xff] }
 0x29d   : > { %v586_v26 = vld [vmem:[%s9818_s7 + $0x830] sm:$0xff] }
 0x29e   : > { %7141 = vmatpush1.bf16.msra.mxu0 %v8334_v16  ;;  %7182 = vmatpush1.bf16.msra.mxu1 %v8462_v18  ;;  %v574_v16 = vld [vmem:[%s9818_s7 + $0x7d0] sm:$0xff]  ;;  %v8527_v33 = vcombine.high %v582_v25, %v586_v26 }
 0x29f   : > { %7142 = vmatprep.subr.bf16.mxu0 %v8343_v20  ;;  %7183 = vmatprep.subr.bf16.mxu1 %v8471_v22  ;;  %v578_v18 = vld [vmem:[%s9818_s7 + $0x7f0] sm:$0xff]  ;;  %v8382_v20 = vcombine.low %v438_v5, %v442_v58  ;;  %v8510_v22 = vcombine.low %v566_v6, %v570_v8 }
 0x2a0   : > { %v8519_v24 = vcombine.high %v574_v16, %v578_v18  ;;  %v590_v35 = vld [vmem:[%s9818_s7 + $0x850] sm:$0xff] }
 0x2a1   : > { %v594_v36 = vld [vmem:[%s9818_s7 + $0x870] sm:$0xff] }
 0x2a2   : > { %7143 = vmatpush1.bf16.msra.mxu0 %v8342_v27  ;;  %7184 = vmatpush1.bf16.msra.mxu1 %v8470_v28  ;;  %v710_v27 = vld [vmem:[%s9818_s7 + $0xc10] sm:$0xff]  ;;  %v8535_v43 = vcombine.high %v590_v35, %v594_v36 }
 0x2a3   : > { %7144 = vmatprep.subr.bf16.mxu0 %v8351_v30  ;;  %7185 = vmatprep.subr.bf16.mxu1 %v8479_v31  ;;  %v714_v28 = vld [vmem:[%s9818_s7 + $0xc30] sm:$0xff]  ;;  %v8390_v30 = vcombine.low %v446_v13, %v450_v14  ;;  %v8518_v31 = vcombine.low %v574_v16, %v578_v18 }
 0x2a4   : > { %v8655_v34 = vcombine.high %v710_v27, %v714_v28  ;;  %v598_v46 = vld [vmem:[%s9818_s7 + $0x890] sm:$0xff] }
 0x2a5   : > { %v602_v47 = vld [vmem:[%s9818_s7 + $0x8b0] sm:$0xff] }
 0x2a6   : > { %7145 = vmatpush1.bf16.msra.mxu0 %v8350_v38  ;;  %7186 = vmatpush1.bf16.msra.mxu1 %v8478_v39  ;;  %v718_v38 = vld [vmem:[%s9818_s7 + $0xc50] sm:$0xff]  ;;  %v8543_v63 = vcombine.high %v598_v46, %v602_v47 }
 0x2a7   : > { %7146 = vmatprep.subr.bf16.mxu0 %v8359_v40  ;;  %7187 = vmatprep.subr.bf16.mxu1 %v8487_v42  ;;  %v722_v39 = vld [vmem:[%s9818_s7 + $0xc70] sm:$0xff]  ;;  %v8526_v40 = vcombine.low %v582_v25, %v586_v26  ;;  %v8654_v42 = vcombine.low %v710_v27, %v714_v28 }
 0x2a8   : > { %v8663_v44 = vcombine.high %v718_v38, %v722_v39  ;;  %v606_v61 = vld [vmem:[%s9818_s7 + $0x8d0] sm:$0xff] }
 0x2a9   : > { %v610_v0 = vld [vmem:[%s9818_s7 + $0x8f0] sm:$0xff] }
 0x2aa   : > { %7147 = vmatpush1.bf16.msra.mxu0 %v8358_v50  ;;  %7188 = vmatpush1.bf16.msra.mxu1 %v8486_v53  ;;  %v726_v50 = vld [vmem:[%s9818_s7 + $0xc90] sm:$0xff]  ;;  %v8551_v5 = vcombine.high %v606_v61, %v610_v0 }
 0x2ab   : > { %7148 = vmatprep.subr.bf16.mxu0 %v8367_v55  ;;  %7189 = vmatprep.subr.bf16.mxu1 %v8495_v56  ;;  %v730_v53 = vld [vmem:[%s9818_s7 + $0xcb0] sm:$0xff]  ;;  %v8534_v55 = vcombine.low %v590_v35, %v594_v36  ;;  %v8662_v56 = vcombine.low %v718_v38, %v722_v39 }
 0x2ac   : > { %v8671_v54 = vcombine.high %v726_v50, %v730_v53  ;;  %v614_v6 = vld [vmem:[%s9818_s7 + $0x910] sm:$0xff] }
 0x2ad   : > { %v618_v8 = vld [vmem:[%s9818_s7 + $0x930] sm:$0xff] }
 0x2ae   : > { %7149 = vmatpush1.bf16.msra.mxu0 %v8366_v62  ;;  %7190 = vmatpush1.bf16.msra.mxu1 %v8494_v1  ;;  %v734_v62 = vld [vmem:[%s9818_s7 + $0xcd0] sm:$0xff]  ;;  %v8559_v13 = vcombine.high %v614_v6, %v618_v8 }
 0x2af   : > { %7150 = vmatprep.subr.bf16.mxu0 %v8375_v2  ;;  %7191 = vmatprep.subr.bf16.mxu1 %v8503_v4  ;;  %v738_v1 = vld [vmem:[%s9818_s7 + $0xcf0] sm:$0xff]  ;;  %v8542_v2 = vcombine.low %v598_v46, %v602_v47  ;;  %v8670_v4 = vcombine.low %v726_v50, %v730_v53 }
 0x2b0   : > { %v8679_v58 = vcombine.high %v734_v62, %v738_v1  ;;  %v622_v16 = vld [vmem:[%s9818_s7 + $0x950] sm:$0xff] }
 0x2b1   : > { %v626_v18 = vld [vmem:[%s9818_s7 + $0x970] sm:$0xff] }
 0x2b2   : > { %7151 = vmatpush1.bf16.msra.mxu0 %v8374_v9  ;;  %7192 = vmatpush1.bf16.msra.mxu1 %v8502_v10  ;;  %v742_v9 = vld [vmem:[%s9818_s7 + $0xd10] sm:$0xff]  ;;  %v8567_v25 = vcombine.high %v622_v16, %v626_v18 }
 0x2b3   : > { %7152 = vmatprep.subr.bf16.mxu0 %v8383_v11  ;;  %7193 = vmatprep.subr.bf16.mxu1 %v8511_v12  ;;  %v746_v10 = vld [vmem:[%s9818_s7 + $0xd30] sm:$0xff]  ;;  %v8550_v11 = vcombine.low %v606_v61, %v610_v0  ;;  %v8678_v12 = vcombine.low %v734_v62, %v738_v1 }
 0x2b4   : > { %v8687_v14 = vcombine.high %v742_v9, %v746_v10  ;;  %v630_v27 = vld [vmem:[%s9818_s7 + $0x990] sm:$0xff] }
 0x2b5   : > { %v634_v28 = vld [vmem:[%s9818_s7 + $0x9b0] sm:$0xff] }
 0x2b6   : > { %7153 = vmatpush1.bf16.msra.mxu0 %v8382_v20  ;;  %7194 = vmatpush1.bf16.msra.mxu1 %v8510_v22  ;;  %v750_v20 = vld [vmem:[%s9818_s7 + $0xd50] sm:$0xff]  ;;  %v8575_v35 = vcombine.high %v630_v27, %v634_v28 }
 0x2b7   : > { %7154 = vmatprep.subr.bf16.mxu0 %v8391_v23  ;;  %7195 = vmatprep.subr.bf16.mxu1 %v8519_v24  ;;  %v754_v22 = vld [vmem:[%s9818_s7 + $0xd70] sm:$0xff]  ;;  %v8558_v23 = vcombine.low %v614_v6, %v618_v8  ;;  %v8686_v24 = vcombine.low %v742_v9, %v746_v10 }
 0x2b8   : > { %v8695_v26 = vcombine.high %v750_v20, %v754_v22  ;;  %v638_v39 = vld [vmem:[%s9818_s7 + $0x9d0] sm:$0xff] }
 0x2b9   : > { %v766_v46 = vld [vmem:[%s9818_s7 + $0xdd0] sm:$0xff] }
 0x2ba   : > { %7155 = vmatpush1.bf16.msra.mxu0 %v8390_v30  ;;  %7196 = vmatpush1.bf16.msra.mxu1 %v8518_v31  ;;  %v758_v30 = vld [vmem:[%s9818_s7 + $0xd90] sm:$0xff] }
 0x2bb   : > { %7206 = vmatprep.subr.bf16.mxu0 %v8527_v33  ;;  %7247 = vmatprep.subr.bf16.mxu1 %v8655_v34  ;;  %v762_v31 = vld [vmem:[%s9818_s7 + $0xdb0] sm:$0xff]  ;;  %v8566_v33 = vcombine.low %v622_v16, %v626_v18  ;;  %v8694_v34 = vcombine.low %v750_v20, %v754_v22 }
 0x2bc   : > { %v8703_v38 = vcombine.high %v758_v30, %v762_v31  ;;  %v770_v47 = vld [vmem:[%s9818_s7 + $0xdf0] sm:$0xff] }
 0x2bd   : > { %7157 = vmatmul.mubr.bf16.vlgmr.msra.gmra.mrb[32].mxu0 %v9924_v17  ;;  %7198 = vmatmul.mubr.bf16.vlgmr.msra.gmra.mrb[32].mxu1 %v9929_v21  ;;  %v8711_v1 = vcombine.high %v766_v46, %v770_v47  ;;  %v8710_v8 = vcombine.low %v766_v46, %v770_v47  ;;  %v806_v46 = vld [vmem:[%s9818_s7 + $0xf10] sm:$0xff] }
 0x2be   : > { %7207 = vmatpush1.bf16.msra.mxu0 %v8526_v40  ;;  %7248 = vmatpush1.bf16.msra.mxu1 %v8654_v42  ;;  %v642_v40 = vld [vmem:[%s9818_s7 + $0x9f0] sm:$0xff] }
 0x2bf   : > { %7208 = vmatprep.subr.bf16.mxu0 %v8535_v43  ;;  %7249 = vmatprep.subr.bf16.mxu1 %v8663_v44  ;;  %v8583_v0 = vcombine.high %v638_v39, %v642_v40  ;;  %v8582_v6 = vcombine.low %v638_v39, %v642_v40  ;;  %v810_v47 = vld [vmem:[%s9818_s7 + $0xf30] sm:$0xff] }
 0x2c0   : > { %7238 = vmatprep.mubr.bf16.mxu0 %v9934_v29  ;;  %7279 = vmatprep.mubr.bf16.mxu1 %v9939_v32 }
 0x2c2   : > { %7209 = vmatpush1.bf16.msra.mxu0 %v8534_v55  ;;  %7250 = vmatpush1.bf16.msra.mxu1 %v8662_v56  ;;  %v8574_v56 = vcombine.low %v630_v27, %v634_v28 }
 0x2c3   : > { %7210 = vmatprep.subr.bf16.mxu0 %v8543_v63  ;;  %7251 = vmatprep.subr.bf16.mxu1 %v8671_v54 }
 0x2c6   : > { %7211 = vmatpush1.bf16.msra.mxu0 %v8542_v2  ;;  %7252 = vmatpush1.bf16.msra.mxu1 %v8670_v4  ;;  %v646_v2 = vld [vmem:[%s9818_s7 + $0xa10] sm:$0xff] }
 0x2c7   : > { %7212 = vmatprep.subr.bf16.mxu0 %v8551_v5  ;;  %7253 = vmatprep.subr.bf16.mxu1 %v8679_v58  ;;  %v650_v4 = vld [vmem:[%s9818_s7 + $0xa30] sm:$0xff] }
 0x2c8   : > { %v774_v5 = vld [vmem:[%s9818_s7 + $0xe10] sm:$0xff]  ;;  %v8591_v9 = vcombine.high %v646_v2, %v650_v4  ;;  %v8590_v16 = vcombine.low %v646_v2, %v650_v4 }
 0x2c9   : > { %v778_v58 = vld [vmem:[%s9818_s7 + $0xe30] sm:$0xff] }
 0x2ca   : > { %7213 = vmatpush1.bf16.msra.mxu0 %v8550_v11  ;;  %7254 = vmatpush1.bf16.msra.mxu1 %v8678_v12  ;;  %v8719_v10 = vcombine.high %v774_v5, %v778_v58  ;;  %v654_v11 = vld [vmem:[%s9818_s7 + $0xa50] sm:$0xff]  ;;  %v8718_v18 = vcombine.low %v774_v5, %v778_v58 }
 0x2cb   : > { %7214 = vmatprep.subr.bf16.mxu0 %v8559_v13  ;;  %7255 = vmatprep.subr.bf16.mxu1 %v8687_v14  ;;  %v658_v12 = vld [vmem:[%s9818_s7 + $0xa70] sm:$0xff] }
 0x2cc   : > { %v782_v13 = vld [vmem:[%s9818_s7 + $0xe50] sm:$0xff]  ;;  %v8599_v20 = vcombine.high %v654_v11, %v658_v12  ;;  %v8598_v27 = vcombine.low %v654_v11, %v658_v12 }
 0x2cd   : > { %v786_v14 = vld [vmem:[%s9818_s7 + $0xe70] sm:$0xff] }
 0x2ce   : > { %7215 = vmatpush1.bf16.msra.mxu0 %v8558_v23  ;;  %7256 = vmatpush1.bf16.msra.mxu1 %v8686_v24  ;;  %v8727_v22 = vcombine.high %v782_v13, %v786_v14  ;;  %v662_v23 = vld [vmem:[%s9818_s7 + $0xa90] sm:$0xff]  ;;  %v8726_v28 = vcombine.low %v782_v13, %v786_v14 }
 0x2cf   : > { %7216 = vmatprep.subr.bf16.mxu0 %v8567_v25  ;;  %7257 = vmatprep.subr.bf16.mxu1 %v8695_v26  ;;  %v666_v24 = vld [vmem:[%s9818_s7 + $0xab0] sm:$0xff] }
 0x2d0   : > { %v6912_v36 = vpop.f32.mrb[20].mxu0  ;;  %v6953_v43 = vpop.f32.mrb[20].mxu1  ;;  %v790_v25 = vld [vmem:[%s9818_s7 + $0xe90] sm:$0xff] }
 0x2d1   : > { %v6913_v42 = vadd.f32 %v6912_v36, %v10488_v51  ;;  %v6914_v44 = vpop.f32.mrb[21].mxu0  ;;  %v6955_v53 = vpop.f32.mrb[21].mxu1  ;;  %v8702_v51 = vcombine.low %v758_v30, %v762_v31  ;;  %v794_v26 = vld [vmem:[%s9818_s7 + $0xeb0] sm:$0xff]  ;;  %v8607_v30 = vcombine.high %v662_v23, %v666_v24 }
 0x2d2   : > { %v6915_v50 = vadd.f32 %v6914_v44, %v10490_v57  ;;  %v6916_v55 = vpop.f32.mrb[22].mxu0  ;;  %7217 = vmatpush1.bf16.msra.mxu0 %v8566_v33  ;;  %v6957_v54 = vpop.f32.mrb[22].mxu1  ;;  %7258 = vmatpush1.bf16.msra.mxu1 %v8694_v34  ;;  %v8735_v31 = vcombine.high %v790_v25, %v794_v26  ;;  %v670_v33 = vld [vmem:[%s9818_s7 + $0xad0] sm:$0xff]  ;;  %v8734_v39 = vcombine.low %v790_v25, %v794_v26 }
 0x2d3   : > { %v10562_v63 = vadd.f32 %v6953_v43, %v6913_v42  ;;  %v6917_v61 = vpop.f32.mrb[23].mxu0  ;;  %7218 = vmatprep.subr.bf16.mxu0 %v8575_v35  ;;  %v6958_v57 = vpop.f32.mrb[23].mxu1  ;;  %7259 = vmatprep.subr.bf16.mxu1 %v8703_v38  ;;  %v674_v34 = vld [vmem:[%s9818_s7 + $0xaf0] sm:$0xff]  ;;  %v8606_v38 = vcombine.low %v662_v23, %v666_v24 }
 0x2d4   : > { %v10564_v62 = vadd.f32 %v6955_v53, %v6915_v50  ;;  %v798_v35 = vld [vmem:[%s9818_s7 + $0xed0] sm:$0xff]  ;;  %v8615_v40 = vcombine.high %v670_v33, %v674_v34  ;;  %v8614_v50 = vcombine.low %v670_v33, %v674_v34 }
 0x2d5   : > { %v802_v36 = vld [vmem:[%s9818_s7 + $0xef0] sm:$0xff] }
 0x2d6   : > { %7219 = vmatpush1.bf16.msra.mxu0 %v8574_v56  ;;  %7260 = vmatpush1.bf16.msra.mxu1 %v8702_v51  ;;  %v8743_v42 = vcombine.high %v798_v35, %v802_v36  ;;  %v678_v43 = vld [vmem:[%s9818_s7 + $0xb10] sm:$0xff]  ;;  %v8742_v53 = vcombine.low %v798_v35, %v802_v36  ;;  %v8751_v56 = vcombine.high %v806_v46, %v810_v47 }
 0x2d7   : > { %7220 = vmatprep.subr.bf16.mxu0 %v8583_v0  ;;  %7261 = vmatprep.subr.bf16.mxu1 %v8711_v1  ;;  %v682_v44 = vld [vmem:[%s9818_s7 + $0xb30] sm:$0xff]  ;;  %v8750_v1 = vcombine.low %v806_v46, %v810_v47 }
 0x2d8   : > { %v8623_v55 = vcombine.high %v678_v43, %v682_v44  ;;  %v686_v54 = vld [vmem:[%s9818_s7 + $0xb50] sm:$0xff]  ;;  %v8622_v57 = vcombine.low %v678_v43, %v682_v44 }
 0x2d9   : > { %v690_v61 = vld [vmem:[%s9818_s7 + $0xb70] sm:$0xff] }
 0x2da   : > { %7221 = vmatpush1.bf16.msra.mxu0 %v8582_v6  ;;  %7262 = vmatpush1.bf16.msra.mxu1 %v8710_v8  ;;  %v814_v51 = vld [vmem:[%s9818_s7 + $0xf50] sm:$0xff]  ;;  %v8631_v2 = vcombine.high %v686_v54, %v690_v61 }
 0x2db   : > { %7222 = vmatprep.subr.bf16.mxu0 %v8591_v9  ;;  %7263 = vmatprep.subr.bf16.mxu1 %v8719_v10  ;;  %v818_v0 = vld [vmem:[%s9818_s7 + $0xf70] sm:$0xff]  ;;  %v8630_v9 = vcombine.low %v686_v54, %v690_v61 }
 0x2dc   : > { %v8759_v4 = vcombine.high %v814_v51, %v818_v0  ;;  %v694_v5 = vld [vmem:[%s9818_s7 + $0xb90] sm:$0xff]  ;;  %v8758_v10 = vcombine.low %v814_v51, %v818_v0 }
 0x2dd   : > { %v698_v58 = vld [vmem:[%s9818_s7 + $0xbb0] sm:$0xff] }
 0x2de   : > { %7223 = vmatpush1.bf16.msra.mxu0 %v8590_v16  ;;  %7264 = vmatpush1.bf16.msra.mxu1 %v8718_v18  ;;  %v822_v6 = vld [vmem:[%s9818_s7 + $0xf90] sm:$0xff]  ;;  %v8639_v11 = vcombine.high %v694_v5, %v698_v58 }
 0x2df   : > { %7224 = vmatprep.subr.bf16.mxu0 %v8599_v20  ;;  %7265 = vmatprep.subr.bf16.mxu1 %v8727_v22  ;;  %v826_v8 = vld [vmem:[%s9818_s7 + $0xfb0] sm:$0xff]  ;;  %v8638_v20 = vcombine.low %v694_v5, %v698_v58 }
 0x2e0   : > { %v8767_v12 = vcombine.high %v822_v6, %v826_v8  ;;  %v702_v13 = vld [vmem:[%s9818_s7 + $0xbd0] sm:$0xff]  ;;  %v8766_v22 = vcombine.low %v822_v6, %v826_v8 }
 0x2e1   : > { %v706_v14 = vld [vmem:[%s9818_s7 + $0xbf0] sm:$0xff] }
 0x2e2   : > { %7225 = vmatpush1.bf16.msra.mxu0 %v8598_v27  ;;  %7266 = vmatpush1.bf16.msra.mxu1 %v8726_v28  ;;  %v830_v16 = vld [vmem:[%s9818_s7 + $0xfd0] sm:$0xff]  ;;  %v8647_v23 = vcombine.high %v702_v13, %v706_v14 }
 0x2e3   : > { %7226 = vmatprep.subr.bf16.mxu0 %v8607_v30  ;;  %7267 = vmatprep.subr.bf16.mxu1 %v8735_v31  ;;  %v834_v18 = vld [vmem:[%s9818_s7 + $0xff0] sm:$0xff]  ;;  %v8646_v30 = vcombine.low %v702_v13, %v706_v14 }
 0x2e4   : > { %v8775_v24 = vcombine.high %v830_v16, %v834_v18  ;;  %v838_v25 = vld [vmem:[%s9818_s7 + $0x1010] sm:$0xff]  ;;  %v8774_v31 = vcombine.low %v830_v16, %v834_v18 }
 0x2e5   : > { %v842_v26 = vld [vmem:[%s9818_s7 + $0x1030] sm:$0xff] }
 0x2e6   : > { %7227 = vmatpush1.bf16.msra.mxu0 %v8606_v38  ;;  %7268 = vmatpush1.bf16.msra.mxu1 %v8734_v39  ;;  %v966_v27 = vld [vmem:[%s9818_s7 + $0x1410] sm:$0xff]  ;;  %v8783_v33 = vcombine.high %v838_v25, %v842_v26 }
 0x2e7   : > { %7228 = vmatprep.subr.bf16.mxu0 %v8615_v40  ;;  %7269 = vmatprep.subr.bf16.mxu1 %v8743_v42  ;;  %v970_v28 = vld [vmem:[%s9818_s7 + $0x1430] sm:$0xff]  ;;  %v8782_v40 = vcombine.low %v838_v25, %v842_v26 }
 0x2e8   : > { %v8911_v34 = vcombine.high %v966_v27, %v970_v28  ;;  %v846_v35 = vld [vmem:[%s9818_s7 + $0x1050] sm:$0xff]  ;;  %v8910_v42 = vcombine.low %v966_v27, %v970_v28 }
 0x2e9   : > { %v850_v36 = vld [vmem:[%s9818_s7 + $0x1070] sm:$0xff] }
 0x2ea   : > { %7229 = vmatpush1.bf16.msra.mxu0 %v8614_v50  ;;  %7270 = vmatpush1.bf16.msra.mxu1 %v8742_v53  ;;  %v974_v38 = vld [vmem:[%s9818_s7 + $0x1450] sm:$0xff]  ;;  %v8791_v43 = vcombine.high %v846_v35, %v850_v36 }
 0x2eb   : > { %7230 = vmatprep.subr.bf16.mxu0 %v8623_v55  ;;  %7271 = vmatprep.subr.bf16.mxu1 %v8751_v56  ;;  %v978_v39 = vld [vmem:[%s9818_s7 + $0x1470] sm:$0xff]  ;;  %v8790_v55 = vcombine.low %v846_v35, %v850_v36 }
 0x2ec   : > { %v8919_v44 = vcombine.high %v974_v38, %v978_v39  ;;  %v854_v46 = vld [vmem:[%s9818_s7 + $0x1090] sm:$0xff]  ;;  %v8918_v56 = vcombine.low %v974_v38, %v978_v39 }
 0x2ed   : > { %v858_v47 = vld [vmem:[%s9818_s7 + $0x10b0] sm:$0xff] }
 0x2ee   : > { %7231 = vmatpush1.bf16.msra.mxu0 %v8622_v57  ;;  %7272 = vmatpush1.bf16.msra.mxu1 %v8750_v1  ;;  %v982_v50 = vld [vmem:[%s9818_s7 + $0x1490] sm:$0xff]  ;;  %v8799_v54 = vcombine.high %v854_v46, %v858_v47 }
 0x2ef   : > { %7232 = vmatprep.subr.bf16.mxu0 %v8631_v2  ;;  %7273 = vmatprep.subr.bf16.mxu1 %v8759_v4  ;;  %v986_v53 = vld [vmem:[%s9818_s7 + $0x14b0] sm:$0xff]  ;;  %v8798_v2 = vcombine.low %v854_v46, %v858_v47 }
 0x2f0   : > { %v8927_v61 = vcombine.high %v982_v50, %v986_v53  ;;  %v862_v51 = vld [vmem:[%s9818_s7 + $0x10d0] sm:$0xff]  ;;  %v8926_v4 = vcombine.low %v982_v50, %v986_v53 }
 0x2f1   : > { %v866_v0 = vld [vmem:[%s9818_s7 + $0x10f0] sm:$0xff] }
 0x2f2   : > { %7233 = vmatpush1.bf16.msra.mxu0 %v8630_v9  ;;  %7274 = vmatpush1.bf16.msra.mxu1 %v8758_v10  ;;  %v990_v57 = vld [vmem:[%s9818_s7 + $0x14d0] sm:$0xff]  ;;  %v8807_v5 = vcombine.high %v862_v51, %v866_v0 }
 0x2f3   : > { %7234 = vmatprep.subr.bf16.mxu0 %v8639_v11  ;;  %7275 = vmatprep.subr.bf16.mxu1 %v8767_v12  ;;  %v994_v1 = vld [vmem:[%s9818_s7 + $0x14f0] sm:$0xff]  ;;  %v8806_v11 = vcombine.low %v862_v51, %v866_v0 }
 0x2f4   : > { %v8935_v58 = vcombine.high %v990_v57, %v994_v1  ;;  %v870_v6 = vld [vmem:[%s9818_s7 + $0x1110] sm:$0xff]  ;;  %v8934_v12 = vcombine.low %v990_v57, %v994_v1 }
 0x2f5   : > { %v874_v8 = vld [vmem:[%s9818_s7 + $0x1130] sm:$0xff] }
 0x2f6   : > { %7235 = vmatpush1.bf16.msra.mxu0 %v8638_v20  ;;  %7276 = vmatpush1.bf16.msra.mxu1 %v8766_v22  ;;  %v998_v9 = vld [vmem:[%s9818_s7 + $0x1510] sm:$0xff]  ;;  %v8815_v13 = vcombine.high %v870_v6, %v874_v8 }
 0x2f7   : > { %7236 = vmatprep.subr.bf16.mxu0 %v8647_v23  ;;  %7277 = vmatprep.subr.bf16.mxu1 %v8775_v24  ;;  %v1002_v10 = vld [vmem:[%s9818_s7 + $0x1530] sm:$0xff]  ;;  %v8814_v23 = vcombine.low %v870_v6, %v874_v8 }
 0x2f8   : > { %v8943_v14 = vcombine.high %v998_v9, %v1002_v10  ;;  %v878_v16 = vld [vmem:[%s9818_s7 + $0x1150] sm:$0xff]  ;;  %v8942_v24 = vcombine.low %v998_v9, %v1002_v10 }
 0x2f9   : > { %v882_v18 = vld [vmem:[%s9818_s7 + $0x1170] sm:$0xff] }
 0x2fa   : > { %7237 = vmatpush1.bf16.msra.mxu0 %v8646_v30  ;;  %7278 = vmatpush1.bf16.msra.mxu1 %v8774_v31  ;;  %v1006_v20 = vld [vmem:[%s9818_s7 + $0x1550] sm:$0xff]  ;;  %v8823_v25 = vcombine.high %v878_v16, %v882_v18 }
 0x2fb   : > { %7288 = vmatprep.subr.bf16.mxu0 %v8783_v33  ;;  %7329 = vmatprep.subr.bf16.mxu1 %v8911_v34  ;;  %v1010_v22 = vld [vmem:[%s9818_s7 + $0x1570] sm:$0xff]  ;;  %v8822_v33 = vcombine.low %v878_v16, %v882_v18 }
 0x2fc   : > { %v8951_v26 = vcombine.high %v1006_v20, %v1010_v22  ;;  %v886_v27 = vld [vmem:[%s9818_s7 + $0x1190] sm:$0xff]  ;;  %v8950_v34 = vcombine.low %v1006_v20, %v1010_v22 }
 0x2fd   : > { %7239 = vmatmul.mubr.bf16.vlgmr.msra.gmra.mrb[36].mxu0 %v10004_v37  ;;  %7280 = vmatmul.mubr.bf16.vlgmr.msra.gmra.mrb[36].mxu1 %v10009_v41  ;;  %v890_v28 = vld [vmem:[%s9818_s7 + $0x11b0] sm:$0xff] }
 0x2fe   : > { %7289 = vmatpush1.bf16.msra.mxu0 %v8782_v40  ;;  %7330 = vmatpush1.bf16.msra.mxu1 %v8910_v42  ;;  %v1014_v30 = vld [vmem:[%s9818_s7 + $0x1590] sm:$0xff]  ;;  %v8831_v35 = vcombine.high %v886_v27, %v890_v28 }
 0x2ff   : > { %7290 = vmatprep.subr.bf16.mxu0 %v8791_v43  ;;  %7331 = vmatprep.subr.bf16.mxu1 %v8919_v44  ;;  %v1018_v31 = vld [vmem:[%s9818_s7 + $0x15b0] sm:$0xff] }
 0x300   : > { %7320 = vmatprep.mubr.bf16.mxu0 %v10014_v49  ;;  %7361 = vmatprep.mubr.bf16.mxu1 %v10019_v52  ;;  %v8959_v38 = vcombine.high %v1014_v30, %v1018_v31  ;;  %v894_v39 = vld [vmem:[%s9818_s7 + $0x11d0] sm:$0xff] }
 0x301   : > { %v898_v40 = vld [vmem:[%s9818_s7 + $0x11f0] sm:$0xff] }
 0x302   : > { %7291 = vmatpush1.bf16.msra.mxu0 %v8790_v55  ;;  %7332 = vmatpush1.bf16.msra.mxu1 %v8918_v56  ;;  %v1022_v46 = vld [vmem:[%s9818_s7 + $0x15d0] sm:$0xff]  ;;  %v8830_v56 = vcombine.low %v886_v27, %v890_v28  ;;  %v8839_v0 = vcombine.high %v894_v39, %v898_v40  ;;  %v8838_v6 = vcombine.low %v894_v39, %v898_v40 }
 0x303   : > { %7292 = vmatprep.subr.bf16.mxu0 %v8799_v54  ;;  %7333 = vmatprep.subr.bf16.mxu1 %v8927_v61  ;;  %v1026_v47 = vld [vmem:[%s9818_s7 + $0x15f0] sm:$0xff] }
 0x304   : > { %v8967_v1 = vcombine.high %v1022_v46, %v1026_v47  ;;  %v8966_v8 = vcombine.low %v1022_v46, %v1026_v47  ;;  %v1062_v46 = vld [vmem:[%s9818_s7 + $0x1710] sm:$0xff] }
 0x305   : > { %v1066_v47 = vld [vmem:[%s9818_s7 + $0x1730] sm:$0xff] }
 0x306   : > { %7293 = vmatpush1.bf16.msra.mxu0 %v8798_v2  ;;  %7334 = vmatpush1.bf16.msra.mxu1 %v8926_v4  ;;  %v902_v2 = vld [vmem:[%s9818_s7 + $0x1210] sm:$0xff] }
 0x307   : > { %7294 = vmatprep.subr.bf16.mxu0 %v8807_v5  ;;  %7335 = vmatprep.subr.bf16.mxu1 %v8935_v58  ;;  %v906_v4 = vld [vmem:[%s9818_s7 + $0x1230] sm:$0xff] }
 0x308   : > { %v1030_v5 = vld [vmem:[%s9818_s7 + $0x1610] sm:$0xff]  ;;  %v8847_v9 = vcombine.high %v902_v2, %v906_v4  ;;  %v8846_v16 = vcombine.low %v902_v2, %v906_v4 }
 0x309   : > { %v1034_v58 = vld [vmem:[%s9818_s7 + $0x1630] sm:$0xff] }
 0x30a   : > { %7295 = vmatpush1.bf16.msra.mxu0 %v8806_v11  ;;  %7336 = vmatpush1.bf16.msra.mxu1 %v8934_v12  ;;  %v8975_v10 = vcombine.high %v1030_v5, %v1034_v58  ;;  %v910_v11 = vld [vmem:[%s9818_s7 + $0x1250] sm:$0xff]  ;;  %v8974_v18 = vcombine.low %v1030_v5, %v1034_v58 }
 0x30b   : > { %7296 = vmatprep.subr.bf16.mxu0 %v8815_v13  ;;  %7337 = vmatprep.subr.bf16.mxu1 %v8943_v14  ;;  %v914_v12 = vld [vmem:[%s9818_s7 + $0x1270] sm:$0xff] }
 0x30c   : > { %v1038_v13 = vld [vmem:[%s9818_s7 + $0x1650] sm:$0xff]  ;;  %v8855_v20 = vcombine.high %v910_v11, %v914_v12  ;;  %v8854_v27 = vcombine.low %v910_v11, %v914_v12 }
 0x30d   : > { %v1042_v14 = vld [vmem:[%s9818_s7 + $0x1670] sm:$0xff] }
 0x30e   : > { %7297 = vmatpush1.bf16.msra.mxu0 %v8814_v23  ;;  %7338 = vmatpush1.bf16.msra.mxu1 %v8942_v24  ;;  %v8983_v22 = vcombine.high %v1038_v13, %v1042_v14  ;;  %v918_v23 = vld [vmem:[%s9818_s7 + $0x1290] sm:$0xff]  ;;  %v8982_v28 = vcombine.low %v1038_v13, %v1042_v14 }
 0x30f   : > { %7298 = vmatprep.subr.bf16.mxu0 %v8823_v25  ;;  %7339 = vmatprep.subr.bf16.mxu1 %v8951_v26  ;;  %v922_v24 = vld [vmem:[%s9818_s7 + $0x12b0] sm:$0xff] }
 0x310   : > { %v6994_v36 = vpop.f32.mrb[24].mxu0  ;;  %v7035_v43 = vpop.f32.mrb[24].mxu1  ;;  %v1046_v25 = vld [vmem:[%s9818_s7 + $0x1690] sm:$0xff] }
 0x311   : > { %v6995_v42 = vadd.f32 %v6994_v36, %v10562_v63  ;;  %v6996_v44 = vpop.f32.mrb[25].mxu0  ;;  %v7037_v53 = vpop.f32.mrb[25].mxu1  ;;  %v8958_v63 = vcombine.low %v1014_v30, %v1018_v31  ;;  %v1050_v26 = vld [vmem:[%s9818_s7 + $0x16b0] sm:$0xff]  ;;  %v8863_v30 = vcombine.high %v918_v23, %v922_v24 }
 0x312   : > { %v6997_v50 = vadd.f32 %v6996_v44, %v10564_v62  ;;  %v6998_v55 = vpop.f32.mrb[26].mxu0  ;;  %7299 = vmatpush1.bf16.msra.mxu0 %v8822_v33  ;;  %v7039_v61 = vpop.f32.mrb[26].mxu1  ;;  %7340 = vmatpush1.bf16.msra.mxu1 %v8950_v34  ;;  %v8991_v31 = vcombine.high %v1046_v25, %v1050_v26  ;;  %v926_v33 = vld [vmem:[%s9818_s7 + $0x12d0] sm:$0xff]  ;;  %v8990_v39 = vcombine.low %v1046_v25, %v1050_v26 }
 0x313   : > { %v10636_v54 = vadd.f32 %v7035_v43, %v6995_v42  ;;  %v6999_v51 = vpop.f32.mrb[27].mxu0  ;;  %7300 = vmatprep.subr.bf16.mxu0 %v8831_v35  ;;  %v7040_v62 = vpop.f32.mrb[27].mxu1  ;;  %7341 = vmatprep.subr.bf16.mxu1 %v8959_v38  ;;  %v930_v34 = vld [vmem:[%s9818_s7 + $0x12f0] sm:$0xff]  ;;  %v8862_v38 = vcombine.low %v918_v23, %v922_v24 }
 0x314   : > { %v10638_v57 = vadd.f32 %v7037_v53, %v6997_v50  ;;  %v1054_v35 = vld [vmem:[%s9818_s7 + $0x16d0] sm:$0xff]  ;;  %v8871_v40 = vcombine.high %v926_v33, %v930_v34  ;;  %v8870_v50 = vcombine.low %v926_v33, %v930_v34 }
 0x315   : > { %v1058_v36 = vld [vmem:[%s9818_s7 + $0x16f0] sm:$0xff] }
 0x316   : > { %7301 = vmatpush1.bf16.msra.mxu0 %v8830_v56  ;;  %7342 = vmatpush1.bf16.msra.mxu1 %v8958_v63  ;;  %v8999_v42 = vcombine.high %v1054_v35, %v1058_v36  ;;  %v934_v43 = vld [vmem:[%s9818_s7 + $0x1310] sm:$0xff]  ;;  %v8998_v53 = vcombine.low %v1054_v35, %v1058_v36  ;;  %v9007_v56 = vcombine.high %v1062_v46, %v1066_v47 }
 0x317   : > { %7302 = vmatprep.subr.bf16.mxu0 %v8839_v0  ;;  %7343 = vmatprep.subr.bf16.mxu1 %v8967_v1  ;;  %v938_v44 = vld [vmem:[%s9818_s7 + $0x1330] sm:$0xff]  ;;  %v9006_v1 = vcombine.low %v1062_v46, %v1066_v47 }
 0x318   : > { %v8879_v55 = vcombine.high %v934_v43, %v938_v44  ;;  %v942_v61 = vld [vmem:[%s9818_s7 + $0x1350] sm:$0xff]  ;;  %v8878_v62 = vcombine.low %v934_v43, %v938_v44 }
 0x319   : > { %v946_v51 = vld [vmem:[%s9818_s7 + $0x1370] sm:$0xff] }
 0x31a   : > { %7303 = vmatpush1.bf16.msra.mxu0 %v8838_v6  ;;  %7344 = vmatpush1.bf16.msra.mxu1 %v8966_v8  ;;  %v1070_v63 = vld [vmem:[%s9818_s7 + $0x1750] sm:$0xff]  ;;  %v8887_v2 = vcombine.high %v942_v61, %v946_v51 }
 0x31b   : > { %7304 = vmatprep.subr.bf16.mxu0 %v8847_v9  ;;  %7345 = vmatprep.subr.bf16.mxu1 %v8975_v10  ;;  %v1074_v0 = vld [vmem:[%s9818_s7 + $0x1770] sm:$0xff]  ;;  %v8886_v9 = vcombine.low %v942_v61, %v946_v51 }
 0x31c   : > { %v9015_v4 = vcombine.high %v1070_v63, %v1074_v0  ;;  %v950_v5 = vld [vmem:[%s9818_s7 + $0x1390] sm:$0xff]  ;;  %v9014_v10 = vcombine.low %v1070_v63, %v1074_v0 }
 0x31d   : > { %v954_v58 = vld [vmem:[%s9818_s7 + $0x13b0] sm:$0xff] }
 0x31e   : > { %7305 = vmatpush1.bf16.msra.mxu0 %v8846_v16  ;;  %7346 = vmatpush1.bf16.msra.mxu1 %v8974_v18  ;;  %v1078_v6 = vld [vmem:[%s9818_s7 + $0x1790] sm:$0xff]  ;;  %v8895_v11 = vcombine.high %v950_v5, %v954_v58 }
 0x31f   : > { %7306 = vmatprep.subr.bf16.mxu0 %v8855_v20  ;;  %7347 = vmatprep.subr.bf16.mxu1 %v8983_v22  ;;  %v1082_v8 = vld [vmem:[%s9818_s7 + $0x17b0] sm:$0xff]  ;;  %v8894_v20 = vcombine.low %v950_v5, %v954_v58 }
 0x320   : > { %v9023_v12 = vcombine.high %v1078_v6, %v1082_v8  ;;  %v958_v13 = vld [vmem:[%s9818_s7 + $0x13d0] sm:$0xff]  ;;  %v9022_v22 = vcombine.low %v1078_v6, %v1082_v8 }
 0x321   : > { %v962_v14 = vld [vmem:[%s9818_s7 + $0x13f0] sm:$0xff] }
 0x322   : > { %7307 = vmatpush1.bf16.msra.mxu0 %v8854_v27  ;;  %7348 = vmatpush1.bf16.msra.mxu1 %v8982_v28  ;;  %v1086_v16 = vld [vmem:[%s9818_s7 + $0x17d0] sm:$0xff]  ;;  %v8903_v23 = vcombine.high %v958_v13, %v962_v14 }
 0x323   : > { %7308 = vmatprep.subr.bf16.mxu0 %v8863_v30  ;;  %7349 = vmatprep.subr.bf16.mxu1 %v8991_v31  ;;  %v1090_v18 = vld [vmem:[%s9818_s7 + $0x17f0] sm:$0xff]  ;;  %v8902_v30 = vcombine.low %v958_v13, %v962_v14 }
 0x324   : > { %v9031_v24 = vcombine.high %v1086_v16, %v1090_v18  ;;  %v1094_v25 = vld [vmem:[%s9818_s7 + $0x1810] sm:$0xff]  ;;  %v9030_v31 = vcombine.low %v1086_v16, %v1090_v18 }
 0x325   : > { %v1098_v26 = vld [vmem:[%s9818_s7 + $0x1830] sm:$0xff] }
 0x326   : > { %7309 = vmatpush1.bf16.msra.mxu0 %v8862_v38  ;;  %7350 = vmatpush1.bf16.msra.mxu1 %v8990_v39  ;;  %v1222_v27 = vld [vmem:[%s9818_s7 + $0x1c10] sm:$0xff]  ;;  %v9039_v33 = vcombine.high %v1094_v25, %v1098_v26 }
 0x327   : > { %7310 = vmatprep.subr.bf16.mxu0 %v8871_v40  ;;  %7351 = vmatprep.subr.bf16.mxu1 %v8999_v42  ;;  %v1226_v28 = vld [vmem:[%s9818_s7 + $0x1c30] sm:$0xff]  ;;  %v9038_v40 = vcombine.low %v1094_v25, %v1098_v26 }
 0x328   : > { %v9167_v34 = vcombine.high %v1222_v27, %v1226_v28  ;;  %v1102_v35 = vld [vmem:[%s9818_s7 + $0x1850] sm:$0xff]  ;;  %v9166_v42 = vcombine.low %v1222_v27, %v1226_v28 }
 0x329   : > { %v1106_v36 = vld [vmem:[%s9818_s7 + $0x1870] sm:$0xff] }
 0x32a   : > { %7311 = vmatpush1.bf16.msra.mxu0 %v8870_v50  ;;  %7352 = vmatpush1.bf16.msra.mxu1 %v8998_v53  ;;  %v1230_v38 = vld [vmem:[%s9818_s7 + $0x1c50] sm:$0xff]  ;;  %v9047_v43 = vcombine.high %v1102_v35, %v1106_v36 }
 0x32b   : > { %7312 = vmatprep.subr.bf16.mxu0 %v8879_v55  ;;  %7353 = vmatprep.subr.bf16.mxu1 %v9007_v56  ;;  %v1234_v39 = vld [vmem:[%s9818_s7 + $0x1c70] sm:$0xff]  ;;  %v9046_v55 = vcombine.low %v1102_v35, %v1106_v36 }
 0x32c   : > { %v9175_v44 = vcombine.high %v1230_v38, %v1234_v39  ;;  %v1110_v46 = vld [vmem:[%s9818_s7 + $0x1890] sm:$0xff]  ;;  %v9174_v56 = vcombine.low %v1230_v38, %v1234_v39 }
 0x32d   : > { %v1114_v47 = vld [vmem:[%s9818_s7 + $0x18b0] sm:$0xff] }
 0x32e   : > { %7313 = vmatpush1.bf16.msra.mxu0 %v8878_v62  ;;  %7354 = vmatpush1.bf16.msra.mxu1 %v9006_v1  ;;  %v1238_v50 = vld [vmem:[%s9818_s7 + $0x1c90] sm:$0xff]  ;;  %v9055_v61 = vcombine.high %v1110_v46, %v1114_v47 }
 0x32f   : > { %7314 = vmatprep.subr.bf16.mxu0 %v8887_v2  ;;  %7355 = vmatprep.subr.bf16.mxu1 %v9015_v4  ;;  %v1242_v53 = vld [vmem:[%s9818_s7 + $0x1cb0] sm:$0xff]  ;;  %v9054_v2 = vcombine.low %v1110_v46, %v1114_v47 }
 0x330   : > { %v9183_v51 = vcombine.high %v1238_v50, %v1242_v53  ;;  %v1118_v63 = vld [vmem:[%s9818_s7 + $0x18d0] sm:$0xff]  ;;  %v9182_v4 = vcombine.low %v1238_v50, %v1242_v53 }
 0x331   : > { %v1122_v0 = vld [vmem:[%s9818_s7 + $0x18f0] sm:$0xff] }
 0x332   : > { %7315 = vmatpush1.bf16.msra.mxu0 %v8886_v9  ;;  %7356 = vmatpush1.bf16.msra.mxu1 %v9014_v10  ;;  %v1246_v62 = vld [vmem:[%s9818_s7 + $0x1cd0] sm:$0xff]  ;;  %v9063_v5 = vcombine.high %v1118_v63, %v1122_v0 }
 0x333   : > { %7316 = vmatprep.subr.bf16.mxu0 %v8895_v11  ;;  %7357 = vmatprep.subr.bf16.mxu1 %v9023_v12  ;;  %v1250_v1 = vld [vmem:[%s9818_s7 + $0x1cf0] sm:$0xff]  ;;  %v9062_v11 = vcombine.low %v1118_v63, %v1122_v0  ;;  %v319_v63 = vld [vmem:[#allocation2 + $0x18] sm:$0xff] }
 0x334   : > { %v9191_v58 = vcombine.high %v1246_v62, %v1250_v1  ;;  %v1126_v6 = vld [vmem:[%s9818_s7 + $0x1910] sm:$0xff]  ;;  %v9190_v12 = vcombine.low %v1246_v62, %v1250_v1 }
 0x335   : > { %v1130_v8 = vld [vmem:[%s9818_s7 + $0x1930] sm:$0xff] }
 0x336   : > { %7317 = vmatpush1.bf16.msra.mxu0 %v8894_v20  ;;  %7358 = vmatpush1.bf16.msra.mxu1 %v9022_v22  ;;  %v1254_v9 = vld [vmem:[%s9818_s7 + $0x1d10] sm:$0xff]  ;;  %v9071_v13 = vcombine.high %v1126_v6, %v1130_v8 }
 0x337   : > { %7318 = vmatprep.subr.bf16.mxu0 %v8903_v23  ;;  %7359 = vmatprep.subr.bf16.mxu1 %v9031_v24  ;;  %v1258_v10 = vld [vmem:[%s9818_s7 + $0x1d30] sm:$0xff]  ;;  %v9070_v23 = vcombine.low %v1126_v6, %v1130_v8 }
 0x338   : > { %v9199_v14 = vcombine.high %v1254_v9, %v1258_v10  ;;  %v1134_v16 = vld [vmem:[%s9818_s7 + $0x1950] sm:$0xff]  ;;  %v9198_v24 = vcombine.low %v1254_v9, %v1258_v10 }
 0x339   : > { %v1138_v18 = vld [vmem:[%s9818_s7 + $0x1970] sm:$0xff] }
 0x33a   : > { %7319 = vmatpush1.bf16.msra.mxu0 %v8902_v30  ;;  %7360 = vmatpush1.bf16.msra.mxu1 %v9030_v31  ;;  %v1262_v20 = vld [vmem:[%s9818_s7 + $0x1d50] sm:$0xff]  ;;  %v9079_v25 = vcombine.high %v1134_v16, %v1138_v18 }
 0x33b   : > { %7370 = vmatprep.subr.bf16.mxu0 %v9039_v33  ;;  %7411 = vmatprep.subr.bf16.mxu1 %v9167_v34  ;;  %v1266_v22 = vld [vmem:[%s9818_s7 + $0x1d70] sm:$0xff]  ;;  %v9078_v33 = vcombine.low %v1134_v16, %v1138_v18 }
 0x33c   : > { %v9207_v26 = vcombine.high %v1262_v20, %v1266_v22  ;;  %v1142_v27 = vld [vmem:[%s9818_s7 + $0x1990] sm:$0xff]  ;;  %v9206_v34 = vcombine.low %v1262_v20, %v1266_v22 }
 0x33d   : > { %7321 = vmatmul.mubr.bf16.vlgmr.msra.gmra.mrb[40].mxu0 %v10084_v3  ;;  %7362 = vmatmul.mubr.bf16.vlgmr.msra.gmra.mrb[40].mxu1 %v10089_v7  ;;  %v1146_v28 = vld [vmem:[%s9818_s7 + $0x19b0] sm:$0xff] }
 0x33e   : > { %7371 = vmatpush1.bf16.msra.mxu0 %v9038_v40  ;;  %7412 = vmatpush1.bf16.msra.mxu1 %v9166_v42  ;;  %v1270_v30 = vld [vmem:[%s9818_s7 + $0x1d90] sm:$0xff]  ;;  %v9087_v35 = vcombine.high %v1142_v27, %v1146_v28 }
 0x33f   : > { %7372 = vmatprep.subr.bf16.mxu0 %v9047_v43  ;;  %7413 = vmatprep.subr.bf16.mxu1 %v9175_v44  ;;  %v1274_v31 = vld [vmem:[%s9818_s7 + $0x1db0] sm:$0xff] }
 0x340   : > { %7402 = vmatprep.mubr.bf16.mxu0 %v10094_v15  ;;  %7443 = vmatprep.mubr.bf16.mxu1 %v10099_v19  ;;  %v9215_v38 = vcombine.high %v1270_v30, %v1274_v31  ;;  %v1150_v39 = vld [vmem:[%s9818_s7 + $0x19d0] sm:$0xff]  ;;  %v9214_v62 = vcombine.low %v1270_v30, %v1274_v31 }
 0x341   : > { %v1154_v40 = vld [vmem:[%s9818_s7 + $0x19f0] sm:$0xff] }
 0x342   : > { %7373 = vmatpush1.bf16.msra.mxu0 %v9046_v55  ;;  %7414 = vmatpush1.bf16.msra.mxu1 %v9174_v56  ;;  %v1278_v46 = vld [vmem:[%s9818_s7 + $0x1dd0] sm:$0xff]  ;;  %v9095_v1 = vcombine.high %v1150_v39, %v1154_v40 }
 0x343   : > { %7374 = vmatprep.subr.bf16.mxu0 %v9055_v61  ;;  %7415 = vmatprep.subr.bf16.mxu1 %v9183_v51  ;;  %v1282_v47 = vld [vmem:[%s9818_s7 + $0x1df0] sm:$0xff]  ;;  %v9086_v61 = vcombine.low %v1142_v27, %v1146_v28 }
 0x344   : > { %v318_v50 = vld [vmem:[#allocation2 + $0x10] sm:$0xff] }
 0x345   : > { %v1286_v8 = vld [vmem:[%s9818_s7 + $0x1e10] sm:$0xff] }
 0x346   : > { %7375 = vmatpush1.bf16.msra.mxu0 %v9054_v2  ;;  %7416 = vmatpush1.bf16.msra.mxu1 %v9182_v4  ;;  %v1290_v9 = vld [vmem:[%s9818_s7 + $0x1e30] sm:$0xff] }
 0x347   : > { %7376 = vmatprep.subr.bf16.mxu0 %v9063_v5  ;;  %7417 = vmatprep.subr.bf16.mxu1 %v9191_v58  ;;  %v1158_v5 = vld [vmem:[%s9818_s7 + $0x1a10] sm:$0xff] }
 0x348   : > { %v1162_v58 = vld [vmem:[%s9818_s7 + $0x1a30] sm:$0xff] }
 0x349   : > { %v1166_v16 = vld [vmem:[%s9818_s7 + $0x1a50] sm:$0xff] }
 0x34a   : > { %7377 = vmatpush1.bf16.msra.mxu0 %v9062_v11  ;;  %7418 = vmatpush1.bf16.msra.mxu1 %v9190_v12  ;;  %v9094_v11 = vcombine.low %v1150_v39, %v1154_v40  ;;  %v9222_v12 = vcombine.low %v1278_v46, %v1282_v47  ;;  %v1170_v18 = vld [vmem:[%s9818_s7 + $0x1a70] sm:$0xff] }
 0x34b   : > { %7378 = vmatprep.subr.bf16.mxu0 %v9071_v13  ;;  %7419 = vmatprep.subr.bf16.mxu1 %v9199_v14  ;;  %v9103_v13 = vcombine.high %v1158_v5, %v1162_v58  ;;  %v9231_v14 = vcombine.high %v1286_v8, %v1290_v9  ;;  %v1294_v20 = vld [vmem:[%s9818_s7 + $0x1e50] sm:$0xff] }
 0x34c   : > { %v1298_v22 = vld [vmem:[%s9818_s7 + $0x1e70] sm:$0xff] }
 0x34d   : > { %v1174_v27 = vld [vmem:[%s9818_s7 + $0x1a90] sm:$0xff] }
 0x34e   : > { %7379 = vmatpush1.bf16.msra.mxu0 %v9070_v23  ;;  %7420 = vmatpush1.bf16.msra.mxu1 %v9198_v24  ;;  %v9102_v23 = vcombine.low %v1158_v5, %v1162_v58  ;;  %v9230_v24 = vcombine.low %v1286_v8, %v1290_v9  ;;  %v1178_v28 = vld [vmem:[%s9818_s7 + $0x1ab0] sm:$0xff] }
 0x34f   : > { %7380 = vmatprep.subr.bf16.mxu0 %v9079_v25  ;;  %7421 = vmatprep.subr.bf16.mxu1 %v9207_v26  ;;  %v9111_v25 = vcombine.high %v1166_v16, %v1170_v18  ;;  %v9239_v26 = vcombine.high %v1294_v20, %v1298_v22  ;;  %v1302_v30 = vld [vmem:[%s9818_s7 + $0x1e90] sm:$0xff] }
 0x350   : > { %v7076_v36 = vpop.f32.mrb[28].mxu0  ;;  %v7117_v43 = vpop.f32.mrb[28].mxu1  ;;  %v1306_v31 = vld [vmem:[%s9818_s7 + $0x1eb0] sm:$0xff] }
 0x351   : > { %v7077_v42 = vadd.f32 %v7076_v36, %v10636_v54  ;;  %v7078_v44 = vpop.f32.mrb[29].mxu0  ;;  %v7119_v55 = vpop.f32.mrb[29].mxu1  ;;  %v9247_v36 = vcombine.high %v1302_v30, %v1306_v31  ;;  %v1186_v39 = vld [vmem:[%s9818_s7 + $0x1af0] sm:$0xff] }
 0x352   : > { %v7079_v53 = vadd.f32 %v7078_v44, %v10638_v57  ;;  %v7080_v56 = vpop.f32.mrb[30].mxu0  ;;  %7381 = vmatpush1.bf16.msra.mxu0 %v9078_v33  ;;  %v7121_v0 = vpop.f32.mrb[30].mxu1  ;;  %7422 = vmatpush1.bf16.msra.mxu1 %v9206_v34  ;;  %v9223_v57 = vcombine.high %v1278_v46, %v1282_v47  ;;  %v9110_v33 = vcombine.low %v1166_v16, %v1170_v18  ;;  %v1310_v40 = vld [vmem:[%s9818_s7 + $0x1ed0] sm:$0xff] }
 0x353   : > { %v7118_v51 = vadd.f32 %v7117_v43, %v7077_v42  ;;  %v7081_v54 = vpop.f32.mrb[31].mxu0  ;;  %7382 = vmatprep.subr.bf16.mxu0 %v9087_v35  ;;  %v7122_v4 = vpop.f32.mrb[31].mxu1  ;;  %7423 = vmatprep.subr.bf16.mxu1 %v9215_v38  ;;  %v9238_v34 = vcombine.low %v1294_v20, %v1298_v22  ;;  %v9119_v35 = vcombine.high %v1174_v27, %v1178_v28  ;;  %v1182_v38 = vld [vmem:[%s9818_s7 + $0x1ad0] sm:$0xff] }
 0x354   : > { %v7120_v2 = vadd.f32 %v7119_v55, %v7079_v53  ;;  %v1314_v42 = vld [vmem:[%s9818_s7 + $0x1ef0] sm:$0xff]  ;;  %v9118_v43 = vcombine.low %v1174_v27, %v1178_v28  ;;  %v9246_v44 = vcombine.low %v1302_v30, %v1306_v31  ;;  %v9127_v46 = vcombine.high %v1182_v38, %v1186_v39  ;;  %v327_v27 = vld [vmem:[%s9818_s7 + $0x18] sm:$0xff] }
 0x355   : > { %v7782_v6 = vadd.f32 %v7118_v51, %v318_v50  ;;  %v9255_v47 = vcombine.high %v1310_v40, %v1314_v42  ;;  %v1190_v50 = vld [vmem:[%s9818_s7 + $0x1b10] sm:$0xff]  ;;  %v9254_v51 = vcombine.low %v1310_v40, %v1314_v42  ;;  %v331_v28 = vld [vmem:[%s9818_s7 + $0x38] sm:$0xff] }
 0x356   : > { %v7783_v10 = vadd.f32 %v7120_v2, %v319_v63  ;;  %7383 = vmatpush1.bf16.msra.mxu0 %v9086_v61  ;;  %7424 = vmatpush1.bf16.msra.mxu1 %v9214_v62  ;;  %v1194_v53 = vld [vmem:[%s9818_s7 + $0x1b30] sm:$0xff]  ;;  %v9126_v61 = vcombine.low %v1182_v38, %v1186_v39  ;;  %v455_v30 = vld [vmem:[%s9818_s7 + $0x418] sm:$0xff] }
 0x357   : > { %7790 = vst [vmem:[#allocation2 + $0x10] sm:$0xff] %v7782_v6  ;;  %7384 = vmatprep.subr.bf16.mxu0 %v9095_v1  ;;  %7425 = vmatprep.subr.bf16.mxu1 %v9223_v57  ;;  %v1318_v55 = vld [vmem:[%s9818_s7 + $0x1f10] sm:$0xff]  ;;  %v9135_v63 = vcombine.high %v1190_v50, %v1194_v53  ;;  %v9134_v4 = vcombine.low %v1190_v50, %v1194_v53  ;;  %v459_v31 = vld [vmem:[%s9818_s7 + $0x438] sm:$0xff] }
 0x358   : > { %7791 = vst [vmem:[#allocation2 + $0x18] sm:$0xff] %v7783_v10  ;;  %v1322_v56 = vld [vmem:[%s9818_s7 + $0x1f30] sm:$0xff]  ;;  %v335_v38 = vld [vmem:[%s9818_s7 + $0x58] sm:$0xff] }
 0x359   : > { %v9263_v0 = vcombine.high %v1318_v55, %v1322_v56  ;;  %v1198_v54 = vld [vmem:[%s9818_s7 + $0x1b50] sm:$0xff]  ;;  %v9262_v57 = vcombine.low %v1318_v55, %v1322_v56  ;;  %v339_v39 = vld [vmem:[%s9818_s7 + $0x78] sm:$0xff] }
 0x35a   : > { %7385 = vmatpush1.bf16.msra.mxu0 %v9094_v11  ;;  %7426 = vmatpush1.bf16.msra.mxu1 %v9222_v12  ;;  %v1202_v62 = vld [vmem:[%s9818_s7 + $0x1b70] sm:$0xff]  ;;  %v463_v40 = vld [vmem:[%s9818_s7 + $0x458] sm:$0xff] }
 0x35b   : > { %7386 = vmatprep.subr.bf16.mxu0 %v9103_v13  ;;  %7427 = vmatprep.subr.bf16.mxu1 %v9231_v14  ;;  %v1326_v1 = vld [vmem:[%s9818_s7 + $0x1f50] sm:$0xff]  ;;  %v9143_v5 = vcombine.high %v1198_v54, %v1202_v62  ;;  %v9142_v11 = vcombine.low %v1198_v54, %v1202_v62  ;;  %v467_v42 = vld [vmem:[%s9818_s7 + $0x478] sm:$0xff] }
 0x35c   : > { %v1330_v2 = vld [vmem:[%s9818_s7 + $0x1f70] sm:$0xff]  ;;  %v343_v50 = vld [vmem:[%s9818_s7 + $0x98] sm:$0xff] }
 0x35d   : > { %v9271_v58 = vcombine.high %v1326_v1, %v1330_v2  ;;  %v1206_v6 = vld [vmem:[%s9818_s7 + $0x1b90] sm:$0xff]  ;;  %v9270_v12 = vcombine.low %v1326_v1, %v1330_v2  ;;  %v347_v53 = vld [vmem:[%s9818_s7 + $0xb8] sm:$0xff] }
 0x35e   : > { %7387 = vmatpush1.bf16.msra.mxu0 %v9102_v23  ;;  %7428 = vmatpush1.bf16.msra.mxu1 %v9230_v24  ;;  %v1210_v8 = vld [vmem:[%s9818_s7 + $0x1bb0] sm:$0xff]  ;;  %v471_v55 = vld [vmem:[%s9818_s7 + $0x498] sm:$0xff] }
 0x35f   : > { %7388 = vmatprep.subr.bf16.mxu0 %v9111_v25  ;;  %7429 = vmatprep.subr.bf16.mxu1 %v9239_v26  ;;  %v1334_v9 = vld [vmem:[%s9818_s7 + $0x1f90] sm:$0xff]  ;;  %v9151_v13 = vcombine.high %v1206_v6, %v1210_v8  ;;  %v9150_v23 = vcombine.low %v1206_v6, %v1210_v8  ;;  %v475_v56 = vld [vmem:[%s9818_s7 + $0x4b8] sm:$0xff] }
 0x360   : > { %v1338_v10 = vld [vmem:[%s9818_s7 + $0x1fb0] sm:$0xff]  ;;  %v351_v54 = vld [vmem:[%s9818_s7 + $0xd8] sm:$0xff] }
 0x361   : > { %v9279_v14 = vcombine.high %v1334_v9, %v1338_v10  ;;  %v1214_v16 = vld [vmem:[%s9818_s7 + $0x1bd0] sm:$0xff]  ;;  %v9278_v24 = vcombine.low %v1334_v9, %v1338_v10  ;;  %v355_v62 = vld [vmem:[%s9818_s7 + $0xf8] sm:$0xff] }
 0x362   : > { %7389 = vmatpush1.bf16.msra.mxu0 %v9110_v33  ;;  %7430 = vmatpush1.bf16.msra.mxu1 %v9238_v34  ;;  %v1218_v18 = vld [vmem:[%s9818_s7 + $0x1bf0] sm:$0xff]  ;;  %v479_v1 = vld [vmem:[%s9818_s7 + $0x4d8] sm:$0xff]  ;;  %v8296_v10 = vcombine.low %v351_v54, %v355_v62 }
 0x363   : > { %7390 = vmatprep.subr.bf16.mxu0 %v9119_v35  ;;  %7431 = vmatprep.subr.bf16.mxu1 %v9247_v36  ;;  %v1342_v20 = vld [vmem:[%s9818_s7 + $0x1fd0] sm:$0xff]  ;;  %v9159_v25 = vcombine.high %v1214_v16, %v1218_v18  ;;  %v9158_v33 = vcombine.low %v1214_v16, %v1218_v18  ;;  %v8273_v35 = vcombine.high %v327_v27, %v331_v28  ;;  %v483_v2 = vld [vmem:[%s9818_s7 + $0x4f8] sm:$0xff] }
 0x364   : > { %v1346_v22 = vld [vmem:[%s9818_s7 + $0x1ff0] sm:$0xff]  ;;  %v8401_v36 = vcombine.high %v455_v30, %v459_v31  ;;  %v359_v6 = vld [vmem:[%s9818_s7 + $0x118] sm:$0xff] }
 0x365   : > { %v9287_v26 = vcombine.high %v1342_v20, %v1346_v22  ;;  %v9286_v34 = vcombine.low %v1342_v20, %v1346_v22  ;;  %v363_v8 = vld [vmem:[%s9818_s7 + $0x138] sm:$0xff] }
 0x366   : > { %7391 = vmatpush1.bf16.msra.mxu0 %v9118_v43  ;;  %7432 = vmatpush1.bf16.msra.mxu1 %v9246_v44  ;;  %v8272_v43 = vcombine.low %v327_v27, %v331_v28  ;;  %v8400_v44 = vcombine.low %v455_v30, %v459_v31  ;;  %v487_v9 = vld [vmem:[%s9818_s7 + $0x518] sm:$0xff]  ;;  %v8304_v20 = vcombine.low %v359_v6, %v363_v8 }
 0x367   : > { %7392 = vmatprep.subr.bf16.mxu0 %v9127_v46  ;;  %7433 = vmatprep.subr.bf16.mxu1 %v9255_v47  ;;  %v8281_v46 = vcombine.high %v335_v38, %v339_v39  ;;  %v8409_v47 = vcombine.high %v463_v40, %v467_v42  ;;  %v495_v16 = vld [vmem:[%s9818_s7 + $0x558] sm:$0xff] }
 0x368   : > { %v499_v18 = vld [vmem:[%s9818_s7 + $0x578] sm:$0xff] }
 0x369   : > { %v503_v27 = vld [vmem:[%s9818_s7 + $0x598] sm:$0xff]  ;;  %v8440_v31 = vcombine.low %v495_v16, %v499_v18 }
 0x36a   : > { %7393 = vmatpush1.bf16.msra.mxu0 %v9126_v61  ;;  %7434 = vmatpush1.bf16.msra.mxu1 %v9254_v51  ;;  %v8280_v61 = vcombine.low %v335_v38, %v339_v39  ;;  %v8408_v51 = vcombine.low %v463_v40, %v467_v42  ;;  %v507_v28 = vld [vmem:[%s9818_s7 + $0x5b8] sm:$0xff] }
 0x36b   : > { %7394 = vmatprep.subr.bf16.mxu0 %v9135_v63  ;;  %7435 = vmatprep.subr.bf16.mxu1 %v9263_v0  ;;  %v8289_v63 = vcombine.high %v343_v50, %v347_v53  ;;  %v8417_v0 = vcombine.high %v471_v55, %v475_v56  ;;  %v387_v38 = vld [vmem:[%s9818_s7 + $0x1f8] sm:$0xff] }
 0x36c   : > { %v511_v42 = vld [vmem:[%s9818_s7 + $0x5d8] sm:$0xff] }
 0x36e   : > { %7395 = vmatpush1.bf16.msra.mxu0 %v9134_v4  ;;  %7436 = vmatpush1.bf16.msra.mxu1 %v9262_v57  ;;  %v8288_v4 = vcombine.low %v343_v50, %v347_v53  ;;  %v8416_v57 = vcombine.low %v471_v55, %v475_v56 }
 0x36f   : > { %7396 = vmatprep.subr.bf16.mxu0 %v9143_v5  ;;  %7437 = vmatprep.subr.bf16.mxu1 %v9271_v58  ;;  %v8297_v5 = vcombine.high %v351_v54, %v355_v62  ;;  %v8425_v58 = vcombine.high %v479_v1, %v483_v2  ;;  %v391_v54 = vld [vmem:[%s9818_s7 + $0x218] sm:$0xff] }
 0x370   : > { %v395_v62 = vld [vmem:[%s9818_s7 + $0x238] sm:$0xff] }
 0x372   : > { %7397 = vmatpush1.bf16.msra.mxu0 %v9142_v11  ;;  %7438 = vmatpush1.bf16.msra.mxu1 %v9270_v12  ;;  %v8305_v11 = vcombine.high %v359_v6, %v363_v8  ;;  %v399_v6 = vld [vmem:[%s9818_s7 + $0x258] sm:$0xff] }
 0x373   : > { %7398 = vmatprep.subr.bf16.mxu0 %v9151_v13  ;;  %7439 = vmatprep.subr.bf16.mxu1 %v9279_v14  ;;  %v367_v13 = vld [vmem:[%s9818_s7 + $0x158] sm:$0xff] }
 0x374   : > { %v371_v14 = vld [vmem:[%s9818_s7 + $0x178] sm:$0xff] }
 0x375   : > { %v8312_v30 = vcombine.low %v367_v13, %v371_v14  ;;  %v403_v8 = vld [vmem:[%s9818_s7 + $0x278] sm:$0xff] }
 0x376   : > { %7399 = vmatpush1.bf16.msra.mxu0 %v9150_v23  ;;  %7440 = vmatpush1.bf16.msra.mxu1 %v9278_v24  ;;  %v8313_v23 = vcombine.high %v367_v13, %v371_v14  ;;  %v8441_v24 = vcombine.high %v495_v16, %v499_v18  ;;  %v407_v13 = vld [vmem:[%s9818_s7 + $0x298] sm:$0xff] }
 0x377   : > { %7400 = vmatprep.subr.bf16.mxu0 %v9159_v25  ;;  %7441 = vmatprep.subr.bf16.mxu1 %v9287_v26  ;;  %v375_v25 = vld [vmem:[%s9818_s7 + $0x198] sm:$0xff] }
 0x378   : > { %v379_v26 = vld [vmem:[%s9818_s7 + $0x1b8] sm:$0xff] }
 0x379   : > { %v8320_v50 = vcombine.low %v375_v25, %v379_v26  ;;  %v411_v14 = vld [vmem:[%s9818_s7 + $0x2b8] sm:$0xff] }
 0x37a   : > { %7401 = vmatpush1.bf16.msra.mxu0 %v9158_v33  ;;  %7442 = vmatpush1.bf16.msra.mxu1 %v9286_v34  ;;  %v8321_v33 = vcombine.high %v375_v25, %v379_v26  ;;  %v535_v16 = vld [vmem:[%s9818_s7 + $0x698] sm:$0xff] }
 0x37b   : > { %7452 = vmatprep.subr.bf16.mxu0 %v8273_v35  ;;  %7493 = vmatprep.subr.bf16.mxu1 %v8401_v36  ;;  %v8449_v35 = vcombine.high %v503_v27, %v507_v28  ;;  %v383_v36 = vld [vmem:[%s9818_s7 + $0x1d8] sm:$0xff] }
 0x37c   : > { %v539_v18 = vld [vmem:[%s9818_s7 + $0x6b8] sm:$0xff] }
 0x37d   : > { %7403 = vmatmul.mubr.bf16.vlgmr.msra.gmra.mrb[44].mxu0 %v10164_v45  ;;  %7444 = vmatmul.mubr.bf16.vlgmr.msra.gmra.mrb[44].mxu1 %v10168_v48  ;;  %v415_v25 = vld [vmem:[%s9818_s7 + $0x2d8] sm:$0xff] }
 0x37e   : > { %7453 = vmatpush1.bf16.msra.mxu0 %v8272_v43  ;;  %7494 = vmatpush1.bf16.msra.mxu1 %v8400_v44  ;;  %v515_v43 = vld [vmem:[%s9818_s7 + $0x5f8] sm:$0xff] }
 0x37f   : > { %7454 = vmatprep.subr.bf16.mxu0 %v8281_v46  ;;  %7495 = vmatprep.subr.bf16.mxu1 %v8409_v47  ;;  %v419_v26 = vld [vmem:[%s9818_s7 + $0x2f8] sm:$0xff] }
 0x380   : > { %7484 = vmatprep.mubr.bf16.mxu0 %v9876_v59  ;;  %7525 = vmatprep.mubr.bf16.mxu1 %v9878_v60  ;;  %v491_v59 = vld [vmem:[%s9818_s7 + $0x538] sm:$0xff]  ;;  %v8424_v60 = vcombine.low %v479_v1, %v483_v2 }
 0x381   : > { %v8433_v12 = vcombine.high %v487_v9, %v491_v59  ;;  %v8432_v22 = vcombine.low %v487_v9, %v491_v59  ;;  %v519_v1 = vld [vmem:[%s9818_s7 + $0x618] sm:$0xff] }
 0x382   : > { %7455 = vmatpush1.bf16.msra.mxu0 %v8280_v61  ;;  %7496 = vmatpush1.bf16.msra.mxu1 %v8408_v51  ;;  %v8448_v61 = vcombine.low %v503_v27, %v507_v28  ;;  %v8329_v51 = vcombine.high %v383_v36, %v387_v38  ;;  %v523_v2 = vld [vmem:[%s9818_s7 + $0x638] sm:$0xff] }
 0x383   : > { %7456 = vmatprep.subr.bf16.mxu0 %v8289_v63  ;;  %7497 = vmatprep.subr.bf16.mxu1 %v8417_v0  ;;  %v8457_v0 = vcombine.high %v511_v42, %v515_v43  ;;  %v527_v9 = vld [vmem:[%s9818_s7 + $0x658] sm:$0xff] }
 0x384   : > { %v531_v59 = vld [vmem:[%s9818_s7 + $0x678] sm:$0xff] }
 0x385   : > { %v543_v27 = vld [vmem:[%s9818_s7 + $0x6d8] sm:$0xff] }
 0x386   : > { %7457 = vmatpush1.bf16.msra.mxu0 %v8288_v4  ;;  %7498 = vmatpush1.bf16.msra.mxu1 %v8416_v57  ;;  %v8328_v4 = vcombine.low %v383_v36, %v387_v38  ;;  %v8456_v57 = vcombine.low %v511_v42, %v515_v43  ;;  %v547_v28 = vld [vmem:[%s9818_s7 + $0x6f8] sm:$0xff] }
 0x387   : > { %7458 = vmatprep.subr.bf16.mxu0 %v8297_v5  ;;  %7499 = vmatprep.subr.bf16.mxu1 %v8425_v58  ;;  %v8337_v5 = vcombine.high %v391_v54, %v395_v62  ;;  %v8465_v58 = vcombine.high %v519_v1, %v523_v2  ;;  %v427_v36 = vld [vmem:[%s9818_s7 + $0x338] sm:$0xff]  ;;  %v8488_v42 = vcombine.low %v543_v27, %v547_v28 }
 0x388   : > { %v551_v38 = vld [vmem:[%s9818_s7 + $0x718] sm:$0xff] }
 0x38a   : > { %7459 = vmatpush1.bf16.msra.mxu0 %v8296_v10  ;;  %7500 = vmatpush1.bf16.msra.mxu1 %v8424_v60  ;;  %v8336_v10 = vcombine.low %v391_v54, %v395_v62  ;;  %v8464_v60 = vcombine.low %v519_v1, %v523_v2  ;;  %v439_v54 = vld [vmem:[%s9818_s7 + $0x398] sm:$0xff] }
 0x38b   : > { %7460 = vmatprep.subr.bf16.mxu0 %v8305_v11  ;;  %7501 = vmatprep.subr.bf16.mxu1 %v8433_v12  ;;  %v8345_v11 = vcombine.high %v399_v6, %v403_v8  ;;  %v8473_v12 = vcombine.high %v527_v9, %v531_v59  ;;  %v443_v62 = vld [vmem:[%s9818_s7 + $0x3b8] sm:$0xff] }
 0x38c   : > { %v567_v1 = vld [vmem:[%s9818_s7 + $0x798] sm:$0xff] }
 0x38d   : > { %v571_v2 = vld [vmem:[%s9818_s7 + $0x7b8] sm:$0xff] }
 0x38e   : > { %7461 = vmatpush1.bf16.msra.mxu0 %v8304_v20  ;;  %7502 = vmatpush1.bf16.msra.mxu1 %v8432_v22  ;;  %v8344_v20 = vcombine.low %v399_v6, %v403_v8  ;;  %v8472_v22 = vcombine.low %v527_v9, %v531_v59  ;;  %v447_v6 = vld [vmem:[%s9818_s7 + $0x3d8] sm:$0xff] }
 0x38f   : > { %7462 = vmatprep.subr.bf16.mxu0 %v8313_v23  ;;  %7503 = vmatprep.subr.bf16.mxu1 %v8441_v24  ;;  %v8353_v23 = vcombine.high %v407_v13, %v411_v14  ;;  %v8481_v24 = vcombine.high %v535_v16, %v539_v18  ;;  %v451_v8 = vld [vmem:[%s9818_s7 + $0x3f8] sm:$0xff] }
 0x390   : > { %v7158_v34 = vpop.f32.mrb[32].mxu0  ;;  %v7199_v39 = vpop.f32.mrb[32].mxu1  ;;  %v575_v9 = vld [vmem:[%s9818_s7 + $0x7d8] sm:$0xff] }
 0x391   : > { %v7160_v40 = vpop.f32.mrb[33].mxu0  ;;  %v10778_v44 = vadd.f32 %v7199_v39, %v7158_v34  ;;  %v7201_v46 = vpop.f32.mrb[33].mxu1  ;;  %v8489_v34 = vcombine.high %v543_v27, %v547_v28  ;;  %v555_v39 = vld [vmem:[%s9818_s7 + $0x738] sm:$0xff] }
 0x392   : > { %v7162_v47 = vpop.f32.mrb[34].mxu0  ;;  %7463 = vmatpush1.bf16.msra.mxu0 %v8312_v30  ;;  %v10780_v53 = vadd.f32 %v7201_v46, %v7160_v40  ;;  %v7203_v55 = vpop.f32.mrb[34].mxu1  ;;  %7504 = vmatpush1.bf16.msra.mxu1 %v8440_v31  ;;  %v8352_v30 = vcombine.low %v407_v13, %v411_v14  ;;  %v8480_v31 = vcombine.low %v535_v16, %v539_v18  ;;  %v579_v59 = vld [vmem:[%s9818_s7 + $0x7f8] sm:$0xff] }
 0x393   : > { %v7163_v56 = vpop.f32.mrb[35].mxu0  ;;  %7464 = vmatprep.subr.bf16.mxu0 %v8321_v33  ;;  %v7204_v63 = vpop.f32.mrb[35].mxu1  ;;  %7505 = vmatprep.subr.bf16.mxu1 %v8449_v35  ;;  %v8361_v33 = vcombine.high %v415_v25, %v419_v26  ;;  %v423_v35 = vld [vmem:[%s9818_s7 + $0x318] sm:$0xff]  ;;  %v8360_v40 = vcombine.low %v415_v25, %v419_v26  ;;  %v8497_v46 = vcombine.high %v551_v38, %v555_v39 }
 0x394   : > { %v8369_v43 = vcombine.high %v423_v35, %v427_v36  ;;  %v431_v47 = vld [vmem:[%s9818_s7 + $0x358] sm:$0xff] }
 0x395   : > { %v559_v55 = vld [vmem:[%s9818_s7 + $0x758] sm:$0xff] }
 0x396   : > { %7465 = vmatpush1.bf16.msra.mxu0 %v8320_v50  ;;  %7506 = vmatpush1.bf16.msra.mxu1 %v8448_v61  ;;  %v435_v50 = vld [vmem:[%s9818_s7 + $0x378] sm:$0xff]  ;;  %v8368_v61 = vcombine.low %v423_v35, %v427_v36 }
 0x397   : > { %7466 = vmatprep.subr.bf16.mxu0 %v8329_v51  ;;  %7507 = vmatprep.subr.bf16.mxu1 %v8457_v0  ;;  %v563_v56 = vld [vmem:[%s9818_s7 + $0x778] sm:$0xff]  ;;  %v8496_v51 = vcombine.low %v551_v38, %v555_v39  ;;  %v8377_v63 = vcombine.high %v431_v47, %v435_v50 }
 0x398   : > { %v8505_v0 = vcombine.high %v559_v55, %v563_v56  ;;  %v583_v13 = vld [vmem:[%s9818_s7 + $0x818] sm:$0xff] }
 0x399   : > { %v587_v14 = vld [vmem:[%s9818_s7 + $0x838] sm:$0xff] }
 0x39a   : > { %7467 = vmatpush1.bf16.msra.mxu0 %v8328_v4  ;;  %7508 = vmatpush1.bf16.msra.mxu1 %v8456_v57  ;;  %v8376_v4 = vcombine.low %v431_v47, %v435_v50  ;;  %v8504_v57 = vcombine.low %v559_v55, %v563_v56  ;;  %v711_v16 = vld [vmem:[%s9818_s7 + $0xc18] sm:$0xff] }
 0x39b   : > { %7468 = vmatprep.subr.bf16.mxu0 %v8337_v5  ;;  %7509 = vmatprep.subr.bf16.mxu1 %v8465_v58  ;;  %v8385_v5 = vcombine.high %v439_v54, %v443_v62  ;;  %v8513_v58 = vcombine.high %v567_v1, %v571_v2  ;;  %v715_v18 = vld [vmem:[%s9818_s7 + $0xc38] sm:$0xff] }
 0x39c   : > { %v591_v25 = vld [vmem:[%s9818_s7 + $0x858] sm:$0xff] }
 0x39d   : > { %v595_v26 = vld [vmem:[%s9818_s7 + $0x878] sm:$0xff] }
 0x39e   : > { %7469 = vmatpush1.bf16.msra.mxu0 %v8336_v10  ;;  %7510 = vmatpush1.bf16.msra.mxu1 %v8464_v60  ;;  %v8384_v10 = vcombine.low %v439_v54, %v443_v62  ;;  %v8512_v60 = vcombine.low %v567_v1, %v571_v2  ;;  %v719_v27 = vld [vmem:[%s9818_s7 + $0xc58] sm:$0xff] }
 0x39f   : > { %7470 = vmatprep.subr.bf16.mxu0 %v8345_v11  ;;  %7511 = vmatprep.subr.bf16.mxu1 %v8473_v12  ;;  %v8393_v11 = vcombine.high %v447_v6, %v451_v8  ;;  %v8521_v12 = vcombine.high %v575_v9, %v579_v59  ;;  %v723_v28 = vld [vmem:[%s9818_s7 + $0xc78] sm:$0xff] }
 0x3a0   : > { %v599_v35 = vld [vmem:[%s9818_s7 + $0x898] sm:$0xff] }
 0x3a1   : > { %v603_v36 = vld [vmem:[%s9818_s7 + $0x8b8] sm:$0xff] }
 0x3a2   : > { %7471 = vmatpush1.bf16.msra.mxu0 %v8344_v20  ;;  %7512 = vmatpush1.bf16.msra.mxu1 %v8472_v22  ;;  %v8392_v20 = vcombine.low %v447_v6, %v451_v8  ;;  %v8520_v22 = vcombine.low %v575_v9, %v579_v59  ;;  %v727_v38 = vld [vmem:[%s9818_s7 + $0xc98] sm:$0xff] }
 0x3a3   : > { %7472 = vmatprep.subr.bf16.mxu0 %v8353_v23  ;;  %7513 = vmatprep.subr.bf16.mxu1 %v8481_v24  ;;  %v8529_v23 = vcombine.high %v583_v13, %v587_v14  ;;  %v8657_v24 = vcombine.high %v711_v16, %v715_v18  ;;  %v731_v39 = vld [vmem:[%s9818_s7 + $0xcb8] sm:$0xff] }
 0x3a4   : > { %v607_v47 = vld [vmem:[%s9818_s7 + $0x8d8] sm:$0xff]  ;;  %v8672_v56 = vcombine.low %v727_v38, %v731_v39 }
 0x3a5   : > { %v611_v50 = vld [vmem:[%s9818_s7 + $0x8f8] sm:$0xff] }
 0x3a6   : > { %7473 = vmatpush1.bf16.msra.mxu0 %v8352_v30  ;;  %7514 = vmatpush1.bf16.msra.mxu1 %v8480_v31  ;;  %v8528_v30 = vcombine.low %v583_v13, %v587_v14  ;;  %v8656_v31 = vcombine.low %v711_v16, %v715_v18  ;;  %v739_v55 = vld [vmem:[%s9818_s7 + $0xcf8] sm:$0xff]  ;;  %v8552_v62 = vcombine.low %v607_v47, %v611_v50 }
 0x3a7   : > { %7474 = vmatprep.subr.bf16.mxu0 %v8361_v33  ;;  %7515 = vmatprep.subr.bf16.mxu1 %v8489_v34  ;;  %v8537_v33 = vcombine.high %v591_v25, %v595_v26  ;;  %v8665_v34 = vcombine.high %v719_v27, %v723_v28  ;;  %v743_v54 = vld [vmem:[%s9818_s7 + $0xd18] sm:$0xff] }
 0x3aa   : > { %7475 = vmatpush1.bf16.msra.mxu0 %v8360_v40  ;;  %7516 = vmatpush1.bf16.msra.mxu1 %v8488_v42  ;;  %v8536_v40 = vcombine.low %v591_v25, %v595_v26  ;;  %v8664_v42 = vcombine.low %v719_v27, %v723_v28  ;;  %v767_v27 = vld [vmem:[%s9818_s7 + $0xdd8] sm:$0xff] }
 0x3ab   : > { %7476 = vmatprep.subr.bf16.mxu0 %v8369_v43  ;;  %7517 = vmatprep.subr.bf16.mxu1 %v8497_v46  ;;  %v8545_v43 = vcombine.high %v599_v35, %v603_v36  ;;  %v8673_v46 = vcombine.high %v727_v38, %v731_v39  ;;  %v771_v28 = vld [vmem:[%s9818_s7 + $0xdf8] sm:$0xff] }
 0x3ae   : > { %7477 = vmatpush1.bf16.msra.mxu0 %v8368_v61  ;;  %7518 = vmatpush1.bf16.msra.mxu1 %v8496_v51  ;;  %v8553_v61 = vcombine.high %v607_v47, %v611_v50  ;;  %v775_v47 = vld [vmem:[%s9818_s7 + $0xe18] sm:$0xff] }
 0x3af   : > { %7478 = vmatprep.subr.bf16.mxu0 %v8377_v63  ;;  %7519 = vmatprep.subr.bf16.mxu1 %v8505_v0  ;;  %v615_v63 = vld [vmem:[%s9818_s7 + $0x918] sm:$0xff] }
 0x3b0   : > { %v619_v0 = vld [vmem:[%s9818_s7 + $0x938] sm:$0xff] }
 0x3b1   : > { %v8561_v1 = vcombine.high %v615_v63, %v619_v0  ;;  %v8560_v6 = vcombine.low %v615_v63, %v619_v0  ;;  %v779_v50 = vld [vmem:[%s9818_s7 + $0xe38] sm:$0xff] }
 0x3b2   : > { %7479 = vmatpush1.bf16.msra.mxu0 %v8376_v4  ;;  %7520 = vmatpush1.bf16.msra.mxu1 %v8504_v57  ;;  %v623_v4 = vld [vmem:[%s9818_s7 + $0x958] sm:$0xff] }
 0x3b3   : > { %7480 = vmatprep.subr.bf16.mxu0 %v8385_v5  ;;  %7521 = vmatprep.subr.bf16.mxu1 %v8513_v58  ;;  %v627_v57 = vld [vmem:[%s9818_s7 + $0x978] sm:$0xff] }
 0x3b4   : > { %v751_v5 = vld [vmem:[%s9818_s7 + $0xd58] sm:$0xff]  ;;  %v8569_v9 = vcombine.high %v623_v4, %v627_v57  ;;  %v8568_v13 = vcombine.low %v623_v4, %v627_v57 }
 0x3b5   : > { %v755_v58 = vld [vmem:[%s9818_s7 + $0xd78] sm:$0xff] }
 0x3b6   : > { %7481 = vmatpush1.bf16.msra.mxu0 %v8384_v10  ;;  %7522 = vmatpush1.bf16.msra.mxu1 %v8512_v60  ;;  %v8697_v59 = vcombine.high %v751_v5, %v755_v58  ;;  %v631_v10 = vld [vmem:[%s9818_s7 + $0x998] sm:$0xff]  ;;  %v8696_v14 = vcombine.low %v751_v5, %v755_v58 }
 0x3b7   : > { %7482 = vmatprep.subr.bf16.mxu0 %v8393_v11  ;;  %7523 = vmatprep.subr.bf16.mxu1 %v8521_v12  ;;  %v635_v60 = vld [vmem:[%s9818_s7 + $0x9b8] sm:$0xff] }
 0x3b8   : > { %v759_v11 = vld [vmem:[%s9818_s7 + $0xd98] sm:$0xff]  ;;  %v8577_v16 = vcombine.high %v631_v10, %v635_v60 }
 0x3b9   : > { %v763_v12 = vld [vmem:[%s9818_s7 + $0xdb8] sm:$0xff] }
 0x3ba   : > { %7483 = vmatpush1.bf16.msra.mxu0 %v8392_v20  ;;  %7524 = vmatpush1.bf16.msra.mxu1 %v8520_v22  ;;  %v8705_v20 = vcombine.high %v759_v11, %v763_v12  ;;  %v639_v22 = vld [vmem:[%s9818_s7 + $0x9d8] sm:$0xff] }
 0x3bb   : > { %7534 = vmatprep.subr.bf16.mxu0 %v8529_v23  ;;  %7575 = vmatprep.subr.bf16.mxu1 %v8657_v24  ;;  %v643_v23 = vld [vmem:[%s9818_s7 + $0x9f8] sm:$0xff] }
 0x3bc   : > { %v8585_v39 = vcombine.high %v639_v22, %v643_v23  ;;  %v783_v63 = vld [vmem:[%s9818_s7 + $0xe58] sm:$0xff] }
 0x3bd   : > { %7485 = vmatmul.mubr.bf16.vlgmr.msra.gmra.mrb[48].mxu0 %v9924_v17  ;;  %7526 = vmatmul.mubr.bf16.vlgmr.msra.gmra.mrb[48].mxu1 %v9929_v21  ;;  %v735_v17 = vld [vmem:[%s9818_s7 + $0xcd8] sm:$0xff]  ;;  %v8544_v21 = vcombine.low %v599_v35, %v603_v36 }
 0x3be   : > { %7535 = vmatpush1.bf16.msra.mxu0 %v8528_v30  ;;  %7576 = vmatpush1.bf16.msra.mxu1 %v8656_v31  ;;  %v8681_v51 = vcombine.high %v735_v17, %v739_v55  ;;  %v787_v0 = vld [vmem:[%s9818_s7 + $0xe78] sm:$0xff] }
 0x3bf   : > { %7536 = vmatprep.subr.bf16.mxu0 %v8537_v33  ;;  %7577 = vmatprep.subr.bf16.mxu1 %v8665_v34  ;;  %v8576_v34 = vcombine.low %v631_v10, %v635_v60  ;;  %v791_v4 = vld [vmem:[%s9818_s7 + $0xe98] sm:$0xff]  ;;  %v8728_v58 = vcombine.low %v783_v63, %v787_v0 }
 0x3c0   : > { %7566 = vmatprep.mubr.bf16.mxu0 %v9934_v29  ;;  %7607 = vmatprep.mubr.bf16.mxu1 %v9939_v32  ;;  %v747_v29 = vld [vmem:[%s9818_s7 + $0xd38] sm:$0xff]  ;;  %v8680_v32 = vcombine.low %v735_v17, %v739_v55  ;;  %v8584_v17 = vcombine.low %v639_v22, %v643_v23  ;;  %v8712_v55 = vcombine.low %v767_v27, %v771_v28 }
 0x3c1   : > { %v8689_v2 = vcombine.high %v743_v54, %v747_v29  ;;  %v8688_v8 = vcombine.low %v743_v54, %v747_v29  ;;  %v8720_v29 = vcombine.low %v775_v47, %v779_v50  ;;  %v795_v57 = vld [vmem:[%s9818_s7 + $0xeb8] sm:$0xff] }
 0x3c2   : > { %7537 = vmatpush1.bf16.msra.mxu0 %v8536_v40  ;;  %7578 = vmatpush1.bf16.msra.mxu1 %v8664_v42  ;;  %v8713_v42 = vcombine.high %v767_v27, %v771_v28  ;;  %v799_v10 = vld [vmem:[%s9818_s7 + $0xed8] sm:$0xff] }
 0x3c3   : > { %7538 = vmatprep.subr.bf16.mxu0 %v8545_v43  ;;  %7579 = vmatprep.subr.bf16.mxu1 %v8673_v46  ;;  %v647_v43 = vld [vmem:[%s9818_s7 + $0xa18] sm:$0xff] }
 0x3c4   : > { %v651_v46 = vld [vmem:[%s9818_s7 + $0xa38] sm:$0xff] }
 0x3c5   : > { %v8592_v54 = vcombine.low %v647_v43, %v651_v46  ;;  %v803_v60 = vld [vmem:[%s9818_s7 + $0xef8] sm:$0xff] }
 0x3c6   : > { %7539 = vmatpush1.bf16.msra.mxu0 %v8544_v21  ;;  %7580 = vmatpush1.bf16.msra.mxu1 %v8672_v56  ;;  %v8593_v21 = vcombine.high %v647_v43, %v651_v46  ;;  %v8721_v56 = vcombine.high %v775_v47, %v779_v50  ;;  %v811_v22 = vld [vmem:[%s9818_s7 + $0xf38] sm:$0xff] }
 0x3c7   : > { %7540 = vmatprep.subr.bf16.mxu0 %v8553_v61  ;;  %7581 = vmatprep.subr.bf16.mxu1 %v8681_v51  ;;  %v655_v61 = vld [vmem:[%s9818_s7 + $0xa58] sm:$0xff] }
 0x3c8   : > { %v659_v51 = vld [vmem:[%s9818_s7 + $0xa78] sm:$0xff] }
 0x3c9   : > { %v8600_v5 = vcombine.low %v655_v61, %v659_v51  ;;  %v687_v27 = vld [vmem:[%s9818_s7 + $0xb58] sm:$0xff] }
 0x3ca   : > { %7541 = vmatpush1.bf16.msra.mxu0 %v8552_v62  ;;  %7582 = vmatpush1.bf16.msra.mxu1 %v8680_v32  ;;  %v8601_v62 = vcombine.high %v655_v61, %v659_v51  ;;  %v8729_v32 = vcombine.high %v783_v63, %v787_v0  ;;  %v691_v28 = vld [vmem:[%s9818_s7 + $0xb78] sm:$0xff] }
 0x3cb   : > { %7542 = vmatprep.subr.bf16.mxu0 %v8561_v1  ;;  %7583 = vmatprep.subr.bf16.mxu1 %v8689_v2  ;;  %v663_v1 = vld [vmem:[%s9818_s7 + $0xa98] sm:$0xff]  ;;  %v8632_v43 = vcombine.low %v687_v27, %v691_v28 }
 0x3cc   : > { %v667_v2 = vld [vmem:[%s9818_s7 + $0xab8] sm:$0xff] }
 0x3ce   : > { %7543 = vmatpush1.bf16.msra.mxu0 %v8560_v6  ;;  %7584 = vmatpush1.bf16.msra.mxu1 %v8688_v8  ;;  %v8609_v6 = vcombine.high %v663_v1, %v667_v2  ;;  %v8737_v8 = vcombine.high %v791_v4, %v795_v57 }
 0x3cf   : > { %7544 = vmatprep.subr.bf16.mxu0 %v8569_v9  ;;  %7585 = vmatprep.subr.bf16.mxu1 %v8697_v59  ;;  %v671_v9 = vld [vmem:[%s9818_s7 + $0xad8] sm:$0xff] }
 0x3d0   : > { %v7240_v18 = vpop.f32.mrb[36].mxu0  ;;  %v7281_v25 = vpop.f32.mrb[36].mxu1  ;;  %v675_v59 = vld [vmem:[%s9818_s7 + $0xaf8] sm:$0xff] }
 0x3d1   : > { %v7241_v24 = vadd.f32 %v7240_v18, %v10778_v44  ;;  %v7242_v26 = vpop.f32.mrb[37].mxu0  ;;  %v7283_v31 = vpop.f32.mrb[37].mxu1  ;;  %v8704_v44 = vcombine.low %v759_v11, %v763_v12  ;;  %v8608_v11 = vcombine.low %v663_v1, %v667_v2  ;;  %v8736_v12 = vcombine.low %v791_v4, %v795_v57  ;;  %v683_v18 = vld [vmem:[%s9818_s7 + $0xb38] sm:$0xff] }
 0x3d2   : > { %v7243_v30 = vadd.f32 %v7242_v26, %v10780_v53  ;;  %v7244_v33 = vpop.f32.mrb[38].mxu0  ;;  %7545 = vmatpush1.bf16.msra.mxu0 %v8568_v13  ;;  %v7285_v36 = vpop.f32.mrb[38].mxu1  ;;  %7586 = vmatpush1.bf16.msra.mxu1 %v8696_v14  ;;  %v8617_v13 = vcombine.high %v671_v9, %v675_v59  ;;  %v8745_v14 = vcombine.high %v799_v10, %v803_v60 }
 0x3d3   : > { %v10852_v35 = vadd.f32 %v7281_v25, %v7241_v24  ;;  %v7245_v38 = vpop.f32.mrb[39].mxu0  ;;  %7546 = vmatprep.subr.bf16.mxu0 %v8577_v16  ;;  %v7286_v53 = vpop.f32.mrb[39].mxu1  ;;  %7587 = vmatprep.subr.bf16.mxu1 %v8705_v20  ;;  %v679_v16 = vld [vmem:[%s9818_s7 + $0xb18] sm:$0xff]  ;;  %v8616_v23 = vcombine.low %v671_v9, %v675_v59  ;;  %v8744_v24 = vcombine.low %v799_v10, %v803_v60 }
 0x3d4   : > { %v10854_v40 = vadd.f32 %v7283_v31, %v7243_v30  ;;  %v807_v20 = vld [vmem:[%s9818_s7 + $0xf18] sm:$0xff]  ;;  %v8625_v25 = vcombine.high %v679_v16, %v683_v18  ;;  %v8624_v33 = vcombine.low %v679_v16, %v683_v18  ;;  %v8633_v36 = vcombine.high %v687_v27, %v691_v28 }
 0x3d5   : > { %v8753_v26 = vcombine.high %v807_v20, %v811_v22  ;;  %v815_v30 = vld [vmem:[%s9818_s7 + $0xf58] sm:$0xff] }
 0x3d6   : > { %7547 = vmatpush1.bf16.msra.mxu0 %v8576_v34  ;;  %7588 = vmatpush1.bf16.msra.mxu1 %v8704_v44  ;;  %v819_v31 = vld [vmem:[%s9818_s7 + $0xf78] sm:$0xff]  ;;  %v8752_v34 = vcombine.low %v807_v20, %v811_v22 }
 0x3d7   : > { %7548 = vmatprep.subr.bf16.mxu0 %v8585_v39  ;;  %7589 = vmatprep.subr.bf16.mxu1 %v8713_v42  ;;  %v8761_v38 = vcombine.high %v815_v30, %v819_v31  ;;  %v695_v44 = vld [vmem:[%s9818_s7 + $0xb98] sm:$0xff]  ;;  %v8760_v46 = vcombine.low %v815_v30, %v819_v31 }
 0x3d8   : > { %v699_v39 = vld [vmem:[%s9818_s7 + $0xbb8] sm:$0xff] }
 0x3d9   : > { %v823_v53 = vld [vmem:[%s9818_s7 + $0xf98] sm:$0xff]  ;;  %v8641_v47 = vcombine.high %v695_v44, %v699_v39  ;;  %v8640_v61 = vcombine.low %v695_v44, %v699_v39 }
 0x3da   : > { %7549 = vmatpush1.bf16.msra.mxu0 %v8584_v17  ;;  %7590 = vmatpush1.bf16.msra.mxu1 %v8712_v55  ;;  %v827_v42 = vld [vmem:[%s9818_s7 + $0xfb8] sm:$0xff] }
 0x3db   : > { %7550 = vmatprep.subr.bf16.mxu0 %v8593_v21  ;;  %7591 = vmatprep.subr.bf16.mxu1 %v8721_v56  ;;  %v8769_v50 = vcombine.high %v823_v53, %v827_v42  ;;  %v703_v17 = vld [vmem:[%s9818_s7 + $0xbd8] sm:$0xff]  ;;  %v8768_v51 = vcombine.low %v823_v53, %v827_v42 }
 0x3dc   : > { %v707_v55 = vld [vmem:[%s9818_s7 + $0xbf8] sm:$0xff] }
 0x3dd   : > { %v831_v21 = vld [vmem:[%s9818_s7 + $0xfd8] sm:$0xff]  ;;  %v8649_v63 = vcombine.high %v703_v17, %v707_v55  ;;  %v8648_v1 = vcombine.low %v703_v17, %v707_v55 }
 0x3de   : > { %7551 = vmatpush1.bf16.msra.mxu0 %v8592_v54  ;;  %7592 = vmatpush1.bf16.msra.mxu1 %v8720_v29  ;;  %v835_v56 = vld [vmem:[%s9818_s7 + $0xff8] sm:$0xff] }
 0x3df   : > { %7552 = vmatprep.subr.bf16.mxu0 %v8601_v62  ;;  %7593 = vmatprep.subr.bf16.mxu1 %v8729_v32  ;;  %v8777_v0 = vcombine.high %v831_v21, %v835_v56  ;;  %v839_v54 = vld [vmem:[%s9818_s7 + $0x1018] sm:$0xff]  ;;  %v8776_v2 = vcombine.low %v831_v21, %v835_v56 }
 0x3e0   : > { %v843_v29 = vld [vmem:[%s9818_s7 + $0x1038] sm:$0xff] }
 0x3e1   : > { %v967_v62 = vld [vmem:[%s9818_s7 + $0x1418] sm:$0xff]  ;;  %v8785_v4 = vcombine.high %v839_v54, %v843_v29  ;;  %v8784_v9 = vcombine.low %v839_v54, %v843_v29 }
 0x3e2   : > { %7553 = vmatpush1.bf16.msra.mxu0 %v8600_v5  ;;  %7594 = vmatpush1.bf16.msra.mxu1 %v8728_v58  ;;  %v971_v32 = vld [vmem:[%s9818_s7 + $0x1438] sm:$0xff] }
 0x3e3   : > { %7554 = vmatprep.subr.bf16.mxu0 %v8609_v6  ;;  %7595 = vmatprep.subr.bf16.mxu1 %v8737_v8  ;;  %v8913_v57 = vcombine.high %v967_v62, %v971_v32  ;;  %v847_v5 = vld [vmem:[%s9818_s7 + $0x1058] sm:$0xff]  ;;  %v8912_v59 = vcombine.low %v967_v62, %v971_v32 }
 0x3e4   : > { %v851_v58 = vld [vmem:[%s9818_s7 + $0x1078] sm:$0xff] }
 0x3e5   : > { %v975_v6 = vld [vmem:[%s9818_s7 + $0x1458] sm:$0xff]  ;;  %v8793_v10 = vcombine.high %v847_v5, %v851_v58  ;;  %v8792_v16 = vcombine.low %v847_v5, %v851_v58 }
 0x3e6   : > { %7555 = vmatpush1.bf16.msra.mxu0 %v8608_v11  ;;  %7596 = vmatpush1.bf16.msra.mxu1 %v8736_v12  ;;  %v979_v8 = vld [vmem:[%s9818_s7 + $0x1478] sm:$0xff] }
 0x3e7   : > { %7556 = vmatprep.subr.bf16.mxu0 %v8617_v13  ;;  %7597 = vmatprep.subr.bf16.mxu1 %v8745_v14  ;;  %v8921_v60 = vcombine.high %v975_v6, %v979_v8  ;;  %v855_v11 = vld [vmem:[%s9818_s7 + $0x1098] sm:$0xff]  ;;  %v8920_v18 = vcombine.low %v975_v6, %v979_v8 }
 0x3e8   : > { %v859_v12 = vld [vmem:[%s9818_s7 + $0x10b8] sm:$0xff] }
 0x3e9   : > { %v983_v13 = vld [vmem:[%s9818_s7 + $0x1498] sm:$0xff]  ;;  %v8801_v20 = vcombine.high %v855_v11, %v859_v12 }
 0x3ea   : > { %7557 = vmatpush1.bf16.msra.mxu0 %v8616_v23  ;;  %7598 = vmatpush1.bf16.msra.mxu1 %v8744_v24  ;;  %v987_v14 = vld [vmem:[%s9818_s7 + $0x14b8] sm:$0xff] }
 0x3eb   : > { %7558 = vmatprep.subr.bf16.mxu0 %v8625_v25  ;;  %7599 = vmatprep.subr.bf16.mxu1 %v8753_v26  ;;  %v8929_v22 = vcombine.high %v983_v13, %v987_v14  ;;  %v863_v23 = vld [vmem:[%s9818_s7 + $0x10d8] sm:$0xff]  ;;  %v8928_v26 = vcombine.low %v983_v13, %v987_v14 }
 0x3ec   : > { %v867_v24 = vld [vmem:[%s9818_s7 + $0x10f8] sm:$0xff] }
 0x3ed   : > { %v995_v25 = vld [vmem:[%s9818_s7 + $0x14f8] sm:$0xff]  ;;  %v8809_v27 = vcombine.high %v863_v23, %v867_v24 }
 0x3ee   : > { %7559 = vmatpush1.bf16.msra.mxu0 %v8624_v33  ;;  %7600 = vmatpush1.bf16.msra.mxu1 %v8752_v34  ;;  %v871_v30 = vld [vmem:[%s9818_s7 + $0x1118] sm:$0xff]  ;;  %v8808_v34 = vcombine.low %v863_v23, %v867_v24 }
 0x3ef   : > { %7560 = vmatprep.subr.bf16.mxu0 %v8633_v36  ;;  %7601 = vmatprep.subr.bf16.mxu1 %v8761_v38  ;;  %v875_v31 = vld [vmem:[%s9818_s7 + $0x1138] sm:$0xff] }
 0x3f0   : > { %v999_v33 = vld [vmem:[%s9818_s7 + $0x1518] sm:$0xff]  ;;  %v8817_v36 = vcombine.high %v871_v30, %v875_v31 }
 0x3f1   : > { %v879_v44 = vld [vmem:[%s9818_s7 + $0x1158] sm:$0xff] }
 0x3f2   : > { %7561 = vmatpush1.bf16.msra.mxu0 %v8632_v43  ;;  %7602 = vmatpush1.bf16.msra.mxu1 %v8760_v46  ;;  %v883_v39 = vld [vmem:[%s9818_s7 + $0x1178] sm:$0xff]  ;;  %v8816_v43 = vcombine.low %v871_v30, %v875_v31 }
 0x3f3   : > { %7562 = vmatprep.subr.bf16.mxu0 %v8641_v47  ;;  %7603 = vmatprep.subr.bf16.mxu1 %v8769_v50  ;;  %v1007_v53 = vld [vmem:[%s9818_s7 + $0x1558] sm:$0xff]  ;;  %v8825_v47 = vcombine.high %v879_v44, %v883_v39 }
 0x3f4   : > { %v1011_v42 = vld [vmem:[%s9818_s7 + $0x1578] sm:$0xff] }
 0x3f5   : > { %v8953_v50 = vcombine.high %v1007_v53, %v1011_v42  ;;  %v887_v17 = vld [vmem:[%s9818_s7 + $0x1198] sm:$0xff] }
 0x3f6   : > { %7563 = vmatpush1.bf16.msra.mxu0 %v8640_v61  ;;  %7604 = vmatpush1.bf16.msra.mxu1 %v8768_v51  ;;  %v891_v55 = vld [vmem:[%s9818_s7 + $0x11b8] sm:$0xff]  ;;  %v8824_v61 = vcombine.low %v879_v44, %v883_v39  ;;  %v8952_v51 = vcombine.low %v1007_v53, %v1011_v42 }
 0x3f7   : > { %7564 = vmatprep.subr.bf16.mxu0 %v8649_v63  ;;  %7605 = vmatprep.subr.bf16.mxu1 %v8777_v0  ;;  %v1015_v21 = vld [vmem:[%s9818_s7 + $0x1598] sm:$0xff]  ;;  %v8833_v63 = vcombine.high %v887_v17, %v891_v55  ;;  %v8832_v8 = vcombine.low %v887_v17, %v891_v55 }
 0x3f8   : > { %v1019_v56 = vld [vmem:[%s9818_s7 + $0x15b8] sm:$0xff] }
 0x3f9   : > { %v8961_v54 = vcombine.high %v1015_v21, %v1019_v56  ;;  %v895_v29 = vld [vmem:[%s9818_s7 + $0x11d8] sm:$0xff] }
 0x3fa   : > { %7565 = vmatpush1.bf16.msra.mxu0 %v8648_v1  ;;  %7606 = vmatpush1.bf16.msra.mxu1 %v8776_v2  ;;  %v899_v62 = vld [vmem:[%s9818_s7 + $0x11f8] sm:$0xff] }
 0x3fb   : > { %7616 = vmatprep.subr.bf16.mxu0 %v8785_v4  ;;  %7657 = vmatprep.subr.bf16.mxu1 %v8913_v57  ;;  %v1023_v4 = vld [vmem:[%s9818_s7 + $0x15d8] sm:$0xff] }
 0x3fc   : > { %v1027_v57 = vld [vmem:[%s9818_s7 + $0x15f8] sm:$0xff] }
 0x3fd   : > { %7567 = vmatmul.mubr.bf16.vlgmr.msra.gmra.mrb[52].mxu0 %v10004_v37  ;;  %7608 = vmatmul.mubr.bf16.vlgmr.msra.gmra.mrb[52].mxu1 %v10009_v41  ;;  %v991_v37 = vld [vmem:[%s9818_s7 + $0x14d8] sm:$0xff]  ;;  %v8800_v41 = vcombine.low %v855_v11, %v859_v12  ;;  %v8969_v12 = vcombine.high %v1023_v4, %v1027_v57 }
 0x3fe   : > { %7617 = vmatpush1.bf16.msra.mxu0 %v8784_v9  ;;  %7658 = vmatpush1.bf16.msra.mxu1 %v8912_v59  ;;  %v8937_v28 = vcombine.high %v991_v37, %v995_v25  ;;  %v903_v13 = vld [vmem:[%s9818_s7 + $0x1218] sm:$0xff] }
 0x3ff   : > { %7618 = vmatprep.subr.bf16.mxu0 %v8793_v10  ;;  %7659 = vmatprep.subr.bf16.mxu1 %v8921_v60  ;;  %v8841_v60 = vcombine.high %v895_v29, %v899_v62  ;;  %v907_v14 = vld [vmem:[%s9818_s7 + $0x1238] sm:$0xff] }
 0x400   : > { %7648 = vmatprep.mubr.bf16.mxu0 %v10014_v49  ;;  %7689 = vmatprep.mubr.bf16.mxu1 %v10019_v52  ;;  %v1003_v49 = vld [vmem:[%s9818_s7 + $0x1538] sm:$0xff]  ;;  %v8936_v52 = vcombine.low %v991_v37, %v995_v25  ;;  %v8849_v23 = vcombine.high %v903_v13, %v907_v14 }
 0x401   : > { %v8945_v38 = vcombine.high %v999_v33, %v1003_v49  ;;  %v8944_v46 = vcombine.low %v999_v33, %v1003_v49  ;;  %v911_v37 = vld [vmem:[%s9818_s7 + $0x1258] sm:$0xff] }
 0x402   : > { %7619 = vmatpush1.bf16.msra.mxu0 %v8792_v16  ;;  %7660 = vmatpush1.bf16.msra.mxu1 %v8920_v18  ;;  %v1031_v16 = vld [vmem:[%s9818_s7 + $0x1618] sm:$0xff] }
 0x403   : > { %7620 = vmatprep.subr.bf16.mxu0 %v8801_v20  ;;  %7661 = vmatprep.subr.bf16.mxu1 %v8929_v22  ;;  %v1035_v18 = vld [vmem:[%s9818_s7 + $0x1638] sm:$0xff]  ;;  %v8840_v20 = vcombine.low %v895_v29, %v899_v62  ;;  %v8968_v22 = vcombine.low %v1023_v4, %v1027_v57 }
 0x404   : > { %v8977_v24 = vcombine.high %v1031_v16, %v1035_v18  ;;  %v915_v25 = vld [vmem:[%s9818_s7 + $0x1278] sm:$0xff] }
 0x405   : > { %v8857_v30 = vcombine.high %v911_v37, %v915_v25  ;;  %v919_v33 = vld [vmem:[%s9818_s7 + $0x1298] sm:$0xff] }
 0x406   : > { %7621 = vmatpush1.bf16.msra.mxu0 %v8800_v41  ;;  %7662 = vmatpush1.bf16.msra.mxu1 %v8928_v26  ;;  %v1039_v41 = vld [vmem:[%s9818_s7 + $0x1658] sm:$0xff] }
 0x407   : > { %7622 = vmatprep.subr.bf16.mxu0 %v8809_v27  ;;  %7663 = vmatprep.subr.bf16.mxu1 %v8937_v28  ;;  %v1043_v26 = vld [vmem:[%s9818_s7 + $0x1678] sm:$0xff]  ;;  %v8848_v27 = vcombine.low %v903_v13, %v907_v14  ;;  %v8976_v28 = vcombine.low %v1031_v16, %v1035_v18 }
 0x408   : > { %v8985_v31 = vcombine.high %v1039_v41, %v1043_v26  ;;  %v923_v49 = vld [vmem:[%s9818_s7 + $0x12b8] sm:$0xff] }
 0x409   : > { %v8865_v44 = vcombine.high %v919_v33, %v923_v49  ;;  %v927_v53 = vld [vmem:[%s9818_s7 + $0x12d8] sm:$0xff] }
 0x40a   : > { %7623 = vmatpush1.bf16.msra.mxu0 %v8808_v34  ;;  %7664 = vmatpush1.bf16.msra.mxu1 %v8936_v52  ;;  %v1047_v34 = vld [vmem:[%s9818_s7 + $0x1698] sm:$0xff] }
 0x40b   : > { %7624 = vmatprep.subr.bf16.mxu0 %v8817_v36  ;;  %7665 = vmatprep.subr.bf16.mxu1 %v8945_v38  ;;  %v1051_v52 = vld [vmem:[%s9818_s7 + $0x16b8] sm:$0xff]  ;;  %v8856_v36 = vcombine.low %v911_v37, %v915_v25  ;;  %v8984_v38 = vcombine.low %v1039_v41, %v1043_v26 }
 0x40c   : > { %v8993_v39 = vcombine.high %v1047_v34, %v1051_v52  ;;  %v931_v42 = vld [vmem:[%s9818_s7 + $0x12f8] sm:$0xff] }
 0x40d   : > { %v8873_v17 = vcombine.high %v927_v53, %v931_v42  ;;  %v943_v62 = vld [vmem:[%s9818_s7 + $0x1358] sm:$0xff] }
 0x40e   : > { %7625 = vmatpush1.bf16.msra.mxu0 %v8816_v43  ;;  %7666 = vmatpush1.bf16.msra.mxu1 %v8944_v46  ;;  %v1055_v43 = vld [vmem:[%s9818_s7 + $0x16d8] sm:$0xff] }
 0x40f   : > { %7626 = vmatprep.subr.bf16.mxu0 %v8825_v47  ;;  %7667 = vmatprep.subr.bf16.mxu1 %v8953_v50  ;;  %v1059_v46 = vld [vmem:[%s9818_s7 + $0x16f8] sm:$0xff]  ;;  %v8864_v47 = vcombine.low %v919_v33, %v923_v49  ;;  %v8992_v50 = vcombine.low %v1047_v34, %v1051_v52 }
 0x410   : > { %v7322_v0 = vpop.f32.mrb[40].mxu0  ;;  %v7363_v1 = vpop.f32.mrb[40].mxu1  ;;  %v9001_v55 = vcombine.high %v1055_v43, %v1059_v46  ;;  %v959_v13 = vld [vmem:[%s9818_s7 + $0x13d8] sm:$0xff] }
 0x411   : > { %v7323_v32 = vadd.f32 %v7322_v0, %v10852_v35  ;;  %v7324_v2 = vpop.f32.mrb[41].mxu0  ;;  %v7365_v58 = vpop.f32.mrb[41].mxu1  ;;  %v8960_v35 = vcombine.low %v1015_v21, %v1019_v56  ;;  %v935_v21 = vld [vmem:[%s9818_s7 + $0x1318] sm:$0xff]  ;;  %v9000_v0 = vcombine.low %v1055_v43, %v1059_v46 }
 0x412   : > { %v7325_v5 = vadd.f32 %v7324_v2, %v10854_v40  ;;  %v7326_v6 = vpop.f32.mrb[42].mxu0  ;;  %7627 = vmatpush1.bf16.msra.mxu0 %v8824_v61  ;;  %v7367_v59 = vpop.f32.mrb[42].mxu1  ;;  %7668 = vmatpush1.bf16.msra.mxu1 %v8952_v51  ;;  %v939_v56 = vld [vmem:[%s9818_s7 + $0x1338] sm:$0xff] }
 0x413   : > { %v10926_v9 = vadd.f32 %v7363_v1, %v7323_v32  ;;  %v7327_v10 = vpop.f32.mrb[43].mxu0  ;;  %7628 = vmatprep.subr.bf16.mxu0 %v8833_v63  ;;  %v7368_v40 = vpop.f32.mrb[43].mxu1  ;;  %7669 = vmatprep.subr.bf16.mxu1 %v8961_v54  ;;  %v1063_v61 = vld [vmem:[%s9818_s7 + $0x1718] sm:$0xff]  ;;  %v8872_v63 = vcombine.low %v927_v53, %v931_v42  ;;  %v8881_v54 = vcombine.high %v935_v21, %v939_v56 }
 0x414   : > { %v10928_v11 = vadd.f32 %v7365_v58, %v7325_v5  ;;  %v1067_v51 = vld [vmem:[%s9818_s7 + $0x1738] sm:$0xff]  ;;  %v8880_v4 = vcombine.low %v935_v21, %v939_v56 }
 0x415   : > { %v9009_v29 = vcombine.high %v1063_v61, %v1067_v51  ;;  %v947_v32 = vld [vmem:[%s9818_s7 + $0x1378] sm:$0xff]  ;;  %v9008_v57 = vcombine.low %v1063_v61, %v1067_v51 }
 0x416   : > { %7629 = vmatpush1.bf16.msra.mxu0 %v8832_v8  ;;  %7670 = vmatpush1.bf16.msra.mxu1 %v8960_v35  ;;  %v1071_v1 = vld [vmem:[%s9818_s7 + $0x1758] sm:$0xff]  ;;  %v8889_v5 = vcombine.high %v943_v62, %v947_v32  ;;  %v8888_v35 = vcombine.low %v943_v62, %v947_v32 }
 0x417   : > { %7630 = vmatprep.subr.bf16.mxu0 %v8841_v60  ;;  %7671 = vmatprep.subr.bf16.mxu1 %v8969_v12  ;;  %v1075_v2 = vld [vmem:[%s9818_s7 + $0x1778] sm:$0xff] }
 0x418   : > { %v9017_v58 = vcombine.high %v1071_v1, %v1075_v2  ;;  %v951_v6 = vld [vmem:[%s9818_s7 + $0x1398] sm:$0xff]  ;;  %v9016_v60 = vcombine.low %v1071_v1, %v1075_v2 }
 0x419   : > { %v955_v8 = vld [vmem:[%s9818_s7 + $0x13b8] sm:$0xff] }
 0x41a   : > { %7631 = vmatpush1.bf16.msra.mxu0 %v8840_v20  ;;  %7672 = vmatpush1.bf16.msra.mxu1 %v8968_v22  ;;  %v1079_v59 = vld [vmem:[%s9818_s7 + $0x1798] sm:$0xff]  ;;  %v8897_v40 = vcombine.high %v951_v6, %v955_v8  ;;  %v8896_v20 = vcombine.low %v951_v6, %v955_v8 }
 0x41b   : > { %7632 = vmatprep.subr.bf16.mxu0 %v8849_v23  ;;  %7673 = vmatprep.subr.bf16.mxu1 %v8977_v24  ;;  %v1083_v10 = vld [vmem:[%s9818_s7 + $0x17b8] sm:$0xff] }
 0x41c   : > { %v9025_v12 = vcombine.high %v1079_v59, %v1083_v10  ;;  %v963_v14 = vld [vmem:[%s9818_s7 + $0x13f8] sm:$0xff]  ;;  %v9024_v22 = vcombine.low %v1079_v59, %v1083_v10 }
 0x41d   : > { %v1087_v16 = vld [vmem:[%s9818_s7 + $0x17d8] sm:$0xff]  ;;  %v8905_v23 = vcombine.high %v959_v13, %v963_v14 }
 0x41e   : > { %7633 = vmatpush1.bf16.msra.mxu0 %v8848_v27  ;;  %7674 = vmatpush1.bf16.msra.mxu1 %v8976_v28  ;;  %v1091_v18 = vld [vmem:[%s9818_s7 + $0x17f8] sm:$0xff]  ;;  %v8904_v27 = vcombine.low %v959_v13, %v963_v14 }
 0x41f   : > { %7634 = vmatprep.subr.bf16.mxu0 %v8857_v30  ;;  %7675 = vmatprep.subr.bf16.mxu1 %v8985_v31  ;;  %v9033_v24 = vcombine.high %v1087_v16, %v1091_v18  ;;  %v1095_v37 = vld [vmem:[%s9818_s7 + $0x1818] sm:$0xff]  ;;  %v9032_v28 = vcombine.low %v1087_v16, %v1091_v18 }
 0x420   : > { %v1099_v25 = vld [vmem:[%s9818_s7 + $0x1838] sm:$0xff] }
 0x421   : > { %v1223_v41 = vld [vmem:[%s9818_s7 + $0x1c18] sm:$0xff]  ;;  %v9041_v30 = vcombine.high %v1095_v37, %v1099_v25 }
 0x422   : > { %7635 = vmatpush1.bf16.msra.mxu0 %v8856_v36  ;;  %7676 = vmatpush1.bf16.msra.mxu1 %v8984_v38  ;;  %v1227_v26 = vld [vmem:[%s9818_s7 + $0x1c38] sm:$0xff]  ;;  %v9040_v36 = vcombine.low %v1095_v37, %v1099_v25 }
 0x423   : > { %7636 = vmatprep.subr.bf16.mxu0 %v8865_v44  ;;  %7677 = vmatprep.subr.bf16.mxu1 %v8993_v39  ;;  %v9169_v31 = vcombine.high %v1223_v41, %v1227_v26  ;;  %v1103_v33 = vld [vmem:[%s9818_s7 + $0x1858] sm:$0xff]  ;;  %v9168_v38 = vcombine.low %v1223_v41, %v1227_v26 }
 0x424   : > { %v1107_v49 = vld [vmem:[%s9818_s7 + $0x1878] sm:$0xff] }
 0x425   : > { %v1231_v34 = vld [vmem:[%s9818_s7 + $0x1c58] sm:$0xff]  ;;  %v9049_v44 = vcombine.high %v1103_v33, %v1107_v49 }
 0x426   : > { %7637 = vmatpush1.bf16.msra.mxu0 %v8864_v47  ;;  %7678 = vmatpush1.bf16.msra.mxu1 %v8992_v50  ;;  %v1235_v52 = vld [vmem:[%s9818_s7 + $0x1c78] sm:$0xff]  ;;  %v9048_v47 = vcombine.low %v1103_v33, %v1107_v49 }
 0x427   : > { %7638 = vmatprep.subr.bf16.mxu0 %v8873_v17  ;;  %7679 = vmatprep.subr.bf16.mxu1 %v9001_v55  ;;  %v9177_v39 = vcombine.high %v1231_v34, %v1235_v52  ;;  %v1111_v53 = vld [vmem:[%s9818_s7 + $0x1898] sm:$0xff]  ;;  %v9176_v50 = vcombine.low %v1231_v34, %v1235_v52  ;;  %v321_v34 = vld [vmem:[#allocation2 + $0x28] sm:$0xff] }
 0x428   : > { %v1115_v42 = vld [vmem:[%s9818_s7 + $0x18b8] sm:$0xff] }
 0x429   : > { %v1239_v43 = vld [vmem:[%s9818_s7 + $0x1c98] sm:$0xff]  ;;  %v9057_v17 = vcombine.high %v1111_v53, %v1115_v42 }
 0x42a   : > { %7639 = vmatpush1.bf16.msra.mxu0 %v8872_v63  ;;  %7680 = vmatpush1.bf16.msra.mxu1 %v9000_v0  ;;  %v1243_v46 = vld [vmem:[%s9818_s7 + $0x1cb8] sm:$0xff] }
 0x42b   : > { %7640 = vmatprep.subr.bf16.mxu0 %v8881_v54  ;;  %7681 = vmatprep.subr.bf16.mxu1 %v9009_v29  ;;  %v9185_v55 = vcombine.high %v1239_v43, %v1243_v46  ;;  %v1119_v21 = vld [vmem:[%s9818_s7 + $0x18d8] sm:$0xff]  ;;  %v9184_v51 = vcombine.low %v1239_v43, %v1243_v46 }
 0x42c   : > { %v1123_v56 = vld [vmem:[%s9818_s7 + $0x18f8] sm:$0xff] }
 0x42d   : > { %v1251_v61 = vld [vmem:[%s9818_s7 + $0x1cf8] sm:$0xff]  ;;  %v9065_v63 = vcombine.high %v1119_v21, %v1123_v56  ;;  %v9064_v32 = vcombine.low %v1119_v21, %v1123_v56 }
 0x42e   : > { %7641 = vmatpush1.bf16.msra.mxu0 %v8880_v4  ;;  %7682 = vmatpush1.bf16.msra.mxu1 %v9008_v57  ;;  %v1127_v54 = vld [vmem:[%s9818_s7 + $0x1918] sm:$0xff] }
 0x42f   : > { %7642 = vmatprep.subr.bf16.mxu0 %v8889_v5  ;;  %7683 = vmatprep.subr.bf16.mxu1 %v9017_v58  ;;  %v1131_v29 = vld [vmem:[%s9818_s7 + $0x1938] sm:$0xff] }
 0x430   : > { %v1255_v62 = vld [vmem:[%s9818_s7 + $0x1d18] sm:$0xff]  ;;  %v9073_v1 = vcombine.high %v1127_v54, %v1131_v29  ;;  %v9072_v6 = vcombine.low %v1127_v54, %v1131_v29 }
 0x431   : > { %v1135_v4 = vld [vmem:[%s9818_s7 + $0x1958] sm:$0xff] }
 0x432   : > { %7643 = vmatpush1.bf16.msra.mxu0 %v8888_v35  ;;  %7684 = vmatpush1.bf16.msra.mxu1 %v9016_v60  ;;  %v1139_v57 = vld [vmem:[%s9818_s7 + $0x1978] sm:$0xff] }
 0x433   : > { %7644 = vmatprep.subr.bf16.mxu0 %v8897_v40  ;;  %7685 = vmatprep.subr.bf16.mxu1 %v9025_v12  ;;  %v1263_v5 = vld [vmem:[%s9818_s7 + $0x1d58] sm:$0xff]  ;;  %v9081_v59 = vcombine.high %v1135_v4, %v1139_v57  ;;  %v9080_v13 = vcombine.low %v1135_v4, %v1139_v57 }
 0x434   : > { %v1267_v58 = vld [vmem:[%s9818_s7 + $0x1d78] sm:$0xff] }
 0x435   : > { %v9209_v10 = vcombine.high %v1263_v5, %v1267_v58  ;;  %v1143_v35 = vld [vmem:[%s9818_s7 + $0x1998] sm:$0xff]  ;;  %v9208_v14 = vcombine.low %v1263_v5, %v1267_v58 }
 0x436   : > { %7645 = vmatpush1.bf16.msra.mxu0 %v8896_v20  ;;  %7686 = vmatpush1.bf16.msra.mxu1 %v9024_v22  ;;  %v1147_v60 = vld [vmem:[%s9818_s7 + $0x19b8] sm:$0xff] }
 0x437   : > { %7646 = vmatprep.subr.bf16.mxu0 %v8905_v23  ;;  %7687 = vmatprep.subr.bf16.mxu1 %v9033_v24  ;;  %v1271_v40 = vld [vmem:[%s9818_s7 + $0x1d98] sm:$0xff]  ;;  %v9089_v16 = vcombine.high %v1143_v35, %v1147_v60  ;;  %v9088_v33 = vcombine.low %v1143_v35, %v1147_v60 }
 0x438   : > { %v1275_v12 = vld [vmem:[%s9818_s7 + $0x1db8] sm:$0xff] }
 0x439   : > { %v9217_v20 = vcombine.high %v1271_v40, %v1275_v12  ;;  %v1151_v22 = vld [vmem:[%s9818_s7 + $0x19d8] sm:$0xff] }
 0x43a   : > { %7647 = vmatpush1.bf16.msra.mxu0 %v8904_v27  ;;  %7688 = vmatpush1.bf16.msra.mxu1 %v9032_v28  ;;  %v1155_v23 = vld [vmem:[%s9818_s7 + $0x19f8] sm:$0xff]  ;;  %v320_v27 = vld [vmem:[#allocation2 + $0x20] sm:$0xff] }
 0x43b   : > { %7698 = vmatprep.subr.bf16.mxu0 %v9041_v30  ;;  %7739 = vmatprep.subr.bf16.mxu1 %v9169_v31  ;;  %v1279_v41 = vld [vmem:[%s9818_s7 + $0x1dd8] sm:$0xff] }
 0x43c   : > { %v1283_v26 = vld [vmem:[%s9818_s7 + $0x1df8] sm:$0xff] }
 0x43d   : > { %7649 = vmatmul.mubr.bf16.vlgmr.msra.gmra.mrb[56].mxu0 %v10084_v3  ;;  %7690 = vmatmul.mubr.bf16.vlgmr.msra.gmra.mrb[56].mxu1 %v10089_v7  ;;  %v1247_v3 = vld [vmem:[%s9818_s7 + $0x1cd8] sm:$0xff]  ;;  %v9056_v7 = vcombine.low %v1111_v53, %v1115_v42 }
 0x43e   : > { %7699 = vmatpush1.bf16.msra.mxu0 %v9040_v36  ;;  %7740 = vmatpush1.bf16.msra.mxu1 %v9168_v38  ;;  %v9193_v0 = vcombine.high %v1247_v3, %v1251_v61  ;;  %v9216_v36 = vcombine.low %v1271_v40, %v1275_v12  ;;  %v9097_v38 = vcombine.high %v1151_v22, %v1155_v23  ;;  %v1159_v53 = vld [vmem:[%s9818_s7 + $0x1a18] sm:$0xff] }
 0x43f   : > { %7700 = vmatprep.subr.bf16.mxu0 %v9049_v44  ;;  %7741 = vmatprep.subr.bf16.mxu1 %v9177_v39  ;;  %v1163_v42 = vld [vmem:[%s9818_s7 + $0x1a38] sm:$0xff] }
 0x440   : > { %7730 = vmatprep.mubr.bf16.mxu0 %v10094_v15  ;;  %7771 = vmatprep.mubr.bf16.mxu1 %v10099_v19  ;;  %v1259_v15 = vld [vmem:[%s9818_s7 + $0x1d38] sm:$0xff]  ;;  %v9192_v19 = vcombine.low %v1247_v3, %v1251_v61  ;;  %v9105_v21 = vcombine.high %v1159_v53, %v1163_v42 }
 0x441   : > { %v9201_v2 = vcombine.high %v1255_v62, %v1259_v15  ;;  %v9200_v8 = vcombine.low %v1255_v62, %v1259_v15  ;;  %v1287_v46 = vld [vmem:[%s9818_s7 + $0x1e18] sm:$0xff] }
 0x442   : > { %7701 = vmatpush1.bf16.msra.mxu0 %v9048_v47  ;;  %7742 = vmatpush1.bf16.msra.mxu1 %v9176_v50  ;;  %v1291_v47 = vld [vmem:[%s9818_s7 + $0x1e38] sm:$0xff] }
 0x443   : > { %7702 = vmatprep.subr.bf16.mxu0 %v9057_v17  ;;  %7743 = vmatprep.subr.bf16.mxu1 %v9185_v55  ;;  %v9096_v17 = vcombine.low %v1151_v22, %v1155_v23  ;;  %v9224_v55 = vcombine.low %v1279_v41, %v1283_v26  ;;  %v9233_v56 = vcombine.high %v1287_v46, %v1291_v47  ;;  %v1167_v3 = vld [vmem:[%s9818_s7 + $0x1a58] sm:$0xff] }
 0x444   : > { %v1171_v61 = vld [vmem:[%s9818_s7 + $0x1a78] sm:$0xff] }
 0x445   : > { %v9113_v54 = vcombine.high %v1167_v3, %v1171_v61  ;;  %v1175_v62 = vld [vmem:[%s9818_s7 + $0x1a98] sm:$0xff] }
 0x446   : > { %7703 = vmatpush1.bf16.msra.mxu0 %v9056_v7  ;;  %7744 = vmatpush1.bf16.msra.mxu1 %v9184_v51  ;;  %v1295_v7 = vld [vmem:[%s9818_s7 + $0x1e58] sm:$0xff] }
 0x447   : > { %7704 = vmatprep.subr.bf16.mxu0 %v9065_v63  ;;  %7745 = vmatprep.subr.bf16.mxu1 %v9193_v0  ;;  %v1299_v51 = vld [vmem:[%s9818_s7 + $0x1e78] sm:$0xff]  ;;  %v9104_v63 = vcombine.low %v1159_v53, %v1163_v42  ;;  %v9232_v0 = vcombine.low %v1287_v46, %v1291_v47 }
 0x448   : > { %v9241_v29 = vcombine.high %v1295_v7, %v1299_v51  ;;  %v1179_v15 = vld [vmem:[%s9818_s7 + $0x1ab8] sm:$0xff] }
 0x449   : > { %v9121_v4 = vcombine.high %v1175_v62, %v1179_v15  ;;  %v1183_v5 = vld [vmem:[%s9818_s7 + $0x1ad8] sm:$0xff] }
 0x44a   : > { %7705 = vmatpush1.bf16.msra.mxu0 %v9064_v32  ;;  %7746 = vmatpush1.bf16.msra.mxu1 %v9192_v19  ;;  %v1303_v32 = vld [vmem:[%s9818_s7 + $0x1e98] sm:$0xff] }
 0x44b   : > { %7706 = vmatprep.subr.bf16.mxu0 %v9073_v1  ;;  %7747 = vmatprep.subr.bf16.mxu1 %v9201_v2  ;;  %v1307_v19 = vld [vmem:[%s9818_s7 + $0x1eb8] sm:$0xff]  ;;  %v9112_v1 = vcombine.low %v1167_v3, %v1171_v61  ;;  %v9240_v2 = vcombine.low %v1295_v7, %v1299_v51 }
 0x44c   : > { %v9249_v57 = vcombine.high %v1303_v32, %v1307_v19  ;;  %v1187_v58 = vld [vmem:[%s9818_s7 + $0x1af8] sm:$0xff] }
 0x44d   : > { %v9129_v35 = vcombine.high %v1183_v5, %v1187_v58  ;;  %v1191_v40 = vld [vmem:[%s9818_s7 + $0x1b18] sm:$0xff] }
 0x44e   : > { %7707 = vmatpush1.bf16.msra.mxu0 %v9072_v6  ;;  %7748 = vmatpush1.bf16.msra.mxu1 %v9200_v8  ;;  %v1311_v6 = vld [vmem:[%s9818_s7 + $0x1ed8] sm:$0xff] }
 0x44f   : > { %7708 = vmatprep.subr.bf16.mxu0 %v9081_v59  ;;  %7749 = vmatprep.subr.bf16.mxu1 %v9209_v10  ;;  %v1315_v8 = vld [vmem:[%s9818_s7 + $0x1ef8] sm:$0xff]  ;;  %v9120_v59 = vcombine.low %v1175_v62, %v1179_v15  ;;  %v9248_v10 = vcombine.low %v1303_v32, %v1307_v19 }
 0x450   : > { %v7404_v18 = vpop.f32.mrb[44].mxu0  ;;  %v7445_v37 = vpop.f32.mrb[44].mxu1  ;;  %v9257_v60 = vcombine.high %v1311_v6, %v1315_v8  ;;  %v1195_v12 = vld [vmem:[%s9818_s7 + $0x1b38] sm:$0xff] }
 0x451   : > { %v7405_v24 = vadd.f32 %v7404_v18, %v10926_v9  ;;  %v7406_v25 = vpop.f32.mrb[45].mxu0  ;;  %v7447_v30 = vpop.f32.mrb[45].mxu1  ;;  %v9256_v18 = vcombine.low %v1311_v6, %v1315_v8  ;;  %v1199_v23 = vld [vmem:[%s9818_s7 + $0x1b58] sm:$0xff] }
 0x452   : > { %v7407_v28 = vadd.f32 %v7406_v25, %v10928_v11  ;;  %v7408_v31 = vpop.f32.mrb[46].mxu0  ;;  %7709 = vmatpush1.bf16.msra.mxu0 %v9080_v13  ;;  %v7449_v52 = vpop.f32.mrb[46].mxu1  ;;  %7750 = vmatpush1.bf16.msra.mxu1 %v9208_v14  ;;  %v9225_v11 = vcombine.high %v1279_v41, %v1283_v26  ;;  %v1319_v13 = vld [vmem:[%s9818_s7 + $0x1f18] sm:$0xff]  ;;  %v9136_v41 = vcombine.low %v1191_v40, %v1195_v12 }
 0x453   : > { %v7446_v49 = vadd.f32 %v7445_v37, %v7405_v24  ;;  %v7409_v9 = vpop.f32.mrb[47].mxu0  ;;  %7710 = vmatprep.subr.bf16.mxu0 %v9089_v16  ;;  %v7450_v39 = vpop.f32.mrb[47].mxu1  ;;  %7751 = vmatprep.subr.bf16.mxu1 %v9217_v20  ;;  %v1323_v14 = vld [vmem:[%s9818_s7 + $0x1f38] sm:$0xff]  ;;  %v9128_v16 = vcombine.low %v1183_v5, %v1187_v58  ;;  %v9137_v20 = vcombine.high %v1191_v40, %v1195_v12 }
 0x454   : > { %v7448_v44 = vadd.f32 %v7447_v30, %v7407_v28  ;;  %v9265_v22 = vcombine.high %v1319_v13, %v1323_v14  ;;  %v1203_v24 = vld [vmem:[%s9818_s7 + $0x1b78] sm:$0xff]  ;;  %v9264_v26 = vcombine.low %v1319_v13, %v1323_v14 }
 0x455   : > { %v7784_v43 = vadd.f32 %v7446_v49, %v320_v27  ;;  %v1327_v37 = vld [vmem:[%s9818_s7 + $0x1f58] sm:$0xff]  ;;  %v9145_v27 = vcombine.high %v1199_v23, %v1203_v24 }
 0x456   : > { %v7785_v50 = vadd.f32 %v7448_v44, %v321_v34  ;;  %7711 = vmatpush1.bf16.msra.mxu0 %v9088_v33  ;;  %7752 = vmatpush1.bf16.msra.mxu1 %v9216_v36  ;;  %v1331_v25 = vld [vmem:[%s9818_s7 + $0x1f78] sm:$0xff]  ;;  %v9144_v34 = vcombine.low %v1199_v23, %v1203_v24  ;;  %v322_v23 = vld [vmem:[#allocation2 + $0x30] sm:$0xff] }
 0x457   : > { %7792 = vst [vmem:[#allocation2 + $0x20] sm:$0xff] %v7784_v43  ;;  %7712 = vmatprep.subr.bf16.mxu0 %v9097_v38  ;;  %7753 = vmatprep.subr.bf16.mxu1 %v9225_v11  ;;  %v9273_v28 = vcombine.high %v1327_v37, %v1331_v25  ;;  %v1207_v30 = vld [vmem:[%s9818_s7 + $0x1b98] sm:$0xff]  ;;  %v9272_v52 = vcombine.low %v1327_v37, %v1331_v25 }
 0x458   : > { %7793 = vst [vmem:[#allocation2 + $0x28] sm:$0xff] %v7785_v50  ;;  %v1211_v31 = vld [vmem:[%s9818_s7 + $0x1bb8] sm:$0xff] }
 0x459   : > { %v1335_v33 = vld [vmem:[%s9818_s7 + $0x1f98] sm:$0xff]  ;;  %v9153_v9 = vcombine.high %v1207_v30, %v1211_v31  ;;  %v9152_v53 = vcombine.low %v1207_v30, %v1211_v31 }
 0x45a   : > { %7713 = vmatpush1.bf16.msra.mxu0 %v9096_v17  ;;  %7754 = vmatpush1.bf16.msra.mxu1 %v9224_v55  ;;  %v1339_v49 = vld [vmem:[%s9818_s7 + $0x1fb8] sm:$0xff] }
 0x45b   : > { %7714 = vmatprep.subr.bf16.mxu0 %v9105_v21  ;;  %7755 = vmatprep.subr.bf16.mxu1 %v9233_v56  ;;  %v9281_v36 = vcombine.high %v1335_v33, %v1339_v49  ;;  %v1215_v38 = vld [vmem:[%s9818_s7 + $0x1bd8] sm:$0xff]  ;;  %v9280_v42 = vcombine.low %v1335_v33, %v1339_v49 }
 0x45c   : > { %v1219_v44 = vld [vmem:[%s9818_s7 + $0x1bf8] sm:$0xff] }
 0x45d   : > { %v1343_v39 = vld [vmem:[%s9818_s7 + $0x1fd8] sm:$0xff]  ;;  %v9161_v43 = vcombine.high %v1215_v38, %v1219_v44  ;;  %v9160_v47 = vcombine.low %v1215_v38, %v1219_v44 }
 0x45e   : > { %7715 = vmatpush1.bf16.msra.mxu0 %v9104_v63  ;;  %7756 = vmatpush1.bf16.msra.mxu1 %v9232_v0  ;;  %v1347_v11 = vld [vmem:[%s9818_s7 + $0x1ff8] sm:$0xff] }
 0x45f   : > { %7716 = vmatprep.subr.bf16.mxu0 %v9113_v54  ;;  %7757 = vmatprep.subr.bf16.mxu1 %v9241_v29  ;;  %v9289_v46 = vcombine.high %v1343_v39, %v1347_v11  ;;  %v9288_v50 = vcombine.low %v1343_v39, %v1347_v11  ;;  %v7800_v11 = vld [vmem:[#allocation2] sm:$0xff] (!%p9290_p3) }
 0x462   : > { %7717 = vmatpush1.bf16.msra.mxu0 %v9112_v1  ;;  %7758 = vmatpush1.bf16.msra.mxu1 %v9240_v2 }
 0x463   : > { %7718 = vmatprep.subr.bf16.mxu0 %v9121_v4  ;;  %7759 = vmatprep.subr.bf16.mxu1 %v9249_v57 }
 0x466   : > { %7719 = vmatpush1.bf16.msra.mxu0 %v9120_v59  ;;  %7760 = vmatpush1.bf16.msra.mxu1 %v9248_v10 }
 0x467   : > { %7720 = vmatprep.subr.bf16.mxu0 %v9129_v35  ;;  %7761 = vmatprep.subr.bf16.mxu1 %v9257_v60 }
 0x46a   : > { %7721 = vmatpush1.bf16.msra.mxu0 %v9128_v16  ;;  %7762 = vmatpush1.bf16.msra.mxu1 %v9256_v18 }
 0x46b   : > { %7722 = vmatprep.subr.bf16.mxu0 %v9137_v20  ;;  %7763 = vmatprep.subr.bf16.mxu1 %v9265_v22 }
 0x46e   : > { %7723 = vmatpush1.bf16.msra.mxu0 %v9136_v41  ;;  %7764 = vmatpush1.bf16.msra.mxu1 %v9264_v26  ;;  %v323_v26 = vld [vmem:[#allocation2 + $0x38] sm:$0xff] }
 0x46f   : > { %7724 = vmatprep.subr.bf16.mxu0 %v9145_v27  ;;  %7765 = vmatprep.subr.bf16.mxu1 %v9273_v28 }
 0x472   : > { %7725 = vmatpush1.bf16.msra.mxu0 %v9144_v34  ;;  %7766 = vmatpush1.bf16.msra.mxu1 %v9272_v52  ;;  %v7810_v34 = vlaneseq (!%p9290_p3) }
 0x473   : > { %7726 = vmatprep.subr.bf16.mxu0 %v9153_v9  ;;  %7767 = vmatprep.subr.bf16.mxu1 %v9281_v36  ;;  %v11036_v9 = vld [vmem:[%s9825_s8] ss:$4 sm:$0xff] (!%p9290_p3) }
 0x474   : > { %v7811_v52 = vshrl.u32 (!%p9290_p3), %v7810_v34, 7 }
 0x476   : > { %7727 = vmatpush1.bf16.msra.mxu0 %v9152_v53  ;;  %7768 = vmatpush1.bf16.msra.mxu1 %v9280_v42  ;;  %v11038_v36 = vsub.s32 (!%p9290_p3), 0, %v7811_v52  ;;  %v11040_v38 = vsub.s32 (!%p9290_p3), 1, %v7811_v52  ;;  %v11042_v44 = vsub.s32 (!%p9290_p3), 2, %v7811_v52  ;;  %v11044_v39 = vsub.s32 (!%p9290_p3), 3, %v7811_v52  ;;  %v7801_v53 = vld [vmem:[#allocation2 + $0x8] sm:$0xff] (!%p9290_p3) }
 0x477   : > { %7728 = vmatprep.subr.bf16.mxu0 %v9161_v43  ;;  %7769 = vmatprep.subr.bf16.mxu1 %v9289_v46  ;;  %v11046_v42 = vsub.s32 (!%p9290_p3), 4, %v7811_v52 }
 0x478   : > { %v7813_v43 = vrot.slane (!%p9290_p3), %v11036_v9, %v11038_v36  ;;  %v7817_v46 = vrot.slane (!%p9290_p3), %v11036_v9, %v11040_v38 }
 0x47a   : > { %7729 = vmatpush1.bf16.msra.mxu0 %v9160_v47  ;;  %7770 = vmatpush1.bf16.msra.mxu1 %v9288_v50  ;;  %v7802_v47 = vld [vmem:[#allocation2 + $0x10] sm:$0xff] (!%p9290_p3)  ;;  %v7821_v50 = vrot.slane (!%p9290_p3), %v11036_v9, %v11042_v44 }
 0x47d   : > { %7731 = vmatmul.mubr.bf16.vlgmr.msra.gmra.mrb[60].mxu0 %v10164_v45  ;;  %7772 = vmatmul.mubr.bf16.vlgmr.msra.gmra.mrb[60].mxu1 %v10168_v48 }
 0x490   : > { %v7486_v17 = vpop.f32.mrb[48].mxu0  ;;  %v7527_v55 = vpop.f32.mrb[48].mxu1 }
 0x491   : > { %v7488_v21 = vpop.f32.mrb[49].mxu0  ;;  %v7528_v56 = vadd.f32 %v7527_v55, %v7486_v17  ;;  %v7529_v3 = vpop.f32.mrb[49].mxu1  ;;  %v7803_v17 = vld [vmem:[#allocation2 + $0x18] sm:$0xff] (!%p9290_p3)  ;;  %v11054_v55 = vsub.s32 (!%p9290_p3), 5, %v7811_v52 }
 0x492   : > { %v7490_v61 = vpop.f32.mrb[50].mxu0  ;;  %v7530_v7 = vadd.f32 %v7529_v3, %v7488_v21  ;;  %v7531_v51 = vpop.f32.mrb[50].mxu1  ;;  %v7850_v21 = vadd.f32 (!%p9290_p3), %v7813_v43, %v7800_v11  ;;  %v7825_v3 = vrot.slane (!%p9290_p3), %v11036_v9, %v11044_v39 }
 0x493   : > { %v7491_v63 = vpop.f32.mrb[51].mxu0  ;;  %v7532_v0 = vpop.f32.mrb[51].mxu1  ;;  %v7804_v61 = vld [vmem:[#allocation2 + $0x20] sm:$0xff] (!%p9290_p3)  ;;  %v7829_v51 = vrot.slane (!%p9290_p3), %v11036_v9, %v11046_v42 }
 0x494   : > { %v7858_v63 = vrot.slane (!%p9290_p3), %v7850_v21, 4 }
 0x4d0   : > { %v7568_v54 = vpop.f32.mrb[52].mxu0  ;;  %v7609_v62 = vpop.f32.mrb[52].mxu1 }
 0x4d1   : > { %v7569_v29 = vadd.f32 %v7568_v54, %v7528_v56  ;;  %v7570_v15 = vpop.f32.mrb[53].mxu0  ;;  %v7611_v19 = vpop.f32.mrb[53].mxu1  ;;  %v7851_v56 = vadd.f32 (!%p9290_p3), %v7817_v46, %v7801_v53  ;;  %v11060_v54 = vadd.f32 (!%p9290_p3), %v7825_v3, %v7803_v17 }
 0x4d2   : > { %v7571_v32 = vadd.f32 %v7570_v15, %v7530_v7  ;;  %v7572_v1 = vpop.f32.mrb[54].mxu0  ;;  %v7613_v2 = vpop.f32.mrb[54].mxu1  ;;  %v7852_v7 = vadd.f32 (!%p9290_p3), %v7821_v50, %v7802_v47 }
 0x4d3   : > { %v7610_v45 = vadd.f32 %v7609_v62, %v7569_v29  ;;  %v7573_v48 = vpop.f32.mrb[55].mxu0  ;;  %v7614_v57 = vpop.f32.mrb[55].mxu1  ;;  %v7864_v0 = vrot.slane (!%p9290_p3), %v7851_v56, 4  ;;  %v7805_v29 = vld [vmem:[#allocation2 + $0x28] sm:$0xff] (!%p9290_p3)  ;;  %v11062_v62 = vsub.s32 (!%p9290_p3), 6, %v7811_v52  ;;  %v7859_v1 = vadd.f32 (!%p9290_p3), %v7858_v63, %v7850_v21 }
 0x4d4   : > { %v7612_v4 = vadd.f32 %v7611_v19, %v7571_v32  ;;  %v7870_v15 = vrot.slane (!%p9290_p3), %v7852_v7, 4  ;;  %v7854_v32 = vadd.f32 (!%p9290_p3), %v7829_v51, %v7804_v61  ;;  %v7833_v19 = vrot.slane (!%p9290_p3), %v11036_v9, %v11054_v55 }
 0x4d5   : > { %v7876_v2 = vrot.slane (!%p9290_p3), %v11060_v54, 4 }
 0x4d6   : > { %v7871_v48 = vadd.f32 (!%p9290_p3), %v7870_v15, %v7852_v7  ;;  %v11067_v57 = vadd.f32 (!%p9290_p3), %v7833_v19, %v7805_v29 }
 0x510   : > { %v7650_v5 = vpop.f32.mrb[56].mxu0  ;;  %v7691_v6 = vpop.f32.mrb[56].mxu1 }
 0x511   : > { %v7651_v58 = vadd.f32 %v7650_v5, %v7610_v45  ;;  %v7652_v8 = vpop.f32.mrb[57].mxu0  ;;  %v7693_v10 = vpop.f32.mrb[57].mxu1  ;;  %v7865_v45 = vadd.f32 (!%p9290_p3), %v7864_v0, %v7851_v56 }
 0x512   : > { %v7653_v59 = vadd.f32 %v7652_v8, %v7612_v4  ;;  %v7654_v35 = vpop.f32.mrb[58].mxu0  ;;  %v7695_v40 = vpop.f32.mrb[58].mxu1  ;;  %v7882_v4 = vrot.slane (!%p9290_p3), %v7854_v32, 4  ;;  %v7877_v8 = vadd.f32 (!%p9290_p3), %v7876_v2, %v11060_v54 }
 0x513   : > { %v7692_v60 = vadd.f32 %v7691_v6, %v7651_v58  ;;  %v7655_v12 = vpop.f32.mrb[59].mxu0  ;;  %v7696_v14 = vpop.f32.mrb[59].mxu1  ;;  %v7860_v58 = vrot.slane (!%p9290_p3), %v7859_v1, 2  ;;  %v7866_v6 = vrot.slane (!%p9290_p3), %v7865_v45, 2  ;;  %v11073_v40 = vsub.s32 (!%p9290_p3), 7, %v7811_v52 }
 0x514   : > { %v7694_v13 = vadd.f32 %v7693_v10, %v7653_v59  ;;  %v7837_v59 = vrot.slane (!%p9290_p3), %v11036_v9, %v11062_v62  ;;  %v7872_v10 = vrot.slane (!%p9290_p3), %v7871_v48, 2  ;;  %v7883_v35 = vadd.f32 (!%p9290_p3), %v7882_v4, %v7854_v32 }
 0x515   : > { %v7861_v12 = vadd.f32 (!%p9290_p3), %v7860_v58, %v7859_v1  ;;  %v7878_v14 = vrot.slane (!%p9290_p3), %v7877_v8, 2 }
 0x550   : > { %v7732_v16 = vpop.f32.mrb[60].mxu0  ;;  %v7773_v20 = vpop.f32.mrb[60].mxu1 }
 0x551   : > { %v7733_v18 = vadd.f32 %v7732_v16, %v7692_v60  ;;  %v7734_v22 = vpop.f32.mrb[61].mxu0  ;;  %v7775_v37 = vpop.f32.mrb[61].mxu1  ;;  %v7888_v60 = vrot.slane (!%p9290_p3), %v11067_v57, 4 }
 0x552   : > { %v7735_v24 = vadd.f32 %v7734_v22, %v7694_v13  ;;  %v7736_v25 = vpop.f32.mrb[62].mxu0  ;;  %v7777_v27 = vpop.f32.mrb[62].mxu1  ;;  %7799 = sbr.rel (%p9290_p3) target bundleno = 1432 (0x598), region = 48  ;;  %v7867_v13 = vadd.f32 (!%p9290_p3), %v7866_v6, %v7865_v45 }
 0x553   : > { %v7774_v41 = vadd.f32 %v7773_v20, %v7733_v18  ;;  %v7737_v28 = vpop.f32.mrb[63].mxu0  ;;  %v7778_v31 = vpop.f32.mrb[63].mxu1  ;;  %v7873_v18 = vadd.f32 (!%p9290_p3), %v7872_v10, %v7871_v48  ;;  %v7884_v20 = vrot.slane (!%p9290_p3), %v7883_v35, 2  ;;  %v7889_v22 = vadd.f32 (!%p9290_p3), %v7888_v60, %v11067_v57 }
 0x554   : > { %v7776_v30 = vadd.f32 %v7775_v37, %v7735_v24  ;;  %v7868_v24 = vrot.slane (!%p9290_p3), %v7867_v13, 1  ;;  %v7879_v37 = vadd.f32 (!%p9290_p3), %v7878_v14, %v7877_v8 }
 0x555   : > { %v7786_v33 = vadd.f32 %v7774_v41, %v322_v23  ;;  %v7862_v23 = vrot.slane (!%p9290_p3), %v7861_v12, 1  ;;  %v7885_v27 = vadd.f32 (!%p9290_p3), %v7884_v20, %v7883_v35  ;;  %v7890_v28 = vrot.slane (!%p9290_p3), %v7889_v22, 2 }
 0x556   : > { %v7787_v49 = vadd.f32 %v7776_v30, %v323_v26  ;;  %v7874_v26 = vrot.slane (!%p9290_p3), %v7873_v18, 1  ;;  %v7841_v30 = vrot.slane (!%p9290_p3), %v11036_v9, %v11073_v40 }
 0x557   : > { %7794 = vst [vmem:[#allocation2 + $0x30] sm:$0xff] %v7786_v33  ;;  %v7863_v31 = vadd.f32 (!%p9290_p3), %v7862_v23, %v7861_v12  ;;  %v7869_v33 = vadd.f32 (!%p9290_p3), %v7868_v24, %v7867_v13  ;;  %v7886_v11 = vrot.slane (!%p9290_p3), %v7885_v27, 1  ;;  %v7891_v53 = vadd.f32 (!%p9290_p3), %v7890_v28, %v7889_v22 }
 0x558   : > { %7795 = vst [vmem:[#allocation2 + $0x38] sm:$0xff] %v7787_v49  ;;  %v7880_v49 = vrot.slane (!%p9290_p3), %v7879_v37, 1  ;;  %v7875_v52 = vadd.f32 (!%p9290_p3), %v7874_v26, %v7873_v18 }
 0x559   : > { %v7907_v46 = vmul.f32 0.125, %v7863_v31  ;;  %v7908_v47 = vmul.f32 0.125, %v7869_v33  ;;  %v7887_v61 = vadd.f32 %v7886_v11, %v7885_v27  ;;  %v7892_v51 = vrot.slane %v7891_v53, 1 }
 0x55a   : > { %v7881_v50 = vadd.f32 %v7880_v49, %v7879_v37  ;;  %v7909_v3 = vmul.f32 0.125, %v7875_v52 }
 0x55b   : > { %v11085_v9 = vsub.f32 %v7850_v21, %v7907_v46  ;;  %v11087_v0 = vsub.f32 %v7851_v56, %v7908_v47  ;;  %v7911_v1 = vmul.f32 0.125, %v7887_v61  ;;  %v7893_v45 = vadd.f32 %v7892_v51, %v7891_v53 }
 0x55c   : > { %v7910_v29 = vmul.f32 0.125, %v7881_v50  ;;  %v11089_v19 = vsub.f32 %v7852_v7, %v7909_v3 }
 0x55d   : > { %v7923_v48 = vmul.f32 %v11085_v9, %v11085_v9  ;;  %v7924_v4 = vmul.f32 %v11087_v0, %v11087_v0  ;;  %v11101_v58 = vsub.f32 %v7854_v32, %v7911_v1  ;;  %v7912_v7 = vmul.f32 0.125, %v7893_v45 }
 0x55e   : > { %v7806_v5 = vld [vmem:[#allocation2 + $0x30] sm:$0xff]  ;;  %v7925_v56 = vmul.f32 %v11089_v19, %v11089_v19 }
 0x55f   : > { %v11075_v16 = vadd.f32 %v7837_v59, %v7806_v5  ;;  %v7807_v41 = vld [vmem:[#allocation2 + $0x38] sm:$0xff]  ;;  %v11097_v5 = vsub.f32 %v11060_v54, %v7910_v29  ;;  %v7931_v8 = vrot.slane %v7923_v48, 4  ;;  %v7937_v59 = vrot.slane %v7924_v4, 4 }
 0x560   : > { %v11082_v43 = vadd.f32 %v7841_v30, %v7807_v41  ;;  %v7943_v60 = vrot.slane %v7925_v56, 4  ;;  %v7927_v12 = vmul.f32 %v11101_v58, %v11101_v58  ;;  %v11108_v54 = vsub.f32 %v11067_v57, %v7912_v7 }
 0x561   : > { %v7894_v25 = vrot.slane %v11075_v16, 4  ;;  %v7926_v10 = vmul.f32 %v11097_v5, %v11097_v5  ;;  %v7932_v14 = vadd.f32 %v7931_v8, %v7923_v48  ;;  %v7938_v18 = vadd.f32 %v7937_v59, %v7924_v4 }
 0x562   : > { %v7900_v63 = vrot.slane %v11082_v43, 4  ;;  %v7944_v22 = vadd.f32 %v7943_v60, %v7925_v56  ;;  %v7955_v23 = vrot.slane %v7927_v12, 4  ;;  %v7928_v24 = vmul.f32 %v11108_v54, %v11108_v54 }
 0x563   : > { %v7895_v34 = vadd.f32 %v7894_v25, %v11075_v16  ;;  %v7949_v32 = vrot.slane %v7926_v10, 4  ;;  %v7933_v25 = vrot.slane %v7932_v14, 2  ;;  %v7939_v41 = vrot.slane %v7938_v18, 2 }
 0x564   : > { %v7901_v2 = vadd.f32 %v7900_v63, %v11082_v43  ;;  %v7945_v28 = vrot.slane %v7944_v22, 2  ;;  %v7956_v57 = vadd.f32 %v7955_v23, %v7927_v12  ;;  %v7961_v30 = vrot.slane %v7928_v24, 4 }
 0x565   : > { %v7896_v17 = vrot.slane %v7895_v34, 2  ;;  %v7950_v26 = vadd.f32 %v7949_v32, %v7926_v10  ;;  %v7934_v33 = vadd.f32 %v7933_v25, %v7932_v14  ;;  %v7940_v49 = vadd.f32 %v7939_v41, %v7938_v18 }
 0x566   : > { %v7902_v6 = vrot.slane %v7901_v2, 2  ;;  %v7946_v11 = vadd.f32 %v7945_v28, %v7944_v22  ;;  %v7957_v53 = vrot.slane %v7956_v57, 2  ;;  %v7962_v46 = vadd.f32 %v7961_v30, %v7928_v24 }
 0x567   : > { %v7897_v15 = vadd.f32 %v7896_v17, %v7895_v34  ;;  %v7951_v34 = vrot.slane %v7950_v26, 2  ;;  %v7935_v50 = vrot.slane %v7934_v33, 1  ;;  %v7941_v17 = vrot.slane %v7940_v49, 1 }
 0x568   : > { %v7903_v13 = vadd.f32 %v7902_v6, %v7901_v2  ;;  %v7958_v51 = vadd.f32 %v7957_v53, %v7956_v57  ;;  %v7963_v63 = vrot.slane %v7962_v46, 2 }
 0x569   : > { %v7898_v21 = vrot.slane %v7897_v15, 1  ;;  %v7952_v3 = vadd.f32 %v7951_v34, %v7950_v26  ;;  %v7942_v1 = vadd.f32 %v7941_v17, %v7940_v49  ;;  %v11123_v49 = vld [vmem:[%s9825_s8 + $0x1] ss:$4 sm:$0xff] }
 0x56a   : > { %v7904_v37 = vrot.slane %v7903_v13, 1  ;;  %v7959_v4 = vrot.slane %v7958_v51, 1  ;;  %v8017_v53 = vrot.slane %v11123_v49, %v11038_v36 }
 0x56b   : > { %v7899_v35 = vadd.f32 %v7898_v21, %v7897_v15  ;;  %v7936_v15 = vadd.f32 %v7935_v50, %v7934_v33  ;;  %v7953_v45 = vrot.slane %v7952_v3, 1  ;;  %v7964_v21 = vadd.f32 %v7963_v63, %v7962_v46 }
 0x56c   : > { %v7905_v31 = vadd.f32 %v7904_v37, %v7903_v13  ;;  %v7980_v6 = vmul.f32 0.125, %v7942_v1  ;;  %v8021_v50 = vrot.slane %v11123_v49, %v11040_v38 }
 0x56d   : > { %v7913_v20 = vmul.f32 0.125, %v7899_v35  ;;  %v7979_v7 = vmul.f32 0.125, %v7936_v15  ;;  %v7954_v8 = vadd.f32 %v7953_v45, %v7952_v3  ;;  %v7960_v35 = vadd.f32 %v7959_v4, %v7958_v51 }
 0x56e   : > { %v7914_v47 = vmul.f32 0.125, %v7905_v31  ;;  %v7965_v60 = vrot.slane %v7964_v21, 1  ;;  %v7988_v13 = vadd.f32 1e-05, %v7980_v6  ;;  %v8033_v4 = vrot.slane %v11123_v49, %v11046_v42 }
 0x56f   : > { %v11113_v27 = vsub.f32 %v11075_v16, %v7913_v20  ;;  %v7947_v16 = vrot.slane %v7946_v11, 1  ;;  %v7982_v14 = vmul.f32 0.125, %v7954_v8  ;;  %v7983_v20 = vmul.f32 0.125, %v7960_v35 }
 0x570   : > { %v11118_v29 = vsub.f32 %v11082_v43, %v7914_v47  ;;  %v7987_v43 = vadd.f32 1e-05, %v7979_v7  ;;  %v7966_v22 = vadd.f32 %v7965_v60, %v7964_v21 }
 0x571   : > { %v7929_v52 = vmul.f32 %v11113_v27, %v11113_v27  ;;  %v7948_v48 = vadd.f32 %v7947_v16, %v7946_v11  ;;  %v7990_v24 = vadd.f32 1e-05, %v7982_v14  ;;  %v7991_v25 = vadd.f32 1e-05, %v7983_v20  ;;  %v11126_v11 = vld [vmem:[%s9825_s8 + $0x2] ss:$4 sm:$0xff] }
 0x572   : > { %v7930_v56 = vmul.f32 %v11118_v29, %v11118_v29  ;;  %9401 = vrsqrt.f32 %v7987_v43  ;;  %v7984_v41 = vmul.f32 0.125, %v7966_v22  ;;  %v8025_v16 = vrot.slane %v11123_v49, %v11042_v44 }
 0x573   : > { %v7967_v61 = vrot.slane %v7929_v52, 4  ;;  %v7981_v10 = vmul.f32 0.125, %v7948_v48  ;;  %9403 = vrsqrt.f32 %v7988_v13  ;;  %v8072_v1 = vrot.slane %v11126_v11, %v11040_v38 }
 0x574   : > { %v7973_v12 = vrot.slane %v7930_v56, 4  ;;  %v7992_v57 = vadd.f32 1e-05, %v7984_v41  ;;  %v8076_v45 = vrot.slane %v11126_v11, %v11042_v44  ;;  %v8080_v38 = vrot.slane %v11126_v11, %v11044_v39 }
 0x575   : > { %v7968_v2 = vadd.f32 %v7967_v61, %v7929_v52  ;;  %v7989_v32 = vadd.f32 1e-05, %v7981_v10  ;;  %v8068_v61 = vrot.slane %v11126_v11, %v11038_v36  ;;  %v8037_v44 = vrot.slane %v11123_v49, %v11054_v55 }
 0x576   : > { %v7974_v23 = vadd.f32 %v7973_v12, %v7930_v56  ;;  %v8041_v13 = vrot.slane %v11123_v49, %v11062_v62  ;;  %v8045_v41 = vrot.slane %v11123_v49, %v11073_v40 }
 0x577   : > { %v7969_v59 = vrot.slane %v7968_v2, 2  ;;  %9405 = vrsqrt.f32 %v7989_v32 }
 0x578   : > { %v7975_v26 = vrot.slane %v7974_v23, 2  ;;  %9407 = vrsqrt.f32 %v7990_v24 }
 0x579   : > { %v7970_v18 = vadd.f32 %v7969_v59, %v7968_v2  ;;  %9409 = vrsqrt.f32 %v7991_v25  ;;  %v8029_v2 = vrot.slane %v11123_v49, %v11044_v39  ;;  %v8084_v59 = vrot.slane %v11126_v11, %v11046_v42 }
 0x57a   : > { %v7976_v30 = vadd.f32 %v7975_v26, %v7974_v23  ;;  %9411 = vrsqrt.f32 %v7992_v57  ;;  %v8088_v39 = vrot.slane %v11126_v11, %v11054_v55  ;;  %v8092_v55 = vrot.slane %v11126_v11, %v11062_v62 }
 0x57b   : > { %v7971_v37 = vrot.slane %v7970_v18, 1  ;;  %v8096_v62 = vrot.slane %v11126_v11, %v11073_v40 }
 0x57c   : > { %v7977_v33 = vrot.slane %v7976_v30, 1  ;;  %v9402_v47 = vpop.eup %9401 }
 0x57d   : > { %v7972_v28 = vadd.f32 %v7971_v37, %v7970_v18  ;;  %v9404_v17 = vpop.eup %9403  ;;  %v8003_v3 = vmul.f32 %v9402_v47, %v11085_v9 }
 0x57e   : > { %v7978_v52 = vadd.f32 %v7977_v33, %v7976_v30  ;;  %v8004_v15 = vmul.f32 %v9404_v17, %v11087_v0 }
 0x57f   : > { %v7985_v31 = vmul.f32 0.125, %v7972_v28  ;;  %v8054_v48 = vmul.f32 %v8017_v53, %v8003_v3 }
 0x580   : > { %v7986_v46 = vmul.f32 0.125, %v7978_v52  ;;  %v8055_v56 = vmul.f32 %v8021_v50, %v8004_v15 }
 0x581   : > { %v7993_v34 = vadd.f32 1e-05, %v7985_v31  ;;  %v9406_v63 = vpop.eup %9405  ;;  %v8105_v6 = vadd.f32 %v8068_v61, %v8054_v48 }
 0x582   : > { %v7994_v51 = vadd.f32 1e-05, %v7986_v46  ;;  %v9408_v9 = vpop.eup %9407  ;;  %v8005_v36 = vmul.f32 %v9406_v63, %v11089_v19  ;;  %v8106_v10 = vadd.f32 %v8072_v1, %v8055_v56 }
 0x583   : > { %9413 = vrsqrt.f32 %v7993_v34  ;;  %v9410_v21 = vpop.eup %9409  ;;  %v8006_v0 = vmul.f32 %v9408_v9, %v11097_v5  ;;  %v8113_v60 = vmax.f32 %v8105_v6, 0.0 }
 0x584   : > { %9415 = vrsqrt.f32 %v7994_v51  ;;  %v9412_v7 = vpop.eup %9411  ;;  %v8056_v8 = vmul.f32 %v8025_v16, %v8005_v36  ;;  %v8007_v19 = vmul.f32 %v9410_v21, %v11101_v58  ;;  %v8114_v14 = vmax.f32 %v8106_v10, 0.0 }
 0x585   : > { %v8057_v35 = vmul.f32 %v8029_v2, %v8006_v0  ;;  %v8008_v5 = vmul.f32 %v9412_v7, %v11108_v54  ;;  %8121 = vst [vmem:[%s9841_s4] sm:$0xff] %v8113_v60 }
 0x586   : > { %v8107_v12 = vadd.f32 %v8076_v45, %v8056_v8  ;;  %v8058_v43 = vmul.f32 %v8033_v4, %v8007_v19  ;;  %8122 = vst [vmem:[%s9841_s4 + $0x8] sm:$0xff] %v8114_v14 }
 0x587   : > { %v8108_v18 = vadd.f32 %v8080_v38, %v8057_v35  ;;  %v8059_v42 = vmul.f32 %v8037_v44, %v8008_v5 }
 0x588   : > { %v8115_v32 = vmax.f32 %v8107_v12, 0.0  ;;  %v8109_v54 = vadd.f32 %v8084_v59, %v8058_v43 }
 0x589   : > { %v8116_v22 = vmax.f32 %v8108_v18, 0.0  ;;  %v8110_v23 = vadd.f32 %v8088_v39, %v8059_v42 }
 0x58a   : > { %8123 = vst [vmem:[%s9841_s4 + $0x10] sm:$0xff] %v8115_v32  ;;  %v8117_v24 = vmax.f32 %v8109_v54, 0.0 }
 0x58b   : > { %8124 = vst [vmem:[%s9841_s4 + $0x18] sm:$0xff] %v8116_v22  ;;  %v8118_v25 = vmax.f32 %v8110_v23, 0.0 }
 0x58c   : > { %8125 = vst [vmem:[%s9841_s4 + $0x20] sm:$0xff] %v8117_v24 }
 0x58d   : > { %v9414_v58 = vpop.eup %9413  ;;  %8126 = vst [vmem:[%s9841_s4 + $0x28] sm:$0xff] %v8118_v25 }
 0x58e   : > { %v8009_v20 = vmul.f32 %v9414_v58, %v11113_v27  ;;  %v9416_v26 = vpop.eup %9415 }
 0x58f   : > { %v8010_v27 = vmul.f32 %v9416_v26, %v11118_v29 }
 0x590   : > { %v8060_v37 = vmul.f32 %v8041_v13, %v8009_v20 }
 0x591   : > { %v8061_v30 = vmul.f32 %v8045_v41, %v8010_v27 }
 0x592   : > { %v8111_v28 = vadd.f32 %v8092_v55, %v8060_v37 }
 0x593   : > { %v8112_v31 = vadd.f32 %v8096_v62, %v8061_v30 }
 0x594   : > { %v8119_v57 = vmax.f32 %v8111_v28, 0.0 }
 0x595   : > { %v8120_v33 = vmax.f32 %v8112_v31, 0.0 }
 0x596   : > { %8127 = vst [vmem:[%s9841_s4 + $0x30] sm:$0xff] %v8119_v57 }
 0x597   : > { %8128 = vst [vmem:[%s9841_s4 + $0x38] sm:$0xff] %v8120_v33 }
 0x598 PF: > { %s19_s22 = sadd.s32 1, %s9571_s22   ;;  %s11234_s7 = sld [smem:[#allocation9_spill]] }
 0x599   : > { %p16_p11 = scmp.ge.s32.totalorder %s19_s22, 6   ;;  %s11235_s12 = smov %s9535_s13 }
 0x59a   : > { %s11236_s13 = smov %s9539_s14  ;;  %s11237_s14 = smov %s9767_s29 }
 0x59b   : > { %s11238_s15 = smov %s9547_s16  ;;  %s11239_s16 = smov %s9551_s17 }
 0x59c   : > { %s11240_s17 = smov %s9772_s6  ;;  %s11241_s18 = smov %s9563_s20 }
 0x59d   : > { %s11242_s19 = smov %s9567_s21  ;;  %s11243_s20 = smov %s11246_s23 }
 0x59e   : > { %s11244_s21 = smov %s11234_s7  ;;  %18 = sbr.rel (!%p16_p11) target bundleno = 11 (0xb), region = 98 }
 0x5a5   :  { %8151 = vsyncpa [#allocation4], 1 }
 0x5a6   :  { %8153 = vsyncpa [#allocation4 + $0x1], 1 }
 0x5a7   :  { %8154 = vsyncpa [#allocation6], 1 }
 0x5a8   :  { %8156 = vsyncpa [#allocation6 + $0x1], 1 }

</bundles_post_ra>
